<compile_context>
chip_gen: v5e
topology: v5e:2x2
jax: 0.10.0
libtpu: 0.0.40
codegen_flags: <defaults>
</compile_context>

<pallas_src>
import functools

import jax
import jax.numpy as jnp
from jax.experimental import pallas as pl
from jax.experimental.pallas import tpu as pltpu

H_K_SZS = (2, 2, 2, 2, 2, 1, 1)
H_DILS = (1, 2, 4, 8, 16, 1, 1)


def seqfeatenc_kernel(x_ref, w1_ref, b1_ref, w2_ref, b2_ref,
                      wpc_ref, wc1_ref, bh_ref, o_ref, xcat_ref,
                      *, seq_len, fuse_taps):
    """One grid step processes Bt flattened sequences: x_ref is (Bt*T, c_in)."""
    f32 = jnp.float32
    bf16 = jnp.bfloat16
    M = x_ref.shape[0]                       # Bt * T
    d_pad = w2_ref.shape[1]                  # lane-padded channel count

    # Within-sequence time index: masks the causal shift both at t < dil and
    # across the sequence boundaries of the flattened (Bt*T, C) layout.
    t_idx = jax.lax.broadcasted_iota(jnp.int32, (M, 1), 0) % seq_len

    # --- mlp: two pointwise convs == matmuls (bf16 operands, f32 accumulate) --
    xb = x_ref[...].astype(bf16)
    h = jnp.dot(xb, w1_ref[...], preferred_element_type=f32) + b1_ref[...]
    h = jnp.maximum(h, 0.0)                                          # ReLU
    h = jnp.dot(h.astype(bf16), w2_ref[...], preferred_element_type=f32) + b2_ref[...]

    # --- highway dilated causal conv block (gating kept in f32) ---------------
    j2 = 0   # index into fused k==2 weights
    j1 = 0   # index into k==1 weights
    for i, (k, dil) in enumerate(zip(H_K_SZS, H_DILS)):
        if k == 2:
            # causal tap h[t - dil]: XLU sublane roll; wrapped / cross-sequence
            # rows all have (t % T) < dil and are selected to zero.
            rolled = pltpu.roll(h, shift=dil, axis=0)
            h_prev = jnp.where(t_idx >= dil, rolled, 0.0)
            if fuse_taps:
                # one K = 2*d_pad matmul; operand built bf16-first in a
                # persistent scratch (both half-writes lane-aligned -> unmasked)
                xcat_ref[:, :d_pad] = h_prev.astype(bf16)
                xcat_ref[:, d_pad:] = h.astype(bf16)
                z = jnp.dot(xcat_ref[...], wpc_ref[j2],
                            preferred_element_type=f32) + bh_ref[i]
            else:
                # 128-deep MXU (v5e and earlier): fusion saves nothing, issue
                # the two taps as two K = d_pad dots and skip the scratch fill.
                w_full = wpc_ref[j2]
                z = (jnp.dot(h_prev.astype(bf16), w_full[:d_pad],
                             preferred_element_type=f32)
                     + jnp.dot(h.astype(bf16), w_full[d_pad:],
                               preferred_element_type=f32)
                     + bh_ref[i])
            j2 += 1
        else:
            z = jnp.dot(h.astype(bf16), wc1_ref[j1],
                        preferred_element_type=f32) + bh_ref[i]
            j1 += 1
        # chunk(2, dim=channel): split at lane offset d_pad (vreg aligned).
        # sigmoid(x) == 0.5*tanh(0.5*x)+0.5  (single EUP transcendental).
        g = 0.5 * jnp.tanh(0.5 * z[:, :d_pad]) + 0.5
        # highway blend: g*z2 + (1-g)*h  ==  h + g*(z2 - h)
        h = h + g * (z[:, d_pad:] - h)

    o_ref[...] = h


def prepare_kernel_params(p):
    """Pad channels to a multiple of 128, fuse the two conv taps, cast to bf16."""
    d_ch = p["w2"].shape[1]
    d_pad = ((d_ch + 127) // 128) * 128
    two = 2 * d_pad
    n2 = sum(1 for k in H_K_SZS if k == 2)
    n1 = len(H_K_SZS) - n2

    w2 = jnp.zeros((p["w2"].shape[0], d_pad), jnp.float32).at[:, :d_ch].set(p["w2"])
    b2 = jnp.zeros((1, d_pad), jnp.float32).at[:, :d_ch].set(p["b2"])

    wpc = jnp.zeros((n2, two, two), jnp.float32)    # [[Wp];[Wc]] for k==2 layers
    wc1 = jnp.zeros((n1, d_pad, two), jnp.float32)  # Wc for k==1 layers
    bh = jnp.zeros((len(H_K_SZS), 1, two), jnp.float32)
    j2 = j1 = 0
    for i, k in enumerate(H_K_SZS):
        wc_i = p["wc"][i]          # (d_ch, 2*d_ch): cols [:d_ch]->h1, [d_ch:]->h2
        bh_i = p["bh"][i]          # (1, 2*d_ch)
        bh = bh.at[i, :, :d_ch].set(bh_i[:, :d_ch])
        bh = bh.at[i, :, d_pad:d_pad + d_ch].set(bh_i[:, d_ch:])
        if k == 2:
            wp_i = p["wp"][i]
            # rows [0:d_ch]       <- h_prev channels (Wp)
            # rows [d_pad:+d_ch]  <- h channels      (Wc)
            wpc = wpc.at[j2, :d_ch, :d_ch].set(wp_i[:, :d_ch])
            wpc = wpc.at[j2, :d_ch, d_pad:d_pad + d_ch].set(wp_i[:, d_ch:])
            wpc = wpc.at[j2, d_pad:d_pad + d_ch, :d_ch].set(wc_i[:, :d_ch])
            wpc = wpc.at[j2, d_pad:d_pad + d_ch, d_pad:d_pad + d_ch].set(wc_i[:, d_ch:])
            j2 += 1
        else:
            wc1 = wc1.at[j1, :d_ch, :d_ch].set(wc_i[:, :d_ch])
            wc1 = wc1.at[j1, :d_ch, d_pad:d_pad + d_ch].set(wc_i[:, d_ch:])
            j1 += 1

    return dict(
        w1=p["w1"].astype(jnp.bfloat16),
        b1=p["b1"].astype(jnp.float32),
        w2=w2.astype(jnp.bfloat16),
        b2=b2,
        wpc=wpc.astype(jnp.bfloat16),
        wc1=wc1.astype(jnp.bfloat16),
        bh=bh,
    )


def _tpu_kind():
    try:
        return jax.devices()[0].device_kind.lower()
    except Exception:
        return ""


def seq_feat_enc(x_ncl, params, *, block_batch=None):
    """x_ncl: (B, input_dim, T) float32 (NCL), like the PyTorch module input."""
    B, c_in, T = x_ncl.shape
    d_ch = params["w2"].shape[1]

    kind = _tpu_kind()
    # Dual-TensorCore chips (v7x): split the batch across both cores.
    # Single-TC chips (v5e/v6e): one big step, no per-step grid overhead.
    if block_batch is None:
        if ("v7" in kind or "7x" in kind) and B >= 2:
            block_batch = max(1, (B + 1) // 2)
        else:
            block_batch = B
    # K = 2*d_pad fusion only pays on 256-deep MXUs (v6e / v7x).
    fuse_taps = not any(s in kind for s in ("v2", "v3", "v4", "v5"))

    kp = prepare_kernel_params(params)
    d_pad = kp["w2"].shape[1]

    Bt = max(1, min(block_batch, B))
    B_pad = ((B + Bt - 1) // Bt) * Bt

    x_nlc = jnp.transpose(x_ncl, (0, 2, 1))                 # NCL -> NLC
    if B_pad != B:
        x_nlc = jnp.pad(x_nlc, ((0, B_pad - B), (0, 0), (0, 0)))
    x_flat = x_nlc.reshape(B_pad * T, c_in)                 # sequences contiguous

    M = Bt * T
    kern = functools.partial(seqfeatenc_kernel, seq_len=T, fuse_taps=fuse_taps)

    def full(shape):
        return pl.BlockSpec(shape, lambda g, _n=len(shape): (0,) * _n)

    out_flat = pl.pallas_call(
        kern,
        out_shape=jax.ShapeDtypeStruct((B_pad * T, d_pad), jnp.float32),
        grid=(B_pad // Bt,),
        in_specs=[
            pl.BlockSpec((M, c_in), lambda g: (g, 0)),      # Bt sequences / step
            full(kp["w1"].shape), full(kp["b1"].shape),
            full(kp["w2"].shape), full(kp["b2"].shape),
            full(kp["wpc"].shape), full(kp["wc1"].shape), full(kp["bh"].shape),
        ],
        out_specs=pl.BlockSpec((M, d_pad), lambda g: (g, 0)),
        scratch_shapes=[pltpu.VMEM((M, 2 * d_pad), jnp.bfloat16)],
        compiler_params=pltpu.CompilerParams(
            dimension_semantics=("parallel",),
            vmem_limit_bytes=32 * 1024 * 1024),
    )(x_flat, kp["w1"], kp["b1"], kp["w2"], kp["b2"],
      kp["wpc"], kp["wc1"], kp["bh"])

    out = out_flat.reshape(B_pad, T, d_pad)[:B, :, :d_ch]   # drop pad batch/chans
    return jnp.transpose(out, (0, 2, 1))                    # NLC -> NCL


def init_params(key, input_dim, e_ch, d_ch):
    """Deterministic synthetic parameters (PyTorch-style uniform fan-in init)."""
    ks = jax.random.split(key, 7)
    n_layers = len(H_K_SZS)

    def u(k, shape, fan_in):
        bound = 1.0 / jnp.sqrt(jnp.float32(fan_in))
        return jax.random.uniform(k, shape, jnp.float32, -bound, bound)

    # mlp convs: PyTorch weight (out, in, 1) stored transposed as (in, out)
    w1 = u(ks[0], (input_dim, e_ch), input_dim)
    b1 = u(ks[1], (1, e_ch), input_dim)
    w2 = u(ks[2], (e_ch, d_ch), e_ch)
    b2 = u(ks[3], (1, d_ch), e_ch)
    # highway convs: PyTorch weight (2*d_ch, d_ch, k);
    #   wp[i] = W[:, :, 0].T   (acts on x[t - dil], only for k == 2)
    #   wc[i] = W[:, :, k-1].T (acts on x[t])
    wp = u(ks[4], (n_layers, d_ch, 2 * d_ch), 2 * d_ch)
    wc = u(ks[5], (n_layers, d_ch, 2 * d_ch), 2 * d_ch)
    bh = u(ks[6], (n_layers, 1, 2 * d_ch), 2 * d_ch)
    mask = jnp.array([1.0 if k == 2 else 0.0 for k in H_K_SZS], jnp.float32)
    wp = wp * mask[:, None, None]
    return dict(w1=w1, b1=b1, w2=w2, b2=b2, wp=wp, wc=wc, bh=bh)


def reference(x_ncl, p):
    """Plain-JAX f32 reference of the same forward pass, for verification."""
    x = jnp.transpose(x_ncl, (0, 2, 1))
    d_ch = p["w2"].shape[1]
    T = x.shape[1]
    h = jnp.maximum(x @ p["w1"] + p["b1"], 0.0)
    h = h @ p["w2"] + p["b2"]
    for i, (k, dil) in enumerate(zip(H_K_SZS, H_DILS)):
        z = h @ p["wc"][i] + p["bh"][i]
        if k == 2:
            h_prev = jnp.pad(h[:, : T - dil], ((0, 0), (dil, 0), (0, 0)))
            z = z + h_prev @ p["wp"][i]
        g = jax.nn.sigmoid(z[..., :d_ch])
        h = g * z[..., d_ch:] + (1.0 - g) * h
    return jnp.transpose(h, (0, 2, 1))


if __name__ == "__main__":
    key = jax.random.PRNGKey(0)
    kx, kp = jax.random.split(key)

    B, input_dim, e_ch, d_ch, T = 8, 8, 32, 32, 32
    x = jax.random.normal(kx, (B, input_dim, T), jnp.float32)    # NCL, like PyTorch
    params = init_params(kp, input_dim, e_ch, d_ch)

    out = jax.block_until_ready(seq_feat_enc(x, params))

    ref = reference(x, params)
    assert out.shape == (B, d_ch, T), out.shape
    max_err = float(jnp.max(jnp.abs(out - ref)))
    # bf16 MXU operands over 9 chained matmuls -> relaxed tolerance vs f32 ref.
    assert jnp.allclose(out, ref, atol=5e-2, rtol=5e-2), \
        f"mismatch vs reference (max abs err {max_err})"
    print("KERNEL_OK")
</pallas_src>

<mosaic_0001>
module attributes {stable_mosaic.version = 11 : i64} {
  func.func @seqfeatenc_kernel(%arg0: i32, %arg1: memref<256x8xf32, #tpu.memory_space<vmem>>, %arg2: memref<8x32xbf16, #tpu.memory_space<vmem>>, %arg3: memref<1x32xf32, #tpu.memory_space<vmem>>, %arg4: memref<32x128xbf16, #tpu.memory_space<vmem>>, %arg5: memref<1x128xf32, #tpu.memory_space<vmem>>, %arg6: memref<5x256x256xbf16, #tpu.memory_space<vmem>>, %arg7: memref<2x128x256xbf16, #tpu.memory_space<vmem>>, %arg8: memref<7x1x256xf32, #tpu.memory_space<vmem>>, %arg9: memref<256x128xf32, #tpu.memory_space<vmem>>, %arg10: memref<256x256xbf16, #tpu.memory_space<vmem>>) attributes {dimension_semantics = [#tpu.dimension_semantics<parallel>], iteration_bounds = array<i64: 1>, scalar_prefetch = 0 : i64, scratch_operands = 1 : i64, tpu.core_type = #tpu.core_type<tc>, window_params = [{transform_indices = @transform_0, window_bounds = array<i64: 256, 8>}, {pipeline_mode = #tpu.pipeline_mode<synchronous>, transform_indices = @transform_1, window_bounds = array<i64: 8, 32>}, {pipeline_mode = #tpu.pipeline_mode<synchronous>, transform_indices = @transform_2, window_bounds = array<i64: 1, 32>}, {pipeline_mode = #tpu.pipeline_mode<synchronous>, transform_indices = @transform_3, window_bounds = array<i64: 32, 128>}, {pipeline_mode = #tpu.pipeline_mode<synchronous>, transform_indices = @transform_4, window_bounds = array<i64: 1, 128>}, {pipeline_mode = #tpu.pipeline_mode<synchronous>, transform_indices = @transform_5, window_bounds = array<i64: 5, 256, 256>}, {pipeline_mode = #tpu.pipeline_mode<synchronous>, transform_indices = @transform_6, window_bounds = array<i64: 2, 128, 256>}, {pipeline_mode = #tpu.pipeline_mode<synchronous>, transform_indices = @transform_7, window_bounds = array<i64: 7, 1, 256>}, {transform_indices = @transform_8, window_bounds = array<i64: 256, 128>}]} {
    %0 = tpu.iota {dimensions = array<i32: 0>} : vector<256x1xi32>
    %c32_i32 = arith.constant 32 : i32
    %c0_i32 = arith.constant 0 : i32
    %1 = arith.cmpi eq, %c32_i32, %c0_i32 : i32
    %c1_i32 = arith.constant 1 : i32
    %2 = arith.select %1, %c1_i32, %c32_i32 : i32
    %3 = vector.broadcast %2 : i32 to vector<256x1xi32>
    %4 = arith.remsi %0, %3 : vector<256x1xi32>
    %c0_i32_0 = arith.constant 0 : i32
    %5 = vector.broadcast %c0_i32_0 : i32 to vector<256x1xi32>
    %6 = arith.cmpi ne, %4, %5 : vector<256x1xi32>
    %c0_i32_1 = arith.constant 0 : i32
    %7 = vector.broadcast %c0_i32_1 : i32 to vector<256x1xi32>
    %8 = arith.cmpi slt, %4, %7 : vector<256x1xi32>
    %c0_i32_2 = arith.constant 0 : i32
    %9 = arith.cmpi slt, %2, %c0_i32_2 : i32
    %10 = vector.broadcast %9 : i1 to vector<256x1xi1>
    %11 = vector.broadcast %10 : vector<256x1xi1> to vector<256x1xi1>
    %12 = arith.xori %8, %11 : vector<256x1xi1>
    %13 = arith.andi %12, %6 : vector<256x1xi1>
    %14 = vector.broadcast %2 : i32 to vector<256x1xi32>
    %15 = arith.addi %4, %14 : vector<256x1xi32>
    %16 = arith.select %13, %15, %4 : vector<256x1xi1>, vector<256x1xi32>
    %c0 = arith.constant 0 : index
    %c0_3 = arith.constant 0 : index
    %17 = vector.load %arg1[%c0, %c0_3] : memref<256x8xf32, #tpu.memory_space<vmem>>, vector<256x8xf32>
    %18 = arith.truncf %17 : vector<256x8xf32> to vector<256x8xbf16>
    %c0_4 = arith.constant 0 : index
    %c0_5 = arith.constant 0 : index
    %19 = vector.load %arg2[%c0_4, %c0_5] : memref<8x32xbf16, #tpu.memory_space<vmem>>, vector<8x32xbf16>
    %cst = arith.constant dense<0.000000e+00> : vector<256x32xf32>
    %20 = tpu.matmul %18, %19, %cst {dimension_numbers = #tpu.dot_dimension_numbers<[1], [0], [0], [1], [0, 0, 1, 1], [], []>} : vector<256x8xbf16>, vector<8x32xbf16>, vector<256x32xf32> -> vector<256x32xf32>
    %c0_6 = arith.constant 0 : index
    %c0_7 = arith.constant 0 : index
    %21 = vector.load %arg3[%c0_6, %c0_7] : memref<1x32xf32, #tpu.memory_space<vmem>>, vector<1x32xf32>
    %22 = vector.broadcast %21 : vector<1x32xf32> to vector<256x32xf32>
    %23 = arith.addf %20, %22 : vector<256x32xf32>
    %cst_8 = arith.constant 0.000000e+00 : f32
    %24 = vector.broadcast %cst_8 : f32 to vector<256x32xf32>
    %25 = arith.maximumf %23, %24 : vector<256x32xf32>
    %26 = arith.truncf %25 : vector<256x32xf32> to vector<256x32xbf16>
    %c0_9 = arith.constant 0 : index
    %c0_10 = arith.constant 0 : index
    %27 = vector.load %arg4[%c0_9, %c0_10] : memref<32x128xbf16, #tpu.memory_space<vmem>>, vector<32x128xbf16>
    %cst_11 = arith.constant dense<0.000000e+00> : vector<256x128xf32>
    %28 = tpu.matmul %26, %27, %cst_11 {dimension_numbers = #tpu.dot_dimension_numbers<[1], [0], [0], [1], [0, 0, 1, 1], [], []>} : vector<256x32xbf16>, vector<32x128xbf16>, vector<256x128xf32> -> vector<256x128xf32>
    %c0_12 = arith.constant 0 : index
    %c0_13 = arith.constant 0 : index
    %29 = vector.load %arg5[%c0_12, %c0_13] : memref<1x128xf32, #tpu.memory_space<vmem>>, vector<1x128xf32>
    %30 = vector.broadcast %29 : vector<1x128xf32> to vector<256x128xf32>
    %31 = arith.addf %28, %30 : vector<256x128xf32>
    %c1_i32_14 = arith.constant 1 : i32
    %32 = tpu.dynamic_rotate %31 by %c1_i32_14 dim 0 : vector<256x128xf32>, i32 -> vector<256x128xf32>
    %c1_i32_15 = arith.constant 1 : i32
    %33 = vector.broadcast %c1_i32_15 : i32 to vector<256x1xi32>
    %34 = arith.cmpi sge, %16, %33 : vector<256x1xi32>
    %cst_16 = arith.constant 0.000000e+00 : f32
    %35 = vector.shape_cast %34 : vector<256x1xi1> to vector<256x1xi1>
    %36 = vector.broadcast %35 : vector<256x1xi1> to vector<256x128xi1>
    %37 = vector.broadcast %cst_16 : f32 to vector<256x128xf32>
    %38 = arith.select %36, %32, %37 : vector<256x128xi1>, vector<256x128xf32>
    %39 = arith.truncf %38 : vector<256x128xf32> to vector<256x128xbf16>
    %c0_17 = arith.constant 0 : index
    %c0_18 = arith.constant 0 : index
    %40 = vector.load %arg10[%c0_17, %c0_18] : memref<256x256xbf16, #tpu.memory_space<vmem>>, vector<256x128xbf16>
    tpu.vector_store %arg10[%c0_17, %c0_18], %39 {strides = array<i32>} : memref<256x256xbf16, #tpu.memory_space<vmem>>, vector<256x128xbf16>,
    %41 = arith.truncf %31 : vector<256x128xf32> to vector<256x128xbf16>
    %c0_19 = arith.constant 0 : index
    %c128 = arith.constant 128 : index
    %42 = vector.load %arg10[%c0_19, %c128] : memref<256x256xbf16, #tpu.memory_space<vmem>>, vector<256x128xbf16>
    tpu.vector_store %arg10[%c0_19, %c128], %41 {strides = array<i32>} : memref<256x256xbf16, #tpu.memory_space<vmem>>, vector<256x128xbf16>,
    %c0_20 = arith.constant 0 : index
    %c0_21 = arith.constant 0 : index
    %43 = vector.load %arg10[%c0_20, %c0_21] : memref<256x256xbf16, #tpu.memory_space<vmem>>, vector<256x256xbf16>
    %c0_22 = arith.constant 0 : index
    %c0_23 = arith.constant 0 : index
    %c0_24 = arith.constant 0 : index
    %44 = vector.load %arg6[%c0_22, %c0_23, %c0_24] : memref<5x256x256xbf16, #tpu.memory_space<vmem>>, vector<1x256x256xbf16>
    %45 = vector.shape_cast %44 : vector<1x256x256xbf16> to vector<256x256xbf16>
    %cst_25 = arith.constant dense<0.000000e+00> : vector<256x256xf32>
    %46 = tpu.matmul %43, %45, %cst_25 {dimension_numbers = #tpu.dot_dimension_numbers<[1], [0], [0], [1], [0, 0, 1, 1], [], []>} : vector<256x256xbf16>, vector<256x256xbf16>, vector<256x256xf32> -> vector<256x256xf32>
    %c0_26 = arith.constant 0 : index
    %c0_27 = arith.constant 0 : index
    %c0_28 = arith.constant 0 : index
    %47 = vector.load %arg8[%c0_26, %c0_27, %c0_28] : memref<7x1x256xf32, #tpu.memory_space<vmem>>, vector<1x1x256xf32>
    %48 = vector.shape_cast %47 : vector<1x1x256xf32> to vector<1x256xf32>
    %49 = vector.broadcast %48 : vector<1x256xf32> to vector<256x256xf32>
    %50 = arith.addf %46, %49 : vector<256x256xf32>
    %51 = vector.extract_strided_slice %50 {offsets = [0, 0], sizes = [256, 128], strides = [1, 1]} : vector<256x256xf32> to vector<256x128xf32>
    %cst_29 = arith.constant 5.000000e-01 : f32
    %52 = vector.broadcast %cst_29 : f32 to vector<256x128xf32>
    %53 = arith.mulf %52, %51 : vector<256x128xf32>
    %54 = math.tanh %53 : vector<256x128xf32>
    %cst_30 = arith.constant 5.000000e-01 : f32
    %55 = vector.broadcast %cst_30 : f32 to vector<256x128xf32>
    %56 = arith.mulf %55, %54 : vector<256x128xf32>
    %cst_31 = arith.constant 5.000000e-01 : f32
    %57 = vector.broadcast %cst_31 : f32 to vector<256x128xf32>
    %58 = arith.addf %56, %57 : vector<256x128xf32>
    %59 = vector.extract_strided_slice %50 {offsets = [0, 128], sizes = [256, 128], strides = [1, 1]} : vector<256x256xf32> to vector<256x128xf32>
    %60 = arith.subf %59, %31 : vector<256x128xf32>
    %61 = arith.mulf %58, %60 : vector<256x128xf32>
    %62 = arith.addf %31, %61 : vector<256x128xf32>
    %c2_i32 = arith.constant 2 : i32
    %63 = tpu.dynamic_rotate %62 by %c2_i32 dim 0 : vector<256x128xf32>, i32 -> vector<256x128xf32>
    %c2_i32_32 = arith.constant 2 : i32
    %64 = vector.broadcast %c2_i32_32 : i32 to vector<256x1xi32>
    %65 = arith.cmpi sge, %16, %64 : vector<256x1xi32>
    %cst_33 = arith.constant 0.000000e+00 : f32
    %66 = vector.shape_cast %65 : vector<256x1xi1> to vector<256x1xi1>
    %67 = vector.broadcast %66 : vector<256x1xi1> to vector<256x128xi1>
    %68 = vector.broadcast %cst_33 : f32 to vector<256x128xf32>
    %69 = arith.select %67, %63, %68 : vector<256x128xi1>, vector<256x128xf32>
    %70 = arith.truncf %69 : vector<256x128xf32> to vector<256x128xbf16>
    %c0_34 = arith.constant 0 : index
    %c0_35 = arith.constant 0 : index
    %71 = vector.load %arg10[%c0_34, %c0_35] : memref<256x256xbf16, #tpu.memory_space<vmem>>, vector<256x128xbf16>
    tpu.vector_store %arg10[%c0_34, %c0_35], %70 {strides = array<i32>} : memref<256x256xbf16, #tpu.memory_space<vmem>>, vector<256x128xbf16>,
    %72 = arith.truncf %62 : vector<256x128xf32> to vector<256x128xbf16>
    %c0_36 = arith.constant 0 : index
    %c128_37 = arith.constant 128 : index
    %73 = vector.load %arg10[%c0_36, %c128_37] : memref<256x256xbf16, #tpu.memory_space<vmem>>, vector<256x128xbf16>
    tpu.vector_store %arg10[%c0_36, %c128_37], %72 {strides = array<i32>} : memref<256x256xbf16, #tpu.memory_space<vmem>>, vector<256x128xbf16>,
    %c0_38 = arith.constant 0 : index
    %c0_39 = arith.constant 0 : index
    %74 = vector.load %arg10[%c0_38, %c0_39] : memref<256x256xbf16, #tpu.memory_space<vmem>>, vector<256x256xbf16>
    %c1 = arith.constant 1 : index
    %c0_40 = arith.constant 0 : index
    %c0_41 = arith.constant 0 : index
    %75 = vector.load %arg6[%c1, %c0_40, %c0_41] : memref<5x256x256xbf16, #tpu.memory_space<vmem>>, vector<1x256x256xbf16>
    %76 = vector.shape_cast %75 : vector<1x256x256xbf16> to vector<256x256xbf16>
    %cst_42 = arith.constant dense<0.000000e+00> : vector<256x256xf32>
    %77 = tpu.matmul %74, %76, %cst_42 {dimension_numbers = #tpu.dot_dimension_numbers<[1], [0], [0], [1], [0, 0, 1, 1], [], []>} : vector<256x256xbf16>, vector<256x256xbf16>, vector<256x256xf32> -> vector<256x256xf32>
    %c1_43 = arith.constant 1 : index
    %c0_44 = arith.constant 0 : index
    %c0_45 = arith.constant 0 : index
    %78 = vector.load %arg8[%c1_43, %c0_44, %c0_45] : memref<7x1x256xf32, #tpu.memory_space<vmem>>, vector<1x1x256xf32>
    %79 = vector.shape_cast %78 : vector<1x1x256xf32> to vector<1x256xf32>
    %80 = vector.broadcast %79 : vector<1x256xf32> to vector<256x256xf32>
    %81 = arith.addf %77, %80 : vector<256x256xf32>
    %82 = vector.extract_strided_slice %81 {offsets = [0, 0], sizes = [256, 128], strides = [1, 1]} : vector<256x256xf32> to vector<256x128xf32>
    %cst_46 = arith.constant 5.000000e-01 : f32
    %83 = vector.broadcast %cst_46 : f32 to vector<256x128xf32>
    %84 = arith.mulf %83, %82 : vector<256x128xf32>
    %85 = math.tanh %84 : vector<256x128xf32>
    %cst_47 = arith.constant 5.000000e-01 : f32
    %86 = vector.broadcast %cst_47 : f32 to vector<256x128xf32>
    %87 = arith.mulf %86, %85 : vector<256x128xf32>
    %cst_48 = arith.constant 5.000000e-01 : f32
    %88 = vector.broadcast %cst_48 : f32 to vector<256x128xf32>
    %89 = arith.addf %87, %88 : vector<256x128xf32>
    %90 = vector.extract_strided_slice %81 {offsets = [0, 128], sizes = [256, 128], strides = [1, 1]} : vector<256x256xf32> to vector<256x128xf32>
    %91 = arith.subf %90, %62 : vector<256x128xf32>
    %92 = arith.mulf %89, %91 : vector<256x128xf32>
    %93 = arith.addf %62, %92 : vector<256x128xf32>
    %c4_i32 = arith.constant 4 : i32
    %94 = tpu.dynamic_rotate %93 by %c4_i32 dim 0 : vector<256x128xf32>, i32 -> vector<256x128xf32>
    %c4_i32_49 = arith.constant 4 : i32
    %95 = vector.broadcast %c4_i32_49 : i32 to vector<256x1xi32>
    %96 = arith.cmpi sge, %16, %95 : vector<256x1xi32>
    %cst_50 = arith.constant 0.000000e+00 : f32
    %97 = vector.shape_cast %96 : vector<256x1xi1> to vector<256x1xi1>
    %98 = vector.broadcast %97 : vector<256x1xi1> to vector<256x128xi1>
    %99 = vector.broadcast %cst_50 : f32 to vector<256x128xf32>
    %100 = arith.select %98, %94, %99 : vector<256x128xi1>, vector<256x128xf32>
    %101 = arith.truncf %100 : vector<256x128xf32> to vector<256x128xbf16>
    %c0_51 = arith.constant 0 : index
    %c0_52 = arith.constant 0 : index
    %102 = vector.load %arg10[%c0_51, %c0_52] : memref<256x256xbf16, #tpu.memory_space<vmem>>, vector<256x128xbf16>
    tpu.vector_store %arg10[%c0_51, %c0_52], %101 {strides = array<i32>} : memref<256x256xbf16, #tpu.memory_space<vmem>>, vector<256x128xbf16>,
    %103 = arith.truncf %93 : vector<256x128xf32> to vector<256x128xbf16>
    %c0_53 = arith.constant 0 : index
    %c128_54 = arith.constant 128 : index
    %104 = vector.load %arg10[%c0_53, %c128_54] : memref<256x256xbf16, #tpu.memory_space<vmem>>, vector<256x128xbf16>
    tpu.vector_store %arg10[%c0_53, %c128_54], %103 {strides = array<i32>} : memref<256x256xbf16, #tpu.memory_space<vmem>>, vector<256x128xbf16>,
    %c0_55 = arith.constant 0 : index
    %c0_56 = arith.constant 0 : index
    %105 = vector.load %arg10[%c0_55, %c0_56] : memref<256x256xbf16, #tpu.memory_space<vmem>>, vector<256x256xbf16>
    %c2 = arith.constant 2 : index
    %c0_57 = arith.constant 0 : index
    %c0_58 = arith.constant 0 : index
    %106 = vector.load %arg6[%c2, %c0_57, %c0_58] : memref<5x256x256xbf16, #tpu.memory_space<vmem>>, vector<1x256x256xbf16>
    %107 = vector.shape_cast %106 : vector<1x256x256xbf16> to vector<256x256xbf16>
    %cst_59 = arith.constant dense<0.000000e+00> : vector<256x256xf32>
    %108 = tpu.matmul %105, %107, %cst_59 {dimension_numbers = #tpu.dot_dimension_numbers<[1], [0], [0], [1], [0, 0, 1, 1], [], []>} : vector<256x256xbf16>, vector<256x256xbf16>, vector<256x256xf32> -> vector<256x256xf32>
    %c2_60 = arith.constant 2 : index
    %c0_61 = arith.constant 0 : index
    %c0_62 = arith.constant 0 : index
    %109 = vector.load %arg8[%c2_60, %c0_61, %c0_62] : memref<7x1x256xf32, #tpu.memory_space<vmem>>, vector<1x1x256xf32>
    %110 = vector.shape_cast %109 : vector<1x1x256xf32> to vector<1x256xf32>
    %111 = vector.broadcast %110 : vector<1x256xf32> to vector<256x256xf32>
    %112 = arith.addf %108, %111 : vector<256x256xf32>
    %113 = vector.extract_strided_slice %112 {offsets = [0, 0], sizes = [256, 128], strides = [1, 1]} : vector<256x256xf32> to vector<256x128xf32>
    %cst_63 = arith.constant 5.000000e-01 : f32
    %114 = vector.broadcast %cst_63 : f32 to vector<256x128xf32>
    %115 = arith.mulf %114, %113 : vector<256x128xf32>
    %116 = math.tanh %115 : vector<256x128xf32>
    %cst_64 = arith.constant 5.000000e-01 : f32
    %117 = vector.broadcast %cst_64 : f32 to vector<256x128xf32>
    %118 = arith.mulf %117, %116 : vector<256x128xf32>
    %cst_65 = arith.constant 5.000000e-01 : f32
    %119 = vector.broadcast %cst_65 : f32 to vector<256x128xf32>
    %120 = arith.addf %118, %119 : vector<256x128xf32>
    %121 = vector.extract_strided_slice %112 {offsets = [0, 128], sizes = [256, 128], strides = [1, 1]} : vector<256x256xf32> to vector<256x128xf32>
    %122 = arith.subf %121, %93 : vector<256x128xf32>
    %123 = arith.mulf %120, %122 : vector<256x128xf32>
    %124 = arith.addf %93, %123 : vector<256x128xf32>
    %c8_i32 = arith.constant 8 : i32
    %125 = tpu.dynamic_rotate %124 by %c8_i32 dim 0 : vector<256x128xf32>, i32 -> vector<256x128xf32>
    %c8_i32_66 = arith.constant 8 : i32
    %126 = vector.broadcast %c8_i32_66 : i32 to vector<256x1xi32>
    %127 = arith.cmpi sge, %16, %126 : vector<256x1xi32>
    %cst_67 = arith.constant 0.000000e+00 : f32
    %128 = vector.shape_cast %127 : vector<256x1xi1> to vector<256x1xi1>
    %129 = vector.broadcast %128 : vector<256x1xi1> to vector<256x128xi1>
    %130 = vector.broadcast %cst_67 : f32 to vector<256x128xf32>
    %131 = arith.select %129, %125, %130 : vector<256x128xi1>, vector<256x128xf32>
    %132 = arith.truncf %131 : vector<256x128xf32> to vector<256x128xbf16>
    %c0_68 = arith.constant 0 : index
    %c0_69 = arith.constant 0 : index
    %133 = vector.load %arg10[%c0_68, %c0_69] : memref<256x256xbf16, #tpu.memory_space<vmem>>, vector<256x128xbf16>
    tpu.vector_store %arg10[%c0_68, %c0_69], %132 {strides = array<i32>} : memref<256x256xbf16, #tpu.memory_space<vmem>>, vector<256x128xbf16>,
    %134 = arith.truncf %124 : vector<256x128xf32> to vector<256x128xbf16>
    %c0_70 = arith.constant 0 : index
    %c128_71 = arith.constant 128 : index
    %135 = vector.load %arg10[%c0_70, %c128_71] : memref<256x256xbf16, #tpu.memory_space<vmem>>, vector<256x128xbf16>
    tpu.vector_store %arg10[%c0_70, %c128_71], %134 {strides = array<i32>} : memref<256x256xbf16, #tpu.memory_space<vmem>>, vector<256x128xbf16>,
    %c0_72 = arith.constant 0 : index
    %c0_73 = arith.constant 0 : index
    %136 = vector.load %arg10[%c0_72, %c0_73] : memref<256x256xbf16, #tpu.memory_space<vmem>>, vector<256x256xbf16>
    %c3 = arith.constant 3 : index
    %c0_74 = arith.constant 0 : index
    %c0_75 = arith.constant 0 : index
    %137 = vector.load %arg6[%c3, %c0_74, %c0_75] : memref<5x256x256xbf16, #tpu.memory_space<vmem>>, vector<1x256x256xbf16>
    %138 = vector.shape_cast %137 : vector<1x256x256xbf16> to vector<256x256xbf16>
    %cst_76 = arith.constant dense<0.000000e+00> : vector<256x256xf32>
    %139 = tpu.matmul %136, %138, %cst_76 {dimension_numbers = #tpu.dot_dimension_numbers<[1], [0], [0], [1], [0, 0, 1, 1], [], []>} : vector<256x256xbf16>, vector<256x256xbf16>, vector<256x256xf32> -> vector<256x256xf32>
    %c3_77 = arith.constant 3 : index
    %c0_78 = arith.constant 0 : index
    %c0_79 = arith.constant 0 : index
    %140 = vector.load %arg8[%c3_77, %c0_78, %c0_79] : memref<7x1x256xf32, #tpu.memory_space<vmem>>, vector<1x1x256xf32>
    %141 = vector.shape_cast %140 : vector<1x1x256xf32> to vector<1x256xf32>
    %142 = vector.broadcast %141 : vector<1x256xf32> to vector<256x256xf32>
    %143 = arith.addf %139, %142 : vector<256x256xf32>
    %144 = vector.extract_strided_slice %143 {offsets = [0, 0], sizes = [256, 128], strides = [1, 1]} : vector<256x256xf32> to vector<256x128xf32>
    %cst_80 = arith.constant 5.000000e-01 : f32
    %145 = vector.broadcast %cst_80 : f32 to vector<256x128xf32>
    %146 = arith.mulf %145, %144 : vector<256x128xf32>
    %147 = math.tanh %146 : vector<256x128xf32>
    %cst_81 = arith.constant 5.000000e-01 : f32
    %148 = vector.broadcast %cst_81 : f32 to vector<256x128xf32>
    %149 = arith.mulf %148, %147 : vector<256x128xf32>
    %cst_82 = arith.constant 5.000000e-01 : f32
    %150 = vector.broadcast %cst_82 : f32 to vector<256x128xf32>
    %151 = arith.addf %149, %150 : vector<256x128xf32>
    %152 = vector.extract_strided_slice %143 {offsets = [0, 128], sizes = [256, 128], strides = [1, 1]} : vector<256x256xf32> to vector<256x128xf32>
    %153 = arith.subf %152, %124 : vector<256x128xf32>
    %154 = arith.mulf %151, %153 : vector<256x128xf32>
    %155 = arith.addf %124, %154 : vector<256x128xf32>
    %c16_i32 = arith.constant 16 : i32
    %156 = tpu.dynamic_rotate %155 by %c16_i32 dim 0 : vector<256x128xf32>, i32 -> vector<256x128xf32>
    %c16_i32_83 = arith.constant 16 : i32
    %157 = vector.broadcast %c16_i32_83 : i32 to vector<256x1xi32>
    %158 = arith.cmpi sge, %16, %157 : vector<256x1xi32>
    %cst_84 = arith.constant 0.000000e+00 : f32
    %159 = vector.shape_cast %158 : vector<256x1xi1> to vector<256x1xi1>
    %160 = vector.broadcast %159 : vector<256x1xi1> to vector<256x128xi1>
    %161 = vector.broadcast %cst_84 : f32 to vector<256x128xf32>
    %162 = arith.select %160, %156, %161 : vector<256x128xi1>, vector<256x128xf32>
    %163 = arith.truncf %162 : vector<256x128xf32> to vector<256x128xbf16>
    %c0_85 = arith.constant 0 : index
    %c0_86 = arith.constant 0 : index
    %164 = vector.load %arg10[%c0_85, %c0_86] : memref<256x256xbf16, #tpu.memory_space<vmem>>, vector<256x128xbf16>
    tpu.vector_store %arg10[%c0_85, %c0_86], %163 {strides = array<i32>} : memref<256x256xbf16, #tpu.memory_space<vmem>>, vector<256x128xbf16>,
    %165 = arith.truncf %155 : vector<256x128xf32> to vector<256x128xbf16>
    %c0_87 = arith.constant 0 : index
    %c128_88 = arith.constant 128 : index
    %166 = vector.load %arg10[%c0_87, %c128_88] : memref<256x256xbf16, #tpu.memory_space<vmem>>, vector<256x128xbf16>
    tpu.vector_store %arg10[%c0_87, %c128_88], %165 {strides = array<i32>} : memref<256x256xbf16, #tpu.memory_space<vmem>>, vector<256x128xbf16>,
    %c0_89 = arith.constant 0 : index
    %c0_90 = arith.constant 0 : index
    %167 = vector.load %arg10[%c0_89, %c0_90] : memref<256x256xbf16, #tpu.memory_space<vmem>>, vector<256x256xbf16>
    %c4 = arith.constant 4 : index
    %c0_91 = arith.constant 0 : index
    %c0_92 = arith.constant 0 : index
    %168 = vector.load %arg6[%c4, %c0_91, %c0_92] : memref<5x256x256xbf16, #tpu.memory_space<vmem>>, vector<1x256x256xbf16>
    %169 = vector.shape_cast %168 : vector<1x256x256xbf16> to vector<256x256xbf16>
    %cst_93 = arith.constant dense<0.000000e+00> : vector<256x256xf32>
    %170 = tpu.matmul %167, %169, %cst_93 {dimension_numbers = #tpu.dot_dimension_numbers<[1], [0], [0], [1], [0, 0, 1, 1], [], []>} : vector<256x256xbf16>, vector<256x256xbf16>, vector<256x256xf32> -> vector<256x256xf32>
    %c4_94 = arith.constant 4 : index
    %c0_95 = arith.constant 0 : index
    %c0_96 = arith.constant 0 : index
    %171 = vector.load %arg8[%c4_94, %c0_95, %c0_96] : memref<7x1x256xf32, #tpu.memory_space<vmem>>, vector<1x1x256xf32>
    %172 = vector.shape_cast %171 : vector<1x1x256xf32> to vector<1x256xf32>
    %173 = vector.broadcast %172 : vector<1x256xf32> to vector<256x256xf32>
    %174 = arith.addf %170, %173 : vector<256x256xf32>
    %175 = vector.extract_strided_slice %174 {offsets = [0, 0], sizes = [256, 128], strides = [1, 1]} : vector<256x256xf32> to vector<256x128xf32>
    %cst_97 = arith.constant 5.000000e-01 : f32
    %176 = vector.broadcast %cst_97 : f32 to vector<256x128xf32>
    %177 = arith.mulf %176, %175 : vector<256x128xf32>
    %178 = math.tanh %177 : vector<256x128xf32>
    %cst_98 = arith.constant 5.000000e-01 : f32
    %179 = vector.broadcast %cst_98 : f32 to vector<256x128xf32>
    %180 = arith.mulf %179, %178 : vector<256x128xf32>
    %cst_99 = arith.constant 5.000000e-01 : f32
    %181 = vector.broadcast %cst_99 : f32 to vector<256x128xf32>
    %182 = arith.addf %180, %181 : vector<256x128xf32>
    %183 = vector.extract_strided_slice %174 {offsets = [0, 128], sizes = [256, 128], strides = [1, 1]} : vector<256x256xf32> to vector<256x128xf32>
    %184 = arith.subf %183, %155 : vector<256x128xf32>
    %185 = arith.mulf %182, %184 : vector<256x128xf32>
    %186 = arith.addf %155, %185 : vector<256x128xf32>
    %187 = arith.truncf %186 : vector<256x128xf32> to vector<256x128xbf16>
    %c0_100 = arith.constant 0 : index
    %c0_101 = arith.constant 0 : index
    %c0_102 = arith.constant 0 : index
    %188 = vector.load %arg7[%c0_100, %c0_101, %c0_102] : memref<2x128x256xbf16, #tpu.memory_space<vmem>>, vector<1x128x256xbf16>
    %189 = vector.shape_cast %188 : vector<1x128x256xbf16> to vector<128x256xbf16>
    %cst_103 = arith.constant dense<0.000000e+00> : vector<256x256xf32>
    %190 = tpu.matmul %187, %189, %cst_103 {dimension_numbers = #tpu.dot_dimension_numbers<[1], [0], [0], [1], [0, 0, 1, 1], [], []>} : vector<256x128xbf16>, vector<128x256xbf16>, vector<256x256xf32> -> vector<256x256xf32>
    %c5 = arith.constant 5 : index
    %c0_104 = arith.constant 0 : index
    %c0_105 = arith.constant 0 : index
    %191 = vector.load %arg8[%c5, %c0_104, %c0_105] : memref<7x1x256xf32, #tpu.memory_space<vmem>>, vector<1x1x256xf32>
    %192 = vector.shape_cast %191 : vector<1x1x256xf32> to vector<1x256xf32>
    %193 = vector.broadcast %192 : vector<1x256xf32> to vector<256x256xf32>
    %194 = arith.addf %190, %193 : vector<256x256xf32>
    %195 = vector.extract_strided_slice %194 {offsets = [0, 0], sizes = [256, 128], strides = [1, 1]} : vector<256x256xf32> to vector<256x128xf32>
    %cst_106 = arith.constant 5.000000e-01 : f32
    %196 = vector.broadcast %cst_106 : f32 to vector<256x128xf32>
    %197 = arith.mulf %196, %195 : vector<256x128xf32>
    %198 = math.tanh %197 : vector<256x128xf32>
    %cst_107 = arith.constant 5.000000e-01 : f32
    %199 = vector.broadcast %cst_107 : f32 to vector<256x128xf32>
    %200 = arith.mulf %199, %198 : vector<256x128xf32>
    %cst_108 = arith.constant 5.000000e-01 : f32
    %201 = vector.broadcast %cst_108 : f32 to vector<256x128xf32>
    %202 = arith.addf %200, %201 : vector<256x128xf32>
    %203 = vector.extract_strided_slice %194 {offsets = [0, 128], sizes = [256, 128], strides = [1, 1]} : vector<256x256xf32> to vector<256x128xf32>
    %204 = arith.subf %203, %186 : vector<256x128xf32>
    %205 = arith.mulf %202, %204 : vector<256x128xf32>
    %206 = arith.addf %186, %205 : vector<256x128xf32>
    %207 = arith.truncf %206 : vector<256x128xf32> to vector<256x128xbf16>
    %c1_109 = arith.constant 1 : index
    %c0_110 = arith.constant 0 : index
    %c0_111 = arith.constant 0 : index
    %208 = vector.load %arg7[%c1_109, %c0_110, %c0_111] : memref<2x128x256xbf16, #tpu.memory_space<vmem>>, vector<1x128x256xbf16>
    %209 = vector.shape_cast %208 : vector<1x128x256xbf16> to vector<128x256xbf16>
    %cst_112 = arith.constant dense<0.000000e+00> : vector<256x256xf32>
    %210 = tpu.matmul %207, %209, %cst_112 {dimension_numbers = #tpu.dot_dimension_numbers<[1], [0], [0], [1], [0, 0, 1, 1], [], []>} : vector<256x128xbf16>, vector<128x256xbf16>, vector<256x256xf32> -> vector<256x256xf32>
    %c6 = arith.constant 6 : index
    %c0_113 = arith.constant 0 : index
    %c0_114 = arith.constant 0 : index
    %211 = vector.load %arg8[%c6, %c0_113, %c0_114] : memref<7x1x256xf32, #tpu.memory_space<vmem>>, vector<1x1x256xf32>
    %212 = vector.shape_cast %211 : vector<1x1x256xf32> to vector<1x256xf32>
    %213 = vector.broadcast %212 : vector<1x256xf32> to vector<256x256xf32>
    %214 = arith.addf %210, %213 : vector<256x256xf32>
    %215 = vector.extract_strided_slice %214 {offsets = [0, 0], sizes = [256, 128], strides = [1, 1]} : vector<256x256xf32> to vector<256x128xf32>
    %cst_115 = arith.constant 5.000000e-01 : f32
    %216 = vector.broadcast %cst_115 : f32 to vector<256x128xf32>
    %217 = arith.mulf %216, %215 : vector<256x128xf32>
    %218 = math.tanh %217 : vector<256x128xf32>
    %cst_116 = arith.constant 5.000000e-01 : f32
    %219 = vector.broadcast %cst_116 : f32 to vector<256x128xf32>
    %220 = arith.mulf %219, %218 : vector<256x128xf32>
    %cst_117 = arith.constant 5.000000e-01 : f32
    %221 = vector.broadcast %cst_117 : f32 to vector<256x128xf32>
    %222 = arith.addf %220, %221 : vector<256x128xf32>
    %223 = vector.extract_strided_slice %214 {offsets = [0, 128], sizes = [256, 128], strides = [1, 1]} : vector<256x256xf32> to vector<256x128xf32>
    %224 = arith.subf %223, %206 : vector<256x128xf32>
    %225 = arith.mulf %222, %224 : vector<256x128xf32>
    %226 = arith.addf %206, %225 : vector<256x128xf32>
    %c0_118 = arith.constant 0 : index
    %c0_119 = arith.constant 0 : index
    %227 = vector.load %arg9[%c0_118, %c0_119] : memref<256x128xf32, #tpu.memory_space<vmem>>, vector<256x128xf32>
    tpu.vector_store %arg9[%c0_118, %c0_119], %226 {strides = array<i32>} : memref<256x128xf32, #tpu.memory_space<vmem>>, vector<256x128xf32>,
    return
  }
  func.func @transform_0(%arg0: i32) -> (i32, i32) {
    %c0_i32 = arith.constant 0 : i32
    %c0_i32_0 = arith.constant 0 : i32
    return %arg0, %c0_i32 : i32, i32
  }
  func.func @transform_1(%arg0: i32) -> (i32, i32) {
    %c0_i32 = arith.constant 0 : i32
    %c0_i32_0 = arith.constant 0 : i32
    %c0_i32_1 = arith.constant 0 : i32
    return %c0_i32, %c0_i32_0 : i32, i32
  }
  func.func @transform_2(%arg0: i32) -> (i32, i32) {
    %c0_i32 = arith.constant 0 : i32
    %c0_i32_0 = arith.constant 0 : i32
    %c0_i32_1 = arith.constant 0 : i32
    return %c0_i32, %c0_i32_0 : i32, i32
  }
  func.func @transform_3(%arg0: i32) -> (i32, i32) {
    %c0_i32 = arith.constant 0 : i32
    %c0_i32_0 = arith.constant 0 : i32
    %c0_i32_1 = arith.constant 0 : i32
    return %c0_i32, %c0_i32_0 : i32, i32
  }
  func.func @transform_4(%arg0: i32) -> (i32, i32) {
    %c0_i32 = arith.constant 0 : i32
    %c0_i32_0 = arith.constant 0 : i32
    %c0_i32_1 = arith.constant 0 : i32
    return %c0_i32, %c0_i32_0 : i32, i32
  }
  func.func @transform_5(%arg0: i32) -> (i32, i32, i32) {
    %c0_i32 = arith.constant 0 : i32
    %c0_i32_0 = arith.constant 0 : i32
    %c0_i32_1 = arith.constant 0 : i32
    %c0_i32_2 = arith.constant 0 : i32
    return %c0_i32, %c0_i32_0, %c0_i32_1 : i32, i32, i32
  }
  func.func @transform_6(%arg0: i32) -> (i32, i32, i32) {
    %c0_i32 = arith.constant 0 : i32
    %c0_i32_0 = arith.constant 0 : i32
    %c0_i32_1 = arith.constant 0 : i32
    %c0_i32_2 = arith.constant 0 : i32
    return %c0_i32, %c0_i32_0, %c0_i32_1 : i32, i32, i32
  }
  func.func @transform_7(%arg0: i32) -> (i32, i32, i32) {
    %c0_i32 = arith.constant 0 : i32
    %c0_i32_0 = arith.constant 0 : i32
    %c0_i32_1 = arith.constant 0 : i32
    %c0_i32_2 = arith.constant 0 : i32
    return %c0_i32, %c0_i32_0, %c0_i32_1 : i32, i32, i32
  }
  func.func @transform_8(%arg0: i32) -> (i32, i32) {
    %c0_i32 = arith.constant 0 : i32
    %c0_i32_0 = arith.constant 0 : i32
    return %arg0, %c0_i32 : i32, i32
  }
}

</mosaic_0001>

<bundles_post_ra>
// kernel: tpu_custom_call.1
= control target key start
LH: loop header
LB: loop body
LE: loop exit
PB: predicated region body
PF: predicated region fallthrough
CT: control target
= control target key end

     0   :  { %13 = vsyncpa [#allocation4], 0  ;;  %s14528_s0 = inlined_call_operand.vmem [shape: f32[256,8], index: 0, kind: input, shape index: {}]   ;;  %s14529_s1 = inlined_call_operand.vmem [shape: bf16[8,32], index: 1, kind: input, shape index: {}]   ;;  %s14530_s2 = inlined_call_operand.vmem [shape: f32[1,32], index: 2, kind: input, shape index: {}]   ;;  %s14531_s3 = inlined_call_operand.vmem [shape: bf16[32,128], index: 3, kind: input, shape index: {}]   ;;  %s14532_s4 = inlined_call_operand.hbm [shape: f32[1,128], index: 4, kind: input, shape index: {}]   ;;  %s14533_s5 = inlined_call_operand.hbm [shape: bf16[5,256,256], index: 5, kind: input, shape index: {}]   ;;  %s14534_s6 = inlined_call_operand.vmem [shape: bf16[2,128,256], index: 6, kind: input, shape index: {}]   ;;  %s14535_s7 = inlined_call_operand.hbm [shape: f32[7,1,256], index: 7, kind: input, shape index: {}]   ;;  %s14536_s8 = inlined_call_operand.hbm [shape: f32[256,128], index: 8, kind: output, shape index: {}]  }
   0x1   :  { %14 = vsyncpa [#allocation7], 0  ;;  %s39_s29 = sshll.u32 %s14533_s5, 4  ;;  %s40_s29 = int_to_ptr.hbm [resolvable:$true] %s39_s29 }
   0x2   :  { %15 = vsyncpa [#allocation5], 0  ;;  %s10712_s30 = smov [#allocation6]   ;;  %s29_s12 = sshll.u32 %s14532_s4, 4  ;;  %s30_s12 = int_to_ptr.hbm [resolvable:$true] %s29_s12 }
   0x3   :  { %s41_s9 = sshll.u32 %s10712_s30, 4  ;;  %s10713_s13 = smov 128   ;;  %s42_s9 = int_to_ptr.vmem [resolvable:$true] %s41_s9 }
   0x4   :  { %s10714_s14 = smov 8   ;;  %s10715_s15 = smov [#allocation3]  }
   0x5   :  { %47 = dma.hbm_to_vmem [thread:$0]  %s40_s29, 20480, %s42_s9, [#allocation7], %s10713_s13, %s10713_s13, %s10714_s14  }
   0x6   :  { %s31_s16 = sshll.u32 %s10715_s15, 4  ;;  %s54_s18 = sshll.u32 %s14535_s7, 4  ;;  %s32_s16 = int_to_ptr.vmem [resolvable:$true] %s31_s16  ;;  %s55_s18 = int_to_ptr.hbm [resolvable:$true] %s54_s18 }
   0x7   :  { %34 = dma.hbm_to_vmem [thread:$0]  %s30_s12, 16, %s32_s16, [#allocation4]  }
   0x8   :  { %s10716_s19 = smov [#allocation8]   ;;  %s10717_s4 = smov 32  }
   0x9   :  { %s56_s20 = sshll.u32 %s10716_s19, 4  ;;  %s10718_s21 = smov 2   ;;  %s57_s20 = int_to_ptr.vmem [resolvable:$true] %s56_s20 }
   0xa   :  { %62 = dma.hbm_to_vmem [thread:$0]  %s55_s18, 224, %s57_s20, [#allocation7], %s10717_s4, %s10717_s4, %s10718_s21  }
   0xb   :  { %10706 = dma.done.wait [#allocation4], 16  }
   0xc   :  { %10707 = vsyncadd [#allocation4], 4294967280 }
   0xd   :  { %10708 = dma.done.wait [#allocation7], 20704  }
   0xe   :  { %10709 = vsyncadd [#allocation7], 4294946592  ;;  %vm595_vm0 = vcmask 1043456   ;;  %v541_v0 = vld [vmem:[%s14529_s1] sm:$0xf]  ;;  %v494_v2 = vld [vmem:[%s14528_s0 + $0x8] sm:$0xff] }
   0xf   :  { %v493_v1 = vld [vmem:[%s14528_s0] sm:$0xff]  ;;  %v597_v3 = vsel %vm595_vm0, %v541_v0, 0  ;;  %v511_v5 = vld [vmem:[%s14528_s0 + $0x90] sm:$0xff]  ;;  %v512_v6 = vld [vmem:[%s14528_s0 + $0x98] sm:$0xff]  ;;  %vm546_vm1 = vcmask 64512   ;;  %vm756_vm2 = vcmask 261120  }
  0x10   :  { %v525_v4 = vpack.c.bf16 %v494_v2, %v493_v1  ;;  %606 = vmatpush.bf16.msra.mxu0 %v597_v3  ;;  %10140 = vmatpush.bf16.msra.mxu3 %v597_v3  ;;  %v534_v7 = vpack.c.bf16 %v512_v6, %v511_v5  ;;  %v495_v8 = vld [vmem:[%s14528_s0 + $0x10] sm:$0xff]  ;;  %v496_v9 = vld [vmem:[%s14528_s0 + $0x18] sm:$0xff]  ;;  %v513_v10 = vld [vmem:[%s14528_s0 + $0xa0] sm:$0xff]  ;;  %s8308_s19 = sshll.u32 %s14536_s8, 4  ;;  %s8309_s19 = int_to_ptr.hbm [resolvable:$true] %s8308_s19 }
  0x11   :  { %v514_v11 = vld [vmem:[%s14528_s0 + $0xa8] sm:$0xff]  ;;  %v526_v12 = vpack.c.bf16 %v496_v9, %v495_v8  ;;  %v497_v14 = vld [vmem:[%s14528_s0 + $0x20] sm:$0xff]  ;;  %v515_v16 = vld [vmem:[%s14528_s0 + $0xb0] sm:$0xff] }
  0x12   :  { %v535_v13 = vpack.c.bf16 %v514_v11, %v513_v10  ;;  %v498_v15 = vld [vmem:[%s14528_s0 + $0x28] sm:$0xff]  ;;  %v516_v17 = vld [vmem:[%s14528_s0 + $0xb8] sm:$0xff]  ;;  %v499_v20 = vld [vmem:[%s14528_s0 + $0x30] sm:$0xff] }
  0x13   :  { %8322 = vmatmul.msk.bf16.vlgmr.msra.gmra.mxu0 %vm546_vm1, %v525_v4  ;;  %8331 = vmatmul.msk.bf16.vlgmr.msra.gmra.mxu3 %vm546_vm1, %v534_v7  ;;  %v527_v18 = vpack.c.bf16 %v498_v15, %v497_v14  ;;  %v536_v19 = vpack.c.bf16 %v516_v17, %v515_v16  ;;  %v500_v21 = vld [vmem:[%s14528_s0 + $0x38] sm:$0xff]  ;;  %v517_v22 = vld [vmem:[%s14528_s0 + $0xc0] sm:$0xff]  ;;  %v518_v23 = vld [vmem:[%s14528_s0 + $0xc8] sm:$0xff] }
  0x14   :  { %v528_v24 = vpack.c.bf16 %v500_v21, %v499_v20  ;;  %v537_v25 = vpack.c.bf16 %v518_v23, %v517_v22  ;;  %v501_v26 = vld [vmem:[%s14528_s0 + $0x40] sm:$0xff]  ;;  %v502_v27 = vld [vmem:[%s14528_s0 + $0x48] sm:$0xff]  ;;  %v519_v28 = vld [vmem:[%s14528_s0 + $0xd0] sm:$0xff] }
  0x15   :  { %v520_v29 = vld [vmem:[%s14528_s0 + $0xd8] sm:$0xff]  ;;  %v529_v30 = vpack.c.bf16 %v502_v27, %v501_v26  ;;  %v503_v32 = vld [vmem:[%s14528_s0 + $0x50] sm:$0xff]  ;;  %v521_v34 = vld [vmem:[%s14528_s0 + $0xe0] sm:$0xff] }
  0x16   :  { %v538_v31 = vpack.c.bf16 %v520_v29, %v519_v28  ;;  %v504_v33 = vld [vmem:[%s14528_s0 + $0x58] sm:$0xff]  ;;  %v522_v35 = vld [vmem:[%s14528_s0 + $0xe8] sm:$0xff]  ;;  %v505_v38 = vld [vmem:[%s14528_s0 + $0x60] sm:$0xff] }
  0x17   :  { %v530_v36 = vpack.c.bf16 %v504_v33, %v503_v32  ;;  %v539_v37 = vpack.c.bf16 %v522_v35, %v521_v34  ;;  %v506_v39 = vld [vmem:[%s14528_s0 + $0x68] sm:$0xff]  ;;  %v523_v40 = vld [vmem:[%s14528_s0 + $0xf0] sm:$0xff]  ;;  %v524_v41 = vld [vmem:[%s14528_s0 + $0xf8] sm:$0xff] }
  0x18   :  { %v531_v42 = vpack.c.bf16 %v506_v39, %v505_v38  ;;  %v540_v43 = vpack.c.bf16 %v524_v41, %v523_v40  ;;  %v9787_v44 = vld [vmem:[%s14531_s3 + $0x8] sm:$0xff]  ;;  %v9786_v45 = vld [vmem:[%s14531_s3] sm:$0xff]  ;;  %v507_v46 = vld [vmem:[%s14528_s0 + $0x70] sm:$0xff] }
  0x19   :  { %811 = vmatpush.bf16.msra.mxu1 %v9787_v44  ;;  %10141 = vmatpush.bf16.msra.mxu2 %v9787_v44  ;;  %v508_v47 = vld [vmem:[%s14528_s0 + $0x78] sm:$0xff]  ;;  %v509_v49 = vld [vmem:[%s14528_s0 + $0x80] sm:$0xff]  ;;  %v510_v50 = vld [vmem:[%s14528_s0 + $0x88] sm:$0xff] }
  0x1a   :  { %v532_v48 = vpack.c.bf16 %v508_v47, %v507_v46  ;;  %v533_v51 = vpack.c.bf16 %v510_v50, %v509_v49  ;;  %v10901_v53 = vld [vmem:[%s14530_s2] ss:$0 sm:$0xff] }
  0x1d   :  { %812 = vmatpush.bf16.msra.mxu1 %v9786_v45  ;;  %10142 = vmatpush.bf16.msra.mxu2 %v9786_v45 }
  0x23   :  { %8323 = vmatmul.msk.bf16.gmra.mxu0 %vm546_vm1, %v526_v12  ;;  %8332 = vmatmul.msk.bf16.gmra.mxu3 %vm546_vm1, %v535_v13 }
  0x33   :  { %8324 = vmatmul.msk.bf16.gmra.mxu0 %vm546_vm1, %v527_v18  ;;  %8333 = vmatmul.msk.bf16.gmra.mxu3 %vm546_vm1, %v536_v19 }
  0x43   :  { %8325 = vmatmul.msk.bf16.gmra.mxu0 %vm546_vm1, %v528_v24  ;;  %8334 = vmatmul.msk.bf16.gmra.mxu3 %vm546_vm1, %v537_v25 }
  0x53   :  { %8326 = vmatmul.msk.bf16.gmra.mxu0 %vm546_vm1, %v529_v30  ;;  %8335 = vmatmul.msk.bf16.gmra.mxu3 %vm546_vm1, %v538_v31 }
  0x63   :  { %8327 = vmatmul.msk.bf16.gmra.mxu0 %vm546_vm1, %v530_v36  ;;  %8336 = vmatmul.msk.bf16.gmra.mxu3 %vm546_vm1, %v539_v37 }
  0x73   :  { %8328 = vmatmul.msk.bf16.gmra.mxu0 %vm546_vm1, %v531_v42  ;;  %8337 = vmatmul.msk.bf16.gmra.mxu3 %vm546_vm1, %v540_v43 }
  0x83   :  { %8329 = vmatmul.msk.bf16.gmra.mxu0 %vm546_vm1, %v532_v48 }
  0x90   :  { %v608_v52 = vpop.f32.mrf.mxu0 }
  0x91   :  { %v609_v54 = vadd.f32 %v10901_v53, %v608_v52 }
  0x93   :  { %8330 = vmatmul.msk.bf16.gmra.mxu0 %vm546_vm1, %v533_v51  ;;  %v688_v57 = vmax.f32 %v609_v54, 0.0 }
  0x96   :  { %v653_v55 = vpop.f32.mrf.mxu3 }
  0x97   :  { %v654_v60 = vadd.f32 %v10901_v53, %v653_v55 }
  0x98   :  { %v610_v56 = vpop.f32.mrf.mxu0 }
  0x99   :  { %v611_v58 = vadd.f32 %v10901_v53, %v610_v56  ;;  %v706_v1 = vmax.f32 %v654_v60, 0.0 }
  0x9b   :  { %v689_v59 = vmax.f32 %v611_v58, 0.0 }
  0x9d   :  { %v720_v61 = vpack.c.bf16 %v689_v59, %v688_v57 }
  0x9e   :  { %v655_v62 = vpop.f32.mrf.mxu3 }
  0x9f   :  { %v656_v63 = vadd.f32 %v10901_v53, %v655_v62  ;;  %8346 = vmatmul.msk.bf16.vlgmr.msra.gmra.mxu1 %vm756_vm2, %v720_v61 }
  0xa0   :  { %v613_v0 = vpop.f32.mrf.mxu0 }
  0xa1   :  { %v707_v2 = vmax.f32 %v656_v63, 0.0  ;;  %v614_v4 = vadd.f32 %v10901_v53, %v613_v0 }
  0xa3   :  { %v729_v3 = vpack.c.bf16 %v707_v2, %v706_v1  ;;  %v690_v7 = vmax.f32 %v614_v4, 0.0 }
  0xa5   :  { %8355 = vmatmul.msk.bf16.vlgmr.msra.gmra.mxu2 %vm756_vm2, %v729_v3 }
  0xa6   :  { %v658_v5 = vpop.f32.mrf.mxu3 }
  0xa7   :  { %v659_v10 = vadd.f32 %v10901_v53, %v658_v5 }
  0xa8   :  { %v615_v6 = vpop.f32.mrf.mxu0 }
  0xa9   :  { %v616_v8 = vadd.f32 %v10901_v53, %v615_v6  ;;  %v708_v15 = vmax.f32 %v659_v10, 0.0  ;;  %v8612_v10 = vld [vmem:[#allocation6 + $0xf0] sm:$0xf] }
  0xab   :  { %v691_v9 = vmax.f32 %v616_v8, 0.0 }
  0xad   :  { %v721_v11 = vpack.c.bf16 %v691_v9, %v690_v7 }
  0xae   :  { %v660_v12 = vpop.f32.mrf.mxu3 }
  0xaf   :  { %v661_v13 = vadd.f32 %v10901_v53, %v660_v12  ;;  %8347 = vmatmul.msk.bf16.gmra.mxu1 %vm756_vm2, %v721_v11  ;;  %v9851_v11 = vld [vmem:[#allocation6 + $0xf4] sm:$0xf0] }
  0xb0   :  { %v618_v14 = vpop.f32.mrf.mxu0  ;;  %v8613_v12 = vor.u32 %v9851_v11, %v8612_v10  ;;  %v8550_v10 = vld [vmem:[#allocation6 + $0x78] sm:$0xf0] }
  0xb1   :  { %v709_v16 = vmax.f32 %v661_v13, 0.0  ;;  %v619_v18 = vadd.f32 %v10901_v53, %v618_v14  ;;  %v9850_v13 = vld [vmem:[#allocation6 + $0xf4] sm:$0xf]  ;;  %v8614_v14 = vld [vmem:[#allocation6 + $0xf8] sm:$0xf0] }
  0xb2   :  { %1694 = vmatpush.bf16.msrb.mxu3 %v8613_v12 }
  0xb3   :  { %v730_v17 = vpack.c.bf16 %v709_v16, %v708_v15  ;;  %v692_v21 = vmax.f32 %v619_v18, 0.0  ;;  %v8617_v16 = vor.u32 %v9850_v13, %v8614_v14  ;;  %v8604_v18 = vld [vmem:[#allocation6 + $0xe0] sm:$0xf]  ;;  %v9837_v14 = vld [vmem:[#allocation6 + $0x84] sm:$0xf0] }
  0xb4   :  { %v8556_v13 = vld [vmem:[#allocation6 + $0x80] sm:$0xf] }
  0xb5   :  { %8356 = vmatmul.msk.bf16.gmra.mxu2 %vm756_vm2, %v730_v17  ;;  %1872 = vmatpush.bf16.msrb.mxu1 %v8617_v16  ;;  %v8557_v16 = vor.u32 %v9837_v14, %v8556_v13 }
  0xb6   :  { %v663_v19 = vpop.f32.mrf.mxu3 }
  0xb7   :  { %v664_v24 = vadd.f32 %v10901_v53, %v663_v19  ;;  %v9849_v19 = vld [vmem:[#allocation6 + $0xe4] sm:$0xf0] }
  0xb8   :  { %v620_v20 = vpop.f32.mrf.mxu0 }
  0xb9   :  { %v621_v22 = vadd.f32 %v10901_v53, %v620_v20  ;;  %v710_v29 = vmax.f32 %v664_v24, 0.0  ;;  %v9848_v20 = vld [vmem:[#allocation6 + $0xe4] sm:$0xf] }
  0xbb   :  { %v693_v23 = vmax.f32 %v621_v22, 0.0  ;;  %v8605_v22 = vor.u32 %v9849_v19, %v8604_v18 }
  0xbd   :  { %v722_v25 = vpack.c.bf16 %v693_v23, %v692_v21  ;;  %v8606_v23 = vld [vmem:[#allocation6 + $0xe8] sm:$0xf0]  ;;  %1695 = vmatpush.bf16.msrb.mxu3 %v8605_v22  ;;  %v8548_v22 = vld [vmem:[#allocation6 + $0x70] sm:$0xf] }
  0xbe   :  { %v665_v26 = vpop.f32.mrf.mxu3  ;;  %v8609_v24 = vor.u32 %v9848_v20, %v8606_v23  ;;  %v9835_v23 = vld [vmem:[#allocation6 + $0x74] sm:$0xf0] }
  0xbf   :  { %v666_v27 = vadd.f32 %v10901_v53, %v665_v26  ;;  %8348 = vmatmul.msk.bf16.gmra.mxu1 %vm756_vm2, %v722_v25 }
  0xc0   :  { %v623_v28 = vpop.f32.mrf.mxu0  ;;  %1873 = vmatpush.bf16.msrb.mxu1 %v8609_v24 }
  0xc1   :  { %v711_v30 = vmax.f32 %v666_v27, 0.0  ;;  %v624_v32 = vadd.f32 %v10901_v53, %v623_v28  ;;  %v8596_v28 = vld [vmem:[#allocation6 + $0xd0] sm:$0xf] }
  0xc3   :  { %v731_v31 = vpack.c.bf16 %v711_v30, %v710_v29  ;;  %v694_v35 = vmax.f32 %v624_v32, 0.0  ;;  %v9847_v29 = vld [vmem:[#allocation6 + $0xd4] sm:$0xf0]  ;;  %v8598_v32 = vld [vmem:[#allocation6 + $0xd8] sm:$0xf0] }
  0xc4   :  { %v8597_v30 = vor.u32 %v9847_v29, %v8596_v28 }
  0xc5   :  { %8357 = vmatmul.msk.bf16.gmra.mxu2 %vm756_vm2, %v731_v31  ;;  %v9846_v31 = vld [vmem:[#allocation6 + $0xd4] sm:$0xf] }
  0xc6   :  { %v668_v33 = vpop.f32.mrf.mxu3  ;;  %1696 = vmatpush.bf16.msrb.mxu3 %v8597_v30  ;;  %v9832_v30 = vld [vmem:[#allocation6 + $0x64] sm:$0xf] }
  0xc7   :  { %v669_v38 = vadd.f32 %v10901_v53, %v668_v33 }
  0xc8   :  { %v625_v34 = vpop.f32.mrf.mxu0 }
  0xc9   :  { %v626_v36 = vadd.f32 %v10901_v53, %v625_v34  ;;  %v712_v43 = vmax.f32 %v669_v38, 0.0  ;;  %v8601_v34 = vor.u32 %v9846_v31, %v8598_v32  ;;  %v9845_v38 = vld [vmem:[#allocation6 + $0xc4] sm:$0xf0]  ;;  %v8542_v31 = vld [vmem:[#allocation6 + $0x68] sm:$0xf0] }
  0xcb   :  { %v695_v37 = vmax.f32 %v626_v36, 0.0  ;;  %1874 = vmatpush.bf16.msrb.mxu1 %v8601_v34  ;;  %v8545_v34 = vor.u32 %v9832_v30, %v8542_v31 }
  0xcd   :  { %v723_v39 = vpack.c.bf16 %v695_v37, %v694_v35  ;;  %v8588_v37 = vld [vmem:[#allocation6 + $0xc0] sm:$0xf] }
  0xce   :  { %v670_v40 = vpop.f32.mrf.mxu3 }
  0xcf   :  { %v671_v41 = vadd.f32 %v10901_v53, %v670_v40  ;;  %8349 = vmatmul.msk.bf16.gmra.mxu1 %vm756_vm2, %v723_v39  ;;  %v9844_v39 = vld [vmem:[#allocation6 + $0xc4] sm:$0xf] }
  0xd0   :  { %v628_v42 = vpop.f32.mrf.mxu0 }
  0xd1   :  { %v713_v44 = vmax.f32 %v671_v41, 0.0  ;;  %v629_v46 = vadd.f32 %v10901_v53, %v628_v42  ;;  %v8589_v41 = vor.u32 %v9845_v38, %v8588_v37  ;;  %v8590_v42 = vld [vmem:[#allocation6 + $0xc8] sm:$0xf0] }
  0xd3   :  { %v732_v45 = vpack.c.bf16 %v713_v44, %v712_v43  ;;  %v696_v49 = vmax.f32 %v629_v46, 0.0  ;;  %v8593_v44 = vor.u32 %v9844_v39, %v8590_v42  ;;  %1697 = vmatpush.bf16.msrb.mxu3 %v8589_v41 }
  0xd5   :  { %8358 = vmatmul.msk.bf16.gmra.mxu2 %vm756_vm2, %v732_v45  ;;  %1875 = vmatpush.bf16.msrb.mxu1 %v8593_v44  ;;  %v9833_v44 = vld [vmem:[#allocation6 + $0x64] sm:$0xf0] }
  0xd6   :  { %v673_v47 = vpop.f32.mrf.mxu3 }
  0xd7   :  { %v674_v52 = vadd.f32 %v10901_v53, %v673_v47 }
  0xd8   :  { %v630_v48 = vpop.f32.mrf.mxu0 }
  0xd9   :  { %v631_v50 = vadd.f32 %v10901_v53, %v630_v48  ;;  %v714_v58 = vmax.f32 %v674_v52, 0.0  ;;  %v8580_v48 = vld [vmem:[#allocation6 + $0xb0] sm:$0xf]  ;;  %v8582_v52 = vld [vmem:[#allocation6 + $0xb8] sm:$0xf0] }
  0xdb   :  { %v697_v51 = vmax.f32 %v631_v50, 0.0 }
  0xdd   :  { %v724_v54 = vpack.c.bf16 %v697_v51, %v696_v49  ;;  %v9843_v49 = vld [vmem:[#allocation6 + $0xb4] sm:$0xf0]  ;;  %v9842_v51 = vld [vmem:[#allocation6 + $0xb4] sm:$0xf] }
  0xde   :  { %v675_v55 = vpop.f32.mrf.mxu3  ;;  %v8581_v50 = vor.u32 %v9843_v49, %v8580_v48 }
  0xdf   :  { %v676_v56 = vadd.f32 %v10901_v53, %v675_v55  ;;  %8350 = vmatmul.msk.bf16.gmra.mxu1 %vm756_vm2, %v724_v54  ;;  %v8585_v55 = vor.u32 %v9842_v51, %v8582_v52 }
  0xe0   :  { %v633_v57 = vpop.f32.mrf.mxu0  ;;  %1698 = vmatpush.bf16.msrb.mxu3 %v8581_v50 }
  0xe1   :  { %v715_v59 = vmax.f32 %v676_v56, 0.0  ;;  %v634_v61 = vadd.f32 %v10901_v53, %v633_v57  ;;  %1876 = vmatpush.bf16.msrb.mxu1 %v8585_v55  ;;  %v8572_v57 = vld [vmem:[#allocation6 + $0xa0] sm:$0xf] }
  0xe3   :  { %v733_v60 = vpack.c.bf16 %v715_v59, %v714_v58  ;;  %v698_v0 = vmax.f32 %v634_v61, 0.0  ;;  %v9841_v58 = vld [vmem:[#allocation6 + $0xa4] sm:$0xf0]  ;;  %v9840_v59 = vld [vmem:[#allocation6 + $0xa4] sm:$0xf] }
  0xe4   :  { %v8574_v61 = vld [vmem:[#allocation6 + $0xa8] sm:$0xf0] }
  0xe5   :  { %8359 = vmatmul.msk.bf16.gmra.mxu2 %vm756_vm2, %v733_v60  ;;  %v8573_v60 = vor.u32 %v9841_v58, %v8572_v57  ;;  %v9830_v58 = vld [vmem:[#allocation6 + $0x54] sm:$0xf] }
  0xe6   :  { %v678_v62 = vpop.f32.mrf.mxu3 }
  0xe7   :  { %v679_v3 = vadd.f32 %v10901_v53, %v678_v62  ;;  %v8577_v62 = vor.u32 %v9840_v59, %v8574_v61  ;;  %1699 = vmatpush.bf16.msrb.mxu3 %v8573_v60  ;;  %v8534_v59 = vld [vmem:[#allocation6 + $0x58] sm:$0xf0] }
  0xe8   :  { %v635_v63 = vpop.f32.mrf.mxu0 }
  0xe9   :  { %v636_v1 = vadd.f32 %v10901_v53, %v635_v63  ;;  %v716_v8 = vmax.f32 %v679_v3, 0.0  ;;  %1877 = vmatpush.bf16.msrb.mxu1 %v8577_v62  ;;  %v9839_v3 = vld [vmem:[#allocation6 + $0x94] sm:$0xf0] }
  0xeb   :  { %v699_v2 = vmax.f32 %v636_v1, 0.0 }
  0xed   :  { %v725_v4 = vpack.c.bf16 %v699_v2, %v698_v0  ;;  %v8564_v2 = vld [vmem:[#allocation6 + $0x90] sm:$0xf] }
  0xee   :  { %v680_v5 = vpop.f32.mrf.mxu3 }
  0xef   :  { %v681_v6 = vadd.f32 %v10901_v53, %v680_v5  ;;  %8351 = vmatmul.msk.bf16.gmra.mxu1 %vm756_vm2, %v725_v4  ;;  %v9838_v4 = vld [vmem:[#allocation6 + $0x94] sm:$0xf]  ;;  %v8565_v5 = vor.u32 %v9839_v3, %v8564_v2 }
  0xf0   :  { %v638_v7 = vpop.f32.mrf.mxu0 }
  0xf1   :  { %v717_v9 = vmax.f32 %v681_v6, 0.0  ;;  %v639_v17 = vadd.f32 %v10901_v53, %v638_v7  ;;  %v8566_v6 = vld [vmem:[#allocation6 + $0x98] sm:$0xf0]  ;;  %1700 = vmatpush.bf16.msrb.mxu3 %v8565_v5 }
  0xf3   :  { %v734_v15 = vpack.c.bf16 %v717_v9, %v716_v8  ;;  %v700_v26 = vmax.f32 %v639_v17, 0.0  ;;  %v8569_v8 = vor.u32 %v9838_v4, %v8566_v6  ;;  %v9834_v9 = vld [vmem:[#allocation6 + $0x74] sm:$0xf]  ;;  %v8558_v17 = vld [vmem:[#allocation6 + $0x88] sm:$0xf0] }
  0xf4   :  { %v8553_v12 = vor.u32 %v9834_v9, %v8550_v10  ;;  %v8532_v6 = vld [vmem:[#allocation6 + $0x50] sm:$0xf] }
  0xf5   :  { %8360 = vmatmul.msk.bf16.gmra.mxu2 %vm756_vm2, %v734_v15  ;;  %1878 = vmatpush.bf16.msrb.mxu1 %v8569_v8  ;;  %v9836_v15 = vld [vmem:[#allocation6 + $0x84] sm:$0xf] }
  0xf6   :  { %v683_v21 = vpop.f32.mrf.mxu3  ;;  %1783 = vmatpush.bf16.msrb.mxu0 %v8553_v12  ;;  %v8561_v18 = vor.u32 %v9836_v15, %v8558_v17  ;;  %1701 = vmatpush.bf16.msrb.mxu3 %v8557_v16 }
  0xf7   :  { %v684_v35 = vadd.f32 %v10901_v53, %v683_v21 }
  0xf8   :  { %v640_v25 = vpop.f32.mrf.mxu0 }
  0xf9   :  { %v641_v27 = vadd.f32 %v10901_v53, %v640_v25  ;;  %v718_v46 = vmax.f32 %v684_v35, 0.0  ;;  %1879 = vmatpush.bf16.msrb.mxu1 %v8561_v18 }
  0xfa   :  { %1784 = vmatpush.bf16.msrb.mxu0 %v8545_v34 }
  0xfb   :  { %v701_v33 = vmax.f32 %v641_v27, 0.0  ;;  %v8549_v27 = vor.u32 %v9835_v23, %v8548_v22 }
  0xfd   :  { %v726_v36 = vpack.c.bf16 %v701_v33, %v700_v26  ;;  %v10951_v26 = vld [vmem:[#allocation3] ss:$0 sm:$0xff]  ;;  %1605 = vmatpush.bf16.msrb.mxu2 %v8549_v27 }
  0xfe   :  { %v685_v40 = vpop.f32.mrf.mxu3 }
  0xff   :  { %v686_v43 = vadd.f32 %v10901_v53, %v685_v40  ;;  %8352 = vmatmul.msk.bf16.gmra.mxu1 %vm756_vm2, %v726_v36 }
 0x100   :  { %v643_v45 = vpop.f32.mrf.mxu0 }
 0x101   :  { %v719_v47 = vmax.f32 %v686_v43, 0.0  ;;  %v644_v56 = vadd.f32 %v10901_v53, %v643_v45  ;;  %v8540_v43 = vld [vmem:[#allocation6 + $0x60] sm:$0xf] }
 0x103   :  { %v735_v54 = vpack.c.bf16 %v719_v47, %v718_v46  ;;  %v702_v63 = vmax.f32 %v644_v56, 0.0  ;;  %v8541_v47 = vor.u32 %v9833_v44, %v8540_v43 }
 0x105   :  { %8361 = vmatmul.msk.bf16.gmra.mxu2 %vm756_vm2, %v735_v54 }
 0x106   :  { %1606 = vmatpush.bf16.msrb.mxu2 %v8541_v47 }
 0x108   :  { %v645_v0 = vpop.f32.mrf.mxu0 }
 0x109   :  { %v646_v1 = vadd.f32 %v10901_v53, %v645_v0 }
 0x10b   :  { %v703_v7 = vmax.f32 %v646_v1, 0.0 }
 0x10d   :  { %v727_v11 = vpack.c.bf16 %v703_v7, %v702_v63  ;;  %v8537_v63 = vor.u32 %v9830_v58, %v8534_v59  ;;  %v9831_v7 = vld [vmem:[#allocation6 + $0x54] sm:$0xf0] }
 0x10e   :  { %v8533_v10 = vor.u32 %v9831_v7, %v8532_v6 }
 0x10f   :  { %8353 = vmatmul.msk.bf16.gmra.mxu1 %vm756_vm2, %v727_v11  ;;  %1785 = vmatpush.bf16.msrb.mxu0 %v8537_v63 }
 0x110   :  { %v648_v19 = vpop.f32.mrf.mxu0  ;;  %1607 = vmatpush.bf16.msrb.mxu2 %v8533_v10 }
 0x111   :  { %v649_v20 = vadd.f32 %v10901_v53, %v648_v19 }
 0x113   :  { %v704_v24 = vmax.f32 %v649_v20, 0.0 }
 0x118   :  { %v650_v21 = vpop.f32.mrf.mxu0 }
 0x119   :  { %v651_v25 = vadd.f32 %v10901_v53, %v650_v21  ;;  %v76_v53 = vlaneseq }
 0x11b   :  { %v705_v28 = vmax.f32 %v651_v25, 0.0  ;;  %v10959_v36 = vshrl.u32 %v76_v53, 7 }
 0x11c   :  { %v814_v29 = vpop.f32.mrf.mxu1 }
 0x11d   :  { %v10954_v32 = vadd.f32 %v10951_v26, %v814_v29  ;;  %v728_v33 = vpack.c.bf16 %v705_v28, %v704_v24  ;;  %vm926_vm3 = vcmp.lt.s32.totalorder %v10959_v36, 1  ;;  %v97_v4 = vadd.s32 160, %v10959_v36 }
 0x11e   :  { %v81_v15 = vadd.s32 32, %v10959_v36  ;;  %vm2217_vm12 = vcmp.lt.s32.totalorder %v10959_v36, 2 }
 0x11f   :  { %v1151_v35 = vpack.c.bf16 %v10954_v32, %v10954_v32  ;;  %8354 = vmatmul.msk.bf16.gmra.mxu1 %vm756_vm2, %v728_v33  ;;  %v894_v38 = vrot.slane %v10954_v32, 7  ;;  %v11004_v14 = vand.u32 31, %v97_v4 }
 0x120   :  { %v11016_v22 = vand.u32 31, %v81_v15 }
 0x121   :  { %1183 = vst [vmem:[#allocation2 + $0x4] sm:$0xf] %v1151_v35  ;;  %vm979_vm4 = vcmp.ge.s32.totalorder %v11004_v14, 1 }
 0x122   :  { %14728 = vst [vmem:[#allocation15_spill] sm:$0xff] %v11004_v14  ;;  %vm963_vm5 = vcmp.ge.s32.totalorder %v11016_v22, 1  ;;  %v8836_v14 = vld [vmem:[#allocation6 + $0x1b0] sm:$0xf]  ;;  %vm2254_vm13 = vcmp.ge.s32.totalorder %v11016_v22, 2 }
 0x124   :  { %v816_v37 = vpop.f32.mrf.mxu1 }
 0x125   :  { %v10963_v39 = vadd.f32 %v10951_v26, %v816_v37 }
 0x127   :  { %v895_v40 = vrot.slane %v10963_v39, 7  ;;  %v1152_v41 = vpack.c.bf16 %v10963_v39, %v10963_v39 }
 0x128   :  { %v859_v42 = vpop.f32.mrf.mxu2  ;;  %v9788_v52 = vld [vmem:[#allocation2 + $0x4] sm:$0xf] }
 0x129   :  { %v957_v45 = vsel %vm926_vm3, %v894_v38, %v895_v40  ;;  %1184 = vst [vmem:[#allocation2 + $0xc] sm:$0xf] %v1152_v41  ;;  %v10974_v46 = vadd.f32 %v10951_v26, %v859_v42  ;;  %v8526_v42 = vld [vmem:[#allocation6 + $0x48] sm:$0xf0] }
 0x12a   :  { %v1088_v48 = vpack.c.bf16 %v957_v45, %v957_v45 }
 0x12b   :  { %14726 = vst [vmem:[#allocation13_spill] sm:$0xff] %v10974_v46  ;;  %v1169_v49 = vpack.c.bf16 %v10974_v46, %v10974_v46  ;;  %v912_v1 = vrot.slane %v10974_v46, 7  ;;  %v9904_v46 = vld [vmem:[#allocation6 + $0x1a4] sm:$0xf] }
 0x12c   :  { %1120 = vst [vmem:[#allocation2 + $0x8] sm:$0xf] %v1088_v48  ;;  %v819_v50 = vpop.f32.mrf.mxu1 }
 0x12d   :  { %1201 = vst [vmem:[#allocation2 + $0x94] sm:$0xf] %v1169_v49  ;;  %v10979_v51 = vadd.f32 %v10951_v26, %v819_v50 }
 0x12f   :  { %v896_v54 = vrot.slane %v10979_v51, 7  ;;  %v1153_v55 = vpack.c.bf16 %v10979_v51, %v10979_v51 }
 0x130   :  { %v861_v56 = vpop.f32.mrf.mxu2  ;;  %v8366_v57 = vld [vmem:[#allocation2 + $0x8] sm:$0xf0] }
 0x131   :  { %v956_v60 = vsel %vm926_vm3, %v895_v40, %v896_v54  ;;  %1185 = vst [vmem:[#allocation2 + $0x14] sm:$0xf] %v1153_v55  ;;  %v10987_v61 = vadd.f32 %v10951_v26, %v861_v56  ;;  %v8369_v62 = vor.u32 %v9788_v52, %v8366_v57  ;;  %v9828_v40 = vld [vmem:[#allocation6 + $0x44] sm:$0xf]  ;;  %v8524_v52 = vld [vmem:[#allocation6 + $0x40] sm:$0xf] }
 0x132   :  { %v1089_v0 = vpack.c.bf16 %v956_v60, %v956_v60  ;;  %v8529_v47 = vor.u32 %v9828_v40, %v8526_v42  ;;  %v85_v42 = vadd.s32 64, %v10959_v36 }
 0x133   :  { %14727 = vst [vmem:[#allocation14_spill] sm:$0xff] %v10987_v61  ;;  %v913_v2 = vrot.slane %v10987_v61, 7  ;;  %v1170_v3 = vpack.c.bf16 %v10987_v61, %v10987_v61  ;;  %1702 = vmatmul.bf16.vlgmr.msrb.gmra.mxu3 %v8369_v62  ;;  %1880 = vmatmul.bf16.vlgmr.msrb.gmra.mxu1 %v8369_v62 }
 0x134   :  { %1121 = vst [vmem:[#allocation2 + $0x10] sm:$0xf] %v1089_v0  ;;  %v821_v5 = vpop.f32.mrf.mxu1  ;;  %1786 = vmatpush.bf16.msrb.mxu0 %v8529_v47 }
 0x135   :  { %v939_v8 = vsel %vm926_vm3, %v912_v1, %v913_v2  ;;  %1202 = vst [vmem:[#allocation2 + $0x9c] sm:$0xf] %v1170_v3  ;;  %v10999_v9 = vadd.f32 %v10951_v26, %v821_v5 }
 0x136   :  { %v1106_v11 = vpack.c.bf16 %v939_v8, %v939_v8 }
 0x137   :  { %v897_v12 = vrot.slane %v10999_v9, 7  ;;  %v1154_v13 = vpack.c.bf16 %v10999_v9, %v10999_v9 }
 0x138   :  { %1138 = vst [vmem:[#allocation2 + $0x98] sm:$0xf] %v1106_v11  ;;  %v864_v16 = vpop.f32.mrf.mxu2  ;;  %v9790_v28 = vld [vmem:[#allocation2 + $0x14] sm:$0xf] }
 0x139   :  { %v955_v17 = vsel %vm926_vm3, %v896_v54, %v897_v12  ;;  %1186 = vst [vmem:[#allocation2 + $0x1c] sm:$0xf] %v1154_v13  ;;  %v11010_v18 = vadd.f32 %v10951_v26, %v864_v16  ;;  %v9829_v54 = vld [vmem:[#allocation6 + $0x44] sm:$0xf0]  ;;  %v8516_v13 = vld [vmem:[#allocation6 + $0x30] sm:$0xf] }
 0x13a   :  { %v1090_v19 = vpack.c.bf16 %v955_v17, %v955_v17  ;;  %v8525_v56 = vor.u32 %v9829_v54, %v8524_v52  ;;  %v11088_v52 = vand.u32 31, %v85_v42 }
 0x13b   :  { %14729 = vst [vmem:[#allocation16_spill] sm:$0xff] %v11010_v18  ;;  %v914_v20 = vrot.slane %v11010_v18, 7  ;;  %v1171_v21 = vpack.c.bf16 %v11010_v18, %v11010_v18  ;;  %v9907_v18 = vld [vmem:[#allocation6 + $0x1b4] sm:$0xf0] }
 0x13c   :  { %1122 = vst [vmem:[#allocation2 + $0x18] sm:$0xf] %v1090_v19  ;;  %v824_v23 = vpop.f32.mrf.mxu1  ;;  %1608 = vmatpush.bf16.msrb.mxu2 %v8525_v56  ;;  %v9827_v19 = vld [vmem:[#allocation6 + $0x34] sm:$0xf0]  ;;  %vm967_vm7 = vcmp.ge.s32.totalorder %v11088_v52, 1  ;;  %vm2258_vm14 = vcmp.ge.s32.totalorder %v11088_v52, 2 }
 0x13d   :  { %v938_v24 = vsel %vm926_vm3, %v913_v2, %v914_v20  ;;  %1203 = vst [vmem:[#allocation2 + $0xa4] sm:$0xf] %v1171_v21  ;;  %v11021_v25 = vadd.f32 %v10951_v26, %v824_v23  ;;  %v8517_v21 = vor.u32 %v9827_v19, %v8516_v13 }
 0x13e   :  { %v1075_v27 = vsel %vm979_vm4, %v938_v24, 0.0 }
 0x13f   :  { %v1107_v29 = vpack.c.bf16 %v1075_v27, %v1075_v27  ;;  %v898_v30 = vrot.slane %v11021_v25, 7  ;;  %v1155_v31 = vpack.c.bf16 %v11021_v25, %v11021_v25  ;;  %v101_v27 = vadd.s32 192, %v10959_v36 }
 0x140   :  { %v866_v33 = vpop.f32.mrf.mxu2  ;;  %v8374_v34 = vld [vmem:[#allocation2 + $0x18] sm:$0xf0]  ;;  %1609 = vmatpush.bf16.msrb.mxu2 %v8517_v21  ;;  %v9824_v21 = vld [vmem:[#allocation6 + $0x24] sm:$0xf] }
 0x141   :  { %1139 = vst [vmem:[#allocation2 + $0xa0] sm:$0xf] %v1107_v29  ;;  %v954_v35 = vsel %vm926_vm3, %v897_v12, %v898_v30  ;;  %v11030_v53 = vadd.f32 %v10951_v26, %v866_v33  ;;  %v8377_v37 = vor.u32 %v9790_v28, %v8374_v34  ;;  %v9826_v29 = vld [vmem:[#allocation6 + $0x34] sm:$0xf] }
 0x142   :  { %v1059_v41 = vsel %vm963_vm5, %v954_v35, 0.0  ;;  %1187 = vst [vmem:[#allocation2 + $0x24] sm:$0xf] %v1155_v31  ;;  %vm3510_vm5 = vcmp.lt.s32.totalorder %v10959_v36, 4 }
 0x143   :  { %14730 = vst [vmem:[#allocation17_spill] sm:$0xff] %v11030_v53  ;;  %v1091_v43 = vpack.c.bf16 %v1059_v41, %v1059_v41  ;;  %v915_v44 = vrot.slane %v11030_v53, 7  ;;  %v1172_v45 = vpack.c.bf16 %v11030_v53, %v11030_v53  ;;  %1707 = vmatmul.bf16.gmra.mxu3 %v8377_v37  ;;  %1885 = vmatmul.bf16.gmra.mxu1 %v8377_v37  ;;  %v11076_v41 = vand.u32 31, %v101_v27 }
 0x144   :  { %v826_v48 = vpop.f32.mrf.mxu1 }
 0x145   :  { %1123 = vst [vmem:[#allocation2 + $0x20] sm:$0xf] %v1091_v43  ;;  %v937_v49 = vsel %vm926_vm3, %v914_v20, %v915_v44  ;;  %v11038_v50 = vadd.f32 %v10951_v26, %v826_v48  ;;  %vm983_vm6 = vcmp.ge.s32.totalorder %v11076_v41, 1 }
 0x146   :  { %v1108_v55 = vpack.c.bf16 %v937_v49, %v937_v49  ;;  %1204 = vst [vmem:[#allocation2 + $0xac] sm:$0xf] %v1172_v45 }
 0x147   :  { %v899_v57 = vrot.slane %v11038_v50, 7  ;;  %v1156_v58 = vpack.c.bf16 %v11038_v50, %v11038_v50  ;;  %14733 = vst [vmem:[#allocation20_spill] sm:$0xff] %v11076_v41 }
 0x148   :  { %1140 = vst [vmem:[#allocation2 + $0xa8] sm:$0xf] %v1108_v55  ;;  %v869_v59 = vpop.f32.mrf.mxu2 }
 0x149   :  { %v953_v60 = vsel %vm926_vm3, %v898_v30, %v899_v57  ;;  %1188 = vst [vmem:[#allocation2 + $0x2c] sm:$0xf] %v1156_v58  ;;  %v11046_v62 = vadd.f32 %v10951_v26, %v869_v59  ;;  %v9792_v7 = vld [vmem:[#allocation2 + $0x24] sm:$0xf]  ;;  %v8518_v30 = vld [vmem:[#allocation6 + $0x38] sm:$0xf0] }
 0x14a   :  { %v1092_v63 = vpack.c.bf16 %v953_v60, %v953_v60  ;;  %v8521_v34 = vor.u32 %v9826_v29, %v8518_v30 }
 0x14b   :  { %14731 = vst [vmem:[#allocation18_spill] sm:$0xff] %v11046_v62  ;;  %v916_v0 = vrot.slane %v11046_v62, 7  ;;  %v1173_v2 = vpack.c.bf16 %v11046_v62, %v11046_v62 }
 0x14c   :  { %1124 = vst [vmem:[#allocation2 + $0x28] sm:$0xf] %v1092_v63  ;;  %v829_v3 = vpop.f32.mrf.mxu1  ;;  %1787 = vmatpush.bf16.msrb.mxu0 %v8521_v34 }
 0x14d   :  { %v936_v4 = vsel %vm926_vm3, %v915_v44, %v916_v0  ;;  %1205 = vst [vmem:[#allocation2 + $0xb4] sm:$0xf] %v1173_v2  ;;  %v11054_v5 = vadd.f32 %v10951_v26, %v829_v3 }
 0x14e   :  { %v1109_v6 = vpack.c.bf16 %v936_v4, %v936_v4 }
 0x14f   :  { %v900_v8 = vrot.slane %v11054_v5, 7  ;;  %v1157_v10 = vpack.c.bf16 %v11054_v5, %v11054_v5 }
 0x150   :  { %1141 = vst [vmem:[#allocation2 + $0xb0] sm:$0xf] %v1109_v6  ;;  %v871_v11 = vpop.f32.mrf.mxu2  ;;  %v8382_v12 = vld [vmem:[#allocation2 + $0x28] sm:$0xf0] }
 0x151   :  { %v952_v15 = vsel %vm926_vm3, %v899_v57, %v900_v8  ;;  %1189 = vst [vmem:[#allocation2 + $0x34] sm:$0xf] %v1157_v10  ;;  %v11062_v16 = vadd.f32 %v10951_v26, %v871_v11  ;;  %v8385_v17 = vor.u32 %v9792_v7, %v8382_v12  ;;  %v8508_v7 = vld [vmem:[#allocation6 + $0x20] sm:$0xf]  ;;  %v9825_v10 = vld [vmem:[#allocation6 + $0x24] sm:$0xf0] }
 0x152   :  { %v1093_v20 = vpack.c.bf16 %v952_v15, %v952_v15  ;;  %v8509_v15 = vor.u32 %v9825_v10, %v8508_v7 }
 0x153   :  { %14732 = vst [vmem:[#allocation19_spill] sm:$0xff] %v11062_v16  ;;  %v917_v23 = vrot.slane %v11062_v16, 7  ;;  %v1174_v24 = vpack.c.bf16 %v11062_v16, %v11062_v16  ;;  %1712 = vmatmul.bf16.gmra.mxu3 %v8385_v17  ;;  %1890 = vmatmul.bf16.gmra.mxu1 %v8385_v17  ;;  %v8862_v16 = vld [vmem:[#allocation6 + $0x1e8] sm:$0xf0] }
 0x154   :  { %1125 = vst [vmem:[#allocation2 + $0x30] sm:$0xf] %v1093_v20  ;;  %v831_v28 = vpop.f32.mrf.mxu1  ;;  %1610 = vmatpush.bf16.msrb.mxu2 %v8509_v15 }
 0x155   :  { %v935_v31 = vsel %vm926_vm3, %v916_v0, %v917_v23  ;;  %1206 = vst [vmem:[#allocation2 + $0xbc] sm:$0xf] %v1174_v24  ;;  %v11071_v33 = vadd.f32 %v10951_v26, %v831_v28 }
 0x156   :  { %v1110_v35 = vpack.c.bf16 %v935_v31, %v935_v31 }
 0x157   :  { %v901_v37 = vrot.slane %v11071_v33, 7  ;;  %v1158_v40 = vpack.c.bf16 %v11071_v33, %v11071_v33 }
 0x158   :  { %1142 = vst [vmem:[#allocation2 + $0xb8] sm:$0xf] %v1110_v35  ;;  %v874_v43 = vpop.f32.mrf.mxu2  ;;  %v9794_v58 = vld [vmem:[#allocation2 + $0x34] sm:$0xf] }
 0x159   :  { %v951_v44 = vsel %vm926_vm3, %v900_v8, %v901_v37  ;;  %1190 = vst [vmem:[#allocation2 + $0x3c] sm:$0xf] %v1158_v40  ;;  %v11082_v45 = vadd.f32 %v10951_v26, %v874_v43  ;;  %v8500_v43 = vld [vmem:[#allocation6 + $0x10] sm:$0xf] }
 0x15a   :  { %v1094_v47 = vpack.c.bf16 %v951_v44, %v951_v44  ;;  %v9823_v44 = vld [vmem:[#allocation6 + $0x14] sm:$0xf0] }
 0x15b   :  { %14734 = vst [vmem:[#allocation21_spill] sm:$0xff] %v11082_v45  ;;  %v918_v48 = vrot.slane %v11082_v45, 7  ;;  %v1175_v49 = vpack.c.bf16 %v11082_v45, %v11082_v45 }
 0x15c   :  { %1126 = vst [vmem:[#allocation2 + $0x38] sm:$0xf] %v1094_v47  ;;  %v834_v54 = vpop.f32.mrf.mxu1 }
 0x15d   :  { %v934_v55 = vsel %vm926_vm3, %v917_v23, %v918_v48  ;;  %1207 = vst [vmem:[#allocation2 + $0xc4] sm:$0xf] %v1175_v49  ;;  %v11093_v56 = vadd.f32 %v10951_v26, %v834_v54  ;;  %v8510_v23 = vld [vmem:[#allocation6 + $0x28] sm:$0xf0]  ;;  %v8501_v49 = vor.u32 %v9823_v44, %v8500_v43  ;;  %v8492_v43 = vld [vmem:[#allocation6] sm:$0xf] }
 0x15e   :  { %v1079_v57 = vsel %vm983_vm6, %v934_v55, 0.0  ;;  %v8513_v27 = vor.u32 %v9824_v21, %v8510_v23  ;;  %v89_v21 = vadd.s32 96, %v10959_v36  ;;  %v9821_v44 = vld [vmem:[#allocation6 + $0x4] sm:$0xf0]  ;;  %vm3547_vm6 = vcmp.ge.s32.totalorder %v11016_v22, 4 }
 0x15f   :  { %v1111_v59 = vpack.c.bf16 %v1079_v57, %v1079_v57  ;;  %v902_v60 = vrot.slane %v11093_v56, 7  ;;  %v1159_v63 = vpack.c.bf16 %v11093_v56, %v11093_v56  ;;  %1611 = vmatpush.bf16.msrb.mxu2 %v8501_v49 }
 0x160   :  { %v876_v0 = vpop.f32.mrf.mxu2  ;;  %v8390_v2 = vld [vmem:[#allocation2 + $0x38] sm:$0xf0]  ;;  %1788 = vmatpush.bf16.msrb.mxu0 %v8513_v27 }
 0x161   :  { %1143 = vst [vmem:[#allocation2 + $0xc0] sm:$0xf] %v1111_v59  ;;  %v950_v3 = vsel %vm926_vm3, %v901_v37, %v902_v60  ;;  %v11102_v4 = vadd.f32 %v10951_v26, %v876_v0  ;;  %v8393_v6 = vor.u32 %v9794_v58, %v8390_v2 }
 0x162   :  { %v1063_v8 = vsel %vm967_vm7, %v950_v3, 0.0  ;;  %1191 = vst [vmem:[#allocation2 + $0x44] sm:$0xf] %v1159_v63  ;;  %vm3551_vm7 = vcmp.ge.s32.totalorder %v11088_v52, 4 }
 0x163   :  { %14735 = vst [vmem:[#allocation22_spill] sm:$0xff] %v11102_v4  ;;  %v1095_v11 = vpack.c.bf16 %v1063_v8, %v1063_v8  ;;  %v919_v12 = vrot.slane %v11102_v4, 7  ;;  %v1176_v13 = vpack.c.bf16 %v11102_v4, %v11102_v4  ;;  %1717 = vmatmul.bf16.gmra.mxu3 %v8393_v6  ;;  %1895 = vmatmul.bf16.gmra.mxu1 %v8393_v6  ;;  %v105_v6 = vadd.s32 224, %v10959_v36 }
 0x164   :  { %v836_v17 = vpop.f32.mrf.mxu1 }
 0x165   :  { %1127 = vst [vmem:[#allocation2 + $0x40] sm:$0xf] %v1095_v11  ;;  %v933_v19 = vsel %vm926_vm3, %v918_v48, %v919_v12  ;;  %v11110_v20 = vadd.f32 %v10951_v26, %v836_v17  ;;  %v11145_v15 = vand.u32 31, %v105_v6 }
 0x166   :  { %v1112_v24 = vpack.c.bf16 %v933_v19, %v933_v19  ;;  %1208 = vst [vmem:[#allocation2 + $0xcc] sm:$0xf] %v1176_v13 }
 0x167   :  { %v903_v28 = vrot.slane %v11110_v20, 7  ;;  %v1160_v29 = vpack.c.bf16 %v11110_v20, %v11110_v20  ;;  %14738 = vst [vmem:[#allocation25_spill] sm:$0xff] %v11145_v15  ;;  %vm987_vm8 = vcmp.ge.s32.totalorder %v11145_v15, 1  ;;  %v8868_v15 = vld [vmem:[#allocation6 + $0x1f0] sm:$0xf] }
 0x168   :  { %1144 = vst [vmem:[#allocation2 + $0xc8] sm:$0xf] %v1112_v24  ;;  %v879_v30 = vpop.f32.mrf.mxu2 }
 0x169   :  { %v949_v31 = vsel %vm926_vm3, %v902_v60, %v903_v28  ;;  %1192 = vst [vmem:[#allocation2 + $0x4c] sm:$0xf] %v1160_v29  ;;  %v11118_v34 = vadd.f32 %v10951_v26, %v879_v30  ;;  %v9796_v55 = vld [vmem:[#allocation2 + $0x44] sm:$0xf]  ;;  %v8502_v30 = vld [vmem:[#allocation6 + $0x18] sm:$0xf0] }
 0x16a   :  { %v1096_v35 = vpack.c.bf16 %v949_v31, %v949_v31 }
 0x16b   :  { %14736 = vst [vmem:[#allocation23_spill] sm:$0xff] %v11118_v34  ;;  %v920_v37 = vrot.slane %v11118_v34, 7  ;;  %v1177_v40 = vpack.c.bf16 %v11118_v34, %v11118_v34 }
 0x16c   :  { %1128 = vst [vmem:[#allocation2 + $0x48] sm:$0xf] %v1096_v35  ;;  %v839_v42 = vpop.f32.mrf.mxu1 }
 0x16d   :  { %v932_v47 = vsel %vm926_vm3, %v919_v12, %v920_v37  ;;  %1209 = vst [vmem:[#allocation2 + $0xd4] sm:$0xf] %v1177_v40  ;;  %v11126_v48 = vadd.f32 %v10951_v26, %v839_v42 }
 0x16e   :  { %v1113_v54 = vpack.c.bf16 %v932_v47, %v932_v47 }
 0x16f   :  { %v904_v57 = vrot.slane %v11126_v48, 7  ;;  %v1161_v58 = vpack.c.bf16 %v11126_v48, %v11126_v48 }
 0x170   :  { %1145 = vst [vmem:[#allocation2 + $0xd0] sm:$0xf] %v1113_v54  ;;  %v881_v59 = vpop.f32.mrf.mxu2  ;;  %v8398_v60 = vld [vmem:[#allocation2 + $0x48] sm:$0xf0] }
 0x171   :  { %v948_v63 = vsel %vm926_vm3, %v903_v28, %v904_v57  ;;  %1193 = vst [vmem:[#allocation2 + $0x54] sm:$0xf] %v1161_v58  ;;  %v11134_v0 = vadd.f32 %v10951_v26, %v881_v59  ;;  %v8401_v2 = vor.u32 %v9796_v55, %v8398_v60  ;;  %v9822_v28 = vld [vmem:[#allocation6 + $0x14] sm:$0xf]  ;;  %v8493_v55 = vor.u32 %v9821_v44, %v8492_v43  ;;  %v9820_v58 = vld [vmem:[#allocation6 + $0x4] sm:$0xf] }
 0x172   :  { %v1097_v3 = vpack.c.bf16 %v948_v63, %v948_v63  ;;  %v8505_v40 = vor.u32 %v9822_v28, %v8502_v30  ;;  %v8494_v59 = vld [vmem:[#allocation6 + $0x8] sm:$0xf0] }
 0x173   :  { %14737 = vst [vmem:[#allocation24_spill] sm:$0xff] %v11134_v0  ;;  %v921_v7 = vrot.slane %v11134_v0, 7  ;;  %v1178_v8 = vpack.c.bf16 %v11134_v0, %v11134_v0  ;;  %1722 = vmatmul.bf16.gmra.mxu3 %v8401_v2  ;;  %1900 = vmatmul.bf16.gmra.mxu1 %v8401_v2  ;;  %v9914_v0 = vld [vmem:[#allocation6 + $0x1f4] sm:$0xf] }
 0x174   :  { %1129 = vst [vmem:[#allocation2 + $0x50] sm:$0xf] %v1097_v3  ;;  %v841_v10 = vpop.f32.mrf.mxu1  ;;  %1789 = vmatpush.bf16.msrb.mxu0 %v8505_v40  ;;  %1612 = vmatpush.bf16.msrb.mxu2 %v8493_v55 }
 0x175   :  { %v931_v11 = vsel %vm926_vm3, %v920_v37, %v921_v7  ;;  %1210 = vst [vmem:[#allocation2 + $0xdc] sm:$0xf] %v1178_v8  ;;  %v11143_v12 = vadd.f32 %v10951_v26, %v841_v10  ;;  %v11160_v37 = vand.u32 31, %v89_v21 }
 0x176   :  { %v1114_v13 = vpack.c.bf16 %v931_v11, %v931_v11 }
 0x177   :  { %v905_v17 = vrot.slane %v11143_v12, 7  ;;  %v1162_v19 = vpack.c.bf16 %v11143_v12, %v11143_v12  ;;  %vm971_vm9 = vcmp.ge.s32.totalorder %v11160_v37, 1  ;;  %vm2262_vm15 = vcmp.ge.s32.totalorder %v11160_v37, 2 }
 0x178   :  { %1146 = vst [vmem:[#allocation2 + $0xd8] sm:$0xf] %v1114_v13  ;;  %v884_v23 = vpop.f32.mrf.mxu2  ;;  %v9798_v54 = vld [vmem:[#allocation2 + $0x54] sm:$0xf] }
 0x179   :  { %v947_v24 = vsel %vm926_vm3, %v904_v57, %v905_v17  ;;  %1194 = vst [vmem:[#allocation2 + $0x5c] sm:$0xf] %v1162_v19  ;;  %v11154_v27 = vadd.f32 %v10951_v26, %v884_v23 }
 0x17a   :  { %v1098_v29 = vpack.c.bf16 %v947_v24, %v947_v24 }
 0x17b   :  { %14739 = vst [vmem:[#allocation26_spill] sm:$0xff] %v11154_v27  ;;  %v922_v31 = vrot.slane %v11154_v27, 7  ;;  %v1179_v35 = vpack.c.bf16 %v11154_v27, %v11154_v27  ;;  %v9915_v27 = vld [vmem:[#allocation6 + $0x1f4] sm:$0xf0] }
 0x17c   :  { %1130 = vst [vmem:[#allocation2 + $0x58] sm:$0xf] %v1098_v29  ;;  %v844_v42 = vpop.f32.mrf.mxu1  ;;  %v8869_v34 = vor.u32 %v9915_v27, %v8868_v15  ;;  %v8852_v27 = vld [vmem:[#allocation6 + $0x1d0] sm:$0xf] }
 0x17d   :  { %v930_v47 = vsel %vm926_vm3, %v921_v7, %v922_v31  ;;  %1211 = vst [vmem:[#allocation2 + $0xe4] sm:$0xf] %v1179_v35  ;;  %v11165_v49 = vadd.f32 %v10951_v26, %v844_v42  ;;  %v8497_v7 = vor.u32 %v9820_v58, %v8494_v59 }
 0x17e   :  { %v1083_v57 = vsel %vm987_vm8, %v930_v47, 0.0  ;;  %2987 = vmatpush.bf16.msra.mxu3 %v8869_v34  ;;  %vm3555_vm8 = vcmp.ge.s32.totalorder %v11160_v37, 4 }
 0x17f   :  { %v1115_v60 = vpack.c.bf16 %v1083_v57, %v1083_v57  ;;  %v906_v63 = vrot.slane %v11165_v49, 7  ;;  %v1163_v2 = vpack.c.bf16 %v11165_v49, %v11165_v49  ;;  %1790 = vmatpush.bf16.msrb.mxu0 %v8497_v7 }
 0x180   :  { %v886_v3 = vpop.f32.mrf.mxu2  ;;  %v8406_v6 = vld [vmem:[#allocation2 + $0x58] sm:$0xf0] }
 0x181   :  { %1147 = vst [vmem:[#allocation2 + $0xe0] sm:$0xf] %v1115_v60  ;;  %v946_v8 = vsel %vm926_vm3, %v905_v17, %v906_v63  ;;  %v11176_v10 = vadd.f32 %v10951_v26, %v886_v3  ;;  %v8409_v11 = vor.u32 %v9798_v54, %v8406_v6 }
 0x182   :  { %v1067_v13 = vsel %vm971_vm9, %v946_v8, 0.0  ;;  %1195 = vst [vmem:[#allocation2 + $0x64] sm:$0xf] %v1163_v2  ;;  %v11206_v2 = vand.u32 31, %v10959_v36 }
 0x183   :  { %14740 = vst [vmem:[#allocation27_spill] sm:$0xff] %v11176_v10  ;;  %v1099_v19 = vpack.c.bf16 %v1067_v13, %v1067_v13  ;;  %v923_v21 = vrot.slane %v11176_v10, 7  ;;  %v1180_v23 = vpack.c.bf16 %v11176_v10, %v11176_v10  ;;  %1727 = vmatmul.bf16.gmra.mxu3 %v8409_v11  ;;  %1905 = vmatmul.bf16.gmra.mxu1 %v8409_v11 }
 0x184   :  { %v846_v24 = vpop.f32.mrf.mxu1  ;;  %14742 = vst [vmem:[#allocation29_spill] sm:$0xff] %v11206_v2  ;;  %vm959_vm10 = vcmp.ge.s32.totalorder %v11206_v2, 1  ;;  %v9816_v4 = vld [vmem:[#allocation2 + $0xe4] sm:$0xf] }
 0x185   :  { %1131 = vst [vmem:[#allocation2 + $0x60] sm:$0xf] %v1099_v19  ;;  %v929_v17 = vsel %vm926_vm3, %v922_v31, %v923_v21  ;;  %v11184_v28 = vadd.f32 %v10951_v26, %v846_v24 }
 0x186   :  { %v1116_v29 = vpack.c.bf16 %v929_v17, %v929_v17  ;;  %1212 = vst [vmem:[#allocation2 + $0xec] sm:$0xf] %v1180_v23 }
 0x187   :  { %v907_v30 = vrot.slane %v11184_v28, 7  ;;  %v1164_v35 = vpack.c.bf16 %v11184_v28, %v11184_v28 }
 0x188   :  { %1148 = vst [vmem:[#allocation2 + $0xe8] sm:$0xf] %v1116_v29  ;;  %v889_v40 = vpop.f32.mrf.mxu2 }
 0x189   :  { %v945_v42 = vsel %vm926_vm3, %v906_v63, %v907_v30  ;;  %1196 = vst [vmem:[#allocation2 + $0x6c] sm:$0xf] %v1164_v35  ;;  %v11192_v43 = vadd.f32 %v10951_v26, %v889_v40  ;;  %v9800_v59 = vld [vmem:[#allocation2 + $0x64] sm:$0xf] }
 0x18a   :  { %v1100_v31 = vpack.c.bf16 %v945_v42, %v945_v42 }
 0x18b   :  { %14741 = vst [vmem:[#allocation28_spill] sm:$0xff] %v11192_v43  ;;  %v924_v44 = vrot.slane %v11192_v43, 7  ;;  %v1181_v47 = vpack.c.bf16 %v11192_v43, %v11192_v43  ;;  %v9814_v43 = vld [vmem:[#allocation2 + $0xd4] sm:$0xf] }
 0x18c   :  { %1132 = vst [vmem:[#allocation2 + $0x68] sm:$0xf] %v1100_v31  ;;  %v849_v54 = vpop.f32.mrf.mxu1 }
 0x18d   :  { %v928_v55 = vsel %vm926_vm3, %v923_v21, %v924_v44  ;;  %1213 = vst [vmem:[#allocation2 + $0xf4] sm:$0xf] %v1181_v47  ;;  %v11200_v57 = vadd.f32 %v10951_v26, %v849_v54  ;;  %v93_v47 = vadd.s32 128, %v10959_v36  ;;  %v14831_v36 = vmov 0.0|0.0  }
 0x18e   :  { %v1117_v58 = vpack.c.bf16 %v928_v55, %v928_v55 }
 0x18f   :  { %v908_v60 = vrot.slane %v11200_v57, 7  ;;  %v1165_v63 = vpack.c.bf16 %v11200_v57, %v11200_v57  ;;  %v11232_v54 = vand.u32 31, %v93_v47 }
 0x190   :  { %1149 = vst [vmem:[#allocation2 + $0xf0] sm:$0xf] %v1117_v58  ;;  %v891_v3 = vpop.f32.mrf.mxu2  ;;  %v8414_v6 = vld [vmem:[#allocation2 + $0x68] sm:$0xf0] }
 0x191   :  { %v944_v7 = vsel %vm926_vm3, %v907_v30, %v908_v60  ;;  %1197 = vst [vmem:[#allocation2 + $0x74] sm:$0xf] %v1165_v63  ;;  %v11211_v8 = vadd.f32 %v10951_v26, %v891_v3  ;;  %v8417_v11 = vor.u32 %v9800_v59, %v8414_v6  ;;  %vm975_vm11 = vcmp.ge.s32.totalorder %v11232_v54, 1 }
 0x192   :  { %v1101_v13 = vpack.c.bf16 %v944_v7, %v944_v7  ;;  %14745 = vst [vmem:[#allocation32_spill] sm:$0xff] %v11232_v54  ;;  %v9789_v7 = vld [vmem:[#allocation2 + $0x4] sm:$0xf0]  ;;  %v8830_v54 = vld [vmem:[#allocation6 + $0x1a8] sm:$0xf0] }
 0x193   :  { %14743 = vst [vmem:[#allocation30_spill] sm:$0xff] %v11211_v8  ;;  %v925_v19 = vrot.slane %v11211_v8, 7  ;;  %v1182_v21 = vpack.c.bf16 %v11211_v8, %v11211_v8  ;;  %1732 = vmatmul.bf16.gmra.mxu3 %v8417_v11  ;;  %1910 = vmatmul.bf16.gmra.mxu1 %v8417_v11 }
 0x194   :  { %1133 = vst [vmem:[#allocation2 + $0x70] sm:$0xf] %v1101_v13  ;;  %v851_v23 = vpop.f32.mrf.mxu1 }
 0x195   :  { %v927_v24 = vsel %vm926_vm3, %v924_v44, %v925_v19  ;;  %v958_v17 = vsel %vm926_vm3, %v925_v19, %v894_v38  ;;  %1214 = vst [vmem:[#allocation2 + $0xfc] sm:$0xf] %v1182_v21  ;;  %v11224_v29 = vadd.f32 %v10951_v26, %v851_v23 }
 0x196   :  { %v1055_v30 = vsel %vm959_vm10, %v958_v17, 0.0  ;;  %v1118_v35 = vpack.c.bf16 %v927_v24, %v927_v24 }
 0x197   :  { %14744 = vst [vmem:[#allocation31_spill] sm:$0xff] %v11224_v29  ;;  %v1087_v40 = vpack.c.bf16 %v1055_v30, %v1055_v30  ;;  %v909_v42 = vrot.slane %v11224_v29, 7  ;;  %v1166_v31 = vpack.c.bf16 %v11224_v29, %v11224_v29 }
 0x198   :  { %1150 = vst [vmem:[#allocation2 + $0xf8] sm:$0xf] %v1118_v35  ;;  %v9802_v3 = vld [vmem:[#allocation2 + $0x74] sm:$0xf] }
 0x199   :  { %1119 = vst [vmem:[#allocation2] sm:$0xf] %v1087_v40  ;;  %v943_v44 = vsel %vm926_vm3, %v908_v60, %v909_v42 }
 0x19a   :  { %v1102_v38 = vpack.c.bf16 %v943_v44, %v943_v44  ;;  %1198 = vst [vmem:[#allocation2 + $0x7c] sm:$0xf] %v1166_v31  ;;  %v9791_v44 = vld [vmem:[#allocation2 + $0x14] sm:$0xf0] }
 0x19c   :  { %1134 = vst [vmem:[#allocation2 + $0x78] sm:$0xf] %v1102_v38  ;;  %v854_v55 = vpop.f32.mrf.mxu1 }
 0x19d   :  { %v11235_v58 = vadd.f32 %v10951_v26, %v854_v55 }
 0x19f   :  { %14746 = vst [vmem:[#allocation33_spill] sm:$0xff] %v11235_v58  ;;  %v910_v59 = vrot.slane %v11235_v58, 7  ;;  %v1167_v63 = vpack.c.bf16 %v11235_v58, %v11235_v58  ;;  %v8814_v58 = vld [vmem:[#allocation6 + $0x188] sm:$0xf0] }
 0x1a0   :  { %v8364_v6 = vld [vmem:[#allocation2] sm:$0xf] }
 0x1a1   :  { %v942_v60 = vsel %vm926_vm3, %v909_v42, %v910_v59  ;;  %1199 = vst [vmem:[#allocation2 + $0x84] sm:$0xf] %v1167_v63  ;;  %v8365_v11 = vor.u32 %v9789_v7, %v8364_v6  ;;  %v8422_v13 = vld [vmem:[#allocation2 + $0x78] sm:$0xf0]  ;;  %v9793_v7 = vld [vmem:[#allocation2 + $0x24] sm:$0xf0] }
 0x1a2   :  { %v1071_v19 = vsel %vm975_vm11, %v942_v60, 0.0  ;;  %v8425_v21 = vor.u32 %v9802_v3, %v8422_v13  ;;  %v8438_v60 = vld [vmem:[#allocation2 + $0x98] sm:$0xf0]  ;;  %v9806_v13 = vld [vmem:[#allocation2 + $0x94] sm:$0xf] }
 0x1a3   :  { %v1103_v23 = vpack.c.bf16 %v1071_v19, %v1071_v19  ;;  %1613 = vmatmul.bf16.vlgmr.msrb.gmra.mxu2 %v8365_v11  ;;  %1791 = vmatmul.bf16.vlgmr.msrb.gmra.mxu0 %v8365_v11  ;;  %v8441_v19 = vor.u32 %v9806_v13, %v8438_v60 }
 0x1a4   :  { %1737 = vmatmul.bf16.gmra.mxu3 %v8425_v21  ;;  %1915 = vmatmul.bf16.gmra.mxu1 %v8425_v21  ;;  %v856_v24 = vpop.f32.mrf.mxu1 }
 0x1a5   :  { %1135 = vst [vmem:[#allocation2 + $0x80] sm:$0xf] %v1103_v23  ;;  %v11244_v17 = vadd.f32 %v10951_v26, %v856_v24  ;;  %v8372_v26 = vld [vmem:[#allocation2 + $0x10] sm:$0xf] }
 0x1a6   :  { %v8373_v63 = vor.u32 %v9791_v44, %v8372_v26  ;;  %v8388_v24 = vld [vmem:[#allocation2 + $0x30] sm:$0xf] }
 0x1a7   :  { %14747 = vst [vmem:[#allocation34_spill] sm:$0xff] %v11244_v17  ;;  %v911_v30 = vrot.slane %v11244_v17, 7  ;;  %v1168_v35 = vpack.c.bf16 %v11244_v17, %v11244_v17 }
 0x1a8   :  { %v9804_v38 = vld [vmem:[#allocation2 + $0x84] sm:$0xf] }
 0x1a9   :  { %v940_v40 = vsel %vm926_vm3, %v911_v30, %v912_v1  ;;  %v941_v42 = vsel %vm926_vm3, %v910_v59, %v911_v30  ;;  %1200 = vst [vmem:[#allocation2 + $0x8c] sm:$0xf] %v1168_v35  ;;  %v8380_v59 = vld [vmem:[#allocation2 + $0x20] sm:$0xf]  ;;  %v9795_v30 = vld [vmem:[#allocation2 + $0x34] sm:$0xf0] }
 0x1aa   :  { %v1104_v31 = vpack.c.bf16 %v941_v42, %v941_v42  ;;  %v1105_v47 = vpack.c.bf16 %v940_v40, %v940_v40  ;;  %v8381_v11 = vor.u32 %v9793_v7, %v8380_v59  ;;  %v8446_v40 = vld [vmem:[#allocation2 + $0xa8] sm:$0xf0]  ;;  %v9810_v7 = vld [vmem:[#allocation2 + $0xb4] sm:$0xf] }
 0x1ac   :  { %1136 = vst [vmem:[#allocation2 + $0x88] sm:$0xf] %v1104_v31  ;;  %v8389_v31 = vor.u32 %v9795_v30, %v8388_v24  ;;  %v8404_v30 = vld [vmem:[#allocation2 + $0x50] sm:$0xf] }
 0x1ad   :  { %1137 = vst [vmem:[#allocation2 + $0x90] sm:$0xf] %v1105_v47  ;;  %v9808_v47 = vld [vmem:[#allocation2 + $0xa4] sm:$0xf] }
 0x1ae   :  { %v8449_v26 = vor.u32 %v9808_v47, %v8446_v40  ;;  %v9799_v40 = vld [vmem:[#allocation2 + $0x54] sm:$0xf0] }
 0x1af   :  { %v8405_v47 = vor.u32 %v9799_v40, %v8404_v30 }
 0x1b0   :  { %v8430_v55 = vld [vmem:[#allocation2 + $0x88] sm:$0xf0]  ;;  %v11255_v6 = vpop.f32.mrf.mxu1 }
 0x1b1   :  { %v8433_v3 = vor.u32 %v9804_v38, %v8430_v55  ;;  %v8396_v55 = vld [vmem:[#allocation2 + $0x40] sm:$0xf] }
 0x1b3   :  { %1618 = vmatmul.bf16.gmra.mxu2 %v8373_v63  ;;  %1796 = vmatmul.bf16.gmra.mxu0 %v8373_v63  ;;  %v9797_v63 = vld [vmem:[#allocation2 + $0x44] sm:$0xf0] }
 0x1b4   :  { %1742 = vmatmul.bf16.gmra.mxu3 %v8433_v3  ;;  %1920 = vmatmul.bf16.gmra.mxu1 %v8433_v3  ;;  %v8454_v3 = vld [vmem:[#allocation2 + $0xb8] sm:$0xf0]  ;;  %v8397_v59 = vor.u32 %v9797_v63, %v8396_v55 }
 0x1b5   :  { %v8457_v60 = vor.u32 %v9810_v7, %v8454_v3  ;;  %v9801_v7 = vld [vmem:[#allocation2 + $0x64] sm:$0xf0] }
 0x1b6   :  { %v11257_v1 = vpop.f32.mrf.mxu3 }
 0x1b8   :  { %v11259_v21 = vpop.f32.mrf.mxu1 }
 0x1be   :  { %v11261_v23 = vpop.f32.mrf.mxu3 }
 0x1c0   :  { %v11263_v35 = vpop.f32.mrf.mxu1 }
 0x1c3   :  { %1623 = vmatmul.bf16.gmra.mxu2 %v8381_v11  ;;  %1801 = vmatmul.bf16.gmra.mxu0 %v8381_v11 }
 0x1c4   :  { %1747 = vmatmul.bf16.gmra.mxu3 %v8441_v19  ;;  %1925 = vmatmul.bf16.gmra.mxu1 %v8441_v19 }
 0x1c6   :  { %v11265_v42 = vpop.f32.mrf.mxu3 }
 0x1c8   :  { %v11267_v44 = vpop.f32.mrf.mxu1 }
 0x1ce   :  { %v11269_v38 = vpop.f32.mrf.mxu3 }
 0x1d0   :  { %v11271_v11 = vpop.f32.mrf.mxu1 }
 0x1d3   :  { %1628 = vmatmul.bf16.gmra.mxu2 %v8389_v31  ;;  %1806 = vmatmul.bf16.gmra.mxu0 %v8389_v31  ;;  %v8462_v31 = vld [vmem:[#allocation2 + $0xc8] sm:$0xf0] }
 0x1d4   :  { %1752 = vmatmul.bf16.gmra.mxu3 %v8449_v26  ;;  %1930 = vmatmul.bf16.gmra.mxu1 %v8449_v26  ;;  %v9812_v26 = vld [vmem:[#allocation2 + $0xc4] sm:$0xf] }
 0x1d5   :  { %v8465_v55 = vor.u32 %v9812_v26, %v8462_v31  ;;  %v9803_v26 = vld [vmem:[#allocation2 + $0x74] sm:$0xf0] }
 0x1d6   :  { %v11273_v13 = vpop.f32.mrf.mxu3 }
 0x1d8   :  { %v11275_v19 = vpop.f32.mrf.mxu1 }
 0x1de   :  { %v11277_v24 = vpop.f32.mrf.mxu3 }
 0x1e0   :  { %v11279_v63 = vpop.f32.mrf.mxu1 }
 0x1e3   :  { %1633 = vmatmul.bf16.gmra.mxu2 %v8397_v59  ;;  %1811 = vmatmul.bf16.gmra.mxu0 %v8397_v59  ;;  %v8412_v59 = vld [vmem:[#allocation2 + $0x60] sm:$0xf] }
 0x1e4   :  { %1757 = vmatmul.bf16.gmra.mxu3 %v8457_v60  ;;  %1935 = vmatmul.bf16.gmra.mxu1 %v8457_v60  ;;  %v8470_v60 = vld [vmem:[#allocation2 + $0xd8] sm:$0xf0]  ;;  %v8413_v8 = vor.u32 %v9801_v7, %v8412_v59 }
 0x1e5   :  { %v8473_v30 = vor.u32 %v9814_v43, %v8470_v60  ;;  %v8870_v59 = vld [vmem:[#allocation6 + $0x1f8] sm:$0xf0]  ;;  %v9913_v60 = vld [vmem:[#allocation6 + $0x1e4] sm:$0xf0] }
 0x1e6   :  { %v11281_v3 = vpop.f32.mrf.mxu3  ;;  %v8873_v41 = vor.u32 %v9914_v0, %v8870_v59  ;;  %v9911_v0 = vld [vmem:[#allocation6 + $0x1d4] sm:$0xf0]  ;;  %v9909_v59 = vld [vmem:[#allocation6 + $0x1c4] sm:$0xf0] }
 0x1e7   :  { %v8853_v34 = vor.u32 %v9911_v0, %v8852_v27  ;;  %v9906_v27 = vld [vmem:[#allocation6 + $0x1b4] sm:$0xf] }
 0x1e8   :  { %v11283_v2 = vpop.f32.mrf.mxu1  ;;  %3165 = vmatpush.bf16.msra.mxu1 %v8873_v41  ;;  %v8428_v41 = vld [vmem:[#allocation2 + $0x80] sm:$0xf] }
 0x1ee   :  { %v11285_v10 = vpop.f32.mrf.mxu3 }
 0x1f0   :  { %v11287_v40 = vpop.f32.mrf.mxu1 }
 0x1f3   :  { %1638 = vmatmul.bf16.gmra.mxu2 %v8405_v47  ;;  %1816 = vmatmul.bf16.gmra.mxu0 %v8405_v47  ;;  %v8420_v47 = vld [vmem:[#allocation2 + $0x70] sm:$0xf] }
 0x1f4   :  { %1762 = vmatmul.bf16.gmra.mxu3 %v8465_v55  ;;  %1940 = vmatmul.bf16.gmra.mxu1 %v8465_v55  ;;  %v8478_v55 = vld [vmem:[#allocation2 + $0xe8] sm:$0xf0]  ;;  %v8421_v7 = vor.u32 %v9803_v26, %v8420_v47  ;;  %v8854_v47 = vld [vmem:[#allocation6 + $0x1d8] sm:$0xf0] }
 0x1f5   :  { %v8481_v43 = vor.u32 %v9816_v4, %v8478_v55  ;;  %v9910_v4 = vld [vmem:[#allocation6 + $0x1d4] sm:$0xf]  ;;  %v8844_v55 = vld [vmem:[#allocation6 + $0x1c0] sm:$0xf] }
 0x1f6   :  { %v11289_v31 = vpop.f32.mrf.mxu3  ;;  %v8857_v26 = vor.u32 %v9910_v4, %v8854_v47  ;;  %v8837_v4 = vor.u32 %v9907_v18, %v8836_v14  ;;  %v1279_v47 = vld [vmem:[#allocation8] sm:$0x3]  ;;  %v8833_v14 = vor.u32 %v9904_v46, %v8830_v54 }
 0x1f7   :  { %v8812_v54 = vld [vmem:[#allocation6 + $0x180] sm:$0xf] }
 0x1f8   :  { %v11291_v62 = vpop.f32.mrf.mxu1 }
 0x1fe   :  { %v11293_v15 = vpop.f32.mrf.mxu3 }
 0x203   :  { %1643 = vmatmul.bf16.gmra.mxu2 %v8413_v8  ;;  %1821 = vmatmul.bf16.gmra.mxu0 %v8413_v8  ;;  %v8860_v8 = vld [vmem:[#allocation6 + $0x1e0] sm:$0xf] }
 0x204   :  { %1767 = vmatmul.bf16.gmra.mxu3 %v8473_v30  ;;  %1945 = vmatmul.bf16.gmra.mxu1 %v8473_v30  ;;  %v9912_v30 = vld [vmem:[#allocation6 + $0x1e4] sm:$0xf]  ;;  %v8861_v45 = vor.u32 %v9913_v60, %v8860_v8  ;;  %v8846_v8 = vld [vmem:[#allocation6 + $0x1c8] sm:$0xf0] }
 0x205   :  { %v8865_v53 = vor.u32 %v9912_v30, %v8862_v16  ;;  %v9805_v16 = vld [vmem:[#allocation2 + $0x84] sm:$0xf0]  ;;  %v8486_v30 = vld [vmem:[#allocation2 + $0xf8] sm:$0xf0] }
 0x206   :  { %2988 = vmatpush.bf16.msra.mxu3 %v8861_v45  ;;  %v11295_v45 = vpop.f32.mrf.mxu1  ;;  %v11297_v0 = vpop.f32.mrf.mxu3  ;;  %v8429_v61 = vor.u32 %v9805_v16, %v8428_v41  ;;  %v8820_v41 = vld [vmem:[#allocation6 + $0x190] sm:$0xf]  ;;  %v9903_v16 = vld [vmem:[#allocation6 + $0x194] sm:$0xf0] }
 0x207   :  { %3166 = vmatpush.bf16.msra.mxu1 %v8865_v53 }
 0x20a   :  { %2989 = vmatpush.bf16.msra.mxu3 %v8853_v34  ;;  %v8838_v34 = vld [vmem:[#allocation6 + $0x1b8] sm:$0xf0] }
 0x20b   :  { %3167 = vmatpush.bf16.msra.mxu1 %v8857_v26  ;;  %v8841_v26 = vor.u32 %v9906_v27, %v8838_v34  ;;  %v8822_v34 = vld [vmem:[#allocation6 + $0x198] sm:$0xf0] }
 0x213   :  { %1648 = vmatmul.bf16.gmra.mxu2 %v8421_v7  ;;  %1826 = vmatmul.bf16.gmra.mxu0 %v8421_v7  ;;  %v9908_v7 = vld [vmem:[#allocation6 + $0x1c4] sm:$0xf] }
 0x214   :  { %1772 = vmatmul.bf16.gmra.mxu3 %v8481_v43  ;;  %1950 = vmatmul.bf16.gmra.mxu1 %v8481_v43  ;;  %v8845_v43 = vor.u32 %v9909_v59, %v8844_v55  ;;  %v8849_v60 = vor.u32 %v9908_v7, %v8846_v8  ;;  %v9818_v55 = vld [vmem:[#allocation2 + $0xf4] sm:$0xf]  ;;  %v11299_v7 = vperm.slane %v1279_v47, 0  ;;  %v9905_v8 = vld [vmem:[#allocation6 + $0x1a4] sm:$0xf0] }
 0x215   :  { %v8489_v59 = vor.u32 %v9818_v55, %v8486_v30  ;;  %v9902_v30 = vld [vmem:[#allocation6 + $0x194] sm:$0xf] }
 0x216   :  { %2990 = vmatpush.bf16.msra.mxu3 %v8845_v43  ;;  %3168 = vmatpush.bf16.msra.mxu1 %v8849_v60  ;;  %v8828_v43 = vld [vmem:[#allocation6 + $0x1a0] sm:$0xf] }
 0x217   :  { %v8829_v17 = vor.u32 %v9905_v8, %v8828_v43  ;;  %v11305_v43 = vpop.f32.mrf.mxu3 }
 0x21a   :  { %2991 = vmatpush.bf16.msra.mxu3 %v8837_v4  ;;  %3169 = vmatpush.bf16.msra.mxu1 %v8841_v26  ;;  %v8821_v4 = vor.u32 %v9903_v16, %v8820_v41  ;;  %v11307_v26 = vperm.slane %v1279_v47, 1  ;;  %v9807_v47 = vld [vmem:[#allocation2 + $0x94] sm:$0xf0] }
 0x21e   :  { %2992 = vmatpush.bf16.msra.mxu3 %v8829_v17  ;;  %3170 = vmatpush.bf16.msra.mxu1 %v8833_v14  ;;  %v9901_v17 = vld [vmem:[#allocation6 + $0x184] sm:$0xf0] }
 0x21f   :  { %v8813_v8 = vor.u32 %v9901_v17, %v8812_v54 }
 0x220   :  { %v1792_v53 = vpop.f32.mrf.mxu0 }
 0x221   :  { %v1793_v16 = vadd.f32 %v1792_v53, %v11307_v26 }
 0x222   :  { %2993 = vmatpush.bf16.msra.mxu3 %v8821_v4 }
 0x223   :  { %1653 = vmatmul.bf16.gmra.mxu2 %v8429_v61  ;;  %1831 = vmatmul.bf16.gmra.mxu0 %v8429_v61  ;;  %v11302_v61 = vpop.f32.mrf.mxu1 }
 0x224   :  { %1777 = vmatmul.bf16.gmra.mxu3 %v8489_v59  ;;  %1955 = vmatmul.bf16.gmra.mxu1 %v8489_v59  ;;  %v8825_v59 = vor.u32 %v9902_v30, %v8822_v34  ;;  %v1882_v34 = vadd.f32 %v11255_v6, %v1793_v16  ;;  %v8804_v16 = vld [vmem:[#allocation6 + $0x170] sm:$0xf] }
 0x226   :  { %v1614_v18 = vpop.f32.mrf.mxu2  ;;  %3171 = vmatpush.bf16.msra.mxu1 %v8825_v59  ;;  %2994 = vmatpush.bf16.msra.mxu3 %v8813_v8 }
 0x227   :  { %v1615_v60 = vadd.f32 %v1614_v18, %v11299_v7  ;;  %v9900_v18 = vld [vmem:[#allocation6 + $0x184] sm:$0xf] }
 0x228   :  { %v1794_v27 = vpop.f32.mrf.mxu0  ;;  %v8817_v41 = vor.u32 %v9900_v18, %v8814_v58  ;;  %v11315_v58 = vpop.f32.mrf.mxu3 }
 0x229   :  { %v1704_v55 = vadd.f32 %v11257_v1, %v1615_v60  ;;  %v8436_v1 = vld [vmem:[#allocation2 + $0x90] sm:$0xf]  ;;  %v1795_v17 = vadd.f32 %v1794_v27, %v11307_v26 }
 0x22a   :  { %v8437_v4 = vor.u32 %v9807_v47, %v8436_v1  ;;  %3172 = vmatpush.bf16.msra.mxu1 %v8817_v41  ;;  %v9899_v1 = vld [vmem:[#allocation6 + $0x174] sm:$0xf0] }
 0x22b   :  { %v1961_v46 = vmul.f32 0.5, %v1704_v55  ;;  %v11313_v54 = vpop.f32.mrf.mxu1  ;;  %v1884_v47 = vadd.f32 %v11259_v21, %v1795_v17 }
 0x22d   :  { %10162 = vtanh.f32 %v1961_v46 }
 0x22e   :  { %v1616_v29 = vpop.f32.mrf.mxu2 }
 0x22f   :  { %v1617_v14 = vadd.f32 %v1616_v29, %v11299_v7  ;;  %v2089_v29 = vsub.f32 %v1882_v34, %v10954_v32 }
 0x230   :  { %v1797_v60 = vpop.f32.mrf.mxu0 }
 0x231   :  { %v1706_v30 = vadd.f32 %v11261_v23, %v1617_v14 }
 0x233   :  { %v10163_v55 = vpop.eup %10162  ;;  %v1962_v59 = vmul.f32 0.5, %v1706_v30  ;;  %1658 = vmatmul.bf16.gmra.mxu2 %v8437_v4  ;;  %1836 = vmatmul.bf16.gmra.mxu0 %v8437_v4  ;;  %v8805_v30 = vor.u32 %v9899_v1, %v8804_v16 }
 0x234   :  { %v2025_v53 = vmul.f32 0.5, %v10163_v55 }
 0x235   :  { %10164 = vtanh.f32 %v1962_v59  ;;  %2898 = vmatpush.bf16.msra.mxu2 %v8805_v30  ;;  %v11327_v59 = vpop.f32.mrf.mxu1 }
 0x236   :  { %v2057_v46 = vadd.f32 0.5, %v2025_v53  ;;  %v1619_v23 = vpop.f32.mrf.mxu2  ;;  %v11329_v53 = vpop.f32.mrf.mxu3 }
 0x237   :  { %v1620_v8 = vadd.f32 %v1619_v23, %v11299_v7 }
 0x238   :  { %v2121_v18 = vmul.f32 %v2089_v29, %v2057_v46  ;;  %v1799_v6 = vpop.f32.mrf.mxu0  ;;  %v1798_v29 = vadd.f32 %v1797_v60, %v11307_v26  ;;  %v9809_v46 = vld [vmem:[#allocation2 + $0xa4] sm:$0xf0] }
 0x239   :  { %v1709_v41 = vadd.f32 %v11265_v42, %v1620_v8  ;;  %v2090_v42 = vsub.f32 %v1884_v47, %v10963_v39 }
 0x23a   :  { %v11322_v14 = vadd.f32 %v2121_v18, %v10954_v32  ;;  %v8444_v18 = vld [vmem:[#allocation2 + $0xa0] sm:$0xf]  ;;  %v1887_v30 = vadd.f32 %v11263_v35, %v1798_v29 }
 0x23b   :  { %v10165_v4 = vpop.eup %10164  ;;  %v1963_v34 = vmul.f32 0.5, %v1709_v41  ;;  %v8445_v16 = vor.u32 %v9809_v46, %v8444_v18 }
 0x23c   :  { %v2442_v27 = vpack.c.bf16 %v11322_v14, %v11322_v14  ;;  %v2026_v55 = vmul.f32 0.5, %v10165_v4  ;;  %v14581_v60 = vrot.slane %v11322_v14, 6  ;;  %v2091_v35 = vsub.f32 %v1887_v30, %v10979_v51 }
 0x23d   :  { %10166 = vtanh.f32 %v1963_v34  ;;  %v11350_v29 = vpop.f32.mrf.mxu1 }
 0x23e   :  { %2474 = vst [vmem:[#allocation2 + $0x4] sm:$0xf] %v2442_v27  ;;  %v2058_v32 = vadd.f32 0.5, %v2026_v55  ;;  %v1621_v21 = vpop.f32.mrf.mxu2  ;;  %v1800_v55 = vadd.f32 %v1799_v6, %v11307_v26 }
 0x23f   :  { %v1622_v17 = vadd.f32 %v1621_v21, %v11299_v7 }
 0x240   :  { %v2122_v23 = vmul.f32 %v2090_v42, %v2058_v32  ;;  %v1802_v8 = vpop.f32.mrf.mxu0  ;;  %v1889_v18 = vadd.f32 %v11267_v44, %v1800_v55 }
 0x241   :  { %v1711_v41 = vadd.f32 %v11269_v38, %v1622_v17  ;;  %v11353_v17 = vpop.f32.mrf.mxu3 }
 0x242   :  { %v11336_v1 = vadd.f32 %v2122_v23, %v10963_v39 }
 0x243   :  { %v10167_v4 = vpop.eup %10166  ;;  %v1964_v47 = vmul.f32 0.5, %v1711_v41  ;;  %1663 = vmatmul.bf16.gmra.mxu2 %v8445_v16  ;;  %1841 = vmatmul.bf16.gmra.mxu0 %v8445_v16  ;;  %v9898_v16 = vld [vmem:[#allocation6 + $0x174] sm:$0xf] }
 0x244   :  { %v2186_v34 = vrot.slane %v11336_v1, 6  ;;  %v2443_v27 = vpack.c.bf16 %v11336_v1, %v11336_v1  ;;  %v2027_v38 = vmul.f32 0.5, %v10167_v4  ;;  %v8806_v4 = vld [vmem:[#allocation6 + $0x178] sm:$0xf0] }
 0x245   :  { %10168 = vtanh.f32 %v1964_v47  ;;  %v8809_v47 = vor.u32 %v9898_v16, %v8806_v4  ;;  %v9852_v44 = vld [vmem:[#allocation2 + $0x4] sm:$0xf] }
 0x246   :  { %v2248_v39 = vsel %vm2217_vm12, %v14581_v60, %v2186_v34  ;;  %2475 = vst [vmem:[#allocation2 + $0xc] sm:$0xf] %v2443_v27  ;;  %v2059_v42 = vadd.f32 0.5, %v2027_v38  ;;  %v1624_v32 = vpop.f32.mrf.mxu2 }
 0x247   :  { %v2379_v21 = vpack.c.bf16 %v2248_v39, %v2248_v39  ;;  %v1625_v46 = vadd.f32 %v1624_v32, %v11299_v7  ;;  %3076 = vmatpush.bf16.msra.mxu0 %v8809_v47 }
 0x248   :  { %v2123_v23 = vmul.f32 %v2091_v35, %v2059_v42  ;;  %v1804_v6 = vpop.f32.mrf.mxu0  ;;  %v2092_v42 = vsub.f32 %v1889_v18, %v10999_v9  ;;  %v8452_v18 = vld [vmem:[#allocation2 + $0xb0] sm:$0xf] }
 0x249   :  { %2411 = vst [vmem:[#allocation2 + $0x8] sm:$0xf] %v2379_v21  ;;  %v1714_v41 = vadd.f32 %v11273_v13, %v1625_v46  ;;  %v1803_v21 = vadd.f32 %v1802_v8, %v11307_v26 }
 0x24a   :  { %v11358_v30 = vadd.f32 %v2123_v23, %v10979_v51 }
 0x24b   :  { %v10169_v27 = vpop.eup %10168  ;;  %v1965_v38 = vmul.f32 0.5, %v1714_v41  ;;  %v9811_v41 = vld [vmem:[#allocation2 + $0xb4] sm:$0xf0] }
 0x24c   :  { %v2187_v39 = vrot.slane %v11358_v30, 6  ;;  %v2444_v32 = vpack.c.bf16 %v11358_v30, %v11358_v30  ;;  %v2028_v35 = vmul.f32 0.5, %v10169_v27 }
 0x24d   :  { %10170 = vtanh.f32 %v1965_v38  ;;  %v8622_v13 = vld [vmem:[#allocation2 + $0x8] sm:$0xf0]  ;;  %v11368_v38 = vpop.f32.mrf.mxu1 }
 0x24e   :  { %v2247_v55 = vsel %vm2217_vm12, %v2186_v34, %v2187_v39  ;;  %2476 = vst [vmem:[#allocation2 + $0x14] sm:$0xf] %v2444_v32  ;;  %v2060_v51 = vadd.f32 0.5, %v2028_v35  ;;  %v1626_v46 = vpop.f32.mrf.mxu2  ;;  %v8625_v23 = vor.u32 %v9852_v44, %v8622_v13  ;;  %v8453_v32 = vor.u32 %v9811_v41, %v8452_v18  ;;  %v11371_v35 = vpop.f32.mrf.mxu3 }
 0x24f   :  { %v2380_v16 = vpack.c.bf16 %v2247_v55, %v2247_v55  ;;  %v1627_v4 = vadd.f32 %v1626_v46, %v11299_v7  ;;  %v1892_v44 = vadd.f32 %v11271_v11, %v1803_v21 }
 0x250   :  { %v2124_v27 = vmul.f32 %v2092_v42, %v2060_v51  ;;  %v1807_v47 = vpop.f32.mrf.mxu0  ;;  %2995 = vmatmul.bf16.vlgmr.msra.gmra.mxu3 %v8625_v23  ;;  %3173 = vmatmul.bf16.vlgmr.msra.gmra.mxu1 %v8625_v23 }
 0x251   :  { %2412 = vst [vmem:[#allocation2 + $0x10] sm:$0xf] %v2380_v16  ;;  %v1716_v34 = vadd.f32 %v11277_v24, %v1627_v4  ;;  %v1805_v24 = vadd.f32 %v1804_v6, %v11307_v26  ;;  %v8796_v6 = vld [vmem:[#allocation6 + $0x160] sm:$0xf] }
 0x252   :  { %v11374_v8 = vadd.f32 %v2124_v27, %v10999_v9  ;;  %v2093_v9 = vsub.f32 %v1892_v44, %v11021_v25 }
 0x253   :  { %v10171_v13 = vpop.eup %10170  ;;  %v1966_v55 = vmul.f32 0.5, %v1716_v34  ;;  %1668 = vmatmul.bf16.gmra.mxu2 %v8453_v32  ;;  %1846 = vmatmul.bf16.gmra.mxu0 %v8453_v32  ;;  %v1894_v18 = vadd.f32 %v11275_v19, %v1805_v24  ;;  %v9897_v32 = vld [vmem:[#allocation6 + $0x164] sm:$0xf0] }
 0x254   :  { %v2188_v42 = vrot.slane %v11374_v8, 6  ;;  %v2445_v51 = vpack.c.bf16 %v11374_v8, %v11374_v8  ;;  %v2029_v46 = vmul.f32 0.5, %v10171_v13 }
 0x255   :  { %10172 = vtanh.f32 %v1966_v55  ;;  %v11390_v44 = vpop.f32.mrf.mxu1  ;;  %v2094_v24 = vsub.f32 %v1894_v18, %v11038_v50 }
 0x256   :  { %v2246_v23 = vsel %vm2217_vm12, %v2187_v39, %v2188_v42  ;;  %2477 = vst [vmem:[#allocation2 + $0x1c] sm:$0xf] %v2445_v51  ;;  %v2061_v11 = vadd.f32 0.5, %v2029_v46  ;;  %v1629_v21 = vpop.f32.mrf.mxu2  ;;  %v8797_v39 = vor.u32 %v9897_v32, %v8796_v6  ;;  %v11393_v46 = vpop.f32.mrf.mxu3 }
 0x257   :  { %v2381_v41 = vpack.c.bf16 %v2246_v23, %v2246_v23  ;;  %v1630_v16 = vadd.f32 %v1629_v21, %v11299_v7 }
 0x258   :  { %v2125_v4 = vmul.f32 %v2093_v9, %v2061_v11  ;;  %v1809_v27 = vpop.f32.mrf.mxu0  ;;  %2899 = vmatpush.bf16.msra.mxu2 %v8797_v39 }
 0x259   :  { %2413 = vst [vmem:[#allocation2 + $0x18] sm:$0xf] %v2381_v41  ;;  %v1719_v34 = vadd.f32 %v11281_v3, %v1630_v16  ;;  %v1808_v41 = vadd.f32 %v1807_v47, %v11307_v26 }
 0x25a   :  { %v11388_v13 = vadd.f32 %v2125_v4, %v11021_v25  ;;  %v9854_v25 = vld [vmem:[#allocation2 + $0x14] sm:$0xf] }
 0x25b   :  { %v10173_v55 = vpop.eup %10172  ;;  %v1967_v51 = vmul.f32 0.5, %v1719_v34  ;;  %v9813_v34 = vld [vmem:[#allocation2 + $0xc4] sm:$0xf0] }
 0x25c   :  { %v2189_v23 = vrot.slane %v11388_v13, 6  ;;  %v2446_v19 = vpack.c.bf16 %v11388_v13, %v11388_v13  ;;  %v2030_v3 = vmul.f32 0.5, %v10173_v55 }
 0x25d   :  { %10174 = vtanh.f32 %v1967_v51  ;;  %v8630_v9 = vld [vmem:[#allocation2 + $0x18] sm:$0xf0]  ;;  %v8460_v51 = vld [vmem:[#allocation2 + $0xc0] sm:$0xf] }
 0x25e   :  { %v2245_v11 = vsel %vm2217_vm12, %v2188_v42, %v2189_v23  ;;  %2478 = vst [vmem:[#allocation2 + $0x24] sm:$0xf] %v2446_v19  ;;  %v2062_v21 = vadd.f32 0.5, %v2030_v3  ;;  %v1631_v16 = vpop.f32.mrf.mxu2  ;;  %v8633_v4 = vor.u32 %v9854_v25, %v8630_v9  ;;  %v8461_v19 = vor.u32 %v9813_v34, %v8460_v51 }
 0x25f   :  { %v2350_v6 = vsel %vm2254_vm13, %v2245_v11, 0.0  ;;  %v1632_v32 = vadd.f32 %v1631_v16, %v11299_v7  ;;  %v1897_v3 = vadd.f32 %v11279_v63, %v1808_v41  ;;  %v11413_v16 = vpop.f32.mrf.mxu1 }
 0x260   :  { %v2382_v39 = vpack.c.bf16 %v2350_v6, %v2350_v6  ;;  %v2126_v18 = vmul.f32 %v2094_v24, %v2062_v21  ;;  %v1812_v55 = vpop.f32.mrf.mxu0  ;;  %3000 = vmatmul.bf16.gmra.mxu3 %v8633_v4  ;;  %3178 = vmatmul.bf16.gmra.mxu1 %v8633_v4  ;;  %v11416_v4 = vpop.f32.mrf.mxu3 }
 0x261   :  { %v1721_v42 = vadd.f32 %v11285_v10, %v1632_v32  ;;  %v1810_v10 = vadd.f32 %v1809_v27, %v11307_v26  ;;  %v2095_v63 = vsub.f32 %v1897_v3, %v11054_v5 }
 0x262   :  { %2414 = vst [vmem:[#allocation2 + $0x20] sm:$0xf] %v2382_v39  ;;  %v11407_v47 = vadd.f32 %v2126_v18, %v11038_v50 }
 0x263   :  { %v10175_v25 = vpop.eup %10174  ;;  %v1968_v9 = vmul.f32 0.5, %v1721_v42  ;;  %1673 = vmatmul.bf16.gmra.mxu2 %v8461_v19  ;;  %1851 = vmatmul.bf16.gmra.mxu0 %v8461_v19  ;;  %v1899_v51 = vadd.f32 %v11283_v2, %v1810_v10  ;;  %v9896_v42 = vld [vmem:[#allocation6 + $0x164] sm:$0xf]  ;;  %v8798_v19 = vld [vmem:[#allocation6 + $0x168] sm:$0xf0] }
 0x264   :  { %v2190_v11 = vrot.slane %v11407_v47, 6  ;;  %v2447_v24 = vpack.c.bf16 %v11407_v47, %v11407_v47  ;;  %v2031_v21 = vmul.f32 0.5, %v10175_v25 }
 0x265   :  { %10176 = vtanh.f32 %v1968_v9  ;;  %v9856_v2 = vld [vmem:[#allocation2 + $0x24] sm:$0xf] }
 0x266   :  { %v2244_v50 = vsel %vm2217_vm12, %v2189_v23, %v2190_v11  ;;  %2479 = vst [vmem:[#allocation2 + $0x2c] sm:$0xf] %v2447_v24  ;;  %v2063_v41 = vadd.f32 0.5, %v2031_v21  ;;  %v1634_v34 = vpop.f32.mrf.mxu2  ;;  %v8801_v23 = vor.u32 %v9896_v42, %v8798_v19 }
 0x267   :  { %v2383_v6 = vpack.c.bf16 %v2244_v50, %v2244_v50  ;;  %v1635_v32 = vadd.f32 %v1634_v34, %v11299_v7 }
 0x268   :  { %v2127_v39 = vmul.f32 %v2095_v63, %v2063_v41  ;;  %v1814_v18 = vpop.f32.mrf.mxu0  ;;  %3077 = vmatpush.bf16.msra.mxu0 %v8801_v23  ;;  %v2096_v63 = vsub.f32 %v1899_v51, %v11071_v33  ;;  %v1813_v41 = vadd.f32 %v1812_v55, %v11307_v26  ;;  %v11437_v19 = vpop.f32.mrf.mxu3 }
 0x269   :  { %2415 = vst [vmem:[#allocation2 + $0x28] sm:$0xf] %v2383_v6  ;;  %v1724_v27 = vadd.f32 %v11289_v31, %v1635_v32  ;;  %v9815_v32 = vld [vmem:[#allocation2 + $0xd4] sm:$0xf0] }
 0x26a   :  { %v11425_v25 = vadd.f32 %v2127_v39, %v11054_v5  ;;  %v11434_v39 = vpop.f32.mrf.mxu1 }
 0x26b   :  { %v10177_v9 = vpop.eup %10176  ;;  %v1969_v3 = vmul.f32 0.5, %v1724_v27 }
 0x26c   :  { %v2191_v24 = vrot.slane %v11425_v25, 6  ;;  %v2448_v21 = vpack.c.bf16 %v11425_v25, %v11425_v25  ;;  %v2032_v50 = vmul.f32 0.5, %v10177_v9  ;;  %v8468_v9 = vld [vmem:[#allocation2 + $0xd0] sm:$0xf] }
 0x26d   :  { %10178 = vtanh.f32 %v1969_v3  ;;  %v8638_v31 = vld [vmem:[#allocation2 + $0x28] sm:$0xf0]  ;;  %v8469_v3 = vor.u32 %v9815_v32, %v8468_v9  ;;  %v8788_v9 = vld [vmem:[#allocation6 + $0x150] sm:$0xf] }
 0x26e   :  { %v2243_v10 = vsel %vm2217_vm12, %v2190_v11, %v2191_v24  ;;  %2480 = vst [vmem:[#allocation2 + $0x34] sm:$0xf] %v2448_v21  ;;  %v2064_v5 = vadd.f32 0.5, %v2032_v50  ;;  %v1636_v34 = vpop.f32.mrf.mxu2  ;;  %v8641_v6 = vor.u32 %v9856_v2, %v8638_v31  ;;  %v1902_v21 = vadd.f32 %v11287_v40, %v1813_v41 }
 0x26f   :  { %v2384_v27 = vpack.c.bf16 %v2243_v10, %v2243_v10  ;;  %v1637_v42 = vadd.f32 %v1636_v34, %v11299_v7 }
 0x270   :  { %v2128_v51 = vmul.f32 %v2096_v63, %v2064_v5  ;;  %v1817_v23 = vpop.f32.mrf.mxu0  ;;  %3005 = vmatmul.bf16.gmra.mxu3 %v8641_v6  ;;  %3183 = vmatmul.bf16.gmra.mxu1 %v8641_v6  ;;  %v1815_v5 = vadd.f32 %v1814_v18, %v11307_v26 }
 0x271   :  { %2416 = vst [vmem:[#allocation2 + $0x30] sm:$0xf] %v2384_v27  ;;  %v1726_v11 = vadd.f32 %v11293_v15, %v1637_v42 }
 0x272   :  { %v11441_v55 = vadd.f32 %v2128_v51, %v11071_v33  ;;  %v2097_v33 = vsub.f32 %v1902_v21, %v11093_v56  ;;  %v11452_v42 = vpop.f32.mrf.mxu1  ;;  %v1904_v51 = vadd.f32 %v11291_v62, %v1815_v5 }
 0x273   :  { %v10179_v50 = vpop.eup %10178  ;;  %v1970_v2 = vmul.f32 0.5, %v1726_v11  ;;  %1678 = vmatmul.bf16.gmra.mxu2 %v8469_v3  ;;  %1856 = vmatmul.bf16.gmra.mxu0 %v8469_v3  ;;  %v9895_v11 = vld [vmem:[#allocation6 + $0x154] sm:$0xf0] }
 0x274   :  { %v2192_v31 = vrot.slane %v11441_v55, 6  ;;  %v2449_v63 = vpack.c.bf16 %v11441_v55, %v11441_v55  ;;  %v2033_v10 = vmul.f32 0.5, %v10179_v50  ;;  %v8789_v21 = vor.u32 %v9895_v11, %v8788_v9 }
 0x275   :  { %10180 = vtanh.f32 %v1970_v2  ;;  %v9858_v5 = vld [vmem:[#allocation2 + $0x34] sm:$0xf] }
 0x276   :  { %v2242_v15 = vsel %vm2217_vm12, %v2191_v24, %v2192_v31  ;;  %2481 = vst [vmem:[#allocation2 + $0x3c] sm:$0xf] %v2449_v63  ;;  %v2065_v40 = vadd.f32 0.5, %v2033_v10  ;;  %v1639_v41 = vpop.f32.mrf.mxu2  ;;  %v11456_v24 = vpop.f32.mrf.mxu3  ;;  %2900 = vmatpush.bf16.msra.mxu2 %v8789_v21  ;;  %v8476_v21 = vld [vmem:[#allocation2 + $0xe0] sm:$0xf] }
 0x277   :  { %v2385_v34 = vpack.c.bf16 %v2242_v15, %v2242_v15  ;;  %v1640_v6 = vadd.f32 %v1639_v41, %v11299_v7 }
 0x278   :  { %v2129_v32 = vmul.f32 %v2097_v33, %v2065_v40  ;;  %v1819_v27 = vpop.f32.mrf.mxu0  ;;  %v1818_v40 = vadd.f32 %v1817_v23, %v11307_v26 }
 0x279   :  { %2417 = vst [vmem:[#allocation2 + $0x38] sm:$0xf] %v2385_v34  ;;  %v1729_v18 = vadd.f32 %v11297_v0, %v1640_v6  ;;  %v2098_v0 = vsub.f32 %v1904_v51, %v11110_v20  ;;  %v9817_v6 = vld [vmem:[#allocation2 + $0xe4] sm:$0xf0] }
 0x27a   :  { %v11459_v3 = vadd.f32 %v2129_v32, %v11093_v56 }
 0x27b   :  { %v10181_v50 = vpop.eup %10180  ;;  %v1971_v2 = vmul.f32 0.5, %v1729_v18 }
 0x27c   :  { %v2193_v63 = vrot.slane %v11459_v3, 6  ;;  %v2450_v10 = vpack.c.bf16 %v11459_v3, %v11459_v3  ;;  %v2034_v62 = vmul.f32 0.5, %v10181_v50  ;;  %v8477_v50 = vor.u32 %v9817_v6, %v8476_v21  ;;  %v8790_v21 = vld [vmem:[#allocation6 + $0x158] sm:$0xf0] }
 0x27d   :  { %10182 = vtanh.f32 %v1971_v2  ;;  %v8646_v15 = vld [vmem:[#allocation2 + $0x38] sm:$0xf0]  ;;  %v1907_v2 = vadd.f32 %v11295_v45, %v1818_v40 }
 0x27e   :  { %v2241_v56 = vsel %vm2217_vm12, %v2192_v31, %v2193_v63  ;;  %2482 = vst [vmem:[#allocation2 + $0x44] sm:$0xf] %v2450_v10  ;;  %v2066_v33 = vadd.f32 0.5, %v2034_v62  ;;  %v1641_v41 = vpop.f32.mrf.mxu2  ;;  %v8649_v34 = vor.u32 %v9858_v5, %v8646_v15  ;;  %v11477_v62 = vpop.f32.mrf.mxu1 }
 0x27f   :  { %v2354_v32 = vsel %vm2258_vm14, %v2241_v56, 0.0  ;;  %v1642_v18 = vadd.f32 %v1641_v41, %v11299_v7  ;;  %v2099_v45 = vsub.f32 %v1907_v2, %v11126_v48 }
 0x280   :  { %v2386_v9 = vpack.c.bf16 %v2354_v32, %v2354_v32  ;;  %v2130_v51 = vmul.f32 %v2098_v0, %v2066_v33  ;;  %v1822_v11 = vpop.f32.mrf.mxu0  ;;  %3010 = vmatmul.bf16.gmra.mxu3 %v8649_v34  ;;  %3188 = vmatmul.bf16.gmra.mxu1 %v8649_v34  ;;  %v11479_v0 = vpop.f32.mrf.mxu3  ;;  %v1820_v33 = vadd.f32 %v1819_v27, %v11307_v26  ;;  %v9894_v27 = vld [vmem:[#allocation6 + $0x154] sm:$0xf] }
 0x281   :  { %v1731_v31 = vadd.f32 %v11305_v43, %v1642_v18 }
 0x282   :  { %2418 = vst [vmem:[#allocation2 + $0x40] sm:$0xf] %v2386_v9  ;;  %v11474_v23 = vadd.f32 %v2130_v51, %v11110_v20  ;;  %v1909_v9 = vadd.f32 %v11302_v61, %v1820_v33 }
 0x283   :  { %v10183_v10 = vpop.eup %10182  ;;  %v1972_v5 = vmul.f32 0.5, %v1731_v31  ;;  %1683 = vmatmul.bf16.gmra.mxu2 %v8477_v50  ;;  %1861 = vmatmul.bf16.gmra.mxu0 %v8477_v50 }
 0x284   :  { %v2194_v15 = vrot.slane %v11474_v23, 6  ;;  %v2451_v43 = vpack.c.bf16 %v11474_v23, %v11474_v23  ;;  %v2035_v56 = vmul.f32 0.5, %v10183_v10  ;;  %v2100_v61 = vsub.f32 %v1909_v9, %v11143_v12 }
 0x285   :  { %10184 = vtanh.f32 %v1972_v5 }
 0x286   :  { %v2240_v20 = vsel %vm2217_vm12, %v2193_v63, %v2194_v15  ;;  %2483 = vst [vmem:[#allocation2 + $0x4c] sm:$0xf] %v2451_v43  ;;  %v2067_v40 = vadd.f32 0.5, %v2035_v56  ;;  %v1644_v41 = vpop.f32.mrf.mxu2  ;;  %v8793_v63 = vor.u32 %v9894_v27, %v8790_v21  ;;  %v11497_v56 = vpop.f32.mrf.mxu1  ;;  %v8484_v21 = vld [vmem:[#allocation2 + $0xf0] sm:$0xf] }
 0x287   :  { %v2387_v34 = vpack.c.bf16 %v2240_v20, %v2240_v20  ;;  %v1645_v6 = vadd.f32 %v1644_v41, %v11299_v7 }
 0x288   :  { %v2131_v32 = vmul.f32 %v2099_v45, %v2067_v40  ;;  %v1824_v18 = vpop.f32.mrf.mxu0  ;;  %3078 = vmatpush.bf16.msra.mxu0 %v8793_v63  ;;  %v11500_v20 = vpop.f32.mrf.mxu3  ;;  %v1823_v40 = vadd.f32 %v1822_v11, %v11307_v26 }
 0x289   :  { %2419 = vst [vmem:[#allocation2 + $0x48] sm:$0xf] %v2387_v34  ;;  %v1734_v51 = vadd.f32 %v11315_v58, %v1645_v6  ;;  %v9860_v58 = vld [vmem:[#allocation2 + $0x44] sm:$0xf]  ;;  %v9819_v6 = vld [vmem:[#allocation2 + $0xf4] sm:$0xf0] }
 0x28a   :  { %v11492_v31 = vadd.f32 %v2131_v32, %v11126_v48  ;;  %v1912_v11 = vadd.f32 %v11313_v54, %v1823_v40 }
 0x28b   :  { %v10185_v50 = vpop.eup %10184  ;;  %v1973_v2 = vmul.f32 0.5, %v1734_v51 }
 0x28c   :  { %v2195_v10 = vrot.slane %v11492_v31, 6  ;;  %v2452_v5 = vpack.c.bf16 %v11492_v31, %v11492_v31  ;;  %v2036_v43 = vmul.f32 0.5, %v10185_v50  ;;  %v8485_v50 = vor.u32 %v9819_v6, %v8484_v21 }
 0x28d   :  { %10186 = vtanh.f32 %v1973_v2  ;;  %v8654_v33 = vld [vmem:[#allocation2 + $0x48] sm:$0xf0] }
 0x28e   :  { %v2239_v48 = vsel %vm2217_vm12, %v2194_v15, %v2195_v10  ;;  %2484 = vst [vmem:[#allocation2 + $0x54] sm:$0xf] %v2452_v5  ;;  %v2068_v45 = vadd.f32 0.5, %v2036_v43  ;;  %v1646_v41 = vpop.f32.mrf.mxu2  ;;  %v8657_v34 = vor.u32 %v9860_v58, %v8654_v33  ;;  %v1825_v33 = vadd.f32 %v1824_v18, %v11307_v26 }
 0x28f   :  { %v2388_v32 = vpack.c.bf16 %v2239_v48, %v2239_v48  ;;  %v1647_v51 = vadd.f32 %v1646_v41, %v11299_v7 }
 0x290   :  { %v2132_v27 = vmul.f32 %v2100_v61, %v2068_v45  ;;  %v1827_v9 = vpop.f32.mrf.mxu0  ;;  %3015 = vmatmul.bf16.gmra.mxu3 %v8657_v34  ;;  %3193 = vmatmul.bf16.gmra.mxu1 %v8657_v34  ;;  %v11518_v45 = vpop.f32.mrf.mxu1  ;;  %v1914_v18 = vadd.f32 %v11327_v59, %v1825_v33 }
 0x291   :  { %2420 = vst [vmem:[#allocation2 + $0x50] sm:$0xf] %v2388_v32  ;;  %v1736_v63 = vadd.f32 %v11329_v53, %v1647_v51  ;;  %v11521_v34 = vpop.f32.mrf.mxu3 }
 0x292   :  { %v11508_v15 = vadd.f32 %v2132_v27, %v11143_v12  ;;  %v2101_v12 = vsub.f32 %v1912_v11, %v11165_v49  ;;  %v9893_v27 = vld [vmem:[#allocation6 + $0x144] sm:$0xf0]  ;;  %v2102_v59 = vsub.f32 %v1914_v18, %v11184_v28 }
 0x293   :  { %v10187_v2 = vpop.eup %10186  ;;  %v1974_v5 = vmul.f32 0.5, %v1736_v63  ;;  %1688 = vmatmul.bf16.gmra.mxu2 %v8485_v50  ;;  %1866 = vmatmul.bf16.gmra.mxu0 %v8485_v50 }
 0x294   :  { %v2196_v43 = vrot.slane %v11508_v15, 6  ;;  %v2453_v61 = vpack.c.bf16 %v11508_v15, %v11508_v15  ;;  %v2037_v58 = vmul.f32 0.5, %v10187_v2 }
 0x295   :  { %10188 = vtanh.f32 %v1974_v5 }
 0x296   :  { %v2238_v53 = vsel %vm2217_vm12, %v2195_v10, %v2196_v43  ;;  %2485 = vst [vmem:[#allocation2 + $0x5c] sm:$0xf] %v2453_v61  ;;  %v2069_v54 = vadd.f32 0.5, %v2037_v58  ;;  %v1649_v48 = vpop.f32.mrf.mxu2  ;;  %v8780_v10 = vld [vmem:[#allocation6 + $0x140] sm:$0xf] }
 0x297   :  { %v2389_v40 = vpack.c.bf16 %v2238_v53, %v2238_v53  ;;  %v1650_v41 = vadd.f32 %v1649_v48, %v11299_v7  ;;  %v8781_v63 = vor.u32 %v9893_v27, %v8780_v10  ;;  %v1828_v53 = vadd.f32 %v1827_v9, %v11307_v26 }
 0x298   :  { %v2133_v6 = vmul.f32 %v2101_v12, %v2069_v54  ;;  %v1829_v32 = vpop.f32.mrf.mxu0  ;;  %v11537_v18 = vpop.f32.mrf.mxu1 }
 0x299   :  { %2421 = vst [vmem:[#allocation2 + $0x58] sm:$0xf] %v2389_v40  ;;  %v1739_v51 = vadd.f32 %v11353_v17, %v1650_v41  ;;  %2901 = vmatpush.bf16.msra.mxu2 %v8781_v63  ;;  %v9862_v17 = vld [vmem:[#allocation2 + $0x54] sm:$0xf]  ;;  %v11540_v27 = vpop.f32.mrf.mxu3  ;;  %v1917_v9 = vadd.f32 %v11350_v29, %v1828_v53 }
 0x29a   :  { %v11526_v21 = vadd.f32 %v2133_v6, %v11165_v49 }
 0x29b   :  { %v10189_v50 = vpop.eup %10188  ;;  %v1975_v11 = vmul.f32 0.5, %v1739_v51 }
 0x29c   :  { %v2197_v2 = vrot.slane %v11526_v21, 6  ;;  %v2454_v5 = vpack.c.bf16 %v11526_v21, %v11526_v21  ;;  %v2038_v61 = vmul.f32 0.5, %v10189_v50 }
 0x29d   :  { %10190 = vtanh.f32 %v1975_v11  ;;  %v8662_v58 = vld [vmem:[#allocation2 + $0x58] sm:$0xf0] }
 0x29e   :  { %v2237_v49 = vsel %vm2217_vm12, %v2196_v43, %v2197_v2  ;;  %2486 = vst [vmem:[#allocation2 + $0x64] sm:$0xf] %v2454_v5  ;;  %v2070_v33 = vadd.f32 0.5, %v2038_v61  ;;  %v1651_v12 = vpop.f32.mrf.mxu2  ;;  %v8665_v54 = vor.u32 %v9862_v17, %v8662_v58 }
 0x29f   :  { %v2358_v48 = vsel %vm2262_vm15, %v2237_v49, 0.0  ;;  %v1652_v40 = vadd.f32 %v1651_v12, %v11299_v7 }
 0x2a0   :  { %v2390_v41 = vpack.c.bf16 %v2358_v48, %v2358_v48  ;;  %v2134_v6 = vmul.f32 %v2102_v59, %v2070_v33  ;;  %v1832_v51 = vpop.f32.mrf.mxu0  ;;  %3020 = vmatmul.bf16.gmra.mxu3 %v8665_v54  ;;  %3198 = vmatmul.bf16.gmra.mxu1 %v8665_v54  ;;  %v1830_v59 = vadd.f32 %v1829_v32, %v11307_v26  ;;  %v9892_v32 = vld [vmem:[#allocation6 + $0x144] sm:$0xf]  ;;  %v8782_v48 = vld [vmem:[#allocation6 + $0x148] sm:$0xf0] }
 0x2a1   :  { %v1741_v10 = vadd.f32 %v11371_v35, %v1652_v40 }
 0x2a2   :  { %2422 = vst [vmem:[#allocation2 + $0x60] sm:$0xf] %v2390_v41  ;;  %v11543_v43 = vadd.f32 %v2134_v6, %v11184_v28  ;;  %v2103_v28 = vsub.f32 %v1917_v9, %v11200_v57  ;;  %v1919_v12 = vadd.f32 %v11368_v38, %v1830_v59  ;;  %v11559_v6 = vpop.f32.mrf.mxu1  ;;  %v11561_v9 = vpop.f32.mrf.mxu3 }
 0x2a3   :  { %v10191_v63 = vpop.eup %10190  ;;  %v1976_v50 = vmul.f32 0.5, %v1741_v10 }
 0x2a4   :  { %v2198_v11 = vrot.slane %v11543_v43, 6  ;;  %v2455_v5 = vpack.c.bf16 %v11543_v43, %v11543_v43  ;;  %v2039_v61 = vmul.f32 0.5, %v10191_v63 }
 0x2a5   :  { %10192 = vtanh.f32 %v1976_v50 }
 0x2a6   :  { %v2236_v35 = vsel %vm2217_vm12, %v2197_v2, %v2198_v11  ;;  %2487 = vst [vmem:[#allocation2 + $0x6c] sm:$0xf] %v2455_v5  ;;  %v2071_v17 = vadd.f32 0.5, %v2039_v61  ;;  %v1654_v58 = vpop.f32.mrf.mxu2  ;;  %v8785_v2 = vor.u32 %v9892_v32, %v8782_v48  ;;  %v9864_v61 = vld [vmem:[#allocation2 + $0x64] sm:$0xf] }
 0x2a7   :  { %v2391_v29 = vpack.c.bf16 %v2236_v35, %v2236_v35  ;;  %v1655_v49 = vadd.f32 %v1654_v58, %v11299_v7 }
 0x2a8   :  { %v2135_v33 = vmul.f32 %v2103_v28, %v2071_v17  ;;  %v1834_v53 = vpop.f32.mrf.mxu0  ;;  %3079 = vmatpush.bf16.msra.mxu0 %v8785_v2  ;;  %v1833_v28 = vadd.f32 %v1832_v51, %v11307_v26 }
 0x2a9   :  { %2423 = vst [vmem:[#allocation2 + $0x68] sm:$0xf] %v2391_v29  ;;  %v1744_v54 = vadd.f32 %v11393_v46, %v1655_v49  ;;  %v14748_v46 = vld [vmem:[#allocation31_spill] sm:$0xff] }
 0x2aa   :  { %v11557_v40 = vadd.f32 %v2135_v33, %v11200_v57  ;;  %v2104_v5 = vsub.f32 %v1919_v12, %v14748_v46 }
 0x2ab   :  { %v10193_v41 = vpop.eup %10192  ;;  %v1977_v10 = vmul.f32 0.5, %v1744_v54 }
 0x2ac   :  { %v2199_v63 = vrot.slane %v11557_v40, 6  ;;  %v2456_v50 = vpack.c.bf16 %v11557_v40, %v11557_v40  ;;  %v2040_v38 = vmul.f32 0.5, %v10193_v41 }
 0x2ad   :  { %10194 = vtanh.f32 %v1977_v10  ;;  %v8670_v57 = vld [vmem:[#allocation2 + $0x68] sm:$0xf0] }
 0x2ae   :  { %v2235_v59 = vsel %vm2217_vm12, %v2198_v11, %v2199_v63  ;;  %2488 = vst [vmem:[#allocation2 + $0x74] sm:$0xf] %v2456_v50  ;;  %v2072_v35 = vadd.f32 0.5, %v2040_v38  ;;  %v1656_v17 = vpop.f32.mrf.mxu2  ;;  %v8673_v58 = vor.u32 %v9864_v61, %v8670_v57  ;;  %v1922_v11 = vadd.f32 %v11390_v44, %v1833_v28  ;;  %v11579_v50 = vpop.f32.mrf.mxu1  ;;  %v14750_v44 = vld [vmem:[#allocation33_spill] sm:$0xff] }
 0x2af   :  { %v2392_v29 = vpack.c.bf16 %v2235_v59, %v2235_v59  ;;  %v1657_v49 = vadd.f32 %v1656_v17, %v11299_v7  ;;  %v1835_v38 = vadd.f32 %v1834_v53, %v11307_v26 }
 0x2b0   :  { %v2136_v33 = vmul.f32 %v2104_v5, %v2072_v35  ;;  %v1837_v54 = vpop.f32.mrf.mxu0  ;;  %3025 = vmatmul.bf16.gmra.mxu3 %v8673_v58  ;;  %3203 = vmatmul.bf16.gmra.mxu1 %v8673_v58  ;;  %v11582_v5 = vpop.f32.mrf.mxu3 }
 0x2b1   :  { %2424 = vst [vmem:[#allocation2 + $0x70] sm:$0xf] %v2392_v29  ;;  %v1746_v12 = vadd.f32 %v11416_v4, %v1657_v49  ;;  %v1924_v58 = vadd.f32 %v11413_v16, %v1835_v38  ;;  %v8772_v29 = vld [vmem:[#allocation6 + $0x130] sm:$0xf]  ;;  %v9891_v49 = vld [vmem:[#allocation6 + $0x134] sm:$0xf0] }
 0x2b2   :  { %v11573_v32 = vadd.f32 %v2136_v33, %v14748_v46  ;;  %v2105_v46 = vsub.f32 %v1922_v11, %v14750_v44  ;;  %v14753_v16 = vld [vmem:[#allocation34_spill] sm:$0xff] }
 0x2b3   :  { %v10195_v48 = vpop.eup %10194  ;;  %v1978_v2 = vmul.f32 0.5, %v1746_v12  ;;  %v2106_v38 = vsub.f32 %v1924_v58, %v14753_v16 }
 0x2b4   :  { %14749 = vst [vmem:[#allocation31_spill] sm:$0xff] %v11573_v32  ;;  %v2200_v51 = vrot.slane %v11573_v32, 6  ;;  %v2457_v41 = vpack.c.bf16 %v11573_v32, %v11573_v32  ;;  %v2041_v10 = vmul.f32 0.5, %v10195_v48  ;;  %v14752_v48 = vld [vmem:[#allocation32_spill] sm:$0xff] }
 0x2b5   :  { %10196 = vtanh.f32 %v1978_v2  ;;  %vm2266_vm0 = vcmp.ge.s32.totalorder %v14752_v48, 2  ;;  %v9964_v48 = vld [vmem:[#allocation6 + $0x284] sm:$0xf] }
 0x2b6   :  { %v2234_v4 = vsel %vm2217_vm12, %v2199_v63, %v2200_v51  ;;  %2489 = vst [vmem:[#allocation2 + $0x7c] sm:$0xf] %v2457_v41  ;;  %v2073_v61 = vadd.f32 0.5, %v2041_v10  ;;  %v1659_v57 = vpop.f32.mrf.mxu2  ;;  %v8773_v63 = vor.u32 %v9891_v49, %v8772_v29 }
 0x2b7   :  { %v2393_v59 = vpack.c.bf16 %v2234_v4, %v2234_v4  ;;  %v1660_v35 = vadd.f32 %v1659_v57, %v11299_v7 }
 0x2b8   :  { %v2137_v28 = vmul.f32 %v2105_v46, %v2073_v61  ;;  %v1839_v17 = vpop.f32.mrf.mxu0  ;;  %2902 = vmatpush.bf16.msra.mxu2 %v8773_v63  ;;  %v1838_v61 = vadd.f32 %v1837_v54, %v11307_v26  ;;  %v11606_v58 = vpop.f32.mrf.mxu3 }
 0x2b9   :  { %2425 = vst [vmem:[#allocation2 + $0x78] sm:$0xf] %v2393_v59  ;;  %v1749_v53 = vadd.f32 %v11437_v19, %v1660_v35  ;;  %v9866_v19 = vld [vmem:[#allocation2 + $0x74] sm:$0xf]  ;;  %v11601_v35 = vpop.f32.mrf.mxu1 }
 0x2ba   :  { %v11591_v33 = vadd.f32 %v2137_v28, %v14750_v44 }
 0x2bb   :  { %v10197_v12 = vpop.eup %10196  ;;  %v1979_v11 = vmul.f32 0.5, %v1749_v53 }
 0x2bc   :  { %14751 = vst [vmem:[#allocation33_spill] sm:$0xff] %v11591_v33  ;;  %v2201_v2 = vrot.slane %v11591_v33, 6  ;;  %v2458_v41 = vpack.c.bf16 %v11591_v33, %v11591_v33  ;;  %v2042_v10 = vmul.f32 0.5, %v10197_v12  ;;  %v1927_v12 = vadd.f32 %v11434_v39, %v1838_v61  ;;  %v9070_v33 = vld [vmem:[#allocation6 + $0x288] sm:$0xf0] }
 0x2bd   :  { %10198 = vtanh.f32 %v1979_v11  ;;  %v8678_v4 = vld [vmem:[#allocation2 + $0x78] sm:$0xf0] }
 0x2be   :  { %v2233_v44 = vsel %vm2217_vm12, %v2200_v51, %v2201_v2  ;;  %2490 = vst [vmem:[#allocation2 + $0x84] sm:$0xf] %v2458_v41  ;;  %v2074_v46 = vadd.f32 0.5, %v2042_v10  ;;  %v1661_v57 = vpop.f32.mrf.mxu2  ;;  %v8681_v59 = vor.u32 %v9866_v19, %v8678_v4 }
 0x2bf   :  { %v2362_v28 = vsel %vm2266_vm0, %v2233_v44, 0.0  ;;  %v1662_v53 = vadd.f32 %v1661_v57, %v11299_v7  ;;  %v14755_v44 = vld [vmem:[#allocation13_spill] sm:$0xff] }
 0x2c0   :  { %v2394_v29 = vpack.c.bf16 %v2362_v28, %v2362_v28  ;;  %v2138_v49 = vmul.f32 %v2106_v38, %v2074_v46  ;;  %v1842_v63 = vpop.f32.mrf.mxu0  ;;  %3030 = vmatmul.bf16.gmra.mxu3 %v8681_v59  ;;  %3208 = vmatmul.bf16.gmra.mxu1 %v8681_v59  ;;  %v1840_v38 = vadd.f32 %v1839_v17, %v11307_v26 }
 0x2c1   :  { %v1751_v51 = vadd.f32 %v11456_v24, %v1662_v53  ;;  %v11621_v53 = vpop.f32.mrf.mxu1 }
 0x2c2   :  { %2426 = vst [vmem:[#allocation2 + $0x80] sm:$0xf] %v2394_v29  ;;  %v11610_v54 = vadd.f32 %v2138_v49, %v14753_v16  ;;  %v2107_v16 = vsub.f32 %v1927_v12, %v14755_v44  ;;  %v1929_v29 = vadd.f32 %v11452_v42, %v1840_v38  ;;  %v9890_v49 = vld [vmem:[#allocation6 + $0x134] sm:$0xf] }
 0x2c3   :  { %v10199_v11 = vpop.eup %10198  ;;  %v1980_v41 = vmul.f32 0.5, %v1751_v51  ;;  %v8774_v51 = vld [vmem:[#allocation6 + $0x138] sm:$0xf0] }
 0x2c4   :  { %14754 = vst [vmem:[#allocation34_spill] sm:$0xff] %v11610_v54  ;;  %v2202_v10 = vrot.slane %v11610_v54, 6  ;;  %v2459_v19 = vpack.c.bf16 %v11610_v54, %v11610_v54  ;;  %v2043_v4 = vmul.f32 0.5, %v10199_v11  ;;  %v8777_v11 = vor.u32 %v9890_v49, %v8774_v51  ;;  %v14757_v42 = vld [vmem:[#allocation14_spill] sm:$0xff] }
 0x2c5   :  { %10200 = vtanh.f32 %v1980_v41  ;;  %v2108_v38 = vsub.f32 %v1929_v29, %v14757_v42 }
 0x2c6   :  { %v2232_v24 = vsel %vm2217_vm12, %v2201_v2, %v2202_v10  ;;  %2491 = vst [vmem:[#allocation2 + $0x8c] sm:$0xf] %v2459_v19  ;;  %v2075_v46 = vadd.f32 0.5, %v2043_v4  ;;  %v1664_v57 = vpop.f32.mrf.mxu2  ;;  %v11625_v2 = vpop.f32.mrf.mxu3  ;;  %3080 = vmatpush.bf16.msra.mxu0 %v8777_v11 }
 0x2c7   :  { %v2395_v39 = vpack.c.bf16 %v2232_v24, %v2232_v24  ;;  %v1665_v61 = vadd.f32 %v1664_v57, %v11299_v7 }
 0x2c8   :  { %v2139_v59 = vmul.f32 %v2107_v16, %v2075_v46  ;;  %v1844_v28 = vpop.f32.mrf.mxu0 }
 0x2c9   :  { %2427 = vst [vmem:[#allocation2 + $0x88] sm:$0xf] %v2395_v39  ;;  %v1754_v17 = vadd.f32 %v11479_v0, %v1665_v61  ;;  %v9868_v0 = vld [vmem:[#allocation2 + $0x84] sm:$0xf]  ;;  %v1843_v39 = vadd.f32 %v1842_v63, %v11307_v26 }
 0x2ca   :  { %v11628_v12 = vadd.f32 %v2139_v59, %v14755_v44 }
 0x2cb   :  { %v10201_v41 = vpop.eup %10200  ;;  %v1981_v19 = vmul.f32 0.5, %v1754_v17 }
 0x2cc   :  { %14756 = vst [vmem:[#allocation13_spill] sm:$0xff] %v11628_v12  ;;  %v2203_v4 = vrot.slane %v11628_v12, 6  ;;  %v2460_v24 = vpack.c.bf16 %v11628_v12, %v11628_v12  ;;  %v2044_v16 = vmul.f32 0.5, %v10201_v41 }
 0x2cd   :  { %10202 = vtanh.f32 %v1981_v19  ;;  %v8686_v46 = vld [vmem:[#allocation2 + $0x88] sm:$0xf0] }
 0x2ce   :  { %v2231_v57 = vsel %vm2217_vm12, %v2202_v10, %v2203_v4  ;;  %2492 = vst [vmem:[#allocation2 + $0x94] sm:$0xf] %v2460_v24  ;;  %v2076_v44 = vadd.f32 0.5, %v2044_v16  ;;  %v1666_v61 = vpop.f32.mrf.mxu2  ;;  %v8689_v59 = vor.u32 %v9868_v0, %v8686_v46  ;;  %v1932_v10 = vadd.f32 %v11477_v62, %v1843_v39  ;;  %v11643_v24 = vpop.f32.mrf.mxu1  ;;  %v14759_v62 = vld [vmem:[#allocation16_spill] sm:$0xff] }
 0x2cf   :  { %v2396_v17 = vpack.c.bf16 %v2231_v57, %v2231_v57  ;;  %v1667_v49 = vadd.f32 %v1666_v61, %v11299_v7  ;;  %v11645_v16 = vpop.f32.mrf.mxu3  ;;  %v1845_v57 = vadd.f32 %v1844_v28, %v11307_v26  ;;  %v8764_v28 = vld [vmem:[#allocation6 + $0x120] sm:$0xf] }
 0x2d0   :  { %v2140_v51 = vmul.f32 %v2108_v38, %v2076_v44  ;;  %v1847_v41 = vpop.f32.mrf.mxu0  ;;  %3035 = vmatmul.bf16.gmra.mxu3 %v8689_v59  ;;  %3213 = vmatmul.bf16.gmra.mxu1 %v8689_v59 }
 0x2d1   :  { %2428 = vst [vmem:[#allocation2 + $0x90] sm:$0xf] %v2396_v17  ;;  %v1756_v29 = vadd.f32 %v11500_v20, %v1667_v49 }
 0x2d2   :  { %v11640_v11 = vadd.f32 %v2140_v51, %v14757_v42  ;;  %v2109_v42 = vsub.f32 %v1932_v10, %v14759_v62  ;;  %v1934_v51 = vadd.f32 %v11497_v56, %v1845_v57 }
 0x2d3   :  { %v10203_v19 = vpop.eup %10202  ;;  %v1982_v63 = vmul.f32 0.5, %v1756_v29 }
 0x2d4   :  { %14758 = vst [vmem:[#allocation14_spill] sm:$0xff] %v11640_v11  ;;  %v2204_v0 = vrot.slane %v11640_v11, 6  ;;  %v2461_v38 = vpack.c.bf16 %v11640_v11, %v11640_v11  ;;  %v2045_v46 = vmul.f32 0.5, %v10203_v19  ;;  %v9889_v19 = vld [vmem:[#allocation6 + $0x124] sm:$0xf0] }
 0x2d5   :  { %10204 = vtanh.f32 %v1982_v63  ;;  %v9086_v11 = vld [vmem:[#allocation6 + $0x2a8] sm:$0xf0] }
 0x2d6   :  { %v2230_v20 = vsel %vm2217_vm12, %v2203_v4, %v2204_v0  ;;  %2493 = vst [vmem:[#allocation2 + $0x9c] sm:$0xf] %v2461_v38  ;;  %v2077_v44 = vadd.f32 0.5, %v2045_v46  ;;  %v1669_v39 = vpop.f32.mrf.mxu2  ;;  %v8765_v4 = vor.u32 %v9889_v19, %v8764_v28  ;;  %v14761_v46 = vld [vmem:[#allocation15_spill] sm:$0xff]  ;;  %v11664_v56 = vpop.f32.mrf.mxu1 }
 0x2d7   :  { %v2397_v61 = vpack.c.bf16 %v2230_v20, %v2230_v20  ;;  %v1670_v59 = vadd.f32 %v1669_v39, %v11299_v7  ;;  %vm2270_vm1 = vcmp.ge.s32.totalorder %v14761_v46, 2  ;;  %v9870_v39 = vld [vmem:[#allocation2 + $0x94] sm:$0xf] }
 0x2d8   :  { %v2141_v17 = vmul.f32 %v2109_v42, %v2077_v44  ;;  %v1849_v49 = vpop.f32.mrf.mxu0  ;;  %2903 = vmatpush.bf16.msra.mxu2 %v8765_v4 }
 0x2d9   :  { %2429 = vst [vmem:[#allocation2 + $0x98] sm:$0xf] %v2397_v61  ;;  %v1759_v29 = vadd.f32 %v11521_v34, %v1670_v59  ;;  %v14762_v34 = vld [vmem:[#allocation17_spill] sm:$0xff]  ;;  %v11667_v61 = vpop.f32.mrf.mxu3 }
 0x2da   :  { %v11658_v63 = vadd.f32 %v2141_v17, %v14759_v62  ;;  %v2110_v57 = vsub.f32 %v1934_v51, %v14762_v34 }
 0x2db   :  { %v10205_v38 = vpop.eup %10204  ;;  %v1983_v10 = vmul.f32 0.5, %v1759_v29  ;;  %v1848_v29 = vadd.f32 %v1847_v41, %v11307_v26 }
 0x2dc   :  { %14760 = vst [vmem:[#allocation16_spill] sm:$0xff] %v11658_v63  ;;  %v2205_v20 = vrot.slane %v11658_v63, 6  ;;  %v2462_v42 = vpack.c.bf16 %v11658_v63, %v11658_v63  ;;  %v2046_v44 = vmul.f32 0.5, %v10205_v38 }
 0x2dd   :  { %10206 = vtanh.f32 %v1983_v10  ;;  %v8694_v62 = vld [vmem:[#allocation2 + $0x98] sm:$0xf0]  ;;  %v1937_v41 = vadd.f32 %v11518_v45, %v1848_v29 }
 0x2de   :  { %v2229_v59 = vsel %vm2217_vm12, %v2204_v0, %v2205_v20  ;;  %2494 = vst [vmem:[#allocation2 + $0xa4] sm:$0xf] %v2462_v42  ;;  %v2078_v17 = vadd.f32 0.5, %v2046_v44  ;;  %v1671_v28 = vpop.f32.mrf.mxu2  ;;  %v8697_v19 = vor.u32 %v9870_v39, %v8694_v62  ;;  %v11687_v45 = vpop.f32.mrf.mxu1 }
 0x2df   :  { %v2366_v4 = vsel %vm2270_vm1, %v2229_v59, 0.0  ;;  %v1672_v38 = vadd.f32 %v1671_v28, %v11299_v7 }
 0x2e0   :  { %v2398_v51 = vpack.c.bf16 %v2366_v4, %v2366_v4  ;;  %v2142_v10 = vmul.f32 %v2110_v57, %v2078_v17  ;;  %v1852_v60 = vpop.f32.mrf.mxu0  ;;  %3040 = vmatmul.bf16.gmra.mxu3 %v8697_v19  ;;  %3218 = vmatmul.bf16.gmra.mxu1 %v8697_v19  ;;  %v1850_v57 = vadd.f32 %v1849_v49, %v11307_v26  ;;  %v14764_v17 = vld [vmem:[#allocation18_spill] sm:$0xff] }
 0x2e1   :  { %v1761_v63 = vadd.f32 %v11540_v27, %v1672_v38  ;;  %v11690_v4 = vpop.f32.mrf.mxu3  ;;  %v9871_v32 = vld [vmem:[#allocation2 + $0x94] sm:$0xf0] }
 0x2e2   :  { %2430 = vst [vmem:[#allocation2 + $0xa0] sm:$0xf] %v2398_v51  ;;  %v11677_v0 = vadd.f32 %v2142_v10, %v14762_v34  ;;  %v2111_v34 = vsub.f32 %v1937_v41, %v14764_v17  ;;  %v1939_v49 = vadd.f32 %v11537_v18, %v1850_v57 }
 0x2e3   :  { %v10207_v42 = vpop.eup %10206  ;;  %v1984_v44 = vmul.f32 0.5, %v1761_v63 }
 0x2e4   :  { %14763 = vst [vmem:[#allocation17_spill] sm:$0xff] %v11677_v0  ;;  %v2206_v39 = vrot.slane %v11677_v0, 6  ;;  %v2463_v62 = vpack.c.bf16 %v11677_v0, %v11677_v0  ;;  %v2047_v59 = vmul.f32 0.5, %v10207_v42  ;;  %v8766_v42 = vld [vmem:[#allocation6 + $0x128] sm:$0xf0] }
 0x2e5   :  { %10208 = vtanh.f32 %v1984_v44  ;;  %v9872_v18 = vld [vmem:[#allocation2 + $0xa4] sm:$0xf] }
 0x2e6   :  { %v2228_v27 = vsel %vm2217_vm12, %v2205_v20, %v2206_v39  ;;  %2495 = vst [vmem:[#allocation2 + $0xac] sm:$0xf] %v2463_v62  ;;  %v2079_v28 = vadd.f32 0.5, %v2047_v59  ;;  %v1674_v19 = vpop.f32.mrf.mxu2  ;;  %v9888_v20 = vld [vmem:[#allocation6 + $0x124] sm:$0xf] }
 0x2e7   :  { %v2399_v63 = vpack.c.bf16 %v2228_v27, %v2228_v27  ;;  %v1675_v29 = vadd.f32 %v1674_v19, %v11299_v7  ;;  %v8769_v44 = vor.u32 %v9888_v20, %v8766_v42 }
 0x2e8   :  { %v2143_v38 = vmul.f32 %v2111_v34, %v2079_v28  ;;  %v1854_v51 = vpop.f32.mrf.mxu0  ;;  %v14766_v28 = vld [vmem:[#allocation19_spill] sm:$0xff] }
 0x2e9   :  { %2431 = vst [vmem:[#allocation2 + $0xa8] sm:$0xf] %v2399_v63  ;;  %v1764_v10 = vadd.f32 %v11561_v9, %v1675_v29  ;;  %3081 = vmatpush.bf16.msra.mxu0 %v8769_v44  ;;  %v2112_v63 = vsub.f32 %v1939_v49, %v14766_v28  ;;  %v1853_v29 = vadd.f32 %v1852_v60, %v11307_v26  ;;  %v11705_v44 = vpop.f32.mrf.mxu1 }
 0x2ea   :  { %v11695_v41 = vadd.f32 %v2143_v38, %v14764_v17 }
 0x2eb   :  { %v10209_v62 = vpop.eup %10208  ;;  %v1985_v59 = vmul.f32 0.5, %v1764_v10  ;;  %v1942_v60 = vadd.f32 %v11559_v6, %v1853_v29 }
 0x2ec   :  { %14765 = vst [vmem:[#allocation18_spill] sm:$0xff] %v11695_v41  ;;  %v2207_v27 = vrot.slane %v11695_v41, 6  ;;  %v2464_v19 = vpack.c.bf16 %v11695_v41, %v11695_v41  ;;  %v2048_v34 = vmul.f32 0.5, %v10209_v62 }
 0x2ed   :  { %10210 = vtanh.f32 %v1985_v59  ;;  %v8702_v9 = vld [vmem:[#allocation2 + $0xa8] sm:$0xf0]  ;;  %v11708_v59 = vpop.f32.mrf.mxu3 }
 0x2ee   :  { %v2227_v57 = vsel %vm2217_vm12, %v2206_v39, %v2207_v27  ;;  %2496 = vst [vmem:[#allocation2 + $0xb4] sm:$0xf] %v2464_v19  ;;  %v2080_v17 = vadd.f32 0.5, %v2048_v34  ;;  %v1676_v38 = vpop.f32.mrf.mxu2  ;;  %v8705_v10 = vor.u32 %v9872_v18, %v8702_v9 }
 0x2ef   :  { %v2400_v20 = vpack.c.bf16 %v2227_v57, %v2227_v57  ;;  %v1677_v42 = vadd.f32 %v1676_v38, %v11299_v7  ;;  %v1855_v57 = vadd.f32 %v1854_v51, %v11307_v26 }
 0x2f0   :  { %v2144_v41 = vmul.f32 %v2112_v63, %v2080_v17  ;;  %3045 = vmatmul.bf16.gmra.mxu3 %v8705_v10  ;;  %3223 = vmatmul.bf16.gmra.mxu1 %v8705_v10  ;;  %v1857_v62 = vpop.f32.mrf.mxu0  ;;  %v14768_v17 = vld [vmem:[#allocation21_spill] sm:$0xff] }
 0x2f1   :  { %2432 = vst [vmem:[#allocation2 + $0xb0] sm:$0xf] %v2400_v20  ;;  %v1766_v49 = vadd.f32 %v11582_v5, %v1677_v42  ;;  %v11722_v20 = vpop.f32.mrf.mxu1  ;;  %v1944_v42 = vadd.f32 %v11579_v50, %v1855_v57 }
 0x2f2   :  { %v11711_v39 = vadd.f32 %v2144_v41, %v14766_v28  ;;  %v2113_v41 = vsub.f32 %v1942_v60, %v14768_v17 }
 0x2f3   :  { %v10211_v19 = vpop.eup %10210  ;;  %v1986_v34 = vmul.f32 0.5, %v1766_v49  ;;  %v8756_v49 = vld [vmem:[#allocation6 + $0x110] sm:$0xf] }
 0x2f4   :  { %14767 = vst [vmem:[#allocation19_spill] sm:$0xff] %v11711_v39  ;;  %v2208_v18 = vrot.slane %v11711_v39, 6  ;;  %v2465_v63 = vpack.c.bf16 %v11711_v39, %v11711_v39  ;;  %v2049_v9 = vmul.f32 0.5, %v10211_v19  ;;  %v9887_v19 = vld [vmem:[#allocation6 + $0x114] sm:$0xf0] }
 0x2f5   :  { %10212 = vtanh.f32 %v1986_v34  ;;  %v11726_v34 = vpop.f32.mrf.mxu3  ;;  %v8757_v60 = vor.u32 %v9887_v19, %v8756_v49 }
 0x2f6   :  { %v2226_v5 = vsel %vm2217_vm12, %v2207_v27, %v2208_v18  ;;  %2497 = vst [vmem:[#allocation2 + $0xbc] sm:$0xf] %v2465_v63  ;;  %v2081_v28 = vadd.f32 0.5, %v2049_v9  ;;  %v1679_v38 = vpop.f32.mrf.mxu2 }
 0x2f7   :  { %v2401_v6 = vpack.c.bf16 %v2226_v5, %v2226_v5  ;;  %v1680_v29 = vadd.f32 %v1679_v38, %v11299_v7  ;;  %v14770_v38 = vld [vmem:[#allocation20_spill] sm:$0xff]  ;;  %2904 = vmatpush.bf16.msra.mxu2 %v8757_v60 }
 0x2f8   :  { %v2145_v10 = vmul.f32 %v2113_v41, %v2081_v28  ;;  %v1859_v5 = vpop.f32.mrf.mxu0  ;;  %vm2274_vm2 = vcmp.ge.s32.totalorder %v14770_v38, 2 }
 0x2f9   :  { %2433 = vst [vmem:[#allocation2 + $0xb8] sm:$0xf] %v2401_v6  ;;  %v1769_v51 = vadd.f32 %v11606_v58, %v1680_v29  ;;  %v14771_v58 = vld [vmem:[#allocation22_spill] sm:$0xff]  ;;  %v9874_v6 = vld [vmem:[#allocation2 + $0xb4] sm:$0xf] }
 0x2fa   :  { %v11729_v27 = vadd.f32 %v2145_v10, %v14768_v17  ;;  %v2114_v28 = vsub.f32 %v1944_v42, %v14771_v58 }
 0x2fb   :  { %v10213_v63 = vpop.eup %10212  ;;  %v1987_v9 = vmul.f32 0.5, %v1769_v51  ;;  %v1858_v51 = vadd.f32 %v1857_v62, %v11307_v26 }
 0x2fc   :  { %14769 = vst [vmem:[#allocation21_spill] sm:$0xff] %v11729_v27  ;;  %v2209_v41 = vrot.slane %v11729_v27, 6  ;;  %v2466_v50 = vpack.c.bf16 %v11729_v27, %v11729_v27  ;;  %v2050_v57 = vmul.f32 0.5, %v10213_v63 }
 0x2fd   :  { %10214 = vtanh.f32 %v1987_v9  ;;  %v8710_v29 = vld [vmem:[#allocation2 + $0xb8] sm:$0xf0] }
 0x2fe   :  { %v2225_v17 = vsel %vm2217_vm12, %v2208_v18, %v2209_v41  ;;  %2498 = vst [vmem:[#allocation2 + $0xc4] sm:$0xf] %v2466_v50  ;;  %v2082_v10 = vadd.f32 0.5, %v2050_v57  ;;  %v1681_v49 = vpop.f32.mrf.mxu2  ;;  %v8713_v19 = vor.u32 %v9874_v6, %v8710_v29  ;;  %v1947_v18 = vadd.f32 %v11601_v35, %v1858_v51  ;;  %v11745_v50 = vpop.f32.mrf.mxu1  ;;  %v14773_v35 = vld [vmem:[#allocation23_spill] sm:$0xff] }
 0x2ff   :  { %v2370_v38 = vsel %vm2274_vm2, %v2225_v17, 0.0  ;;  %v1682_v39 = vadd.f32 %v1681_v49, %v11299_v7  ;;  %v11747_v57 = vpop.f32.mrf.mxu3 }
 0x300   :  { %v2402_v27 = vpack.c.bf16 %v2370_v38, %v2370_v38  ;;  %v2146_v63 = vmul.f32 %v2114_v28, %v2082_v10  ;;  %3050 = vmatmul.bf16.gmra.mxu3 %v8713_v19  ;;  %3228 = vmatmul.bf16.gmra.mxu1 %v8713_v19 }
 0x301   :  { %v1771_v42 = vadd.f32 %v11625_v2, %v1682_v39  ;;  %v1860_v2 = vadd.f32 %v1859_v5, %v11307_v26  ;;  %v1862_v39 = vpop.f32.mrf.mxu0  ;;  %v9886_v5 = vld [vmem:[#allocation6 + $0x114] sm:$0xf] }
 0x302   :  { %2434 = vst [vmem:[#allocation2 + $0xc0] sm:$0xf] %v2402_v27  ;;  %v11742_v60 = vadd.f32 %v2146_v63, %v14771_v58  ;;  %v2115_v58 = vsub.f32 %v1947_v18, %v14773_v35 }
 0x303   :  { %v10215_v9 = vpop.eup %10214  ;;  %v1988_v62 = vmul.f32 0.5, %v1771_v42  ;;  %v1949_v19 = vadd.f32 %v11621_v53, %v1860_v2  ;;  %v8758_v42 = vld [vmem:[#allocation6 + $0x118] sm:$0xf0]  ;;  %v14775_v53 = vld [vmem:[#allocation24_spill] sm:$0xff] }
 0x304   :  { %14772 = vst [vmem:[#allocation22_spill] sm:$0xff] %v11742_v60  ;;  %v2210_v6 = vrot.slane %v11742_v60, 6  ;;  %v2467_v38 = vpack.c.bf16 %v11742_v60, %v11742_v60  ;;  %v2051_v28 = vmul.f32 0.5, %v10215_v9  ;;  %v9869_v60 = vld [vmem:[#allocation2 + $0x84] sm:$0xf0] }
 0x305   :  { %10216 = vtanh.f32 %v1988_v62  ;;  %v2116_v2 = vsub.f32 %v1949_v19, %v14775_v53 }
 0x306   :  { %v2224_v27 = vsel %vm2217_vm12, %v2209_v41, %v2210_v6  ;;  %2499 = vst [vmem:[#allocation2 + $0xcc] sm:$0xf] %v2467_v38  ;;  %v2083_v29 = vadd.f32 0.5, %v2051_v28  ;;  %v1684_v17 = vpop.f32.mrf.mxu2  ;;  %v8761_v41 = vor.u32 %v9886_v5, %v8758_v42 }
 0x307   :  { %v2403_v10 = vpack.c.bf16 %v2224_v27, %v2224_v27  ;;  %v1685_v51 = vadd.f32 %v1684_v17, %v11299_v7  ;;  %v11768_v17 = vpop.f32.mrf.mxu3 }
 0x308   :  { %v2147_v49 = vmul.f32 %v2115_v58, %v2083_v29  ;;  %3082 = vmatpush.bf16.msra.mxu0 %v8761_v41  ;;  %v11765_v58 = vpop.f32.mrf.mxu1 }
 0x309   :  { %2435 = vst [vmem:[#allocation2 + $0xc8] sm:$0xf] %v2403_v10  ;;  %v1774_v63 = vadd.f32 %v11645_v16, %v1685_v51  ;;  %v9876_v16 = vld [vmem:[#allocation2 + $0xc4] sm:$0xf]  ;;  %v1863_v51 = vadd.f32 %v1862_v39, %v11307_v26  ;;  %v1864_v42 = vpop.f32.mrf.mxu0 }
 0x30a   :  { %v11760_v9 = vadd.f32 %v2147_v49, %v14773_v35 }
 0x30b   :  { %v10217_v62 = vpop.eup %10216  ;;  %v1989_v38 = vmul.f32 0.5, %v1774_v63 }
 0x30c   :  { %14774 = vst [vmem:[#allocation23_spill] sm:$0xff] %v11760_v9  ;;  %v2211_v18 = vrot.slane %v11760_v9, 6  ;;  %v2468_v28 = vpack.c.bf16 %v11760_v9, %v11760_v9  ;;  %v2052_v27 = vmul.f32 0.5, %v10217_v62 }
 0x30d   :  { %10218 = vtanh.f32 %v1989_v38  ;;  %v8718_v29 = vld [vmem:[#allocation2 + $0xc8] sm:$0xf0] }
 0x30e   :  { %v2223_v35 = vsel %vm2217_vm12, %v2210_v6, %v2211_v18  ;;  %2500 = vst [vmem:[#allocation2 + $0xd4] sm:$0xf] %v2468_v28  ;;  %v2084_v10 = vadd.f32 0.5, %v2052_v27  ;;  %v1686_v49 = vpop.f32.mrf.mxu2  ;;  %v8721_v63 = vor.u32 %v9876_v16, %v8718_v29  ;;  %v1952_v6 = vadd.f32 %v11643_v24, %v1863_v51 }
 0x30f   :  { %v2404_v5 = vpack.c.bf16 %v2223_v35, %v2223_v35  ;;  %v1687_v41 = vadd.f32 %v1686_v49, %v11299_v7 }
 0x310   :  { %v2148_v62 = vmul.f32 %v2116_v2, %v2084_v10  ;;  %3055 = vmatmul.bf16.gmra.mxu3 %v8721_v63  ;;  %3233 = vmatmul.bf16.gmra.mxu1 %v8721_v63  ;;  %v1865_v2 = vadd.f32 %v1864_v42, %v11307_v26  ;;  %v11787_v63 = vpop.f32.mrf.mxu1 }
 0x311   :  { %2436 = vst [vmem:[#allocation2 + $0xd0] sm:$0xf] %v2404_v5  ;;  %v1776_v19 = vadd.f32 %v11667_v61, %v1687_v41  ;;  %v14777_v61 = vld [vmem:[#allocation26_spill] sm:$0xff]  ;;  %v11789_v5 = vpop.f32.mrf.mxu3 }
 0x312   :  { %v11776_v38 = vadd.f32 %v2148_v62, %v14775_v53  ;;  %v2117_v53 = vsub.f32 %v1952_v6, %v14777_v61  ;;  %v1954_v42 = vadd.f32 %v11664_v56, %v1865_v2  ;;  %v1867_v62 = vpop.f32.mrf.mxu0  ;;  %v8748_v6 = vld [vmem:[#allocation6 + $0x100] sm:$0xf] }
 0x313   :  { %v10219_v28 = vpop.eup %10218  ;;  %v1990_v27 = vmul.f32 0.5, %v1776_v19 }
 0x314   :  { %14776 = vst [vmem:[#allocation24_spill] sm:$0xff] %v11776_v38  ;;  %v2212_v39 = vrot.slane %v11776_v38, 6  ;;  %v2469_v16 = vpack.c.bf16 %v11776_v38, %v11776_v38  ;;  %v2053_v29 = vmul.f32 0.5, %v10219_v28  ;;  %v9885_v28 = vld [vmem:[#allocation6 + $0x104] sm:$0xf0] }
 0x315   :  { %10220 = vtanh.f32 %v1990_v27  ;;  %v9884_v27 = vld [vmem:[#allocation6 + $0x104] sm:$0xf]  ;;  %v8750_v38 = vld [vmem:[#allocation6 + $0x108] sm:$0xf0] }
 0x316   :  { %v2222_v35 = vsel %vm2217_vm12, %v2211_v18, %v2212_v39  ;;  %2501 = vst [vmem:[#allocation2 + $0xdc] sm:$0xf] %v2469_v16  ;;  %v2085_v10 = vadd.f32 0.5, %v2053_v29  ;;  %v1689_v49 = vpop.f32.mrf.mxu2  ;;  %v14779_v29 = vld [vmem:[#allocation25_spill] sm:$0xff] }
 0x317   :  { %v2405_v24 = vpack.c.bf16 %v2222_v35, %v2222_v35  ;;  %v1690_v51 = vadd.f32 %v1689_v49, %v11299_v7  ;;  %vm2278_vm3 = vcmp.ge.s32.totalorder %v14779_v29, 2  ;;  %v8749_v49 = vor.u32 %v9885_v28, %v8748_v6 }
 0x318   :  { %v2149_v41 = vmul.f32 %v2117_v53, %v2085_v10  ;;  %v8753_v10 = vor.u32 %v9884_v27, %v8750_v38  ;;  %v1868_v6 = vadd.f32 %v1867_v62, %v11307_v26 }
 0x319   :  { %2437 = vst [vmem:[#allocation2 + $0xd8] sm:$0xf] %v2405_v24  ;;  %v1779_v19 = vadd.f32 %v11690_v4, %v1690_v51  ;;  %v14780_v4 = vld [vmem:[#allocation27_spill] sm:$0xff]  ;;  %2905 = vmatpush.bf16.msra.mxu2 %v8749_v49  ;;  %v11808_v49 = vpop.f32.mrf.mxu1 }
 0x31a   :  { %v11794_v18 = vadd.f32 %v2149_v41, %v14777_v61  ;;  %v2118_v24 = vsub.f32 %v1954_v42, %v14780_v4  ;;  %v9878_v61 = vld [vmem:[#allocation2 + $0xd4] sm:$0xf]  ;;  %3083 = vmatpush.bf16.msra.mxu0 %v8753_v10  ;;  %v1869_v10 = vpop.f32.mrf.mxu0 }
 0x31b   :  { %v10221_v16 = vpop.eup %10220  ;;  %v1991_v35 = vmul.f32 0.5, %v1779_v19 }
 0x31c   :  { %14778 = vst [vmem:[#allocation26_spill] sm:$0xff] %v11794_v18  ;;  %v2213_v53 = vrot.slane %v11794_v18, 6  ;;  %v2470_v56 = vpack.c.bf16 %v11794_v18, %v11794_v18  ;;  %v2054_v2 = vmul.f32 0.5, %v10221_v16  ;;  %v9108_v18 = vld [vmem:[#allocation6 + $0x2d0] sm:$0xf] }
 0x31d   :  { %10222 = vtanh.f32 %v1991_v35  ;;  %v8726_v51 = vld [vmem:[#allocation2 + $0xd8] sm:$0xf0] }
 0x31e   :  { %v2221_v41 = vsel %vm2217_vm12, %v2212_v39, %v2213_v53  ;;  %2502 = vst [vmem:[#allocation2 + $0xe4] sm:$0xf] %v2470_v56  ;;  %v2086_v19 = vadd.f32 0.5, %v2054_v2  ;;  %v1691_v28 = vpop.f32.mrf.mxu2  ;;  %v8729_v9 = vor.u32 %v9878_v61, %v8726_v51  ;;  %v11810_v39 = vpop.f32.mrf.mxu3  ;;  %v1957_v56 = vadd.f32 %v11687_v45, %v1868_v6  ;;  %v14782_v51 = vld [vmem:[#allocation28_spill] sm:$0xff] }
 0x31f   :  { %v2374_v16 = vsel %vm2278_vm3, %v2221_v41, 0.0  ;;  %v1692_v38 = vadd.f32 %v1691_v28, %v11299_v7 }
 0x320   :  { %v2406_v42 = vpack.c.bf16 %v2374_v16, %v2374_v16  ;;  %v2150_v27 = vmul.f32 %v2118_v24, %v2086_v19  ;;  %3060 = vmatmul.bf16.gmra.mxu3 %v8729_v9  ;;  %3238 = vmatmul.bf16.gmra.mxu1 %v8729_v9  ;;  %v2119_v41 = vsub.f32 %v1957_v56, %v14782_v51 }
 0x321   :  { %v1781_v35 = vadd.f32 %v11708_v59, %v1692_v38  ;;  %v1870_v19 = vadd.f32 %v1869_v10, %v11307_v26 }
 0x322   :  { %2438 = vst [vmem:[#allocation2 + $0xe0] sm:$0xf] %v2406_v42  ;;  %v11813_v62 = vadd.f32 %v2150_v27, %v14780_v4  ;;  %v11827_v42 = vpop.f32.mrf.mxu1 }
 0x323   :  { %v10223_v2 = vpop.eup %10222  ;;  %v1992_v61 = vmul.f32 0.5, %v1781_v35  ;;  %v1959_v16 = vadd.f32 %v11705_v44, %v1870_v19 }
 0x324   :  { %14781 = vst [vmem:[#allocation27_spill] sm:$0xff] %v11813_v62  ;;  %v2214_v7 = vrot.slane %v11813_v62, 6  ;;  %v2471_v9 = vpack.c.bf16 %v11813_v62, %v11813_v62  ;;  %v2055_v24 = vmul.f32 0.5, %v10223_v2 }
 0x325   :  { %10224 = vtanh.f32 %v1992_v61  ;;  %v9880_v26 = vld [vmem:[#allocation2 + $0xe4] sm:$0xf]  ;;  %v14784_v61 = vld [vmem:[#allocation30_spill] sm:$0xff] }
 0x326   :  { %v2220_v59 = vsel %vm2217_vm12, %v2213_v53, %v2214_v7  ;;  %2503 = vst [vmem:[#allocation2 + $0xec] sm:$0xf] %v2471_v9  ;;  %v2087_v4 = vadd.f32 0.5, %v2055_v24  ;;  %v11829_v27 = vpop.f32.mrf.mxu3  ;;  %v2120_v9 = vsub.f32 %v1959_v16, %v14784_v61 }
 0x327   :  { %v2407_v45 = vpack.c.bf16 %v2220_v59, %v2220_v59 }
 0x328   :  { %v2151_v6 = vmul.f32 %v2119_v41, %v2087_v4  ;;  %v14786_v4 = vld [vmem:[#allocation29_spill] sm:$0xff] }
 0x329   :  { %2439 = vst [vmem:[#allocation2 + $0xe8] sm:$0xf] %v2407_v45  ;;  %vm2250_vm4 = vcmp.ge.s32.totalorder %v14786_v4, 2  ;;  %v9126_v4 = vld [vmem:[#allocation6 + $0x2f8] sm:$0xf0] }
 0x32a   :  { %v11824_v28 = vadd.f32 %v2151_v6, %v14782_v51  ;;  %v11844_v45 = vpop.f32.mrf.mxu1 }
 0x32b   :  { %v10225_v38 = vpop.eup %10224 }
 0x32c   :  { %14783 = vst [vmem:[#allocation28_spill] sm:$0xff] %v11824_v28  ;;  %v2215_v53 = vrot.slane %v11824_v28, 6  ;;  %v2472_v35 = vpack.c.bf16 %v11824_v28, %v11824_v28  ;;  %v2056_v56 = vmul.f32 0.5, %v10225_v38  ;;  %v14787_v38 = vrot.slane %v11322_v14, 6 }
 0x32d   :  { %v8734_v2 = vld [vmem:[#allocation2 + $0xe8] sm:$0xf0] }
 0x32e   :  { %v2219_v10 = vsel %vm2217_vm12, %v2214_v7, %v2215_v53  ;;  %2504 = vst [vmem:[#allocation2 + $0xf4] sm:$0xf] %v2472_v35  ;;  %v2088_v44 = vadd.f32 0.5, %v2056_v56  ;;  %v8737_v24 = vor.u32 %v9880_v26, %v8734_v2  ;;  %v11846_v6 = vpop.f32.mrf.mxu3 }
 0x32f   :  { %v2408_v59 = vpack.c.bf16 %v2219_v10, %v2219_v10 }
 0x330   :  { %v2152_v51 = vmul.f32 %v2120_v9, %v2088_v44  ;;  %3065 = vmatmul.bf16.gmra.mxu3 %v8737_v24  ;;  %3243 = vmatmul.bf16.gmra.mxu1 %v8737_v24 }
 0x331   :  { %2440 = vst [vmem:[#allocation2 + $0xf0] sm:$0xf] %v2408_v59  ;;  %v9853_v59 = vld [vmem:[#allocation2 + $0x4] sm:$0xf0] }
 0x332   :  { %v11838_v41 = vadd.f32 %v2152_v51, %v14784_v61  ;;  %v11854_v44 = vpop.f32.mrf.mxu1 }
 0x334   :  { %14785 = vst [vmem:[#allocation30_spill] sm:$0xff] %v11838_v41  ;;  %v2216_v19 = vrot.slane %v11838_v41, 6  ;;  %v2473_v7 = vpack.c.bf16 %v11838_v41, %v11838_v41 }
 0x335   :  { %v9882_v10 = vld [vmem:[#allocation2 + $0xf4] sm:$0xf] }
 0x336   :  { %v2218_v16 = vsel %vm2217_vm12, %v2215_v53, %v2216_v19  ;;  %v2249_v35 = vsel %vm2217_vm12, %v2216_v19, %v14787_v38  ;;  %2505 = vst [vmem:[#allocation2 + $0xfc] sm:$0xf] %v2473_v7  ;;  %v11856_v24 = vpop.f32.mrf.mxu3  ;;  %v9855_v19 = vld [vmem:[#allocation2 + $0x14] sm:$0xf0]  ;;  %v8628_v7 = vld [vmem:[#allocation2 + $0x10] sm:$0xf] }
 0x337   :  { %v2346_v56 = vsel %vm2250_vm4, %v2249_v35, 0.0  ;;  %v2409_v26 = vpack.c.bf16 %v2218_v16, %v2218_v16  ;;  %v8629_v16 = vor.u32 %v9855_v19, %v8628_v7  ;;  %v9857_v38 = vld [vmem:[#allocation2 + $0x24] sm:$0xf0]  ;;  %v8636_v35 = vld [vmem:[#allocation2 + $0x20] sm:$0xf] }
 0x338   :  { %v2378_v2 = vpack.c.bf16 %v2346_v56, %v2346_v56  ;;  %v8637_v56 = vor.u32 %v9857_v38, %v8636_v35  ;;  %v9865_v7 = vld [vmem:[#allocation2 + $0x64] sm:$0xf0] }
 0x339   :  { %2441 = vst [vmem:[#allocation2 + $0xf8] sm:$0xf] %v2409_v26  ;;  %v9859_v26 = vld [vmem:[#allocation2 + $0x34] sm:$0xf0] }
 0x33a   :  { %2410 = vst [vmem:[#allocation2] sm:$0xf] %v2378_v2  ;;  %v8644_v2 = vld [vmem:[#allocation2 + $0x30] sm:$0xf]  ;;  %v11858_v35 = vpop.f32.mrf.mxu1 }
 0x33d   :  { %v8742_v61 = vld [vmem:[#allocation2 + $0xf8] sm:$0xf0] }
 0x33e   :  { %v8745_v9 = vor.u32 %v9882_v10, %v8742_v61  ;;  %v8645_v10 = vor.u32 %v9859_v26, %v8644_v2  ;;  %v9861_v61 = vld [vmem:[#allocation2 + $0x44] sm:$0xf0]  ;;  %v9867_v26 = vld [vmem:[#allocation2 + $0x74] sm:$0xf0]  ;;  %v9124_v2 = vld [vmem:[#allocation6 + $0x2f0] sm:$0xf] }
 0x340   :  { %3070 = vmatmul.bf16.gmra.mxu3 %v8745_v9  ;;  %3248 = vmatmul.bf16.gmra.mxu1 %v8745_v9  ;;  %v8652_v9 = vld [vmem:[#allocation2 + $0x40] sm:$0xf] }
 0x341   :  { %v8620_v53 = vld [vmem:[#allocation2] sm:$0xf] }
 0x342   :  { %v8621_v51 = vor.u32 %v9853_v59, %v8620_v53  ;;  %v8653_v53 = vor.u32 %v9861_v61, %v8652_v9  ;;  %v9863_v59 = vld [vmem:[#allocation2 + $0x54] sm:$0xf0]  ;;  %v8676_v9 = vld [vmem:[#allocation2 + $0x70] sm:$0xf]  ;;  %v11862_v28 = vpop.f32.mrf.mxu1 }
 0x343   :  { %v9978_v61 = vld [vmem:[#allocation6 + $0x2f4] sm:$0xf]  ;;  %v8677_v41 = vor.u32 %v9867_v26, %v8676_v9  ;;  %v9110_v26 = vld [vmem:[#allocation6 + $0x2d8] sm:$0xf0]  ;;  %v9973_v9 = vld [vmem:[#allocation6 + $0x2c4] sm:$0xf0] }
 0x344   :  { %2906 = vmatmul.bf16.vlgmr.msra.gmra.mxu2 %v8621_v51  ;;  %3084 = vmatmul.bf16.vlgmr.msra.gmra.mxu0 %v8621_v51  ;;  %v8660_v51 = vld [vmem:[#allocation2 + $0x50] sm:$0xf] }
 0x345   :  { %v8661_v19 = vor.u32 %v9863_v59, %v8660_v51  ;;  %v9129_v59 = vor.u32 %v9978_v61, %v9126_v4  ;;  %v9116_v51 = vld [vmem:[#allocation6 + $0x2e0] sm:$0xf] }
 0x347   :  { %4458 = vmatpush.bf16.msrb.mxu1 %v9129_v59 }
 0x34a   :  { %v11866_v0 = vpop.f32.mrf.mxu1 }
 0x354   :  { %2911 = vmatmul.bf16.gmra.mxu2 %v8629_v16  ;;  %3089 = vmatmul.bf16.gmra.mxu0 %v8629_v16  ;;  %v8668_v16 = vld [vmem:[#allocation2 + $0x60] sm:$0xf] }
 0x355   :  { %v8669_v38 = vor.u32 %v9865_v7, %v8668_v16  ;;  %v9976_v7 = vld [vmem:[#allocation6 + $0x2e4] sm:$0xf] }
 0x364   :  { %2916 = vmatmul.bf16.gmra.mxu2 %v8637_v56  ;;  %3094 = vmatmul.bf16.gmra.mxu0 %v8637_v56  ;;  %v11860_v56 = vpop.f32.mrf.mxu3 }
 0x36c   :  { %v11864_v62 = vpop.f32.mrf.mxu3 }
 0x374   :  { %2921 = vmatmul.bf16.gmra.mxu2 %v8645_v10  ;;  %3099 = vmatmul.bf16.gmra.mxu0 %v8645_v10  ;;  %v9979_v10 = vld [vmem:[#allocation6 + $0x2f4] sm:$0xf0] }
 0x384   :  { %2926 = vmatmul.bf16.gmra.mxu2 %v8653_v53  ;;  %3104 = vmatmul.bf16.gmra.mxu0 %v8653_v53  ;;  %v9125_v53 = vor.u32 %v9979_v10, %v9124_v2  ;;  %v9975_v2 = vld [vmem:[#allocation6 + $0x2d4] sm:$0xf0]  ;;  %v9974_v10 = vld [vmem:[#allocation6 + $0x2d4] sm:$0xf] }
 0x385   :  { %v9109_v4 = vor.u32 %v9975_v2, %v9108_v18  ;;  %v9113_v61 = vor.u32 %v9974_v10, %v9110_v26  ;;  %v8684_v2 = vld [vmem:[#allocation2 + $0x80] sm:$0xf]  ;;  %v2572_v26 = vld [vmem:[#allocation8 + $0x2] sm:$0x3] }
 0x386   :  { %4280 = vmatpush.bf16.msrb.mxu3 %v9125_v53  ;;  %v9972_v53 = vld [vmem:[#allocation6 + $0x2c4] sm:$0xf]  ;;  %v8685_v46 = vor.u32 %v9869_v60, %v8684_v2  ;;  %v9966_v60 = vld [vmem:[#allocation6 + $0x294] sm:$0xf] }
 0x394   :  { %2931 = vmatmul.bf16.gmra.mxu2 %v8661_v19  ;;  %3109 = vmatmul.bf16.gmra.mxu0 %v8661_v19  ;;  %v9977_v19 = vld [vmem:[#allocation6 + $0x2e4] sm:$0xf0] }
 0x395   :  { %v9117_v16 = vor.u32 %v9977_v19, %v9116_v51  ;;  %v9102_v51 = vld [vmem:[#allocation6 + $0x2c8] sm:$0xf0] }
 0x396   :  { %v9105_v19 = vor.u32 %v9972_v53, %v9102_v51  ;;  %v9969_v53 = vld [vmem:[#allocation6 + $0x2a4] sm:$0xf0] }
 0x397   :  { %4281 = vmatpush.bf16.msrb.mxu3 %v9117_v16  ;;  %v9092_v16 = vld [vmem:[#allocation6 + $0x2b0] sm:$0xf] }
 0x39b   :  { %4282 = vmatpush.bf16.msrb.mxu3 %v9109_v4  ;;  %v9094_v4 = vld [vmem:[#allocation6 + $0x2b8] sm:$0xf0] }
 0x3a4   :  { %2936 = vmatmul.bf16.gmra.mxu2 %v8669_v38  ;;  %3114 = vmatmul.bf16.gmra.mxu0 %v8669_v38  ;;  %v9118_v38 = vld [vmem:[#allocation6 + $0x2e8] sm:$0xf0] }
 0x3a5   :  { %v9121_v29 = vor.u32 %v9976_v7, %v9118_v38  ;;  %v11868_v7 = vpop.f32.mrf.mxu3  ;;  %v9971_v38 = vld [vmem:[#allocation6 + $0x2b4] sm:$0xf0] }
 0x3a6   :  { %v9093_v10 = vor.u32 %v9971_v38, %v9092_v16  ;;  %v9076_v16 = vld [vmem:[#allocation6 + $0x290] sm:$0xf]  ;;  %v9967_v38 = vld [vmem:[#allocation6 + $0x294] sm:$0xf0] }
 0x3a7   :  { %4459 = vmatpush.bf16.msrb.mxu1 %v9121_v29  ;;  %v9970_v29 = vld [vmem:[#allocation6 + $0x2b4] sm:$0xf]  ;;  %v9077_v2 = vor.u32 %v9967_v38, %v9076_v16 }
 0x3ab   :  { %4460 = vmatpush.bf16.msrb.mxu1 %v9113_v61  ;;  %v9097_v61 = vor.u32 %v9970_v29, %v9094_v4  ;;  %v11873_v4 = vpop.f32.mrf.mxu1 }
 0x3af   :  { %4461 = vmatpush.bf16.msrb.mxu1 %v9105_v19 }
 0x3b3   :  { %4462 = vmatpush.bf16.msrb.mxu1 %v9097_v61 }
 0x3b4   :  { %2941 = vmatmul.bf16.gmra.mxu2 %v8677_v41  ;;  %3119 = vmatmul.bf16.gmra.mxu0 %v8677_v41  ;;  %v9100_v41 = vld [vmem:[#allocation6 + $0x2c0] sm:$0xf] }
 0x3b5   :  { %v9101_v59 = vor.u32 %v9973_v9, %v9100_v41  ;;  %v11870_v41 = vperm.slane %v2572_v26, 0  ;;  %v9084_v9 = vld [vmem:[#allocation6 + $0x2a0] sm:$0xf] }
 0x3b6   :  { %v9085_v51 = vor.u32 %v9969_v53, %v9084_v9  ;;  %v11878_v53 = vperm.slane %v2572_v26, 1  ;;  %v8692_v26 = vld [vmem:[#allocation2 + $0x90] sm:$0xf] }
 0x3b7   :  { %4283 = vmatpush.bf16.msrb.mxu3 %v9101_v59  ;;  %v9968_v59 = vld [vmem:[#allocation6 + $0x2a4] sm:$0xf] }
 0x3b8   :  { %v9089_v12 = vor.u32 %v9968_v59, %v9086_v11  ;;  %v9068_v59 = vld [vmem:[#allocation6 + $0x280] sm:$0xf] }
 0x3ba   :  { %4463 = vmatpush.bf16.msrb.mxu1 %v9089_v12  ;;  %v9073_v12 = vor.u32 %v9964_v48, %v9070_v33 }
 0x3bb   :  { %4284 = vmatpush.bf16.msrb.mxu3 %v9093_v10  ;;  %v9078_v10 = vld [vmem:[#allocation6 + $0x298] sm:$0xf0] }
 0x3bc   :  { %v9081_v9 = vor.u32 %v9966_v60, %v9078_v10 }
 0x3be   :  { %4464 = vmatpush.bf16.msrb.mxu1 %v9081_v9  ;;  %v11884_v9 = vpop.f32.mrf.mxu1 }
 0x3bf   :  { %4285 = vmatpush.bf16.msrb.mxu3 %v9085_v51 }
 0x3c1   :  { %v3085_v18 = vpop.f32.mrf.mxu0 }
 0x3c2   :  { %v3086_v16 = vadd.f32 %v3085_v18, %v11878_v53  ;;  %4465 = vmatpush.bf16.msrb.mxu1 %v9073_v12 }
 0x3c3   :  { %4286 = vmatpush.bf16.msrb.mxu3 %v9077_v2  ;;  %v8693_v2 = vor.u32 %v9871_v32, %v8692_v26 }
 0x3c4   :  { %2946 = vmatmul.bf16.gmra.mxu2 %v8685_v46  ;;  %3124 = vmatmul.bf16.gmra.mxu0 %v8685_v46  ;;  %v11875_v46 = vpop.f32.mrf.mxu3  ;;  %v3175_v10 = vadd.f32 %v11722_v20, %v3086_v16  ;;  %v9060_v16 = vld [vmem:[#allocation6 + $0x270] sm:$0xf] }
 0x3c6   :  { %v3382_v18 = vsub.f32 %v3175_v10, %v11322_v14 }
 0x3c7   :  { %v2907_v54 = vpop.f32.mrf.mxu2 }
 0x3c8   :  { %v2908_v19 = vadd.f32 %v2907_v54, %v11870_v41  ;;  %v9965_v54 = vld [vmem:[#allocation6 + $0x284] sm:$0xf0] }
 0x3c9   :  { %v3087_v29 = vpop.f32.mrf.mxu0  ;;  %v9069_v51 = vor.u32 %v9965_v54, %v9068_v59 }
 0x3ca   :  { %v2997_v61 = vadd.f32 %v11726_v34, %v2908_v19  ;;  %v3088_v54 = vadd.f32 %v3087_v29, %v11878_v53 }
 0x3cb   :  { %4287 = vmatpush.bf16.msrb.mxu3 %v9069_v51 }
 0x3cc   :  { %v3254_v11 = vmul.f32 0.5, %v2997_v61  ;;  %v3177_v26 = vadd.f32 %v11745_v50, %v3088_v54 }
 0x3ce   :  { %10226 = vtanh.f32 %v3254_v11  ;;  %v11886_v11 = vpop.f32.mrf.mxu3 }
 0x3cf   :  { %v2909_v38 = vpop.f32.mrf.mxu2 }
 0x3d0   :  { %v2910_v34 = vadd.f32 %v2909_v38, %v11870_v41  ;;  %v9963_v38 = vld [vmem:[#allocation6 + $0x274] sm:$0xf0] }
 0x3d1   :  { %v3090_v19 = vpop.f32.mrf.mxu0 }
 0x3d2   :  { %v2999_v60 = vadd.f32 %v11747_v57, %v2910_v34 }
 0x3d4   :  { %v10227_v61 = vpop.eup %10226  ;;  %v3255_v33 = vmul.f32 0.5, %v2999_v60  ;;  %2951 = vmatmul.bf16.gmra.mxu2 %v8693_v2  ;;  %3129 = vmatmul.bf16.gmra.mxu0 %v8693_v2  ;;  %v9061_v60 = vor.u32 %v9963_v38, %v9060_v16 }
 0x3d5   :  { %v3318_v48 = vmul.f32 0.5, %v10227_v61 }
 0x3d6   :  { %10228 = vtanh.f32 %v3255_v33  ;;  %4191 = vmatpush.bf16.msrb.mxu2 %v9061_v60  ;;  %v11898_v33 = vpop.f32.mrf.mxu1 }
 0x3d7   :  { %v3350_v59 = vadd.f32 0.5, %v3318_v48  ;;  %v2912_v51 = vpop.f32.mrf.mxu2  ;;  %v11900_v48 = vpop.f32.mrf.mxu3 }
 0x3d8   :  { %v2913_v32 = vadd.f32 %v2912_v51, %v11870_v41 }
 0x3d9   :  { %v3414_v57 = vmul.f32 %v3382_v18, %v3350_v59  ;;  %v3092_v20 = vpop.f32.mrf.mxu0  ;;  %v3091_v18 = vadd.f32 %v3090_v19, %v11878_v53  ;;  %v9873_v59 = vld [vmem:[#allocation2 + $0xa4] sm:$0xf0] }
 0x3da   :  { %v3002_v12 = vadd.f32 %v11768_v17, %v2913_v32  ;;  %v3383_v17 = vsub.f32 %v3177_v26, %v11336_v1 }
 0x3db   :  { %v11893_v34 = vadd.f32 %v3414_v57, %v11322_v14  ;;  %v8700_v57 = vld [vmem:[#allocation2 + $0xa0] sm:$0xf]  ;;  %v3180_v60 = vadd.f32 %v11765_v58, %v3091_v18 }
 0x3dc   :  { %v10229_v2 = vpop.eup %10228  ;;  %v3256_v10 = vmul.f32 0.5, %v3002_v12  ;;  %v8701_v16 = vor.u32 %v9873_v59, %v8700_v57 }
 0x3dd   :  { %v3735_v29 = vpack.c.bf16 %v11893_v34, %v11893_v34  ;;  %v3319_v61 = vmul.f32 0.5, %v10229_v2  ;;  %v14619_v19 = vrot.slane %v11893_v34, 4  ;;  %v3384_v58 = vsub.f32 %v3180_v60, %v11358_v30 }
 0x3de   :  { %10230 = vtanh.f32 %v3256_v10  ;;  %v11921_v18 = vpop.f32.mrf.mxu1 }
 0x3df   :  { %3767 = vst [vmem:[#allocation2 + $0x4] sm:$0xf] %v3735_v29  ;;  %v3351_v14 = vadd.f32 0.5, %v3319_v61  ;;  %v2914_v50 = vpop.f32.mrf.mxu2  ;;  %v3093_v61 = vadd.f32 %v3092_v20, %v11878_v53 }
 0x3e0   :  { %v2915_v54 = vadd.f32 %v2914_v50, %v11870_v41  ;;  %v11923_v50 = vpop.f32.mrf.mxu3 }
 0x3e1   :  { %v3415_v51 = vmul.f32 %v3383_v17, %v3351_v14  ;;  %v3095_v32 = vpop.f32.mrf.mxu0  ;;  %v3182_v57 = vadd.f32 %v11787_v63, %v3093_v61 }
 0x3e2   :  { %v3004_v12 = vadd.f32 %v11789_v5, %v2915_v54 }
 0x3e3   :  { %v11907_v38 = vadd.f32 %v3415_v51, %v11336_v1 }
 0x3e4   :  { %v10231_v2 = vpop.eup %10230  ;;  %v3257_v26 = vmul.f32 0.5, %v3004_v12  ;;  %2956 = vmatmul.bf16.gmra.mxu2 %v8701_v16  ;;  %3134 = vmatmul.bf16.gmra.mxu0 %v8701_v16 }
 0x3e5   :  { %v3479_v10 = vrot.slane %v11907_v38, 4  ;;  %v3736_v29 = vpack.c.bf16 %v11907_v38, %v11907_v38  ;;  %v3320_v5 = vmul.f32 0.5, %v10231_v2 }
 0x3e6   :  { %10232 = vtanh.f32 %v3257_v26 }
 0x3e7   :  { %v3541_v1 = vsel %vm3510_vm5, %v14619_v19, %v3479_v10  ;;  %3768 = vst [vmem:[#allocation2 + $0xc] sm:$0xf] %v3736_v29  ;;  %v3352_v17 = vadd.f32 0.5, %v3320_v5  ;;  %v2917_v14 = vpop.f32.mrf.mxu2 }
 0x3e8   :  { %v3672_v59 = vpack.c.bf16 %v3541_v1, %v3541_v1  ;;  %v2918_v54 = vadd.f32 %v2917_v14, %v11870_v41  ;;  %v3385_v1 = vsub.f32 %v3182_v57, %v11374_v8  ;;  %v8708_v57 = vld [vmem:[#allocation2 + $0xb0] sm:$0xf]  ;;  %v11941_v19 = vpop.f32.mrf.mxu3 }
 0x3e9   :  { %v3416_v51 = vmul.f32 %v3384_v58, %v3352_v17  ;;  %v3097_v20 = vpop.f32.mrf.mxu0  ;;  %v9916_v58 = vld [vmem:[#allocation2 + $0x4] sm:$0xf] }
 0x3ea   :  { %3704 = vst [vmem:[#allocation2 + $0x8] sm:$0xf] %v3672_v59  ;;  %v3007_v12 = vadd.f32 %v11810_v39, %v2918_v54  ;;  %v9875_v59 = vld [vmem:[#allocation2 + $0xb4] sm:$0xf0] }
 0x3eb   :  { %v11929_v16 = vadd.f32 %v3416_v51, %v11358_v30  ;;  %v3096_v30 = vadd.f32 %v3095_v32, %v11878_v53 }
 0x3ec   :  { %v10233_v60 = vpop.eup %10232  ;;  %v3258_v2 = vmul.f32 0.5, %v3007_v12 }
 0x3ed   :  { %v3480_v26 = vrot.slane %v11929_v16, 4  ;;  %v3737_v29 = vpack.c.bf16 %v11929_v16, %v11929_v16  ;;  %v3321_v5 = vmul.f32 0.5, %v10233_v60 }
 0x3ee   :  { %10234 = vtanh.f32 %v3258_v2  ;;  %v8878_v17 = vld [vmem:[#allocation2 + $0x8] sm:$0xf0]  ;;  %v11939_v2 = vpop.f32.mrf.mxu1 }
 0x3ef   :  { %v3540_v63 = vsel %vm3510_vm5, %v3479_v10, %v3480_v26  ;;  %3769 = vst [vmem:[#allocation2 + $0x14] sm:$0xf] %v3737_v29  ;;  %v3353_v39 = vadd.f32 0.5, %v3321_v5  ;;  %v2919_v61 = vpop.f32.mrf.mxu2  ;;  %v8881_v14 = vor.u32 %v9916_v58, %v8878_v17  ;;  %v8709_v29 = vor.u32 %v9875_v59, %v8708_v57 }
 0x3f0   :  { %v3673_v54 = vpack.c.bf16 %v3540_v63, %v3540_v63  ;;  %v2920_v51 = vadd.f32 %v2919_v61, %v11870_v41  ;;  %v3185_v5 = vadd.f32 %v11808_v49, %v3096_v30  ;;  %v3098_v61 = vadd.f32 %v3097_v20, %v11878_v53  ;;  %v9052_v20 = vld [vmem:[#allocation6 + $0x260] sm:$0xf] }
 0x3f1   :  { %v3417_v12 = vmul.f32 %v3385_v1, %v3353_v39  ;;  %v3100_v60 = vpop.f32.mrf.mxu0  ;;  %4288 = vmatmul.bf16.vlgmr.msrb.gmra.mxu3 %v8881_v14  ;;  %4466 = vmatmul.bf16.vlgmr.msrb.gmra.mxu1 %v8881_v14 }
 0x3f2   :  { %3705 = vst [vmem:[#allocation2 + $0x10] sm:$0xf] %v3673_v54  ;;  %v3009_v10 = vadd.f32 %v11829_v27, %v2920_v51 }
 0x3f3   :  { %v11945_v32 = vadd.f32 %v3417_v12, %v11374_v8  ;;  %v3386_v8 = vsub.f32 %v3185_v5, %v11388_v13  ;;  %v3187_v12 = vadd.f32 %v11827_v42, %v3098_v61 }
 0x3f4   :  { %v10235_v58 = vpop.eup %10234  ;;  %v3259_v17 = vmul.f32 0.5, %v3009_v10  ;;  %2961 = vmatmul.bf16.gmra.mxu2 %v8709_v29  ;;  %3139 = vmatmul.bf16.gmra.mxu0 %v8709_v29  ;;  %v9961_v10 = vld [vmem:[#allocation6 + $0x264] sm:$0xf0] }
 0x3f5   :  { %v3481_v1 = vrot.slane %v11945_v32, 4  ;;  %v3738_v63 = vpack.c.bf16 %v11945_v32, %v11945_v32  ;;  %v3322_v39 = vmul.f32 0.5, %v10235_v58  ;;  %v3387_v61 = vsub.f32 %v3187_v12, %v11407_v47 }
 0x3f6   :  { %10236 = vtanh.f32 %v3259_v17  ;;  %v11961_v5 = vpop.f32.mrf.mxu1  ;;  %v11963_v17 = vpop.f32.mrf.mxu3 }
 0x3f7   :  { %v3539_v27 = vsel %vm3510_vm5, %v3480_v26, %v3481_v1  ;;  %3770 = vst [vmem:[#allocation2 + $0x1c] sm:$0xf] %v3738_v63  ;;  %v3354_v49 = vadd.f32 0.5, %v3322_v39  ;;  %v2922_v30 = vpop.f32.mrf.mxu2  ;;  %v9053_v26 = vor.u32 %v9961_v10, %v9052_v20 }
 0x3f8   :  { %v3674_v14 = vpack.c.bf16 %v3539_v27, %v3539_v27  ;;  %v2923_v59 = vadd.f32 %v2922_v30, %v11870_v41  ;;  %v3101_v30 = vadd.f32 %v3100_v60, %v11878_v53 }
 0x3f9   :  { %v3418_v54 = vmul.f32 %v3386_v8, %v3354_v49  ;;  %v3102_v51 = vpop.f32.mrf.mxu0  ;;  %4192 = vmatpush.bf16.msrb.mxu2 %v9053_v26 }
 0x3fa   :  { %3706 = vst [vmem:[#allocation2 + $0x18] sm:$0xf] %v3674_v14  ;;  %v3012_v57 = vadd.f32 %v11846_v6, %v2923_v59 }
 0x3fb   :  { %v11959_v29 = vadd.f32 %v3418_v54, %v11388_v13  ;;  %v9918_v13 = vld [vmem:[#allocation2 + $0x14] sm:$0xf]  ;;  %v9877_v54 = vld [vmem:[#allocation2 + $0xc4] sm:$0xf0] }
 0x3fc   :  { %v10237_v58 = vpop.eup %10236  ;;  %v3260_v63 = vmul.f32 0.5, %v3012_v57 }
 0x3fd   :  { %v3482_v39 = vrot.slane %v11959_v29, 4  ;;  %v3739_v42 = vpack.c.bf16 %v11959_v29, %v11959_v29  ;;  %v3323_v6 = vmul.f32 0.5, %v10237_v58  ;;  %v8716_v58 = vld [vmem:[#allocation2 + $0xc0] sm:$0xf] }
 0x3fe   :  { %10238 = vtanh.f32 %v3260_v63  ;;  %v8886_v27 = vld [vmem:[#allocation2 + $0x18] sm:$0xf0]  ;;  %v8717_v63 = vor.u32 %v9877_v54, %v8716_v58 }
 0x3ff   :  { %v3538_v8 = vsel %vm3510_vm5, %v3481_v1, %v3482_v39  ;;  %3771 = vst [vmem:[#allocation2 + $0x24] sm:$0xf] %v3739_v42  ;;  %v3355_v49 = vadd.f32 0.5, %v3323_v6  ;;  %v2924_v14 = vpop.f32.mrf.mxu2  ;;  %v8889_v59 = vor.u32 %v9918_v13, %v8886_v27  ;;  %v3190_v42 = vadd.f32 %v11844_v45, %v3101_v30 }
 0x400   :  { %v3643_v57 = vsel %vm3547_vm6, %v3538_v8, 0.0  ;;  %v2925_v20 = vadd.f32 %v2924_v14, %v11870_v41  ;;  %v11984_v8 = vpop.f32.mrf.mxu1 }
 0x401   :  { %v3675_v10 = vpack.c.bf16 %v3643_v57, %v3643_v57  ;;  %v3419_v12 = vmul.f32 %v3387_v61, %v3355_v49  ;;  %v3105_v26 = vpop.f32.mrf.mxu0  ;;  %4293 = vmatmul.bf16.gmra.mxu3 %v8889_v59  ;;  %4471 = vmatmul.bf16.gmra.mxu1 %v8889_v59  ;;  %v3103_v49 = vadd.f32 %v3102_v51, %v11878_v53 }
 0x402   :  { %v3014_v1 = vadd.f32 %v11856_v24, %v2925_v20  ;;  %v11986_v24 = vpop.f32.mrf.mxu3  ;;  %v3388_v45 = vsub.f32 %v3190_v42, %v11425_v25 }
 0x403   :  { %3707 = vst [vmem:[#allocation2 + $0x20] sm:$0xf] %v3675_v10  ;;  %v11978_v60 = vadd.f32 %v3419_v12, %v11407_v47  ;;  %v3192_v10 = vadd.f32 %v11854_v44, %v3103_v49 }
 0x404   :  { %v10239_v6 = vpop.eup %10238  ;;  %v3261_v22 = vmul.f32 0.5, %v3014_v1  ;;  %2966 = vmatmul.bf16.gmra.mxu2 %v8717_v63  ;;  %3144 = vmatmul.bf16.gmra.mxu0 %v8717_v63 }
 0x405   :  { %v3483_v13 = vrot.slane %v11978_v60, 4  ;;  %v3740_v61 = vpack.c.bf16 %v11978_v60, %v11978_v60  ;;  %v3324_v27 = vmul.f32 0.5, %v10239_v6  ;;  %v3389_v6 = vsub.f32 %v3192_v10, %v11441_v55  ;;  %v8724_v10 = vld [vmem:[#allocation2 + $0xd0] sm:$0xf] }
 0x406   :  { %10240 = vtanh.f32 %v3261_v22  ;;  %v9920_v22 = vld [vmem:[#allocation2 + $0x24] sm:$0xf] }
 0x407   :  { %v3537_v47 = vsel %vm3510_vm5, %v3482_v39, %v3483_v13  ;;  %3772 = vst [vmem:[#allocation2 + $0x2c] sm:$0xf] %v3740_v61  ;;  %v3356_v30 = vadd.f32 0.5, %v3324_v27  ;;  %v2927_v14 = vpop.f32.mrf.mxu2 }
 0x408   :  { %v3676_v59 = vpack.c.bf16 %v3537_v47, %v3537_v47  ;;  %v2928_v54 = vadd.f32 %v2927_v14, %v11870_v41  ;;  %v9879_v47 = vld [vmem:[#allocation2 + $0xd4] sm:$0xf0] }
 0x409   :  { %v3420_v57 = vmul.f32 %v3388_v45, %v3356_v30  ;;  %v3107_v20 = vpop.f32.mrf.mxu0  ;;  %v12005_v45 = vpop.f32.mrf.mxu1 }
 0x40a   :  { %3708 = vst [vmem:[#allocation2 + $0x28] sm:$0xf] %v3676_v59  ;;  %v3017_v12 = vadd.f32 %v11860_v56, %v2928_v54  ;;  %v12007_v30 = vpop.f32.mrf.mxu3 }
 0x40b   :  { %v11996_v51 = vadd.f32 %v3420_v57, %v11425_v25  ;;  %v3106_v25 = vadd.f32 %v3105_v26, %v11878_v53 }
 0x40c   :  { %v10241_v58 = vpop.eup %10240  ;;  %v3262_v39 = vmul.f32 0.5, %v3017_v12  ;;  %v8725_v12 = vor.u32 %v9879_v47, %v8724_v10 }
 0x40d   :  { %v3484_v1 = vrot.slane %v11996_v51, 4  ;;  %v3741_v63 = vpack.c.bf16 %v11996_v51, %v11996_v51  ;;  %v3325_v42 = vmul.f32 0.5, %v10241_v58  ;;  %v3195_v58 = vadd.f32 %v11858_v35, %v3106_v25 }
 0x40e   :  { %10242 = vtanh.f32 %v3262_v39  ;;  %v8894_v61 = vld [vmem:[#allocation2 + $0x28] sm:$0xf0] }
 0x40f   :  { %v3536_v44 = vsel %vm3510_vm5, %v3483_v13, %v3484_v1  ;;  %3773 = vst [vmem:[#allocation2 + $0x34] sm:$0xf] %v3741_v63  ;;  %v3357_v56 = vadd.f32 0.5, %v3325_v42  ;;  %v2929_v27 = vpop.f32.mrf.mxu2  ;;  %v8897_v49 = vor.u32 %v9920_v22, %v8894_v61  ;;  %v3108_v61 = vadd.f32 %v3107_v20, %v11878_v53 }
 0x410   :  { %v3677_v14 = vpack.c.bf16 %v3536_v44, %v3536_v44  ;;  %v2930_v59 = vadd.f32 %v2929_v27, %v11870_v41 }
 0x411   :  { %v3421_v54 = vmul.f32 %v3389_v6, %v3357_v56  ;;  %v3110_v57 = vpop.f32.mrf.mxu0  ;;  %4298 = vmatmul.bf16.gmra.mxu3 %v8897_v49  ;;  %4476 = vmatmul.bf16.gmra.mxu1 %v8897_v49  ;;  %v12023_v47 = vpop.f32.mrf.mxu1  ;;  %v3197_v20 = vadd.f32 %v11862_v28, %v3108_v61 }
 0x412   :  { %3709 = vst [vmem:[#allocation2 + $0x30] sm:$0xf] %v3677_v14  ;;  %v3019_v13 = vadd.f32 %v11864_v62, %v2930_v59  ;;  %v12025_v14 = vpop.f32.mrf.mxu3 }
 0x413   :  { %v12012_v26 = vadd.f32 %v3421_v54, %v11441_v55  ;;  %v3390_v55 = vsub.f32 %v3195_v58, %v11459_v3  ;;  %v9959_v54 = vld [vmem:[#allocation6 + $0x254] sm:$0xf0]  ;;  %v3391_v28 = vsub.f32 %v3197_v20, %v11474_v23 }
 0x414   :  { %v10243_v39 = vpop.eup %10242  ;;  %v3263_v63 = vmul.f32 0.5, %v3019_v13  ;;  %2971 = vmatmul.bf16.gmra.mxu2 %v8725_v12  ;;  %3149 = vmatmul.bf16.gmra.mxu0 %v8725_v12 }
 0x415   :  { %v3485_v42 = vrot.slane %v12012_v26, 4  ;;  %v3742_v6 = vpack.c.bf16 %v12012_v26, %v12012_v26  ;;  %v3326_v22 = vmul.f32 0.5, %v10243_v39 }
 0x416   :  { %10244 = vtanh.f32 %v3263_v63 }
 0x417   :  { %v3535_v62 = vsel %vm3510_vm5, %v3484_v1, %v3485_v42  ;;  %3774 = vst [vmem:[#allocation2 + $0x3c] sm:$0xf] %v3742_v6  ;;  %v3358_v35 = vadd.f32 0.5, %v3326_v22  ;;  %v2932_v44 = vpop.f32.mrf.mxu2  ;;  %v9044_v1 = vld [vmem:[#allocation6 + $0x250] sm:$0xf] }
 0x418   :  { %v3678_v56 = vpack.c.bf16 %v3535_v62, %v3535_v62  ;;  %v2933_v25 = vadd.f32 %v2932_v44, %v11870_v41  ;;  %v9045_v13 = vor.u32 %v9959_v54, %v9044_v1  ;;  %v3111_v62 = vadd.f32 %v3110_v57, %v11878_v53  ;;  %v9881_v44 = vld [vmem:[#allocation2 + $0xe4] sm:$0xf0]  ;;  %v8732_v1 = vld [vmem:[#allocation2 + $0xe0] sm:$0xf] }
 0x419   :  { %v3422_v27 = vmul.f32 %v3390_v55, %v3358_v35  ;;  %v3112_v49 = vpop.f32.mrf.mxu0  ;;  %v8733_v54 = vor.u32 %v9881_v44, %v8732_v1  ;;  %v12048_v52 = vpop.f32.mrf.mxu1 }
 0x41a   :  { %3710 = vst [vmem:[#allocation2 + $0x38] sm:$0xf] %v3678_v56  ;;  %v3022_v59 = vadd.f32 %v11868_v7, %v2933_v25  ;;  %4193 = vmatpush.bf16.msrb.mxu2 %v9045_v13  ;;  %v9922_v7 = vld [vmem:[#allocation2 + $0x34] sm:$0xf]  ;;  %v3200_v13 = vadd.f32 %v11866_v0, %v3111_v62 }
 0x41b   :  { %v12030_v10 = vadd.f32 %v3422_v27, %v11459_v3 }
 0x41c   :  { %v10245_v12 = vpop.eup %10244  ;;  %v3264_v58 = vmul.f32 0.5, %v3022_v59  ;;  %v3392_v0 = vsub.f32 %v3200_v13, %v11492_v31 }
 0x41d   :  { %v3486_v39 = vrot.slane %v12030_v10, 4  ;;  %v3743_v63 = vpack.c.bf16 %v12030_v10, %v12030_v10  ;;  %v3327_v6 = vmul.f32 0.5, %v10245_v12 }
 0x41e   :  { %10246 = vtanh.f32 %v3264_v58  ;;  %v8902_v22 = vld [vmem:[#allocation2 + $0x38] sm:$0xf0]  ;;  %v12050_v58 = vpop.f32.mrf.mxu3 }
 0x41f   :  { %v3534_v3 = vsel %vm3510_vm5, %v3485_v42, %v3486_v39  ;;  %3775 = vst [vmem:[#allocation2 + $0x44] sm:$0xf] %v3743_v63  ;;  %v3359_v61 = vadd.f32 0.5, %v3327_v6  ;;  %v2934_v55 = vpop.f32.mrf.mxu2  ;;  %v8905_v35 = vor.u32 %v9922_v7, %v8902_v22  ;;  %v3113_v7 = vadd.f32 %v3112_v49, %v11878_v53 }
 0x420   :  { %v3647_v56 = vsel %vm3551_vm7, %v3534_v3, 0.0  ;;  %v2935_v25 = vadd.f32 %v2934_v55, %v11870_v41 }
 0x421   :  { %v3679_v27 = vpack.c.bf16 %v3647_v56, %v3647_v56  ;;  %v3423_v20 = vmul.f32 %v3391_v28, %v3359_v61  ;;  %v3115_v59 = vpop.f32.mrf.mxu0  ;;  %4303 = vmatmul.bf16.gmra.mxu3 %v8905_v35  ;;  %4481 = vmatmul.bf16.gmra.mxu1 %v8905_v35  ;;  %v3202_v44 = vadd.f32 %v11873_v4, %v3113_v7  ;;  %v9883_v7 = vld [vmem:[#allocation2 + $0xf4] sm:$0xf0] }
 0x422   :  { %v3024_v42 = vadd.f32 %v11875_v46, %v2935_v25 }
 0x423   :  { %3711 = vst [vmem:[#allocation2 + $0x40] sm:$0xf] %v3679_v27  ;;  %v12045_v57 = vadd.f32 %v3423_v20, %v11474_v23  ;;  %v3393_v13 = vsub.f32 %v3202_v44, %v11508_v15 }
 0x424   :  { %v10247_v12 = vpop.eup %10246  ;;  %v3265_v63 = vmul.f32 0.5, %v3024_v42  ;;  %2976 = vmatmul.bf16.gmra.mxu2 %v8733_v54  ;;  %3154 = vmatmul.bf16.gmra.mxu0 %v8733_v54  ;;  %v12068_v42 = vpop.f32.mrf.mxu1 }
 0x425   :  { %v3487_v6 = vrot.slane %v12045_v57, 4  ;;  %v3744_v46 = vpack.c.bf16 %v12045_v57, %v12045_v57  ;;  %v3328_v28 = vmul.f32 0.5, %v10247_v12 }
 0x426   :  { %10248 = vtanh.f32 %v3265_v63  ;;  %v12070_v54 = vpop.f32.mrf.mxu3  ;;  %v9924_v4 = vld [vmem:[#allocation2 + $0x44] sm:$0xf]  ;;  %v3116_v63 = vadd.f32 %v3115_v59, %v11878_v53 }
 0x427   :  { %v3533_v23 = vsel %vm3510_vm5, %v3486_v39, %v3487_v6  ;;  %3776 = vst [vmem:[#allocation2 + $0x4c] sm:$0xf] %v3744_v46  ;;  %v3360_v22 = vadd.f32 0.5, %v3328_v28  ;;  %v2937_v3 = vpop.f32.mrf.mxu2 }
 0x428   :  { %v3680_v61 = vpack.c.bf16 %v3533_v23, %v3533_v23  ;;  %v2938_v62 = vadd.f32 %v2937_v3, %v11870_v41  ;;  %v3205_v59 = vadd.f32 %v11884_v9, %v3116_v63 }
 0x429   :  { %v3424_v55 = vmul.f32 %v3392_v0, %v3360_v22  ;;  %v3117_v35 = vpop.f32.mrf.mxu0 }
 0x42a   :  { %3712 = vst [vmem:[#allocation2 + $0x48] sm:$0xf] %v3680_v61  ;;  %v3027_v56 = vadd.f32 %v11886_v11, %v2938_v62  ;;  %v8740_v61 = vld [vmem:[#allocation2 + $0xf0] sm:$0xf] }
 0x42b   :  { %v12063_v49 = vadd.f32 %v3424_v55, %v11492_v31  ;;  %v8741_v55 = vor.u32 %v9883_v7, %v8740_v61  ;;  %v9957_v7 = vld [vmem:[#allocation6 + $0x244] sm:$0xf0] }
 0x42c   :  { %v10249_v25 = vpop.eup %10248  ;;  %v3266_v39 = vmul.f32 0.5, %v3027_v56 }
 0x42d   :  { %v3488_v27 = vrot.slane %v12063_v49, 4  ;;  %v3745_v20 = vpack.c.bf16 %v12063_v49, %v12063_v49  ;;  %v3329_v1 = vmul.f32 0.5, %v10249_v25 }
 0x42e   :  { %10250 = vtanh.f32 %v3266_v39  ;;  %v8910_v11 = vld [vmem:[#allocation2 + $0x48] sm:$0xf0] }
 0x42f   :  { %v3532_v31 = vsel %vm3510_vm5, %v3487_v6, %v3488_v27  ;;  %3777 = vst [vmem:[#allocation2 + $0x54] sm:$0xf] %v3745_v20  ;;  %v3361_v12 = vadd.f32 0.5, %v3329_v1  ;;  %v2939_v46 = vpop.f32.mrf.mxu2  ;;  %v8913_v28 = vor.u32 %v9924_v4, %v8910_v11  ;;  %v3118_v1 = vadd.f32 %v3117_v35, %v11878_v53  ;;  %v12089_v4 = vpop.f32.mrf.mxu1 }
 0x430   :  { %v3681_v23 = vpack.c.bf16 %v3532_v31, %v3532_v31  ;;  %v2940_v0 = vadd.f32 %v2939_v46, %v11870_v41  ;;  %v12091_v11 = vpop.f32.mrf.mxu3 }
 0x431   :  { %v3425_v22 = vmul.f32 %v3393_v13, %v3361_v12  ;;  %v3120_v3 = vpop.f32.mrf.mxu0  ;;  %4308 = vmatmul.bf16.gmra.mxu3 %v8913_v28  ;;  %4486 = vmatmul.bf16.gmra.mxu1 %v8913_v28  ;;  %v3207_v35 = vadd.f32 %v11898_v33, %v3118_v1 }
 0x432   :  { %3713 = vst [vmem:[#allocation2 + $0x50] sm:$0xf] %v3681_v23  ;;  %v3029_v62 = vadd.f32 %v11900_v48, %v2940_v0 }
 0x433   :  { %v12079_v6 = vadd.f32 %v3425_v22, %v11508_v15  ;;  %v3394_v15 = vsub.f32 %v3205_v59, %v11526_v21  ;;  %v3395_v33 = vsub.f32 %v3207_v35, %v11543_v43 }
 0x434   :  { %v10251_v44 = vpop.eup %10250  ;;  %v3267_v56 = vmul.f32 0.5, %v3029_v62  ;;  %2981 = vmatmul.bf16.gmra.mxu2 %v8741_v55  ;;  %3159 = vmatmul.bf16.gmra.mxu0 %v8741_v55 }
 0x435   :  { %v3489_v25 = vrot.slane %v12079_v6, 4  ;;  %v3746_v39 = vpack.c.bf16 %v12079_v6, %v12079_v6  ;;  %v3330_v20 = vmul.f32 0.5, %v10251_v44 }
 0x436   :  { %10252 = vtanh.f32 %v3267_v56 }
 0x437   :  { %v3531_v48 = vsel %vm3510_vm5, %v3488_v27, %v3489_v25  ;;  %3778 = vst [vmem:[#allocation2 + $0x5c] sm:$0xf] %v3746_v39  ;;  %v3362_v9 = vadd.f32 0.5, %v3330_v20  ;;  %v2942_v13 = vpop.f32.mrf.mxu2  ;;  %v9036_v27 = vld [vmem:[#allocation6 + $0x240] sm:$0xf]  ;;  %v3121_v39 = vadd.f32 %v3120_v3, %v11878_v53 }
 0x438   :  { %v3682_v31 = vpack.c.bf16 %v3531_v48, %v3531_v48  ;;  %v2943_v12 = vadd.f32 %v2942_v13, %v11870_v41  ;;  %v9037_v0 = vor.u32 %v9957_v7, %v9036_v27 }
 0x439   :  { %v3426_v63 = vmul.f32 %v3394_v15, %v3362_v9  ;;  %v3122_v46 = vpop.f32.mrf.mxu0  ;;  %v3210_v3 = vadd.f32 %v11921_v18, %v3121_v39 }
 0x43a   :  { %3714 = vst [vmem:[#allocation2 + $0x58] sm:$0xf] %v3682_v31  ;;  %v3032_v28 = vadd.f32 %v11923_v50, %v2943_v12  ;;  %4194 = vmatpush.bf16.msrb.mxu2 %v9037_v0  ;;  %v9926_v50 = vld [vmem:[#allocation2 + $0x54] sm:$0xf]  ;;  %v12108_v31 = vpop.f32.mrf.mxu1  ;;  %v12110_v12 = vpop.f32.mrf.mxu3 }
 0x43b   :  { %v12097_v23 = vadd.f32 %v3426_v63, %v11526_v21 }
 0x43c   :  { %v10253_v22 = vpop.eup %10252  ;;  %v3268_v61 = vmul.f32 0.5, %v3032_v28 }
 0x43d   :  { %14788 = vst [vmem:[#allocation35_spill] sm:$0xff] %v12097_v23  ;;  %v3490_v62 = vrot.slane %v12097_v23, 4  ;;  %v3747_v55 = vpack.c.bf16 %v12097_v23, %v12097_v23  ;;  %v3331_v59 = vmul.f32 0.5, %v10253_v22  ;;  %v3123_v22 = vadd.f32 %v3122_v46, %v11878_v53  ;;  %v9962_v46 = vld [vmem:[#allocation6 + $0x274] sm:$0xf] }
 0x43e   :  { %10254 = vtanh.f32 %v3268_v61  ;;  %v8918_v44 = vld [vmem:[#allocation2 + $0x58] sm:$0xf0]  ;;  %v10030_v23 = vld [vmem:[#allocation6 + $0x394] sm:$0xf] }
 0x43f   :  { %v3530_v21 = vsel %vm3510_vm5, %v3489_v25, %v3490_v62  ;;  %3779 = vst [vmem:[#allocation2 + $0x64] sm:$0xf] %v3747_v55  ;;  %v3363_v56 = vadd.f32 0.5, %v3331_v59  ;;  %v2944_v37 = vpop.f32.mrf.mxu2  ;;  %v8921_v20 = vor.u32 %v9926_v50, %v8918_v44  ;;  %v3212_v44 = vadd.f32 %v11939_v2, %v3123_v22 }
 0x440   :  { %v3651_v1 = vsel %vm3555_vm8, %v3530_v21, 0.0  ;;  %v2945_v48 = vadd.f32 %v2944_v37, %v11870_v41 }
 0x441   :  { %v3683_v15 = vpack.c.bf16 %v3651_v1, %v3651_v1  ;;  %v3427_v9 = vmul.f32 %v3395_v33, %v3363_v56  ;;  %v3125_v13 = vpop.f32.mrf.mxu0  ;;  %4313 = vmatmul.bf16.gmra.mxu3 %v8921_v20  ;;  %4491 = vmatmul.bf16.gmra.mxu1 %v8921_v20  ;;  %v9062_v56 = vld [vmem:[#allocation6 + $0x278] sm:$0xf0] }
 0x442   :  { %v3034_v25 = vadd.f32 %v11941_v19, %v2945_v48  ;;  %v12130_v20 = vpop.f32.mrf.mxu1  ;;  %v12132_v1 = vpop.f32.mrf.mxu3 }
 0x443   :  { %3715 = vst [vmem:[#allocation2 + $0x60] sm:$0xf] %v3683_v15  ;;  %v12114_v63 = vadd.f32 %v3427_v9, %v11543_v43  ;;  %v3396_v43 = vsub.f32 %v3210_v3, %v11557_v40 }
 0x444   :  { %v10255_v35 = vpop.eup %10254  ;;  %v3269_v28 = vmul.f32 0.5, %v3034_v25 }
 0x445   :  { %14789 = vst [vmem:[#allocation36_spill] sm:$0xff] %v12114_v63  ;;  %v3491_v27 = vrot.slane %v12114_v63, 4  ;;  %v3748_v7 = vpack.c.bf16 %v12114_v63, %v12114_v63  ;;  %v3332_v0 = vmul.f32 0.5, %v10255_v35 }
 0x446   :  { %10256 = vtanh.f32 %v3269_v28  ;;  %v9928_v3 = vld [vmem:[#allocation2 + $0x64] sm:$0xf] }
 0x447   :  { %v3529_v19 = vsel %vm3510_vm5, %v3490_v62, %v3491_v27  ;;  %3780 = vst [vmem:[#allocation2 + $0x6c] sm:$0xf] %v3748_v7  ;;  %v3364_v61 = vadd.f32 0.5, %v3332_v0  ;;  %v2947_v55 = vpop.f32.mrf.mxu2  ;;  %v9065_v62 = vor.u32 %v9962_v46, %v9062_v56  ;;  %v3126_v7 = vadd.f32 %v3125_v13, %v11878_v53 }
 0x448   :  { %v3684_v18 = vpack.c.bf16 %v3529_v19, %v3529_v19  ;;  %v2948_v59 = vadd.f32 %v2947_v55, %v11870_v41 }
 0x449   :  { %v3428_v33 = vmul.f32 %v3396_v43, %v3364_v61  ;;  %v3127_v50 = vpop.f32.mrf.mxu0  ;;  %4369 = vmatpush.bf16.msrb.mxu0 %v9065_v62 }
 0x44a   :  { %3716 = vst [vmem:[#allocation2 + $0x68] sm:$0xf] %v3684_v18  ;;  %v3037_v21 = vadd.f32 %v11963_v17, %v2948_v59  ;;  %v14791_v17 = vld [vmem:[#allocation31_spill] sm:$0xff]  ;;  %v12150_v56 = vpop.f32.mrf.mxu1  ;;  %v12152_v62 = vpop.f32.mrf.mxu3 }
 0x44b   :  { %v12128_v39 = vadd.f32 %v3428_v33, %v11557_v40  ;;  %v3397_v25 = vsub.f32 %v3212_v44, %v14791_v17 }
 0x44c   :  { %v10257_v37 = vpop.eup %10256  ;;  %v3270_v48 = vmul.f32 0.5, %v3037_v21 }
 0x44d   :  { %14790 = vst [vmem:[#allocation37_spill] sm:$0xff] %v12128_v39  ;;  %v3492_v15 = vrot.slane %v12128_v39, 4  ;;  %v3749_v9 = vpack.c.bf16 %v12128_v39, %v12128_v39  ;;  %v3333_v2 = vmul.f32 0.5, %v10257_v37  ;;  %v3128_v37 = vadd.f32 %v3127_v50, %v11878_v53  ;;  %v9028_v50 = vld [vmem:[#allocation6 + $0x230] sm:$0xf] }
 0x44e   :  { %10258 = vtanh.f32 %v3270_v48  ;;  %v8926_v40 = vld [vmem:[#allocation2 + $0x68] sm:$0xf0] }
 0x44f   :  { %v3528_v35 = vsel %vm3510_vm5, %v3491_v27, %v3492_v15  ;;  %3781 = vst [vmem:[#allocation2 + $0x74] sm:$0xf] %v3749_v9  ;;  %v3365_v28 = vadd.f32 0.5, %v3333_v2  ;;  %v2949_v0 = vpop.f32.mrf.mxu2  ;;  %v8929_v22 = vor.u32 %v9928_v3, %v8926_v40  ;;  %v3215_v27 = vadd.f32 %v11961_v5, %v3126_v7  ;;  %v14793_v5 = vld [vmem:[#allocation33_spill] sm:$0xff]  ;;  %v9955_v7 = vld [vmem:[#allocation6 + $0x234] sm:$0xf0] }
 0x450   :  { %v3685_v19 = vpack.c.bf16 %v3528_v35, %v3528_v35  ;;  %v2950_v43 = vadd.f32 %v2949_v0, %v11870_v41  ;;  %v3217_v35 = vadd.f32 %v11984_v8, %v3128_v37  ;;  %v14796_v8 = vld [vmem:[#allocation34_spill] sm:$0xff] }
 0x451   :  { %v3429_v61 = vmul.f32 %v3397_v25, %v3365_v28  ;;  %v3130_v55 = vpop.f32.mrf.mxu0  ;;  %4318 = vmatmul.bf16.gmra.mxu3 %v8929_v22  ;;  %4496 = vmatmul.bf16.gmra.mxu1 %v8929_v22  ;;  %v3398_v48 = vsub.f32 %v3215_v27, %v14793_v5 }
 0x452   :  { %3717 = vst [vmem:[#allocation2 + $0x70] sm:$0xf] %v3685_v19  ;;  %v3039_v18 = vadd.f32 %v11986_v24, %v2950_v43  ;;  %v14795_v43 = vld [vmem:[#allocation32_spill] sm:$0xff]  ;;  %v3131_v37 = vadd.f32 %v3130_v55, %v11878_v53 }
 0x453   :  { %v12144_v59 = vadd.f32 %v3429_v61, %v14791_v17  ;;  %vm3559_vm9 = vcmp.ge.s32.totalorder %v14795_v43, 4 }
 0x454   :  { %v10259_v33 = vpop.eup %10258  ;;  %v3271_v44 = vmul.f32 0.5, %v3039_v18 }
 0x455   :  { %14792 = vst [vmem:[#allocation31_spill] sm:$0xff] %v12144_v59  ;;  %v3493_v13 = vrot.slane %v12144_v59, 4  ;;  %v3750_v21 = vpack.c.bf16 %v12144_v59, %v12144_v59  ;;  %v3334_v46 = vmul.f32 0.5, %v10259_v33  ;;  %v3399_v33 = vsub.f32 %v3217_v35, %v14796_v8 }
 0x456   :  { %10260 = vtanh.f32 %v3271_v44 }
 0x457   :  { %v3527_v24 = vsel %vm3510_vm5, %v3492_v15, %v3493_v13  ;;  %3782 = vst [vmem:[#allocation2 + $0x7c] sm:$0xf] %v3750_v21  ;;  %v3366_v9 = vadd.f32 0.5, %v3334_v46  ;;  %v2952_v2 = vpop.f32.mrf.mxu2  ;;  %v9029_v15 = vor.u32 %v9955_v7, %v9028_v50 }
 0x458   :  { %v3686_v17 = vpack.c.bf16 %v3527_v24, %v3527_v24  ;;  %v2953_v25 = vadd.f32 %v2952_v2, %v11870_v41 }
 0x459   :  { %v3430_v3 = vmul.f32 %v3398_v48, %v3366_v9  ;;  %v3132_v40 = vpop.f32.mrf.mxu0  ;;  %4195 = vmatpush.bf16.msrb.mxu2 %v9029_v15  ;;  %v12172_v48 = vpop.f32.mrf.mxu1 }
 0x45a   :  { %3718 = vst [vmem:[#allocation2 + $0x78] sm:$0xf] %v3686_v17  ;;  %v3042_v28 = vadd.f32 %v12007_v30, %v2953_v25  ;;  %v9930_v30 = vld [vmem:[#allocation2 + $0x74] sm:$0xf]  ;;  %v12174_v9 = vpop.f32.mrf.mxu3  ;;  %v3133_v43 = vadd.f32 %v3132_v40, %v11878_v53 }
 0x45b   :  { %v12162_v0 = vadd.f32 %v3430_v3, %v14793_v5 }
 0x45c   :  { %v10261_v22 = vpop.eup %10260  ;;  %v3272_v19 = vmul.f32 0.5, %v3042_v28  ;;  %v3220_v28 = vadd.f32 %v12005_v45, %v3131_v37  ;;  %v3222_v40 = vadd.f32 %v12023_v47, %v3133_v43 }
 0x45d   :  { %14794 = vst [vmem:[#allocation33_spill] sm:$0xff] %v12162_v0  ;;  %v3494_v61 = vrot.slane %v12162_v0, 4  ;;  %v3751_v18 = vpack.c.bf16 %v12162_v0, %v12162_v0  ;;  %v3335_v27 = vmul.f32 0.5, %v10261_v22 }
 0x45e   :  { %10262 = vtanh.f32 %v3272_v19  ;;  %v8934_v44 = vld [vmem:[#allocation2 + $0x78] sm:$0xf0] }
 0x45f   :  { %v3526_v21 = vsel %vm3510_vm5, %v3493_v13, %v3494_v61  ;;  %3783 = vst [vmem:[#allocation2 + $0x84] sm:$0xf] %v3751_v18  ;;  %v3367_v46 = vadd.f32 0.5, %v3335_v27  ;;  %v2954_v24 = vpop.f32.mrf.mxu2  ;;  %v8937_v5 = vor.u32 %v9930_v30, %v8934_v44  ;;  %v14798_v18 = vld [vmem:[#allocation13_spill] sm:$0xff] }
 0x460   :  { %v3655_v2 = vsel %vm3559_vm9, %v3526_v21, 0.0  ;;  %v2955_v17 = vadd.f32 %v2954_v24, %v11870_v41  ;;  %v3400_v27 = vsub.f32 %v3220_v28, %v14798_v18 }
 0x461   :  { %v3687_v25 = vpack.c.bf16 %v3655_v2, %v3655_v2  ;;  %v3431_v3 = vmul.f32 %v3399_v33, %v3367_v46  ;;  %v3135_v35 = vpop.f32.mrf.mxu0  ;;  %4323 = vmatmul.bf16.gmra.mxu3 %v8937_v5  ;;  %4501 = vmatmul.bf16.gmra.mxu1 %v8937_v5  ;;  %v12192_v46 = vpop.f32.mrf.mxu1  ;;  %v9054_v5 = vld [vmem:[#allocation6 + $0x268] sm:$0xf0] }
 0x462   :  { %v3044_v13 = vadd.f32 %v12025_v14, %v2955_v17  ;;  %v12194_v37 = vpop.f32.mrf.mxu3 }
 0x463   :  { %3719 = vst [vmem:[#allocation2 + $0x80] sm:$0xf] %v3687_v25  ;;  %v12181_v55 = vadd.f32 %v3431_v3, %v14796_v8 }
 0x464   :  { %v10263_v50 = vpop.eup %10262  ;;  %v3273_v7 = vmul.f32 0.5, %v3044_v13 }
 0x465   :  { %14797 = vst [vmem:[#allocation32_spill] sm:$0xff] %v12181_v55  ;;  %v3495_v15 = vrot.slane %v12181_v55, 4  ;;  %v3752_v22 = vpack.c.bf16 %v12181_v55, %v12181_v55  ;;  %v3336_v19 = vmul.f32 0.5, %v10263_v50  ;;  %v10035_v55 = vld [vmem:[#allocation6 + $0x3b4] sm:$0xf0] }
 0x466   :  { %10264 = vtanh.f32 %v3273_v7  ;;  %v14800_v7 = vld [vmem:[#allocation14_spill] sm:$0xff]  ;;  %v9932_v47 = vld [vmem:[#allocation2 + $0x84] sm:$0xf] }
 0x467   :  { %v3525_v14 = vsel %vm3510_vm5, %v3494_v61, %v3495_v15  ;;  %3784 = vst [vmem:[#allocation2 + $0x8c] sm:$0xf] %v3752_v22  ;;  %v3368_v8 = vadd.f32 0.5, %v3336_v19  ;;  %v2957_v33 = vpop.f32.mrf.mxu2  ;;  %v9960_v61 = vld [vmem:[#allocation6 + $0x264] sm:$0xf]  ;;  %v3401_v22 = vsub.f32 %v3222_v40, %v14800_v7 }
 0x468   :  { %v3688_v45 = vpack.c.bf16 %v3525_v14, %v3525_v14  ;;  %v2958_v30 = vadd.f32 %v2957_v33, %v11870_v41  ;;  %v9057_v17 = vor.u32 %v9960_v61, %v9054_v5  ;;  %v3136_v14 = vadd.f32 %v3135_v35, %v11878_v53 }
 0x469   :  { %v3432_v44 = vmul.f32 %v3400_v27, %v3368_v8  ;;  %v3137_v21 = vpop.f32.mrf.mxu0  ;;  %v12214_v61 = vpop.f32.mrf.mxu1 }
 0x46a   :  { %3720 = vst [vmem:[#allocation2 + $0x88] sm:$0xf] %v3688_v45  ;;  %v3047_v24 = vadd.f32 %v12050_v58, %v2958_v30  ;;  %4370 = vmatpush.bf16.msrb.mxu0 %v9057_v17  ;;  %v12216_v35 = vpop.f32.mrf.mxu3 }
 0x46b   :  { %v12199_v2 = vadd.f32 %v3432_v44, %v14798_v18 }
 0x46c   :  { %v10265_v25 = vpop.eup %10264  ;;  %v3274_v3 = vmul.f32 0.5, %v3047_v24 }
 0x46d   :  { %14799 = vst [vmem:[#allocation34_spill] sm:$0xff] %v12199_v2  ;;  %v3496_v13 = vrot.slane %v12199_v2, 4  ;;  %v3753_v28 = vpack.c.bf16 %v12199_v2, %v12199_v2  ;;  %v3337_v50 = vmul.f32 0.5, %v10265_v25 }
 0x46e   :  { %10266 = vtanh.f32 %v3274_v3  ;;  %v8942_v58 = vld [vmem:[#allocation2 + $0x88] sm:$0xf0] }
 0x46f   :  { %v3524_v19 = vsel %vm3510_vm5, %v3495_v15, %v3496_v13  ;;  %3785 = vst [vmem:[#allocation2 + $0x94] sm:$0xf] %v3753_v28  ;;  %v3369_v43 = vadd.f32 0.5, %v3337_v50  ;;  %v2959_v18 = vpop.f32.mrf.mxu2  ;;  %v8945_v27 = vor.u32 %v9932_v47, %v8942_v58  ;;  %v3225_v15 = vadd.f32 %v12048_v52, %v3136_v14  ;;  %v14802_v52 = vld [vmem:[#allocation16_spill] sm:$0xff] }
 0x470   :  { %v3689_v8 = vpack.c.bf16 %v3524_v19, %v3524_v19  ;;  %v2960_v33 = vadd.f32 %v2959_v18, %v11870_v41  ;;  %v3138_v28 = vadd.f32 %v3137_v21, %v11878_v53  ;;  %v9020_v21 = vld [vmem:[#allocation6 + $0x220] sm:$0xf] }
 0x471   :  { %v3433_v45 = vmul.f32 %v3401_v22, %v3369_v43  ;;  %v3140_v30 = vpop.f32.mrf.mxu0  ;;  %4328 = vmatmul.bf16.gmra.mxu3 %v8945_v27  ;;  %4506 = vmatmul.bf16.gmra.mxu1 %v8945_v27  ;;  %v3402_v50 = vsub.f32 %v3225_v15, %v14802_v52  ;;  %v9953_v27 = vld [vmem:[#allocation6 + $0x224] sm:$0xf0] }
 0x472   :  { %3721 = vst [vmem:[#allocation2 + $0x90] sm:$0xf] %v3689_v8  ;;  %v3049_v44 = vadd.f32 %v12070_v54, %v2960_v33  ;;  %v3227_v14 = vadd.f32 %v12068_v42, %v3138_v28  ;;  %v12235_v42 = vpop.f32.mrf.mxu1 }
 0x473   :  { %v12211_v40 = vadd.f32 %v3433_v45, %v14800_v7 }
 0x474   :  { %v10267_v24 = vpop.eup %10266  ;;  %v3275_v5 = vmul.f32 0.5, %v3049_v44  ;;  %v14804_v44 = vld [vmem:[#allocation15_spill] sm:$0xff] }
 0x475   :  { %14801 = vst [vmem:[#allocation13_spill] sm:$0xff] %v12211_v40  ;;  %v3497_v17 = vrot.slane %v12211_v40, 4  ;;  %v3754_v25 = vpack.c.bf16 %v12211_v40, %v12211_v40  ;;  %v3338_v3 = vmul.f32 0.5, %v10267_v24  ;;  %vm3563_vm10 = vcmp.ge.s32.totalorder %v14804_v44, 4 }
 0x476   :  { %10268 = vtanh.f32 %v3275_v5  ;;  %v9934_v28 = vld [vmem:[#allocation2 + $0x94] sm:$0xf] }
 0x477   :  { %v3523_v54 = vsel %vm3510_vm5, %v3496_v13, %v3497_v17  ;;  %3786 = vst [vmem:[#allocation2 + $0x9c] sm:$0xf] %v3754_v25  ;;  %v3370_v7 = vadd.f32 0.5, %v3338_v3  ;;  %v2962_v22 = vpop.f32.mrf.mxu2  ;;  %v9021_v13 = vor.u32 %v9953_v27, %v9020_v21  ;;  %v14805_v25 = vld [vmem:[#allocation17_spill] sm:$0xff] }
 0x478   :  { %v3690_v47 = vpack.c.bf16 %v3523_v54, %v3523_v54  ;;  %v2963_v58 = vadd.f32 %v2962_v22, %v11870_v41  ;;  %v3403_v3 = vsub.f32 %v3227_v14, %v14805_v25 }
 0x479   :  { %v3434_v19 = vmul.f32 %v3402_v50, %v3370_v7  ;;  %v3142_v43 = vpop.f32.mrf.mxu0  ;;  %4196 = vmatpush.bf16.msrb.mxu2 %v9021_v13  ;;  %v3141_v7 = vadd.f32 %v3140_v30, %v11878_v53 }
 0x47a   :  { %3722 = vst [vmem:[#allocation2 + $0x98] sm:$0xf] %v3690_v47  ;;  %v3052_v18 = vadd.f32 %v12091_v11, %v2963_v58  ;;  %v12237_v11 = vpop.f32.mrf.mxu3 }
 0x47b   :  { %v12229_v8 = vadd.f32 %v3434_v19, %v14802_v52  ;;  %v3230_v30 = vadd.f32 %v12089_v4, %v3141_v7  ;;  %v12258_v4 = vpop.f32.mrf.mxu1 }
 0x47c   :  { %v10269_v33 = vpop.eup %10268  ;;  %v3276_v45 = vmul.f32 0.5, %v3052_v18 }
 0x47d   :  { %14803 = vst [vmem:[#allocation14_spill] sm:$0xff] %v12229_v8  ;;  %v3498_v15 = vrot.slane %v12229_v8, 4  ;;  %v3755_v24 = vpack.c.bf16 %v12229_v8, %v12229_v8  ;;  %v3339_v5 = vmul.f32 0.5, %v10269_v33 }
 0x47e   :  { %10270 = vtanh.f32 %v3276_v45  ;;  %v8950_v54 = vld [vmem:[#allocation2 + $0x98] sm:$0xf0] }
 0x47f   :  { %v3522_v52 = vsel %vm3510_vm5, %v3497_v17, %v3498_v15  ;;  %3787 = vst [vmem:[#allocation2 + $0xa4] sm:$0xf] %v3755_v24  ;;  %v3371_v50 = vadd.f32 0.5, %v3339_v5  ;;  %v2964_v22 = vpop.f32.mrf.mxu2  ;;  %v8953_v47 = vor.u32 %v9934_v28, %v8950_v54  ;;  %v3143_v5 = vadd.f32 %v3142_v43, %v11878_v53 }
 0x480   :  { %v3659_v58 = vsel %vm3563_vm10, %v3522_v52, 0.0  ;;  %v2965_v19 = vadd.f32 %v2964_v22, %v11870_v41 }
 0x481   :  { %v3691_v18 = vpack.c.bf16 %v3659_v58, %v3659_v58  ;;  %v3435_v21 = vmul.f32 %v3403_v3, %v3371_v50  ;;  %v3145_v14 = vpop.f32.mrf.mxu0  ;;  %4333 = vmatmul.bf16.gmra.mxu3 %v8953_v47  ;;  %4511 = vmatmul.bf16.gmra.mxu1 %v8953_v47  ;;  %v14807_v3 = vld [vmem:[#allocation18_spill] sm:$0xff]  ;;  %v3232_v43 = vadd.f32 %v12108_v31, %v3143_v5 }
 0x482   :  { %v3054_v27 = vadd.f32 %v12110_v12, %v2965_v19  ;;  %v12260_v52 = vpop.f32.mrf.mxu3  ;;  %v9046_v19 = vld [vmem:[#allocation6 + $0x258] sm:$0xf0] }
 0x483   :  { %3723 = vst [vmem:[#allocation2 + $0xa0] sm:$0xf] %v3691_v18  ;;  %v12248_v17 = vadd.f32 %v3435_v21, %v14805_v25  ;;  %v3404_v25 = vsub.f32 %v3230_v30, %v14807_v3 }
 0x484   :  { %v10271_v13 = vpop.eup %10270  ;;  %v3277_v33 = vmul.f32 0.5, %v3054_v27 }
 0x485   :  { %14806 = vst [vmem:[#allocation16_spill] sm:$0xff] %v12248_v17  ;;  %v3499_v45 = vrot.slane %v12248_v17, 4  ;;  %v3756_v44 = vpack.c.bf16 %v12248_v17, %v12248_v17  ;;  %v3340_v24 = vmul.f32 0.5, %v10271_v13  ;;  %v9366_v17 = vld [vmem:[#allocation6 + $0x3d8] sm:$0xf0] }
 0x486   :  { %10272 = vtanh.f32 %v3277_v33  ;;  %v9936_v31 = vld [vmem:[#allocation2 + $0xa4] sm:$0xf] }
 0x487   :  { %v3521_v12 = vsel %vm3510_vm5, %v3498_v15, %v3499_v45  ;;  %3788 = vst [vmem:[#allocation2 + $0xac] sm:$0xf] %v3756_v44  ;;  %v3372_v28 = vadd.f32 0.5, %v3340_v24  ;;  %v2967_v54 = vpop.f32.mrf.mxu2  ;;  %v9958_v15 = vld [vmem:[#allocation6 + $0x254] sm:$0xf]  ;;  %v14809_v24 = vld [vmem:[#allocation19_spill] sm:$0xff] }
 0x488   :  { %v3692_v50 = vpack.c.bf16 %v3521_v12, %v3521_v12  ;;  %v2968_v7 = vadd.f32 %v2967_v54, %v11870_v41  ;;  %v9049_v21 = vor.u32 %v9958_v15, %v9046_v19  ;;  %v3405_v12 = vsub.f32 %v3232_v43, %v14809_v24  ;;  %v12276_v43 = vpop.f32.mrf.mxu1 }
 0x489   :  { %v3436_v22 = vmul.f32 %v3404_v25, %v3372_v28  ;;  %v3147_v47 = vpop.f32.mrf.mxu0  ;;  %v3146_v25 = vadd.f32 %v3145_v14, %v11878_v53 }
 0x48a   :  { %3724 = vst [vmem:[#allocation2 + $0xa8] sm:$0xf] %v3692_v50  ;;  %v3057_v58 = vadd.f32 %v12132_v1, %v2968_v7  ;;  %4371 = vmatpush.bf16.msrb.mxu0 %v9049_v21  ;;  %v12278_v15 = vpop.f32.mrf.mxu3 }
 0x48b   :  { %v12266_v18 = vadd.f32 %v3436_v22, %v14807_v3  ;;  %v3235_v14 = vadd.f32 %v12130_v20, %v3146_v25 }
 0x48c   :  { %v10273_v27 = vpop.eup %10272  ;;  %v3278_v30 = vmul.f32 0.5, %v3057_v58 }
 0x48d   :  { %14808 = vst [vmem:[#allocation15_spill] sm:$0xff] %v12266_v18  ;;  %v3500_v13 = vrot.slane %v12266_v18, 4  ;;  %v3757_v33 = vpack.c.bf16 %v12266_v18, %v12266_v18  ;;  %v3341_v44 = vmul.f32 0.5, %v10273_v27  ;;  %v10038_v18 = vld [vmem:[#allocation6 + $0x3d4] sm:$0xf] }
 0x48e   :  { %10274 = vtanh.f32 %v3278_v30  ;;  %v8958_v1 = vld [vmem:[#allocation2 + $0xa8] sm:$0xf0] }
 0x48f   :  { %v3520_v5 = vsel %vm3510_vm5, %v3499_v45, %v3500_v13  ;;  %3789 = vst [vmem:[#allocation2 + $0xb4] sm:$0xf] %v3757_v33  ;;  %v3373_v3 = vadd.f32 0.5, %v3341_v44  ;;  %v2969_v28 = vpop.f32.mrf.mxu2  ;;  %v8961_v54 = vor.u32 %v9936_v31, %v8958_v1 }
 0x490   :  { %v3693_v50 = vpack.c.bf16 %v3520_v5, %v3520_v5  ;;  %v2970_v7 = vadd.f32 %v2969_v28, %v11870_v41  ;;  %v12293_v28 = vpop.f32.mrf.mxu1 }
 0x491   :  { %v3437_v22 = vmul.f32 %v3405_v12, %v3373_v3  ;;  %v3150_v58 = vpop.f32.mrf.mxu0  ;;  %4338 = vmatmul.bf16.gmra.mxu3 %v8961_v54  ;;  %4516 = vmatmul.bf16.gmra.mxu1 %v8961_v54  ;;  %v3148_v12 = vadd.f32 %v3147_v47, %v11878_v53 }
 0x492   :  { %3725 = vst [vmem:[#allocation2 + $0xb0] sm:$0xf] %v3693_v50  ;;  %v3059_v45 = vadd.f32 %v12152_v62, %v2970_v7  ;;  %v14811_v62 = vld [vmem:[#allocation21_spill] sm:$0xff]  ;;  %v12295_v54 = vpop.f32.mrf.mxu3 }
 0x493   :  { %v12282_v19 = vadd.f32 %v3437_v22, %v14809_v24  ;;  %v3406_v24 = vsub.f32 %v3235_v14, %v14811_v62  ;;  %v3237_v47 = vadd.f32 %v12150_v56, %v3148_v12  ;;  %v9012_v7 = vld [vmem:[#allocation6 + $0x210] sm:$0xf]  ;;  %v14814_v56 = vld [vmem:[#allocation22_spill] sm:$0xff] }
 0x494   :  { %v10275_v21 = vpop.eup %10274  ;;  %v3279_v27 = vmul.f32 0.5, %v3059_v45 }
 0x495   :  { %14810 = vst [vmem:[#allocation17_spill] sm:$0xff] %v12282_v19  ;;  %v3501_v30 = vrot.slane %v12282_v19, 4  ;;  %v3758_v33 = vpack.c.bf16 %v12282_v19, %v12282_v19  ;;  %v3342_v44 = vmul.f32 0.5, %v10275_v21 }
 0x496   :  { %10276 = vtanh.f32 %v3279_v27  ;;  %v9938_v12 = vld [vmem:[#allocation2 + $0xb4] sm:$0xf] }
 0x497   :  { %v3519_v31 = vsel %vm3510_vm5, %v3500_v13, %v3501_v30  ;;  %3790 = vst [vmem:[#allocation2 + $0xbc] sm:$0xf] %v3758_v33  ;;  %v3374_v1 = vadd.f32 0.5, %v3342_v44  ;;  %v2972_v5 = vpop.f32.mrf.mxu2  ;;  %v9951_v13 = vld [vmem:[#allocation6 + $0x214] sm:$0xf0]  ;;  %v14813_v33 = vld [vmem:[#allocation20_spill] sm:$0xff] }
 0x498   :  { %v3694_v20 = vpack.c.bf16 %v3519_v31, %v3519_v31  ;;  %v2973_v3 = vadd.f32 %v2972_v5, %v11870_v41  ;;  %v9013_v14 = vor.u32 %v9951_v13, %v9012_v7  ;;  %vm3567_vm11 = vcmp.ge.s32.totalorder %v14813_v33, 4  ;;  %v12316_v33 = vpop.f32.mrf.mxu1 }
 0x499   :  { %v3438_v25 = vmul.f32 %v3406_v24, %v3374_v1  ;;  %v3152_v45 = vpop.f32.mrf.mxu0 }
 0x49a   :  { %3726 = vst [vmem:[#allocation2 + $0xb8] sm:$0xf] %v3694_v20  ;;  %v3062_v50 = vadd.f32 %v12174_v9, %v2973_v3  ;;  %4197 = vmatpush.bf16.msrb.mxu2 %v9013_v14  ;;  %v3407_v9 = vsub.f32 %v3237_v47, %v14814_v56  ;;  %v3151_v20 = vadd.f32 %v3150_v58, %v11878_v53  ;;  %v12318_v58 = vpop.f32.mrf.mxu3 }
 0x49b   :  { %v12300_v22 = vadd.f32 %v3438_v25, %v14811_v62 }
 0x49c   :  { %v10277_v21 = vpop.eup %10276  ;;  %v3280_v27 = vmul.f32 0.5, %v3062_v50 }
 0x49d   :  { %14812 = vst [vmem:[#allocation18_spill] sm:$0xff] %v12300_v22  ;;  %v3502_v44 = vrot.slane %v12300_v22, 4  ;;  %v3759_v31 = vpack.c.bf16 %v12300_v22, %v12300_v22  ;;  %v3343_v24 = vmul.f32 0.5, %v10277_v21 }
 0x49e   :  { %10278 = vtanh.f32 %v3280_v27  ;;  %v8966_v1 = vld [vmem:[#allocation2 + $0xb8] sm:$0xf0] }
 0x49f   :  { %v3518_v62 = vsel %vm3510_vm5, %v3501_v30, %v3502_v44  ;;  %3791 = vst [vmem:[#allocation2 + $0xc4] sm:$0xf] %v3759_v31  ;;  %v3375_v5 = vadd.f32 0.5, %v3343_v24  ;;  %v2974_v3 = vpop.f32.mrf.mxu2  ;;  %v8969_v25 = vor.u32 %v9938_v12, %v8966_v1  ;;  %v3240_v30 = vadd.f32 %v12172_v48, %v3151_v20  ;;  %v14816_v48 = vld [vmem:[#allocation23_spill] sm:$0xff] }
 0x4a0   :  { %v3663_v50 = vsel %vm3567_vm11, %v3518_v62, 0.0  ;;  %v2975_v7 = vadd.f32 %v2974_v3, %v11870_v41 }
 0x4a1   :  { %v3695_v13 = vpack.c.bf16 %v3663_v50, %v3663_v50  ;;  %v3439_v21 = vmul.f32 %v3407_v9, %v3375_v5  ;;  %4343 = vmatmul.bf16.gmra.mxu3 %v8969_v25  ;;  %4521 = vmatmul.bf16.gmra.mxu1 %v8969_v25  ;;  %v3155_v1 = vpop.f32.mrf.mxu0  ;;  %v3408_v62 = vsub.f32 %v3240_v30, %v14816_v48 }
 0x4a2   :  { %v3064_v47 = vadd.f32 %v12194_v37, %v2975_v7  ;;  %v3153_v37 = vadd.f32 %v3152_v45, %v11878_v53  ;;  %v9038_v45 = vld [vmem:[#allocation6 + $0x248] sm:$0xf0] }
 0x4a3   :  { %3727 = vst [vmem:[#allocation2 + $0xc0] sm:$0xf] %v3695_v13  ;;  %v12313_v14 = vadd.f32 %v3439_v21, %v14814_v56  ;;  %v9956_v21 = vld [vmem:[#allocation6 + $0x244] sm:$0xf] }
 0x4a4   :  { %v10279_v27 = vpop.eup %10278  ;;  %v3281_v31 = vmul.f32 0.5, %v3064_v47  ;;  %v3242_v7 = vadd.f32 %v12192_v46, %v3153_v37  ;;  %v12338_v46 = vpop.f32.mrf.mxu3 }
 0x4a5   :  { %14815 = vst [vmem:[#allocation19_spill] sm:$0xff] %v12313_v14  ;;  %v3503_v24 = vrot.slane %v12313_v14, 4  ;;  %v3760_v9 = vpack.c.bf16 %v12313_v14, %v12313_v14  ;;  %v3344_v12 = vmul.f32 0.5, %v10279_v27 }
 0x4a6   :  { %10280 = vtanh.f32 %v3281_v31 }
 0x4a7   :  { %v3517_v56 = vsel %vm3510_vm5, %v3502_v44, %v3503_v24  ;;  %3792 = vst [vmem:[#allocation2 + $0xcc] sm:$0xf] %v3760_v9  ;;  %v3376_v5 = vadd.f32 0.5, %v3344_v12  ;;  %v2977_v20 = vpop.f32.mrf.mxu2  ;;  %v9041_v44 = vor.u32 %v9956_v21, %v9038_v45 }
 0x4a8   :  { %v3696_v3 = vpack.c.bf16 %v3517_v56, %v3517_v56  ;;  %v2978_v25 = vadd.f32 %v2977_v20, %v11870_v41  ;;  %v12336_v56 = vpop.f32.mrf.mxu1 }
 0x4a9   :  { %v3440_v50 = vmul.f32 %v3408_v62, %v3376_v5  ;;  %4372 = vmatpush.bf16.msrb.mxu0 %v9041_v44  ;;  %v9940_v62 = vld [vmem:[#allocation2 + $0xc4] sm:$0xf] }
 0x4aa   :  { %3728 = vst [vmem:[#allocation2 + $0xc8] sm:$0xf] %v3696_v3  ;;  %v3067_v13 = vadd.f32 %v12216_v35, %v2978_v25  ;;  %v14818_v35 = vld [vmem:[#allocation24_spill] sm:$0xff]  ;;  %v3156_v3 = vadd.f32 %v3155_v1, %v11878_v53  ;;  %v3157_v25 = vpop.f32.mrf.mxu0  ;;  %v9954_v1 = vld [vmem:[#allocation6 + $0x234] sm:$0xf] }
 0x4ab   :  { %v12331_v47 = vadd.f32 %v3440_v50, %v14816_v48  ;;  %v3409_v37 = vsub.f32 %v3242_v7, %v14818_v35 }
 0x4ac   :  { %v10281_v27 = vpop.eup %10280  ;;  %v3282_v31 = vmul.f32 0.5, %v3067_v13 }
 0x4ad   :  { %14817 = vst [vmem:[#allocation21_spill] sm:$0xff] %v12331_v47  ;;  %v3504_v30 = vrot.slane %v12331_v47, 4  ;;  %v3761_v9 = vpack.c.bf16 %v12331_v47, %v12331_v47  ;;  %v3345_v12 = vmul.f32 0.5, %v10281_v27  ;;  %v9950_v47 = vld [vmem:[#allocation6 + $0x214] sm:$0xf] }
 0x4ae   :  { %10282 = vtanh.f32 %v3282_v31  ;;  %v8974_v48 = vld [vmem:[#allocation2 + $0xc8] sm:$0xf0] }
 0x4af   :  { %v3516_v5 = vsel %vm3510_vm5, %v3503_v24, %v3504_v30  ;;  %3793 = vst [vmem:[#allocation2 + $0xd4] sm:$0xf] %v3761_v9  ;;  %v3377_v20 = vadd.f32 0.5, %v3345_v12  ;;  %v2979_v50 = vpop.f32.mrf.mxu2  ;;  %v8977_v13 = vor.u32 %v9940_v62, %v8974_v48  ;;  %v3245_v24 = vadd.f32 %v12214_v61, %v3156_v3  ;;  %v9030_v12 = vld [vmem:[#allocation6 + $0x238] sm:$0xf0] }
 0x4b0   :  { %v3697_v21 = vpack.c.bf16 %v3516_v5, %v3516_v5  ;;  %v2980_v45 = vadd.f32 %v2979_v50, %v11870_v41  ;;  %v9033_v5 = vor.u32 %v9954_v1, %v9030_v12 }
 0x4b1   :  { %v3441_v44 = vmul.f32 %v3409_v37, %v3377_v20  ;;  %4348 = vmatmul.bf16.gmra.mxu3 %v8977_v13  ;;  %4526 = vmatmul.bf16.gmra.mxu1 %v8977_v13  ;;  %v3158_v20 = vadd.f32 %v3157_v25, %v11878_v53  ;;  %v12357_v13 = vpop.f32.mrf.mxu1 }
 0x4b2   :  { %3729 = vst [vmem:[#allocation2 + $0xd0] sm:$0xf] %v3697_v21  ;;  %v3069_v7 = vadd.f32 %v12237_v11, %v2980_v45  ;;  %4373 = vmatpush.bf16.msrb.mxu0 %v9033_v5 }
 0x4b3   :  { %v12347_v27 = vadd.f32 %v3441_v44, %v14818_v35  ;;  %v14820_v35 = vld [vmem:[#allocation26_spill] sm:$0xff]  ;;  %v9952_v44 = vld [vmem:[#allocation6 + $0x224] sm:$0xf] }
 0x4b4   :  { %v10283_v31 = vpop.eup %10282  ;;  %v3283_v9 = vmul.f32 0.5, %v3069_v7  ;;  %v3410_v61 = vsub.f32 %v3245_v24, %v14820_v35  ;;  %v9022_v7 = vld [vmem:[#allocation6 + $0x228] sm:$0xf0] }
 0x4b5   :  { %14819 = vst [vmem:[#allocation20_spill] sm:$0xff] %v12347_v27  ;;  %v3505_v62 = vrot.slane %v12347_v27, 4  ;;  %v3762_v48 = vpack.c.bf16 %v12347_v27, %v12347_v27  ;;  %v3346_v37 = vmul.f32 0.5, %v10283_v31  ;;  %v12360_v31 = vpop.f32.mrf.mxu3  ;;  %v9025_v1 = vor.u32 %v9952_v44, %v9022_v7 }
 0x4b6   :  { %10284 = vtanh.f32 %v3283_v9  ;;  %v3160_v9 = vpop.f32.mrf.mxu0 }
 0x4b7   :  { %v3515_v11 = vsel %vm3510_vm5, %v3504_v30, %v3505_v62  ;;  %3794 = vst [vmem:[#allocation2 + $0xdc] sm:$0xf] %v3762_v48  ;;  %v3378_v3 = vadd.f32 0.5, %v3346_v37  ;;  %v2982_v50 = vpop.f32.mrf.mxu2  ;;  %v3247_v30 = vadd.f32 %v12235_v42, %v3158_v20  ;;  %v9004_v48 = vld [vmem:[#allocation6 + $0x200] sm:$0xf]  ;;  %4374 = vmatpush.bf16.msrb.mxu0 %v9025_v1  ;;  %v3161_v1 = vadd.f32 %v3160_v9, %v11878_v53 }
 0x4b8   :  { %v3698_v21 = vpack.c.bf16 %v3515_v11, %v3515_v11  ;;  %v2983_v45 = vadd.f32 %v2982_v50, %v11870_v41  ;;  %v9949_v37 = vld [vmem:[#allocation6 + $0x204] sm:$0xf0]  ;;  %v14822_v11 = vld [vmem:[#allocation25_spill] sm:$0xff] }
 0x4b9   :  { %v3442_v25 = vmul.f32 %v3410_v61, %v3378_v3  ;;  %vm3571_vm12 = vcmp.ge.s32.totalorder %v14822_v11, 4  ;;  %v9005_v27 = vor.u32 %v9949_v37, %v9004_v48  ;;  %v9014_v61 = vld [vmem:[#allocation6 + $0x218] sm:$0xf0]  ;;  %v3250_v11 = vadd.f32 %v12258_v4, %v3161_v1  ;;  %v14825_v1 = vld [vmem:[#allocation28_spill] sm:$0xff] }
 0x4ba   :  { %3730 = vst [vmem:[#allocation2 + $0xd8] sm:$0xf] %v3698_v21  ;;  %v3072_v24 = vadd.f32 %v12260_v52, %v2983_v45  ;;  %v9017_v52 = vor.u32 %v9950_v47, %v9014_v61  ;;  %v14823_v21 = vld [vmem:[#allocation27_spill] sm:$0xff]  ;;  %v9942_v45 = vld [vmem:[#allocation2 + $0xd4] sm:$0xf] }
 0x4bb   :  { %v12365_v12 = vadd.f32 %v3442_v25, %v14820_v35  ;;  %v3411_v35 = vsub.f32 %v3247_v30, %v14823_v21  ;;  %4198 = vmatpush.bf16.msrb.mxu2 %v9005_v27  ;;  %v9948_v30 = vld [vmem:[#allocation6 + $0x204] sm:$0xf] }
 0x4bc   :  { %v10285_v5 = vpop.eup %10284  ;;  %v3284_v50 = vmul.f32 0.5, %v3072_v24  ;;  %4375 = vmatpush.bf16.msrb.mxu0 %v9017_v52 }
 0x4bd   :  { %14821 = vst [vmem:[#allocation22_spill] sm:$0xff] %v12365_v12  ;;  %v3506_v3 = vrot.slane %v12365_v12, 4  ;;  %v3763_v42 = vpack.c.bf16 %v12365_v12, %v12365_v12  ;;  %v3347_v20 = vmul.f32 0.5, %v10285_v5  ;;  %v9006_v5 = vld [vmem:[#allocation6 + $0x208] sm:$0xf0]  ;;  %v12381_v9 = vpop.f32.mrf.mxu3 }
 0x4be   :  { %10286 = vtanh.f32 %v3284_v50  ;;  %v8982_v44 = vld [vmem:[#allocation2 + $0xd8] sm:$0xf0]  ;;  %v9009_v27 = vor.u32 %v9948_v30, %v9006_v5  ;;  %v12397_v5 = vld [vmem:[#allocation2 + $0x40] sm:$0xf] }
 0x4bf   :  { %v3514_v7 = vsel %vm3510_vm5, %v3505_v62, %v3506_v3  ;;  %3795 = vst [vmem:[#allocation2 + $0xe4] sm:$0xf] %v3763_v42  ;;  %v3379_v25 = vadd.f32 0.5, %v3347_v20  ;;  %v2984_v24 = vpop.f32.mrf.mxu2  ;;  %v8985_v48 = vor.u32 %v9942_v45, %v8982_v44  ;;  %v12378_v62 = vpop.f32.mrf.mxu1 }
 0x4c0   :  { %v3667_v37 = vsel %vm3571_vm12, %v3514_v7, 0.0  ;;  %v2985_v47 = vadd.f32 %v2984_v24, %v11870_v41  ;;  %v3162_v41 = vpop.f32.mrf.mxu0  ;;  %4376 = vmatpush.bf16.msrb.mxu0 %v9009_v27 }
 0x4c1   :  { %v3699_v50 = vpack.c.bf16 %v3667_v37, %v3667_v37  ;;  %v3443_v61 = vmul.f32 %v3411_v35, %v3379_v25  ;;  %4353 = vmatmul.bf16.gmra.mxu3 %v8985_v48  ;;  %4531 = vmatmul.bf16.gmra.mxu1 %v8985_v48  ;;  %v12387_v35 = vld [vmem:[#allocation2 + $0x20] sm:$0xf]  ;;  %v9316_v25 = vld [vmem:[#allocation6 + $0x370] sm:$0xf]  ;;  %v3163_v24 = vadd.f32 %v3162_v41, %v11878_v53  ;;  %v14632_v48 = vmov 0.0|0.0  }
 0x4c2   :  { %v3074_v42 = vadd.f32 %v12278_v15, %v2985_v47  ;;  %4935 = vst [vmem:[#allocation2 + $0x20] sm:$0xf] %v14632_v48  ;;  %v3412_v37 = vsub.f32 %v3250_v11, %v14825_v1  ;;  %v12410_v11 = vld [vmem:[#allocation2 + $0xa0] sm:$0xf] }
 0x4c3   :  { %3731 = vst [vmem:[#allocation2 + $0xe0] sm:$0xf] %v3699_v50  ;;  %v12384_v20 = vadd.f32 %v3443_v61, %v14823_v21  ;;  %v10027_v21 = vld [vmem:[#allocation6 + $0x374] sm:$0xf0]  ;;  %v12400_v61 = vld [vmem:[#allocation2 + $0x60] sm:$0xf]  ;;  %v3252_v27 = vadd.f32 %v12276_v43, %v3163_v24 }
 0x4c4   :  { %v10287_v52 = vpop.eup %10286  ;;  %v3285_v45 = vmul.f32 0.5, %v3074_v42  ;;  %v9317_v30 = vor.u32 %v10027_v21, %v9316_v25  ;;  %4939 = vst [vmem:[#allocation2 + $0x40] sm:$0xf] %v14632_v48  ;;  %v14827_v21 = vld [vmem:[#allocation30_spill] sm:$0xff] }
 0x4c5   :  { %14824 = vst [vmem:[#allocation23_spill] sm:$0xff] %v12384_v20  ;;  %v3507_v44 = vrot.slane %v12384_v20, 4  ;;  %v3764_v7 = vpack.c.bf16 %v12384_v20, %v12384_v20  ;;  %v3348_v15 = vmul.f32 0.5, %v10287_v52  ;;  %v12413_v52 = vld [vmem:[#allocation2 + $0xc0] sm:$0xf] }
 0x4c6   :  { %10288 = vtanh.f32 %v3285_v45  ;;  %5419 = vmatpush.bf16.msra.mxu2 %v9317_v30  ;;  %4943 = vst [vmem:[#allocation2 + $0x60] sm:$0xf] %v14632_v48  ;;  %v9944_v24 = vld [vmem:[#allocation2 + $0xe4] sm:$0xf] }
 0x4c7   :  { %v3513_v4 = vsel %vm3510_vm5, %v3506_v3, %v3507_v44  ;;  %3796 = vst [vmem:[#allocation2 + $0xec] sm:$0xf] %v3764_v7  ;;  %v3380_v47 = vadd.f32 0.5, %v3348_v15  ;;  %v12404_v3 = vld [vmem:[#allocation2 + $0x80] sm:$0xf]  ;;  %v12415_v45 = vpop.f32.mrf.mxu1  ;;  %v12417_v7 = vpop.f32.mrf.mxu3 }
 0x4c8   :  { %v3700_v50 = vpack.c.bf16 %v3513_v4, %v3513_v4  ;;  %4947 = vst [vmem:[#allocation2 + $0x80] sm:$0xf] %v14632_v48  ;;  %v3413_v4 = vsub.f32 %v3252_v27, %v14827_v21 }
 0x4c9   :  { %v3444_v53 = vmul.f32 %v3412_v37, %v3380_v47  ;;  %4951 = vst [vmem:[#allocation2 + $0xa0] sm:$0xf] %v14632_v48  ;;  %v9380_v37 = vld [vmem:[#allocation6 + $0x3f0] sm:$0xf]  ;;  %v10043_v47 = vld [vmem:[#allocation6 + $0x3f4] sm:$0xf0] }
 0x4ca   :  { %3732 = vst [vmem:[#allocation2 + $0xe8] sm:$0xf] %v3700_v50  ;;  %v9381_v20 = vor.u32 %v10043_v47, %v9380_v37  ;;  %v12426_v12 = vld [vmem:[#allocation2 + $0xe0] sm:$0xf] }
 0x4cb   :  { %v12407_v42 = vadd.f32 %v3444_v53, %v14825_v1  ;;  %4955 = vst [vmem:[#allocation2 + $0xc0] sm:$0xf] %v14632_v48 }
 0x4cc   :  { %v10289_v41 = vpop.eup %10288  ;;  %4959 = vst [vmem:[#allocation2 + $0xe0] sm:$0xf] %v14632_v48  ;;  %5508 = vmatpush.bf16.msra.mxu3 %v9381_v20 }
 0x4cd   :  { %14826 = vst [vmem:[#allocation24_spill] sm:$0xff] %v12407_v42  ;;  %v3508_v43 = vrot.slane %v12407_v42, 4  ;;  %v3765_v15 = vpack.c.bf16 %v12407_v42, %v12407_v42  ;;  %v3349_v25 = vmul.f32 0.5, %v10289_v41  ;;  %v14829_v42 = vld [vmem:[#allocation29_spill] sm:$0xff] }
 0x4ce   :  { %v8990_v1 = vld [vmem:[#allocation2 + $0xe8] sm:$0xf0]  ;;  %vm3543_vm13 = vcmp.ge.s32.totalorder %v14829_v42, 4 }
 0x4cf   :  { %v3512_v30 = vsel %vm3510_vm5, %v3507_v44, %v3508_v43  ;;  %3797 = vst [vmem:[#allocation2 + $0xf4] sm:$0xf] %v3765_v15  ;;  %v3381_v50 = vadd.f32 0.5, %v3349_v25  ;;  %v8993_v53 = vor.u32 %v9944_v24, %v8990_v1  ;;  %v12436_v25 = vpop.f32.mrf.mxu1  ;;  %v12438_v24 = vpop.f32.mrf.mxu3 }
 0x4d0   :  { %v3701_v14 = vpack.c.bf16 %v3512_v30, %v3512_v30 }
 0x4d1   :  { %v3445_v41 = vmul.f32 %v3413_v4, %v3381_v50  ;;  %4358 = vmatmul.bf16.gmra.mxu3 %v8993_v53  ;;  %4536 = vmatmul.bf16.gmra.mxu1 %v8993_v53 }
 0x4d2   :  { %3733 = vst [vmem:[#allocation2 + $0xf0] sm:$0xf] %v3701_v14  ;;  %v14830_v14 = vrot.slane %v11893_v34, 4 }
 0x4d3   :  { %v12430_v27 = vadd.f32 %v3445_v41, %v14827_v21  ;;  %v9917_v41 = vld [vmem:[#allocation2 + $0x4] sm:$0xf0] }
 0x4d5   :  { %14828 = vst [vmem:[#allocation26_spill] sm:$0xff] %v12430_v27  ;;  %v3509_v44 = vrot.slane %v12430_v27, 4  ;;  %v3766_v15 = vpack.c.bf16 %v12430_v27, %v12430_v27  ;;  %v9923_v27 = vld [vmem:[#allocation2 + $0x34] sm:$0xf0] }
 0x4d6   :  { %v9946_v37 = vld [vmem:[#allocation2 + $0xf4] sm:$0xf] }
 0x4d7   :  { %v3511_v4 = vsel %vm3510_vm5, %v3508_v43, %v3509_v44  ;;  %v3542_v20 = vsel %vm3510_vm5, %v3509_v44, %v14830_v14  ;;  %3798 = vst [vmem:[#allocation2 + $0xfc] sm:$0xf] %v3766_v15  ;;  %v12446_v50 = vpop.f32.mrf.mxu1  ;;  %v12448_v53 = vpop.f32.mrf.mxu3  ;;  %v9308_v44 = vld [vmem:[#allocation6 + $0x360] sm:$0xf]  ;;  %v10025_v15 = vld [vmem:[#allocation6 + $0x364] sm:$0xf0] }
 0x4d8   :  { %v3639_v21 = vsel %vm3543_vm13, %v3542_v20, 0.0  ;;  %v3702_v42 = vpack.c.bf16 %v3511_v4, %v3511_v4  ;;  %v9309_v4 = vor.u32 %v10025_v15, %v9308_v44  ;;  %v9372_v14 = vld [vmem:[#allocation6 + $0x3e0] sm:$0xf]  ;;  %v10041_v20 = vld [vmem:[#allocation6 + $0x3e4] sm:$0xf0] }
 0x4d9   :  { %v3671_v1 = vpack.c.bf16 %v3639_v21, %v3639_v21  ;;  %v9373_v21 = vor.u32 %v10041_v20, %v9372_v14  ;;  %v9364_v44 = vld [vmem:[#allocation6 + $0x3d0] sm:$0xf]  ;;  %v10039_v15 = vld [vmem:[#allocation6 + $0x3d4] sm:$0xf0] }
 0x4da   :  { %3734 = vst [vmem:[#allocation2 + $0xf8] sm:$0xf] %v3702_v42  ;;  %5420 = vmatpush.bf16.msra.mxu2 %v9309_v4  ;;  %v9919_v42 = vld [vmem:[#allocation2 + $0x14] sm:$0xf0]  ;;  %v9365_v4 = vor.u32 %v10039_v15, %v9364_v44  ;;  %v8900_v14 = vld [vmem:[#allocation2 + $0x30] sm:$0xf] }
 0x4db   :  { %3703 = vst [vmem:[#allocation2] sm:$0xf] %v3671_v1  ;;  %5509 = vmatpush.bf16.msra.mxu3 %v9373_v21  ;;  %v8884_v1 = vld [vmem:[#allocation2 + $0x10] sm:$0xf]  ;;  %v8901_v20 = vor.u32 %v9923_v27, %v8900_v14  ;;  %v9925_v21 = vld [vmem:[#allocation2 + $0x44] sm:$0xf0] }
 0x4dc   :  { %v10026_v27 = vld [vmem:[#allocation6 + $0x374] sm:$0xf]  ;;  %v9318_v15 = vld [vmem:[#allocation6 + $0x378] sm:$0xf0] }
 0x4dd   :  { %v9321_v14 = vor.u32 %v10026_v27, %v9318_v15  ;;  %v9284_v15 = vld [vmem:[#allocation6 + $0x330] sm:$0xf] }
 0x4de   :  { %v8998_v47 = vld [vmem:[#allocation2 + $0xf8] sm:$0xf0] }
 0x4df   :  { %v9001_v30 = vor.u32 %v9946_v37, %v8998_v47  ;;  %v8885_v37 = vor.u32 %v9919_v42, %v8884_v1  ;;  %v9921_v47 = vld [vmem:[#allocation2 + $0x24] sm:$0xf0]  ;;  %5510 = vmatpush.bf16.msra.mxu3 %v9365_v4  ;;  %v12452_v42 = vpop.f32.mrf.mxu1  ;;  %v9292_v1 = vld [vmem:[#allocation6 + $0x340] sm:$0xf]  ;;  %v9927_v4 = vld [vmem:[#allocation2 + $0x54] sm:$0xf0]  ;;  %5597 = vmatpush.bf16.msra.mxu0 %v9321_v14 }
 0x4e1   :  { %4363 = vmatmul.bf16.gmra.mxu3 %v9001_v30  ;;  %4541 = vmatmul.bf16.gmra.mxu1 %v9001_v30  ;;  %v8893_v30 = vor.u32 %v9921_v47, %v12387_v35  ;;  %v8909_v35 = vor.u32 %v9925_v21, %v12397_v5  ;;  %v8916_v5 = vld [vmem:[#allocation2 + $0x50] sm:$0xf] }
 0x4e2   :  { %v8876_v43 = vld [vmem:[#allocation2] sm:$0xf]  ;;  %v8917_v21 = vor.u32 %v9927_v4, %v8916_v5  ;;  %v10019_v4 = vld [vmem:[#allocation6 + $0x334] sm:$0xf0] }
 0x4e3   :  { %v8877_v48 = vor.u32 %v9917_v41, %v8876_v43  ;;  %4931 = vst [vmem:[#allocation2] sm:$0xf] %v14831_v36  ;;  %v9300_v43 = vld [vmem:[#allocation6 + $0x350] sm:$0xf]  ;;  %v9285_v14 = vor.u32 %v10019_v4, %v9284_v15  ;;  %v9369_v15 = vor.u32 %v10038_v18, %v9366_v17  ;;  %v10036_v4 = vld [vmem:[#allocation6 + $0x3c4] sm:$0xf] }
 0x4e4   :  { %v9340_v18 = vld [vmem:[#allocation6 + $0x3a0] sm:$0xf] }
 0x4e5   :  { %4199 = vmatmul.bf16.vlgmr.msrb.gmra.mxu2 %v8877_v48  ;;  %4377 = vmatmul.bf16.vlgmr.msrb.gmra.mxu0 %v8877_v48  ;;  %v10023_v48 = vld [vmem:[#allocation6 + $0x354] sm:$0xf0] }
 0x4e6   :  { %v9301_v41 = vor.u32 %v10023_v48, %v9300_v43  ;;  %v9356_v48 = vld [vmem:[#allocation6 + $0x3c0] sm:$0xf] }
 0x4e7   :  { %v12457_v43 = vpop.f32.mrf.mxu1 }
 0x4e8   :  { %5421 = vmatpush.bf16.msra.mxu2 %v9301_v41  ;;  %v10037_v41 = vld [vmem:[#allocation6 + $0x3c4] sm:$0xf0] }
 0x4e9   :  { %v9357_v44 = vor.u32 %v10037_v41, %v9356_v48  ;;  %v9929_v41 = vld [vmem:[#allocation2 + $0x64] sm:$0xf0] }
 0x4ea   :  { %v8925_v27 = vor.u32 %v9929_v41, %v12400_v61  ;;  %v10040_v61 = vld [vmem:[#allocation6 + $0x3e4] sm:$0xf]  ;;  %v9374_v41 = vld [vmem:[#allocation6 + $0x3e8] sm:$0xf0] }
 0x4eb   :  { %5511 = vmatpush.bf16.msra.mxu3 %v9357_v44 }
 0x4f5   :  { %4204 = vmatmul.bf16.gmra.mxu2 %v8885_v37  ;;  %4382 = vmatmul.bf16.gmra.mxu0 %v8885_v37  ;;  %v10021_v37 = vld [vmem:[#allocation6 + $0x344] sm:$0xf0] }
 0x4f6   :  { %v9293_v47 = vor.u32 %v10021_v37, %v9292_v1  ;;  %v9382_v1 = vld [vmem:[#allocation6 + $0x3f8] sm:$0xf0]  ;;  %v12461_v37 = vpop.f32.mrf.mxu1 }
 0x4f8   :  { %5422 = vmatpush.bf16.msra.mxu2 %v9293_v47 }
 0x4fc   :  { %5423 = vmatpush.bf16.msra.mxu2 %v9285_v14  ;;  %v9358_v14 = vld [vmem:[#allocation6 + $0x3c8] sm:$0xf0] }
 0x4fd   :  { %v9361_v2 = vor.u32 %v10036_v4, %v9358_v14  ;;  %v9342_v14 = vld [vmem:[#allocation6 + $0x3a8] sm:$0xf0] }
 0x4fe   :  { %v12465_v48 = vpop.f32.mrf.mxu1 }
 0x505   :  { %4209 = vmatmul.bf16.gmra.mxu2 %v8893_v30  ;;  %4387 = vmatmul.bf16.gmra.mxu0 %v8893_v30  ;;  %v12455_v30 = vpop.f32.mrf.mxu3 }
 0x506   :  { %v12470_v5 = vpop.f32.mrf.mxu1 }
 0x507   :  { %14832 = vst [vmem:[#allocation25_spill] sm:$0xff] %v12470_v5 }
 0x50e   :  { %v12474_v19 = vpop.f32.mrf.mxu1 }
 0x50f   :  { %14833 = vst [vmem:[#allocation27_spill] sm:$0xff] %v12474_v19 }
 0x515   :  { %4214 = vmatmul.bf16.gmra.mxu2 %v8901_v20  ;;  %4392 = vmatmul.bf16.gmra.mxu0 %v8901_v20  ;;  %v12459_v20 = vpop.f32.mrf.mxu3 }
 0x516   :  { %v12478_v40 = vpop.f32.mrf.mxu1 }
 0x517   :  { %14835 = vst [vmem:[#allocation30_spill] sm:$0xff] %v12478_v40 }
 0x51d   :  { %v12463_v22 = vpop.f32.mrf.mxu3 }
 0x525   :  { %4219 = vmatmul.bf16.gmra.mxu2 %v8909_v35  ;;  %4397 = vmatmul.bf16.gmra.mxu0 %v8909_v35  ;;  %v10042_v35 = vld [vmem:[#allocation6 + $0x3f4] sm:$0xf]  ;;  %v12468_v44 = vpop.f32.mrf.mxu3 }
 0x526   :  { %v9385_v47 = vor.u32 %v10042_v35, %v9382_v1  ;;  %v9931_v35 = vld [vmem:[#allocation2 + $0x74] sm:$0xf0]  ;;  %v8932_v1 = vld [vmem:[#allocation2 + $0x70] sm:$0xf] }
 0x528   :  { %5686 = vmatpush.bf16.msra.mxu1 %v9385_v47  ;;  %v8933_v47 = vor.u32 %v9931_v35, %v8932_v1  ;;  %v9933_v35 = vld [vmem:[#allocation2 + $0x84] sm:$0xf0]  ;;  %v9348_v1 = vld [vmem:[#allocation6 + $0x3b0] sm:$0xf] }
 0x529   :  { %v9349_v59 = vor.u32 %v10035_v55, %v9348_v1  ;;  %v12485_v55 = vpop.f32.mrf.mxu1 }
 0x52a   :  { %14837 = vst [vmem:[#allocation38_spill] sm:$0xff] %v12485_v55  ;;  %v10029_v55 = vld [vmem:[#allocation6 + $0x384] sm:$0xf0] }
 0x52b   :  { %5512 = vmatpush.bf16.msra.mxu3 %v9349_v59  ;;  %v9332_v59 = vld [vmem:[#allocation6 + $0x390] sm:$0xf] }
 0x535   :  { %4224 = vmatmul.bf16.gmra.mxu2 %v8917_v21  ;;  %4402 = vmatmul.bf16.gmra.mxu0 %v8917_v21  ;;  %v12472_v21 = vpop.f32.mrf.mxu3 }
 0x53d   :  { %v12476_v8 = vpop.f32.mrf.mxu3 }
 0x53e   :  { %14834 = vst [vmem:[#allocation28_spill] sm:$0xff] %v12476_v8 }
 0x545   :  { %4229 = vmatmul.bf16.gmra.mxu2 %v8925_v27  ;;  %4407 = vmatmul.bf16.gmra.mxu0 %v8925_v27  ;;  %v9377_v27 = vor.u32 %v10040_v61, %v9374_v41  ;;  %v9350_v61 = vld [vmem:[#allocation6 + $0x3b8] sm:$0xf0]  ;;  %v3865_v41 = vld [vmem:[#allocation8 + $0x4] sm:$0x3]  ;;  %v12481_v63 = vpop.f32.mrf.mxu3 }
 0x546   :  { %14836 = vst [vmem:[#allocation29_spill] sm:$0xff] %v12481_v63  ;;  %v12483_v17 = vperm.slane %v3865_v41, 0  ;;  %v10031_v63 = vld [vmem:[#allocation6 + $0x394] sm:$0xf0] }
 0x547   :  { %5687 = vmatpush.bf16.msra.mxu1 %v9377_v27  ;;  %v8941_v27 = vor.u32 %v9933_v35, %v12404_v3  ;;  %v12487_v3 = vld [vmem:[#allocation2] sm:$0xf] }
 0x548   :  { %6159 = vst [vmem:[#allocation2] sm:$0xf] %v14831_v36 }
 0x54b   :  { %5688 = vmatpush.bf16.msra.mxu1 %v9369_v15  ;;  %v10033_v15 = vld [vmem:[#allocation6 + $0x3a4] sm:$0xf0] }
 0x54c   :  { %v9341_v4 = vor.u32 %v10033_v15, %v9340_v18  ;;  %v9333_v15 = vor.u32 %v10031_v63, %v9332_v59 }
 0x54d   :  { %v12494_v5 = vpop.f32.mrf.mxu3 }
 0x54e   :  { %5513 = vmatpush.bf16.msra.mxu3 %v9341_v4  ;;  %v12492_v4 = vperm.slane %v3865_v41, 1 }
 0x54f   :  { %5689 = vmatpush.bf16.msra.mxu1 %v9361_v2  ;;  %v10032_v2 = vld [vmem:[#allocation6 + $0x3a4] sm:$0xf] }
 0x550   :  { %v9345_v40 = vor.u32 %v10032_v2, %v9342_v14 }
 0x552   :  { %5514 = vmatpush.bf16.msra.mxu3 %v9333_v15 }
 0x555   :  { %4234 = vmatmul.bf16.gmra.mxu2 %v8933_v47  ;;  %4412 = vmatmul.bf16.gmra.mxu0 %v8933_v47  ;;  %v10034_v47 = vld [vmem:[#allocation6 + $0x3b4] sm:$0xf] }
 0x556   :  { %v9353_v39 = vor.u32 %v10034_v47, %v9350_v61  ;;  %v10024_v47 = vld [vmem:[#allocation6 + $0x364] sm:$0xf]  ;;  %v9310_v61 = vld [vmem:[#allocation6 + $0x368] sm:$0xf0] }
 0x558   :  { %5690 = vmatpush.bf16.msra.mxu1 %v9353_v39  ;;  %v9334_v39 = vld [vmem:[#allocation6 + $0x398] sm:$0xf0] }
 0x559   :  { %v9337_v2 = vor.u32 %v10030_v23, %v9334_v39 }
 0x55c   :  { %5691 = vmatpush.bf16.msra.mxu1 %v9345_v40 }
 0x560   :  { %5692 = vmatpush.bf16.msra.mxu1 %v9337_v2 }
 0x562   :  { %v4378_v0 = vpop.f32.mrf.mxu0 }
 0x563   :  { %v4379_v63 = vadd.f32 %v4378_v0, %v12492_v4 }
 0x565   :  { %4239 = vmatmul.bf16.gmra.mxu2 %v8941_v27  ;;  %4417 = vmatmul.bf16.gmra.mxu0 %v8941_v27  ;;  %v9313_v27 = vor.u32 %v10024_v47, %v9310_v61  ;;  %v10028_v47 = vld [vmem:[#allocation6 + $0x384] sm:$0xf]  ;;  %v9326_v61 = vld [vmem:[#allocation6 + $0x388] sm:$0xf0] }
 0x566   :  { %v9329_v8 = vor.u32 %v10028_v47, %v9326_v61 }
 0x567   :  { %5598 = vmatpush.bf16.msra.mxu0 %v9313_v27  ;;  %v8948_v27 = vld [vmem:[#allocation2 + $0x90] sm:$0xf] }
 0x568   :  { %v4200_v1 = vpop.f32.mrf.mxu2  ;;  %5693 = vmatpush.bf16.msra.mxu1 %v9329_v8  ;;  %v9276_v8 = vld [vmem:[#allocation6 + $0x320] sm:$0xf] }
 0x569   :  { %v4201_v35 = vadd.f32 %v4200_v1, %v12483_v17  ;;  %v9324_v1 = vld [vmem:[#allocation6 + $0x380] sm:$0xf] }
 0x56a   :  { %v4380_v19 = vpop.f32.mrf.mxu0  ;;  %v9325_v40 = vor.u32 %v10029_v55, %v9324_v1  ;;  %v4468_v55 = vadd.f32 %v12293_v28, %v4379_v63 }
 0x56b   :  { %v4290_v18 = vadd.f32 %v12295_v54, %v4201_v35  ;;  %v9935_v54 = vld [vmem:[#allocation2 + $0x94] sm:$0xf0]  ;;  %v12498_v35 = vpop.f32.mrf.mxu1  ;;  %v4381_v47 = vadd.f32 %v4380_v19, %v12492_v4 }
 0x56c   :  { %5515 = vmatpush.bf16.msra.mxu3 %v9325_v40  ;;  %v4675_v1 = vsub.f32 %v4468_v55, %v11893_v34 }
 0x56d   :  { %v4547_v14 = vmul.f32 0.5, %v4290_v18  ;;  %v8949_v18 = vor.u32 %v9935_v54, %v8948_v27 }
 0x56f   :  { %10290 = vtanh.f32 %v4547_v14  ;;  %v12502_v14 = vpop.f32.mrf.mxu3 }
 0x570   :  { %v4202_v23 = vpop.f32.mrf.mxu2 }
 0x571   :  { %v4203_v41 = vadd.f32 %v4202_v23, %v12483_v17  ;;  %v10017_v23 = vld [vmem:[#allocation6 + $0x324] sm:$0xf0] }
 0x572   :  { %v4383_v59 = vpop.f32.mrf.mxu0  ;;  %v9277_v54 = vor.u32 %v10017_v23, %v9276_v8 }
 0x573   :  { %v4292_v39 = vadd.f32 %v12318_v58, %v4203_v41  ;;  %v12508_v27 = vpop.f32.mrf.mxu1 }
 0x574   :  { %5424 = vmatpush.bf16.msra.mxu2 %v9277_v54 }
 0x575   :  { %v10291_v15 = vpop.eup %10290  ;;  %v4548_v2 = vmul.f32 0.5, %v4292_v39  ;;  %4244 = vmatmul.bf16.gmra.mxu2 %v8949_v18  ;;  %4422 = vmatmul.bf16.gmra.mxu0 %v8949_v18  ;;  %v4470_v18 = vadd.f32 %v12316_v33, %v4381_v47 }
 0x576   :  { %v4611_v0 = vmul.f32 0.5, %v10291_v15 }
 0x577   :  { %10292 = vtanh.f32 %v4548_v2  ;;  %v12519_v8 = vpop.f32.mrf.mxu3 }
 0x578   :  { %v4643_v40 = vadd.f32 0.5, %v4611_v0  ;;  %v4205_v61 = vpop.f32.mrf.mxu2  ;;  %v4676_v0 = vsub.f32 %v4470_v18, %v11907_v38 }
 0x579   :  { %v4206_v58 = vadd.f32 %v4205_v61, %v12483_v17  ;;  %v9937_v61 = vld [vmem:[#allocation2 + $0xa4] sm:$0xf0] }
 0x57a   :  { %v4707_v28 = vmul.f32 %v4675_v1, %v4643_v40  ;;  %v4385_v63 = vpop.f32.mrf.mxu0 }
 0x57b   :  { %v4295_v41 = vadd.f32 %v12338_v46, %v4206_v58  ;;  %v4384_v46 = vadd.f32 %v4383_v59, %v12492_v4  ;;  %v8957_v58 = vor.u32 %v9937_v61, %v12410_v11  ;;  %v12527_v18 = vpop.f32.mrf.mxu1 }
 0x57c   :  { %v12511_v39 = vadd.f32 %v4707_v28, %v11893_v34 }
 0x57d   :  { %v10293_v55 = vpop.eup %10292  ;;  %v4549_v19 = vmul.f32 0.5, %v4295_v41  ;;  %v4473_v28 = vadd.f32 %v12336_v56, %v4384_v46  ;;  %v9302_v46 = vld [vmem:[#allocation6 + $0x358] sm:$0xf0] }
 0x57e   :  { %v4900_v15 = vpack.c.bf16 %v12511_v39, %v12511_v39  ;;  %v4612_v2 = vmul.f32 0.5, %v10293_v55 }
 0x57f   :  { %10294 = vtanh.f32 %v4549_v19 }
 0x580   :  { %4932 = vst [vmem:[#allocation2 + $0x8] sm:$0xf] %v4900_v15  ;;  %v4644_v1 = vadd.f32 0.5, %v4612_v2  ;;  %v4207_v40 = vpop.f32.mrf.mxu2 }
 0x581   :  { %4995 = vst [vmem:[#allocation2 + $0x4] sm:$0xf] %v4900_v15  ;;  %v4208_v34 = vadd.f32 %v4207_v40, %v12483_v17 }
 0x582   :  { %v4708_v33 = vmul.f32 %v4676_v0, %v4644_v1  ;;  %v4388_v47 = vpop.f32.mrf.mxu0  ;;  %v10022_v1 = vld [vmem:[#allocation6 + $0x354] sm:$0xf] }
 0x583   :  { %v4297_v23 = vadd.f32 %v12360_v31, %v4208_v34  ;;  %v4677_v31 = vsub.f32 %v4473_v28, %v11929_v16  ;;  %v9305_v34 = vor.u32 %v10022_v1, %v9302_v46 }
 0x584   :  { %v12524_v54 = vadd.f32 %v4708_v33, %v11907_v38  ;;  %v4386_v38 = vadd.f32 %v4385_v63, %v12492_v4  ;;  %v12538_v33 = vld [vmem:[#allocation2 + $0x20] sm:$0xf]  ;;  %v12542_v63 = vpop.f32.mrf.mxu3 }
 0x585   :  { %v10295_v41 = vpop.eup %10294  ;;  %v4550_v59 = vmul.f32 0.5, %v4297_v23  ;;  %4249 = vmatmul.bf16.gmra.mxu2 %v8957_v58  ;;  %4427 = vmatmul.bf16.gmra.mxu0 %v8957_v58  ;;  %6163 = vst [vmem:[#allocation2 + $0x20] sm:$0xf] %v14831_v36 }
 0x586   :  { %v4901_v55 = vpack.c.bf16 %v12524_v54, %v12524_v54  ;;  %v4613_v19 = vmul.f32 0.5, %v10295_v41  ;;  %v4475_v58 = vadd.f32 %v12357_v13, %v4386_v38  ;;  %5599 = vmatpush.bf16.msra.mxu0 %v9305_v34 }
 0x587   :  { %10296 = vtanh.f32 %v4550_v59  ;;  %v9981_v15 = vld [vmem:[#allocation2 + $0x4] sm:$0xf0] }
 0x588   :  { %4933 = vst [vmem:[#allocation2 + $0x10] sm:$0xf] %v4901_v55  ;;  %v4645_v11 = vadd.f32 0.5, %v4613_v19  ;;  %v4210_v2 = vpop.f32.mrf.mxu2  ;;  %v12534_v56 = vor.u32 %v9981_v15, %v12487_v3  ;;  %v9980_v19 = vld [vmem:[#allocation2 + $0x4] sm:$0xf] }
 0x589   :  { %4996 = vst [vmem:[#allocation2 + $0xc] sm:$0xf] %v4901_v55  ;;  %v4211_v0 = vadd.f32 %v4210_v2, %v12483_v17  ;;  %v9939_v15 = vld [vmem:[#allocation2 + $0xb4] sm:$0xf0] }
 0x58a   :  { %v4709_v40 = vmul.f32 %v4677_v31, %v4645_v11  ;;  %v4390_v61 = vpop.f32.mrf.mxu0  ;;  %6160 = vst [vmem:[#allocation2 + $0x8] sm:$0xf] %v14831_v36  ;;  %v4678_v31 = vsub.f32 %v4475_v58, %v11945_v32 }
 0x58b   :  { %v4300_v23 = vadd.f32 %v12381_v9, %v4211_v0  ;;  %v12550_v9 = vpop.f32.mrf.mxu1 }
 0x58c   :  { %v12545_v3 = vadd.f32 %v4709_v40, %v11929_v16  ;;  %v4389_v16 = vadd.f32 %v4388_v47, %v12492_v4  ;;  %v8964_v40 = vld [vmem:[#allocation2 + $0xb0] sm:$0xf] }
 0x58d   :  { %v10297_v28 = vpop.eup %10296  ;;  %v4551_v41 = vmul.f32 0.5, %v4300_v23  ;;  %v8965_v23 = vor.u32 %v9939_v15, %v8964_v40 }
 0x58e   :  { %v4902_v59 = vpack.c.bf16 %v12545_v3, %v12545_v3  ;;  %v4614_v55 = vmul.f32 0.5, %v10297_v28  ;;  %v4478_v58 = vadd.f32 %v12378_v62, %v4389_v16  ;;  %v10015_v16 = vld [vmem:[#allocation6 + $0x314] sm:$0xf0] }
 0x58f   :  { %10298 = vtanh.f32 %v4551_v41 }
 0x590   :  { %4934 = vst [vmem:[#allocation2 + $0x18] sm:$0xf] %v4902_v59  ;;  %v4646_v11 = vadd.f32 0.5, %v4614_v55  ;;  %v4212_v2 = vpop.f32.mrf.mxu2  ;;  %v9134_v13 = vld [vmem:[#allocation2 + $0x8] sm:$0xf0] }
 0x591   :  { %4997 = vst [vmem:[#allocation2 + $0x14] sm:$0xf] %v4902_v59  ;;  %v4213_v38 = vadd.f32 %v4212_v2, %v12483_v17  ;;  %v9137_v0 = vor.u32 %v9980_v19, %v9134_v13  ;;  %v12560_v59 = vpop.f32.mrf.mxu3 }
 0x592   :  { %v4710_v1 = vmul.f32 %v4678_v31, %v4646_v11  ;;  %v4393_v46 = vpop.f32.mrf.mxu0  ;;  %v9268_v11 = vld [vmem:[#allocation6 + $0x310] sm:$0xf] }
 0x593   :  { %v4302_v34 = vadd.f32 %v12417_v7, %v4213_v38  ;;  %5516 = vmatmul.bf16.vlgmr.msra.gmra.mxu3 %v9137_v0  ;;  %5694 = vmatmul.bf16.vlgmr.msra.gmra.mxu1 %v9137_v0  ;;  %v4679_v7 = vsub.f32 %v4478_v58, %v11959_v29  ;;  %v12567_v2 = vpop.f32.mrf.mxu1  ;;  %v9269_v0 = vor.u32 %v10015_v16, %v9268_v11 }
 0x594   :  { %v12557_v28 = vadd.f32 %v4710_v1, %v11945_v32  ;;  %v4391_v32 = vadd.f32 %v4390_v61, %v12492_v4 }
 0x595   :  { %v10299_v47 = vpop.eup %10298  ;;  %v4552_v41 = vmul.f32 0.5, %v4302_v34  ;;  %4254 = vmatmul.bf16.gmra.mxu2 %v8965_v23  ;;  %4432 = vmatmul.bf16.gmra.mxu0 %v8965_v23 }
 0x596   :  { %v4966_v55 = vpack.c.bf16 %v12557_v28, %v12557_v28  ;;  %v4615_v19 = vmul.f32 0.5, %v10299_v47  ;;  %v4480_v34 = vadd.f32 %v12415_v45, %v4391_v32  ;;  %5425 = vmatpush.bf16.msra.mxu2 %v9269_v0  ;;  %v9941_v32 = vld [vmem:[#allocation2 + $0xc4] sm:$0xf0] }
 0x597   :  { %10300 = vtanh.f32 %v4552_v41 }
 0x598   :  { %4998 = vst [vmem:[#allocation2 + $0x1c] sm:$0xf] %v4966_v55  ;;  %v4647_v15 = vadd.f32 0.5, %v4615_v19  ;;  %v4215_v31 = vpop.f32.mrf.mxu2  ;;  %v9982_v41 = vld [vmem:[#allocation2 + $0x14] sm:$0xf] }
 0x599   :  { %v4216_v62 = vadd.f32 %v4215_v31, %v12483_v17  ;;  %v12576_v19 = vpop.f32.mrf.mxu3 }
 0x59a   :  { %v4711_v13 = vmul.f32 %v4679_v7, %v4647_v15  ;;  %v4395_v38 = vpop.f32.mrf.mxu0 }
 0x59b   :  { %v4305_v1 = vadd.f32 %v12438_v24, %v4216_v62  ;;  %v4680_v24 = vsub.f32 %v4480_v34, %v11978_v60  ;;  %v12583_v0 = vpop.f32.mrf.mxu1 }
 0x59c   :  { %v12571_v40 = vadd.f32 %v4711_v13, %v11959_v29  ;;  %v4394_v29 = vadd.f32 %v4393_v46, %v12492_v4  ;;  %v8973_v13 = vor.u32 %v9941_v32, %v12413_v52 }
 0x59d   :  { %v10301_v23 = vpop.eup %10300  ;;  %v4553_v61 = vmul.f32 0.5, %v4305_v1 }
 0x59e   :  { %v4904_v58 = vpack.c.bf16 %v12571_v40, %v12571_v40  ;;  %v4616_v47 = vmul.f32 0.5, %v10301_v23  ;;  %v4483_v46 = vadd.f32 %v12436_v25, %v4394_v29 }
 0x59f   :  { %10302 = vtanh.f32 %v4553_v61  ;;  %v9142_v55 = vld [vmem:[#allocation2 + $0x18] sm:$0xf0] }
 0x5a0   :  { %4999 = vst [vmem:[#allocation2 + $0x24] sm:$0xf] %v4904_v58  ;;  %v4648_v7 = vadd.f32 0.5, %v4616_v47  ;;  %v4217_v15 = vpop.f32.mrf.mxu2  ;;  %v9145_v45 = vor.u32 %v9982_v41, %v9142_v55  ;;  %v4396_v47 = vadd.f32 %v4395_v38, %v12492_v4  ;;  %v10020_v55 = vld [vmem:[#allocation6 + $0x344] sm:$0xf] }
 0x5a1   :  { %4936 = vst [vmem:[#allocation2 + $0x28] sm:$0xf] %v4904_v58  ;;  %v4218_v31 = vadd.f32 %v4217_v15, %v12483_v17  ;;  %v12597_v29 = vpop.f32.mrf.mxu3 }
 0x5a2   :  { %v4712_v62 = vmul.f32 %v4680_v24, %v4648_v7  ;;  %v4398_v11 = vpop.f32.mrf.mxu0  ;;  %v9294_v24 = vld [vmem:[#allocation6 + $0x348] sm:$0xf0] }
 0x5a3   :  { %v4307_v16 = vadd.f32 %v12448_v53, %v4218_v31  ;;  %5521 = vmatmul.bf16.gmra.mxu3 %v9145_v45  ;;  %5699 = vmatmul.bf16.gmra.mxu1 %v9145_v45  ;;  %v4681_v53 = vsub.f32 %v4483_v46, %v11996_v51  ;;  %v9297_v32 = vor.u32 %v10020_v55, %v9294_v24  ;;  %v12600_v31 = vld [vmem:[#allocation2 + $0x40] sm:$0xf]  ;;  %v12608_v46 = vpop.f32.mrf.mxu1  ;;  %v8980_v55 = vld [vmem:[#allocation2 + $0xd0] sm:$0xf] }
 0x5a4   :  { %v12586_v1 = vadd.f32 %v4712_v62, %v11978_v60  ;;  %6167 = vst [vmem:[#allocation2 + $0x40] sm:$0xf] %v14831_v36 }
 0x5a5   :  { %v10303_v34 = vpop.eup %10302  ;;  %v4554_v23 = vmul.f32 0.5, %v4307_v16  ;;  %4259 = vmatmul.bf16.gmra.mxu2 %v8973_v13  ;;  %4437 = vmatmul.bf16.gmra.mxu0 %v8973_v13  ;;  %v4485_v16 = vadd.f32 %v12446_v50, %v4396_v47 }
 0x5a6   :  { %v4905_v61 = vpack.c.bf16 %v12586_v1, %v12586_v1  ;;  %v4617_v58 = vmul.f32 0.5, %v10303_v34  ;;  %5600 = vmatpush.bf16.msra.mxu0 %v9297_v32 }
 0x5a7   :  { %10304 = vtanh.f32 %v4554_v23 }
 0x5a8   :  { %4937 = vst [vmem:[#allocation2 + $0x30] sm:$0xf] %v4905_v61  ;;  %v4649_v52 = vadd.f32 0.5, %v4617_v58  ;;  %v4220_v41 = vpop.f32.mrf.mxu2  ;;  %v9985_v60 = vld [vmem:[#allocation2 + $0x24] sm:$0xf0] }
 0x5a9   :  { %5000 = vst [vmem:[#allocation2 + $0x2c] sm:$0xf] %v4905_v61  ;;  %v4221_v25 = vadd.f32 %v4220_v41, %v12483_v17  ;;  %v12595_v7 = vor.u32 %v9985_v60, %v12538_v33  ;;  %v9984_v61 = vld [vmem:[#allocation2 + $0x24] sm:$0xf]  ;;  %v9943_v58 = vld [vmem:[#allocation2 + $0xd4] sm:$0xf0]  ;;  %v12616_v32 = vpop.f32.mrf.mxu3 }
 0x5aa   :  { %v4713_v15 = vmul.f32 %v4681_v53, %v4649_v52  ;;  %v4400_v45 = vpop.f32.mrf.mxu0  ;;  %6164 = vst [vmem:[#allocation2 + $0x28] sm:$0xf] %v14831_v36 }
 0x5ab   :  { %v4310_v38 = vadd.f32 %v12455_v30, %v4221_v25  ;;  %v4682_v30 = vsub.f32 %v4485_v16, %v12012_v26  ;;  %v10018_v16 = vld [vmem:[#allocation6 + $0x334] sm:$0xf] }
 0x5ac   :  { %v12605_v62 = vadd.f32 %v4713_v15, %v11996_v51  ;;  %v4399_v51 = vadd.f32 %v4398_v11, %v12492_v4  ;;  %v8981_v15 = vor.u32 %v9943_v58, %v8980_v55  ;;  %v12624_v58 = vpop.f32.mrf.mxu1 }
 0x5ad   :  { %v10305_v33 = vpop.eup %10304  ;;  %v4555_v13 = vmul.f32 0.5, %v4310_v38 }
 0x5ae   :  { %v4906_v34 = vpack.c.bf16 %v12605_v62, %v12605_v62  ;;  %v4618_v23 = vmul.f32 0.5, %v10305_v33  ;;  %v4488_v11 = vadd.f32 %v12452_v42, %v4399_v51  ;;  %v9286_v33 = vld [vmem:[#allocation6 + $0x338] sm:$0xf0]  ;;  %v4401_v42 = vadd.f32 %v4400_v45, %v12492_v4  ;;  %v10014_v45 = vld [vmem:[#allocation6 + $0x314] sm:$0xf] }
 0x5af   :  { %10306 = vtanh.f32 %v4555_v13 }
 0x5b0   :  { %4938 = vst [vmem:[#allocation2 + $0x38] sm:$0xf] %v4906_v34  ;;  %v4650_v53 = vadd.f32 0.5, %v4618_v23  ;;  %v4222_v52 = vpop.f32.mrf.mxu2  ;;  %v9150_v50 = vld [vmem:[#allocation2 + $0x28] sm:$0xf0]  ;;  %v9289_v23 = vor.u32 %v10018_v16, %v9286_v33 }
 0x5b1   :  { %5001 = vst [vmem:[#allocation2 + $0x34] sm:$0xf] %v4906_v34  ;;  %v4223_v47 = vadd.f32 %v4222_v52, %v12483_v17  ;;  %v9153_v41 = vor.u32 %v9984_v61, %v9150_v50  ;;  %v9260_v52 = vld [vmem:[#allocation6 + $0x300] sm:$0xf]  ;;  %v10013_v50 = vld [vmem:[#allocation6 + $0x304] sm:$0xf0] }
 0x5b2   :  { %v4714_v60 = vmul.f32 %v4682_v30, %v4650_v53  ;;  %v4403_v25 = vpop.f32.mrf.mxu0  ;;  %5601 = vmatpush.bf16.msra.mxu0 %v9289_v23  ;;  %v9261_v55 = vor.u32 %v10013_v50, %v9260_v52 }
 0x5b3   :  { %v4312_v24 = vadd.f32 %v12459_v20, %v4223_v47  ;;  %5526 = vmatmul.bf16.gmra.mxu3 %v9153_v41  ;;  %5704 = vmatmul.bf16.gmra.mxu1 %v9153_v41  ;;  %v10016_v47 = vld [vmem:[#allocation6 + $0x324] sm:$0xf] }
 0x5b4   :  { %v12619_v38 = vadd.f32 %v4714_v60, %v12012_v26  ;;  %v4683_v26 = vsub.f32 %v4488_v11, %v12030_v10  ;;  %v4490_v11 = vadd.f32 %v12457_v43, %v4401_v42  ;;  %5426 = vmatpush.bf16.msra.mxu2 %v9261_v55  ;;  %v9262_v55 = vld [vmem:[#allocation6 + $0x308] sm:$0xf0] }
 0x5b5   :  { %v10307_v13 = vpop.eup %10306  ;;  %v4556_v34 = vmul.f32 0.5, %v4312_v24  ;;  %4264 = vmatmul.bf16.gmra.mxu2 %v8981_v15  ;;  %4442 = vmatmul.bf16.gmra.mxu0 %v8981_v15  ;;  %v9278_v24 = vld [vmem:[#allocation6 + $0x328] sm:$0xf0] }
 0x5b6   :  { %v4970_v20 = vpack.c.bf16 %v12619_v38, %v12619_v38  ;;  %v4619_v61 = vmul.f32 0.5, %v10307_v13  ;;  %v9281_v16 = vor.u32 %v10016_v47, %v9278_v24  ;;  %v9270_v13 = vld [vmem:[#allocation6 + $0x318] sm:$0xf0]  ;;  %v4684_v43 = vsub.f32 %v4490_v11, %v12045_v57  ;;  %v10012_v47 = vld [vmem:[#allocation6 + $0x304] sm:$0xf]  ;;  %v12641_v24 = vpop.f32.mrf.mxu1 }
 0x5b7   :  { %10308 = vtanh.f32 %v4556_v34 }
 0x5b8   :  { %5002 = vst [vmem:[#allocation2 + $0x3c] sm:$0xf] %v4970_v20  ;;  %v4651_v30 = vadd.f32 0.5, %v4619_v61  ;;  %v4225_v53 = vpop.f32.mrf.mxu2  ;;  %5602 = vmatpush.bf16.msra.mxu0 %v9281_v16  ;;  %v9273_v20 = vor.u32 %v10014_v45, %v9270_v13  ;;  %v12634_v61 = vpop.f32.mrf.mxu3  ;;  %v9265_v45 = vor.u32 %v10012_v47, %v9262_v55 }
 0x5b9   :  { %v4226_v51 = vadd.f32 %v4225_v53, %v12483_v17 }
 0x5ba   :  { %v4715_v41 = vmul.f32 %v4683_v26, %v4651_v30  ;;  %v4405_v60 = vpop.f32.mrf.mxu0 }
 0x5bb   :  { %v4315_v15 = vadd.f32 %v12463_v22, %v4226_v51  ;;  %v9986_v22 = vld [vmem:[#allocation2 + $0x34] sm:$0xf]  ;;  %v4404_v51 = vadd.f32 %v4403_v25, %v12492_v4 }
 0x5bc   :  { %v12631_v33 = vadd.f32 %v4715_v41, %v12030_v10  ;;  %v9945_v10 = vld [vmem:[#allocation2 + $0xe4] sm:$0xf0]  ;;  %5603 = vmatpush.bf16.msra.mxu0 %v9273_v20 }
 0x5bd   :  { %v10309_v34 = vpop.eup %10308  ;;  %v4557_v23 = vmul.f32 0.5, %v4315_v15  ;;  %v8989_v11 = vor.u32 %v9945_v10, %v12426_v12 }
 0x5be   :  { %v4908_v26 = vpack.c.bf16 %v12631_v33, %v12631_v33  ;;  %v4620_v30 = vmul.f32 0.5, %v10309_v34  ;;  %v4493_v34 = vadd.f32 %v12461_v37, %v4404_v51  ;;  %v12664_v47 = vpop.f32.mrf.mxu1 }
 0x5bf   :  { %10310 = vtanh.f32 %v4557_v23  ;;  %v9158_v53 = vld [vmem:[#allocation2 + $0x38] sm:$0xf0] }
 0x5c0   :  { %5003 = vst [vmem:[#allocation2 + $0x44] sm:$0xf] %v4908_v26  ;;  %v4652_v42 = vadd.f32 0.5, %v4620_v30  ;;  %v4227_v52 = vpop.f32.mrf.mxu2  ;;  %v9161_v50 = vor.u32 %v9986_v22, %v9158_v53  ;;  %5604 = vmatpush.bf16.msra.mxu0 %v9265_v45  ;;  %v4685_v12 = vsub.f32 %v4493_v34, %v12063_v49 }
 0x5c1   :  { %4940 = vst [vmem:[#allocation2 + $0x48] sm:$0xf] %v4908_v26  ;;  %v4228_v41 = vadd.f32 %v4227_v52, %v12483_v17  ;;  %v12660_v52 = vld [vmem:[#allocation2 + $0x60] sm:$0xf] }
 0x5c2   :  { %v4716_v15 = vmul.f32 %v4684_v43, %v4652_v42  ;;  %v4408_v16 = vpop.f32.mrf.mxu0  ;;  %6171 = vst [vmem:[#allocation2 + $0x60] sm:$0xf] %v14831_v36 }
 0x5c3   :  { %v4317_v13 = vadd.f32 %v12468_v44, %v4228_v41  ;;  %5531 = vmatmul.bf16.gmra.mxu3 %v9161_v50  ;;  %5709 = vmatmul.bf16.gmra.mxu1 %v9161_v50  ;;  %v12651_v44 = vpop.f32.mrf.mxu3 }
 0x5c4   :  { %v12646_v25 = vadd.f32 %v4716_v15, %v12045_v57  ;;  %v4406_v57 = vadd.f32 %v4405_v60, %v12492_v4 }
 0x5c5   :  { %v10311_v23 = vpop.eup %10310  ;;  %v4558_v26 = vmul.f32 0.5, %v4317_v13  ;;  %4269 = vmatmul.bf16.gmra.mxu2 %v8989_v11  ;;  %4447 = vmatmul.bf16.gmra.mxu0 %v8989_v11  ;;  %v9947_v11 = vld [vmem:[#allocation2 + $0xf4] sm:$0xf0] }
 0x5c6   :  { %v4909_v20 = vpack.c.bf16 %v12646_v25, %v12646_v25  ;;  %v4621_v30 = vmul.f32 0.5, %v10311_v23  ;;  %v4495_v41 = vadd.f32 %v12465_v48, %v4406_v57  ;;  %v4409_v23 = vadd.f32 %v4408_v16, %v12492_v4  ;;  %v8996_v57 = vld [vmem:[#allocation2 + $0xf0] sm:$0xf] }
 0x5c7   :  { %10312 = vtanh.f32 %v4558_v26  ;;  %v9988_v13 = vld [vmem:[#allocation2 + $0x44] sm:$0xf]  ;;  %v14840_v16 = vld [vmem:[#allocation25_spill] sm:$0xff] }
 0x5c8   :  { %4941 = vst [vmem:[#allocation2 + $0x50] sm:$0xf] %v4909_v20  ;;  %v4653_v22 = vadd.f32 0.5, %v4621_v30  ;;  %v4230_v53 = vpop.f32.mrf.mxu2  ;;  %v9989_v37 = vld [vmem:[#allocation2 + $0x44] sm:$0xf0] }
 0x5c9   :  { %5004 = vst [vmem:[#allocation2 + $0x4c] sm:$0xf] %v4909_v20  ;;  %v4231_v10 = vadd.f32 %v4230_v53, %v12483_v17  ;;  %v12657_v43 = vor.u32 %v9989_v37, %v12600_v31  ;;  %v14838_v53 = vld [vmem:[#allocation28_spill] sm:$0xff] }
 0x5ca   :  { %v4717_v42 = vmul.f32 %v4685_v12, %v4653_v22  ;;  %v4410_v51 = vpop.f32.mrf.mxu0  ;;  %6168 = vst [vmem:[#allocation2 + $0x48] sm:$0xf] %v14831_v36 }
 0x5cb   :  { %v4320_v50 = vadd.f32 %v12472_v21, %v4231_v10  ;;  %v4686_v21 = vsub.f32 %v4495_v41, %v12079_v6  ;;  %v12675_v30 = vpop.f32.mrf.mxu3  ;;  %v8997_v10 = vor.u32 %v9947_v11, %v8996_v57  ;;  %v14842_v57 = vld [vmem:[#allocation29_spill] sm:$0xff] }
 0x5cc   :  { %v12667_v60 = vadd.f32 %v4717_v42, %v12063_v49 }
 0x5cd   :  { %v10313_v55 = vpop.eup %10312  ;;  %v4559_v31 = vmul.f32 0.5, %v4320_v50  ;;  %v4498_v50 = vadd.f32 %v14840_v16, %v4409_v23  ;;  %v14844_v16 = vld [vmem:[#allocation27_spill] sm:$0xff] }
 0x5ce   :  { %v4910_v15 = vpack.c.bf16 %v12667_v60, %v12667_v60  ;;  %v4622_v45 = vmul.f32 0.5, %v10313_v55 }
 0x5cf   :  { %10314 = vtanh.f32 %v4559_v31  ;;  %v12682_v31 = vpop.f32.mrf.mxu1 }
 0x5d0   :  { %4942 = vst [vmem:[#allocation2 + $0x58] sm:$0xf] %v4910_v15  ;;  %v4654_v34 = vadd.f32 0.5, %v4622_v45  ;;  %v4232_v26 = vpop.f32.mrf.mxu2  ;;  %v9166_v49 = vld [vmem:[#allocation2 + $0x48] sm:$0xf0] }
 0x5d1   :  { %5005 = vst [vmem:[#allocation2 + $0x54] sm:$0xf] %v4910_v15  ;;  %v4233_v48 = vadd.f32 %v4232_v26, %v12483_v17  ;;  %v9169_v20 = vor.u32 %v9988_v13, %v9166_v49  ;;  %v14841_v13 = vld [vmem:[#allocation35_spill] sm:$0xff]  ;;  %v9572_v26 = vld [vmem:[#allocation6 + $0x470] sm:$0xf] }
 0x5d2   :  { %v4718_v12 = vmul.f32 %v4686_v21, %v4654_v34  ;;  %v4413_v22 = vpop.f32.mrf.mxu0  ;;  %v4687_v21 = vsub.f32 %v4498_v50, %v14841_v13  ;;  %v10091_v49 = vld [vmem:[#allocation6 + $0x474] sm:$0xf0] }
 0x5d3   :  { %v4322_v37 = vadd.f32 %v14838_v53, %v4233_v48  ;;  %5536 = vmatmul.bf16.gmra.mxu3 %v9169_v20  ;;  %5714 = vmatmul.bf16.gmra.mxu1 %v9169_v20 }
 0x5d4   :  { %v12679_v42 = vadd.f32 %v4718_v12, %v12079_v6  ;;  %v4411_v6 = vadd.f32 %v4410_v51, %v12492_v4  ;;  %v9573_v12 = vor.u32 %v10091_v49, %v9572_v26 }
 0x5d5   :  { %v10315_v41 = vpop.eup %10314  ;;  %v4560_v55 = vmul.f32 0.5, %v4322_v37  ;;  %4274 = vmatmul.bf16.gmra.mxu2 %v8997_v10  ;;  %4452 = vmatmul.bf16.gmra.mxu0 %v8997_v10  ;;  %v12690_v37 = vpop.f32.mrf.mxu3 }
 0x5d6   :  { %14839 = vst [vmem:[#allocation28_spill] sm:$0xff] %v12679_v42  ;;  %v4974_v15 = vpack.c.bf16 %v12679_v42, %v12679_v42  ;;  %v4623_v45 = vmul.f32 0.5, %v10315_v41  ;;  %v4500_v50 = vadd.f32 %v14844_v16, %v4411_v6  ;;  %6647 = vmatpush.bf16.msrb.mxu2 %v9573_v12 }
 0x5d7   :  { %10316 = vtanh.f32 %v4560_v55 }
 0x5d8   :  { %5006 = vst [vmem:[#allocation2 + $0x5c] sm:$0xf] %v4974_v15  ;;  %v4655_v11 = vadd.f32 0.5, %v4623_v45  ;;  %v4235_v34 = vpop.f32.mrf.mxu2  ;;  %v9990_v45 = vld [vmem:[#allocation2 + $0x54] sm:$0xf] }
 0x5d9   :  { %v4236_v23 = vadd.f32 %v4235_v34, %v12483_v17  ;;  %v14845_v34 = vld [vmem:[#allocation36_spill] sm:$0xff] }
 0x5da   :  { %v4719_v48 = vmul.f32 %v4687_v21, %v4655_v11  ;;  %v4415_v20 = vpop.f32.mrf.mxu0  ;;  %v12698_v11 = vpop.f32.mrf.mxu1 }
 0x5db   :  { %v4325_v53 = vadd.f32 %v14842_v57, %v4236_v23  ;;  %v4688_v23 = vsub.f32 %v4500_v50, %v14845_v34 }
 0x5dc   :  { %v12693_v10 = vadd.f32 %v4719_v48, %v14841_v13  ;;  %v4414_v13 = vadd.f32 %v4413_v22, %v12492_v4 }
 0x5dd   :  { %v10317_v41 = vpop.eup %10316  ;;  %v4561_v51 = vmul.f32 0.5, %v4325_v53  ;;  %v12710_v22 = vpop.f32.mrf.mxu3 }
 0x5de   :  { %14843 = vst [vmem:[#allocation25_spill] sm:$0xff] %v12693_v10  ;;  %v4912_v55 = vpack.c.bf16 %v12693_v10, %v12693_v10  ;;  %v4624_v15 = vmul.f32 0.5, %v10317_v41  ;;  %v14847_v41 = vld [vmem:[#allocation30_spill] sm:$0xff] }
 0x5df   :  { %10318 = vtanh.f32 %v4561_v51  ;;  %v9174_v21 = vld [vmem:[#allocation2 + $0x58] sm:$0xf0]  ;;  %v4503_v51 = vadd.f32 %v14847_v41, %v4414_v13 }
 0x5e0   :  { %5007 = vst [vmem:[#allocation2 + $0x64] sm:$0xf] %v4912_v55  ;;  %v4656_v26 = vadd.f32 0.5, %v4624_v15  ;;  %v4237_v49 = vpop.f32.mrf.mxu2  ;;  %v9177_v6 = vor.u32 %v9990_v45, %v9174_v21 }
 0x5e1   :  { %4944 = vst [vmem:[#allocation2 + $0x68] sm:$0xf] %v4912_v55  ;;  %v4238_v48 = vadd.f32 %v4237_v49, %v12483_v17 }
 0x5e2   :  { %v4720_v12 = vmul.f32 %v4688_v23, %v4656_v26  ;;  %v4418_v57 = vpop.f32.mrf.mxu0  ;;  %v4416_v23 = vadd.f32 %v4415_v20, %v12492_v4 }
 0x5e3   :  { %v4327_v53 = vadd.f32 %v12494_v5, %v4238_v48  ;;  %5541 = vmatmul.bf16.gmra.mxu3 %v9177_v6  ;;  %5719 = vmatmul.bf16.gmra.mxu1 %v9177_v6  ;;  %v14848_v5 = vld [vmem:[#allocation37_spill] sm:$0xff] }
 0x5e4   :  { %v12705_v16 = vadd.f32 %v4720_v12, %v14845_v34  ;;  %v4689_v21 = vsub.f32 %v4503_v51, %v14848_v5  ;;  %v9636_v6 = vld [vmem:[#allocation6 + $0x4f0] sm:$0xf]  ;;  %v12720_v12 = vpop.f32.mrf.mxu1  ;;  %v12723_v51 = vld [vmem:[#allocation2 + $0x80] sm:$0xf] }
 0x5e5   :  { %v10319_v50 = vpop.eup %10318  ;;  %v4562_v15 = vmul.f32 0.5, %v4327_v53  ;;  %5427 = vmatmul.bf16.vlgmr.msra.gmra.mxu2 %v12534_v56  ;;  %5605 = vmatmul.bf16.vlgmr.msra.gmra.mxu0 %v12534_v56  ;;  %v10107_v56 = vld [vmem:[#allocation6 + $0x4f4] sm:$0xf0]  ;;  %6175 = vst [vmem:[#allocation2 + $0x80] sm:$0xf] %v14831_v36 }
 0x5e6   :  { %14846 = vst [vmem:[#allocation35_spill] sm:$0xff] %v12705_v16  ;;  %v4913_v55 = vpack.c.bf16 %v12705_v16, %v12705_v16  ;;  %v4625_v45 = vmul.f32 0.5, %v10319_v50  ;;  %v9637_v50 = vor.u32 %v10107_v56, %v9636_v6  ;;  %v9983_v6 = vld [vmem:[#allocation2 + $0x14] sm:$0xf0]  ;;  %v12733_v56 = vpop.f32.mrf.mxu3 }
 0x5e7   :  { %10320 = vtanh.f32 %v4562_v15 }
 0x5e8   :  { %4945 = vst [vmem:[#allocation2 + $0x70] sm:$0xf] %v4913_v55  ;;  %v4657_v34 = vadd.f32 0.5, %v4625_v45  ;;  %v4240_v26 = vpop.f32.mrf.mxu2  ;;  %v9993_v13 = vld [vmem:[#allocation2 + $0x64] sm:$0xf0]  ;;  %6736 = vmatpush.bf16.msrb.mxu3 %v9637_v50 }
 0x5e9   :  { %5008 = vst [vmem:[#allocation2 + $0x6c] sm:$0xf] %v4913_v55  ;;  %v4241_v49 = vadd.f32 %v4240_v26, %v12483_v17  ;;  %v12718_v48 = vor.u32 %v9993_v13, %v12660_v52  ;;  %v14850_v55 = vld [vmem:[#allocation38_spill] sm:$0xff]  ;;  %v9992_v13 = vld [vmem:[#allocation2 + $0x64] sm:$0xf] }
 0x5ea   :  { %v4721_v53 = vmul.f32 %v4689_v21, %v4657_v34  ;;  %v4420_v41 = vpop.f32.mrf.mxu0  ;;  %6172 = vst [vmem:[#allocation2 + $0x68] sm:$0xf] %v14831_v36  ;;  %v4505_v45 = vadd.f32 %v14850_v55, %v4416_v23 }
 0x5eb   :  { %v4330_v20 = vadd.f32 %v12502_v14, %v4241_v49  ;;  %v14851_v14 = vld [vmem:[#allocation31_spill] sm:$0xff] }
 0x5ec   :  { %v12728_v15 = vadd.f32 %v4721_v53, %v14848_v5  ;;  %v4690_v49 = vsub.f32 %v4505_v45, %v14851_v14  ;;  %v4419_v5 = vadd.f32 %v4418_v57, %v12492_v4  ;;  %v12739_v42 = vpop.f32.mrf.mxu1 }
 0x5ed   :  { %v10321_v52 = vpop.eup %10320  ;;  %v4563_v26 = vmul.f32 0.5, %v4330_v20 }
 0x5ee   :  { %14849 = vst [vmem:[#allocation29_spill] sm:$0xff] %v12728_v15  ;;  %v4914_v21 = vpack.c.bf16 %v12728_v15, %v12728_v15  ;;  %v4626_v34 = vmul.f32 0.5, %v10321_v52  ;;  %v9140_v52 = vld [vmem:[#allocation2 + $0x10] sm:$0xf]  ;;  %v4508_v57 = vadd.f32 %v12498_v35, %v4419_v5  ;;  %v10089_v35 = vld [vmem:[#allocation6 + $0x464] sm:$0xf0]  ;;  %v12750_v5 = vpop.f32.mrf.mxu3 }
 0x5ef   :  { %10322 = vtanh.f32 %v4563_v26  ;;  %v9141_v10 = vor.u32 %v9983_v6, %v9140_v52 }
 0x5f0   :  { %4946 = vst [vmem:[#allocation2 + $0x78] sm:$0xf] %v4914_v21  ;;  %v4658_v16 = vadd.f32 0.5, %v4626_v34  ;;  %v4242_v53 = vpop.f32.mrf.mxu2  ;;  %v9182_v23 = vld [vmem:[#allocation2 + $0x68] sm:$0xf0] }
 0x5f1   :  { %5009 = vst [vmem:[#allocation2 + $0x74] sm:$0xf] %v4914_v21  ;;  %v4243_v50 = vadd.f32 %v4242_v53, %v12483_v17  ;;  %v9185_v20 = vor.u32 %v9992_v13, %v9182_v23  ;;  %v4421_v53 = vadd.f32 %v4420_v41, %v12492_v4 }
 0x5f2   :  { %v4722_v55 = vmul.f32 %v4690_v49, %v4658_v16  ;;  %v4423_v15 = vpop.f32.mrf.mxu0 }
 0x5f3   :  { %v4332_v26 = vadd.f32 %v12519_v8, %v4243_v50  ;;  %5546 = vmatmul.bf16.gmra.mxu3 %v9185_v20  ;;  %5724 = vmatmul.bf16.gmra.mxu1 %v9185_v20  ;;  %v14853_v8 = vld [vmem:[#allocation33_spill] sm:$0xff]  ;;  %v9564_v50 = vld [vmem:[#allocation6 + $0x460] sm:$0xf] }
 0x5f4   :  { %v12742_v45 = vadd.f32 %v4722_v55, %v14851_v14  ;;  %v4691_v49 = vsub.f32 %v4508_v57, %v14853_v8  ;;  %v9565_v55 = vor.u32 %v10089_v35, %v9564_v50  ;;  %v4510_v57 = vadd.f32 %v12508_v27, %v4421_v53 }
 0x5f5   :  { %v10323_v34 = vpop.eup %10322  ;;  %v4564_v21 = vmul.f32 0.5, %v4332_v26  ;;  %5432 = vmatmul.bf16.gmra.mxu2 %v9141_v10  ;;  %5610 = vmatmul.bf16.gmra.mxu0 %v9141_v10 }
 0x5f6   :  { %14852 = vst [vmem:[#allocation27_spill] sm:$0xff] %v12742_v45  ;;  %v4978_v16 = vpack.c.bf16 %v12742_v45, %v12742_v45  ;;  %v4627_v13 = vmul.f32 0.5, %v10323_v34  ;;  %6648 = vmatpush.bf16.msrb.mxu2 %v9565_v55  ;;  %v9606_v45 = vld [vmem:[#allocation6 + $0x4b8] sm:$0xf0] }
 0x5f7   :  { %10324 = vtanh.f32 %v4564_v21  ;;  %v12757_v21 = vpop.f32.mrf.mxu1 }
 0x5f8   :  { %5010 = vst [vmem:[#allocation2 + $0x7c] sm:$0xf] %v4978_v16  ;;  %v4659_v6 = vadd.f32 0.5, %v4627_v13  ;;  %v4245_v23 = vpop.f32.mrf.mxu2 }
 0x5f9   :  { %v4246_v14 = vadd.f32 %v4245_v23, %v12483_v17  ;;  %v14855_v23 = vld [vmem:[#allocation32_spill] sm:$0xff] }
 0x5fa   :  { %v4723_v20 = vmul.f32 %v4691_v49, %v4659_v6  ;;  %v4425_v10 = vpop.f32.mrf.mxu0  ;;  %v9994_v49 = vld [vmem:[#allocation2 + $0x74] sm:$0xf] }
 0x5fb   :  { %v4335_v52 = vadd.f32 %v12542_v63, %v4246_v14  ;;  %v4692_v63 = vsub.f32 %v4510_v57, %v14855_v23 }
 0x5fc   :  { %v12754_v26 = vadd.f32 %v4723_v20, %v14853_v8  ;;  %v4424_v8 = vadd.f32 %v4423_v15, %v12492_v4 }
 0x5fd   :  { %v10325_v34 = vpop.eup %10324  ;;  %v4565_v41 = vmul.f32 0.5, %v4335_v52  ;;  %v12765_v52 = vpop.f32.mrf.mxu3 }
 0x5fe   :  { %14854 = vst [vmem:[#allocation36_spill] sm:$0xff] %v12754_v26  ;;  %v4916_v16 = vpack.c.bf16 %v12754_v26, %v12754_v26  ;;  %v4628_v13 = vmul.f32 0.5, %v10325_v34  ;;  %v4513_v57 = vadd.f32 %v12527_v18, %v4424_v8 }
 0x5ff   :  { %10326 = vtanh.f32 %v4565_v41  ;;  %v9190_v6 = vld [vmem:[#allocation2 + $0x78] sm:$0xf0] }
 0x600   :  { %5011 = vst [vmem:[#allocation2 + $0x84] sm:$0xf] %v4916_v16  ;;  %v4660_v14 = vadd.f32 0.5, %v4628_v13  ;;  %v4247_v50 = vpop.f32.mrf.mxu2  ;;  %v9193_v27 = vor.u32 %v9994_v49, %v9190_v6  ;;  %v14857_v49 = vld [vmem:[#allocation34_spill] sm:$0xff] }
 0x601   :  { %4948 = vst [vmem:[#allocation2 + $0x88] sm:$0xf] %v4916_v16  ;;  %v4248_v53 = vadd.f32 %v4247_v50, %v12483_v17  ;;  %v4693_v6 = vsub.f32 %v4513_v57, %v14857_v49  ;;  %v9628_v50 = vld [vmem:[#allocation6 + $0x4e0] sm:$0xf] }
 0x602   :  { %v4724_v35 = vmul.f32 %v4692_v63, %v4660_v14  ;;  %v4428_v20 = vpop.f32.mrf.mxu0  ;;  %v4426_v63 = vadd.f32 %v4425_v10, %v12492_v4 }
 0x603   :  { %v4337_v55 = vadd.f32 %v12560_v59, %v4248_v53  ;;  %5551 = vmatmul.bf16.gmra.mxu3 %v9193_v27  ;;  %5729 = vmatmul.bf16.gmra.mxu1 %v9193_v27  ;;  %v12775_v59 = vpop.f32.mrf.mxu1 }
 0x604   :  { %v12768_v34 = vadd.f32 %v4724_v35, %v14855_v23 }
 0x605   :  { %v10327_v41 = vpop.eup %10326  ;;  %v4566_v15 = vmul.f32 0.5, %v4337_v55  ;;  %5437 = vmatmul.bf16.gmra.mxu2 %v12595_v7  ;;  %5615 = vmatmul.bf16.gmra.mxu0 %v12595_v7  ;;  %v10105_v7 = vld [vmem:[#allocation6 + $0x4e4] sm:$0xf0] }
 0x606   :  { %14856 = vst [vmem:[#allocation30_spill] sm:$0xff] %v12768_v34  ;;  %v4917_v16 = vpack.c.bf16 %v12768_v34, %v12768_v34  ;;  %v4629_v13 = vmul.f32 0.5, %v10327_v41  ;;  %v9629_v55 = vor.u32 %v10105_v7, %v9628_v50  ;;  %v12784_v41 = vld [vmem:[#allocation2 + $0xa0] sm:$0xf] }
 0x607   :  { %10328 = vtanh.f32 %v4566_v15  ;;  %6179 = vst [vmem:[#allocation2 + $0xa0] sm:$0xf] %v14831_v36  ;;  %v4515_v15 = vadd.f32 %v12550_v9, %v4426_v63 }
 0x608   :  { %4949 = vst [vmem:[#allocation2 + $0x90] sm:$0xf] %v4917_v16  ;;  %v4661_v23 = vadd.f32 0.5, %v4629_v13  ;;  %v4250_v18 = vpop.f32.mrf.mxu2  ;;  %v9997_v14 = vld [vmem:[#allocation2 + $0x84] sm:$0xf0]  ;;  %6737 = vmatpush.bf16.msrb.mxu3 %v9629_v55  ;;  %v12792_v13 = vpop.f32.mrf.mxu3 }
 0x609   :  { %5012 = vst [vmem:[#allocation2 + $0x8c] sm:$0xf] %v4917_v16  ;;  %v4251_v8 = vadd.f32 %v4250_v18, %v12483_v17  ;;  %v12781_v27 = vor.u32 %v9997_v14, %v12723_v51  ;;  %v9996_v18 = vld [vmem:[#allocation2 + $0x84] sm:$0xf]  ;;  %v9987_v14 = vld [vmem:[#allocation2 + $0x34] sm:$0xf0] }
 0x60a   :  { %v4725_v53 = vmul.f32 %v4693_v6, %v4661_v23  ;;  %v4430_v35 = vpop.f32.mrf.mxu0  ;;  %6176 = vst [vmem:[#allocation2 + $0x88] sm:$0xf] %v14831_v36 }
 0x60b   :  { %v4340_v57 = vadd.f32 %v12576_v19, %v4251_v8  ;;  %v14859_v19 = vld [vmem:[#allocation13_spill] sm:$0xff] }
 0x60c   :  { %v12789_v10 = vadd.f32 %v4725_v53, %v14857_v49  ;;  %v4694_v8 = vsub.f32 %v4515_v15, %v14859_v19  ;;  %v4429_v49 = vadd.f32 %v4428_v20, %v12492_v4 }
 0x60d   :  { %v10329_v16 = vpop.eup %10328  ;;  %v4567_v51 = vmul.f32 0.5, %v4340_v57 }
 0x60e   :  { %14858 = vst [vmem:[#allocation37_spill] sm:$0xff] %v12789_v10  ;;  %v4918_v6 = vpack.c.bf16 %v12789_v10, %v12789_v10  ;;  %v4630_v23 = vmul.f32 0.5, %v10329_v16  ;;  %v9156_v16 = vld [vmem:[#allocation2 + $0x30] sm:$0xf]  ;;  %v4518_v20 = vadd.f32 %v12567_v2, %v4429_v49 }
 0x60f   :  { %10330 = vtanh.f32 %v4567_v51  ;;  %v9157_v34 = vor.u32 %v9987_v14, %v9156_v16 }
 0x610   :  { %4950 = vst [vmem:[#allocation2 + $0x98] sm:$0xf] %v4918_v6  ;;  %v4662_v50 = vadd.f32 0.5, %v4630_v23  ;;  %v12798_v7 = vpop.f32.mrf.mxu1  ;;  %v4252_v9 = vpop.f32.mrf.mxu2  ;;  %v9198_v63 = vld [vmem:[#allocation2 + $0x88] sm:$0xf0] }
 0x611   :  { %5013 = vst [vmem:[#allocation2 + $0x94] sm:$0xf] %v4918_v6  ;;  %v4253_v53 = vadd.f32 %v4252_v9, %v12483_v17  ;;  %v9201_v55 = vor.u32 %v9996_v18, %v9198_v63  ;;  %v9556_v63 = vld [vmem:[#allocation6 + $0x450] sm:$0xf] }
 0x612   :  { %v4726_v57 = vmul.f32 %v4694_v8, %v4662_v50  ;;  %v4433_v10 = vpop.f32.mrf.mxu0 }
 0x613   :  { %v4342_v51 = vadd.f32 %v12597_v29, %v4253_v53  ;;  %5556 = vmatmul.bf16.gmra.mxu3 %v9201_v55  ;;  %5734 = vmatmul.bf16.gmra.mxu1 %v9201_v55  ;;  %v14861_v29 = vld [vmem:[#allocation14_spill] sm:$0xff] }
 0x614   :  { %v12803_v15 = vadd.f32 %v4726_v57, %v14859_v19  ;;  %v4695_v50 = vsub.f32 %v4518_v20, %v14861_v29  ;;  %v4431_v19 = vadd.f32 %v4430_v35, %v12492_v4 }
 0x615   :  { %v10331_v23 = vpop.eup %10330  ;;  %v4568_v26 = vmul.f32 0.5, %v4342_v51  ;;  %5442 = vmatmul.bf16.gmra.mxu2 %v9157_v34  ;;  %5620 = vmatmul.bf16.gmra.mxu0 %v9157_v34  ;;  %v10087_v34 = vld [vmem:[#allocation6 + $0x454] sm:$0xf0] }
 0x616   :  { %14860 = vst [vmem:[#allocation38_spill] sm:$0xff] %v12803_v15  ;;  %v4982_v6 = vpack.c.bf16 %v12803_v15, %v12803_v15  ;;  %v4631_v18 = vmul.f32 0.5, %v10331_v23  ;;  %v12808_v8 = vpop.f32.mrf.mxu3  ;;  %v9557_v57 = vor.u32 %v10087_v34, %v9556_v63  ;;  %v4520_v51 = vadd.f32 %v12583_v0, %v4431_v19 }
 0x617   :  { %10332 = vtanh.f32 %v4568_v26 }
 0x618   :  { %5014 = vst [vmem:[#allocation2 + $0x9c] sm:$0xf] %v4982_v6  ;;  %v4663_v14 = vadd.f32 0.5, %v4631_v18  ;;  %v12812_v9 = vpop.f32.mrf.mxu1  ;;  %v4255_v2 = vpop.f32.mrf.mxu2  ;;  %6649 = vmatpush.bf16.msrb.mxu2 %v9557_v57 }
 0x619   :  { %v4256_v49 = vadd.f32 %v4255_v2, %v12483_v17  ;;  %v14863_v2 = vld [vmem:[#allocation16_spill] sm:$0xff] }
 0x61a   :  { %v4727_v53 = vmul.f32 %v4695_v50, %v4663_v14  ;;  %v4435_v55 = vpop.f32.mrf.mxu0  ;;  %v9998_v50 = vld [vmem:[#allocation2 + $0x94] sm:$0xf] }
 0x61b   :  { %v4345_v16 = vadd.f32 %v12616_v32, %v4256_v49  ;;  %v4696_v32 = vsub.f32 %v4520_v51, %v14863_v2 }
 0x61c   :  { %v12817_v26 = vadd.f32 %v4727_v53, %v14861_v29  ;;  %v4434_v29 = vadd.f32 %v4433_v10, %v12492_v4 }
 0x61d   :  { %v10333_v20 = vpop.eup %10332  ;;  %v4569_v35 = vmul.f32 0.5, %v4345_v16 }
 0x61e   :  { %14862 = vst [vmem:[#allocation31_spill] sm:$0xff] %v12817_v26  ;;  %v4920_v23 = vpack.c.bf16 %v12817_v26, %v12817_v26  ;;  %v4632_v6 = vmul.f32 0.5, %v10333_v20  ;;  %v12822_v18 = vpop.f32.mrf.mxu3  ;;  %v4523_v51 = vadd.f32 %v12608_v46, %v4434_v29 }
 0x61f   :  { %10334 = vtanh.f32 %v4569_v35  ;;  %v9206_v14 = vld [vmem:[#allocation2 + $0x98] sm:$0xf0] }
 0x620   :  { %5015 = vst [vmem:[#allocation2 + $0xa4] sm:$0xf] %v4920_v23  ;;  %v4664_v49 = vadd.f32 0.5, %v4632_v6  ;;  %v12826_v63 = vpop.f32.mrf.mxu1  ;;  %v4257_v0 = vpop.f32.mrf.mxu2  ;;  %v9209_v19 = vor.u32 %v9998_v50, %v9206_v14 }
 0x621   :  { %4952 = vst [vmem:[#allocation2 + $0xa8] sm:$0xf] %v4920_v23  ;;  %v4258_v34 = vadd.f32 %v4257_v0, %v12483_v17  ;;  %v9620_v0 = vld [vmem:[#allocation6 + $0x4d0] sm:$0xf] }
 0x622   :  { %v4728_v53 = vmul.f32 %v4696_v32, %v4664_v49  ;;  %v4438_v57 = vpop.f32.mrf.mxu0  ;;  %v4436_v32 = vadd.f32 %v4435_v55, %v12492_v4 }
 0x623   :  { %v4347_v16 = vadd.f32 %v12634_v61, %v4258_v34  ;;  %5561 = vmatmul.bf16.gmra.mxu3 %v9209_v19  ;;  %5739 = vmatmul.bf16.gmra.mxu1 %v9209_v19  ;;  %v14865_v61 = vld [vmem:[#allocation15_spill] sm:$0xff]  ;;  %v10103_v19 = vld [vmem:[#allocation6 + $0x4d4] sm:$0xf0] }
 0x624   :  { %v12831_v20 = vadd.f32 %v4728_v53, %v14863_v2  ;;  %v4697_v14 = vsub.f32 %v4523_v51, %v14865_v61  ;;  %v12849_v51 = vld [vmem:[#allocation2 + $0xc0] sm:$0xf] }
 0x625   :  { %v10335_v35 = vpop.eup %10334  ;;  %v4570_v10 = vmul.f32 0.5, %v4347_v16  ;;  %5447 = vmatmul.bf16.gmra.mxu2 %v12657_v43  ;;  %5625 = vmatmul.bf16.gmra.mxu0 %v12657_v43  ;;  %6183 = vst [vmem:[#allocation2 + $0xc0] sm:$0xf] %v14831_v36 }
 0x626   :  { %14864 = vst [vmem:[#allocation33_spill] sm:$0xff] %v12831_v20  ;;  %v4921_v23 = vpack.c.bf16 %v12831_v20, %v12831_v20  ;;  %v4633_v6 = vmul.f32 0.5, %v10335_v35  ;;  %v12838_v50 = vpop.f32.mrf.mxu3  ;;  %v9621_v35 = vor.u32 %v10103_v19, %v9620_v0  ;;  %v9991_v0 = vld [vmem:[#allocation2 + $0x54] sm:$0xf0]  ;;  %v9172_v20 = vld [vmem:[#allocation2 + $0x50] sm:$0xf] }
 0x627   :  { %10336 = vtanh.f32 %v4570_v10  ;;  %v9173_v26 = vor.u32 %v9991_v0, %v9172_v20 }
 0x628   :  { %4953 = vst [vmem:[#allocation2 + $0xb0] sm:$0xf] %v4921_v23  ;;  %v4665_v2 = vadd.f32 0.5, %v4633_v6  ;;  %v12842_v46 = vpop.f32.mrf.mxu1  ;;  %v4260_v49 = vpop.f32.mrf.mxu2  ;;  %v10001_v29 = vld [vmem:[#allocation2 + $0xa4] sm:$0xf0]  ;;  %6738 = vmatpush.bf16.msrb.mxu3 %v9621_v35 }
 0x629   :  { %5016 = vst [vmem:[#allocation2 + $0xac] sm:$0xf] %v4921_v23  ;;  %v4261_v43 = vadd.f32 %v4260_v49, %v12483_v17  ;;  %v12846_v34 = vor.u32 %v10001_v29, %v12784_v41  ;;  %v4525_v23 = vadd.f32 %v12624_v58, %v4436_v32  ;;  %v10000_v29 = vld [vmem:[#allocation2 + $0xa4] sm:$0xf] }
 0x62a   :  { %v4729_v53 = vmul.f32 %v4697_v14, %v4665_v2  ;;  %v4440_v16 = vpop.f32.mrf.mxu0  ;;  %6180 = vst [vmem:[#allocation2 + $0xa8] sm:$0xf] %v14831_v36 }
 0x62b   :  { %v4350_v55 = vadd.f32 %v12651_v44, %v4261_v43  ;;  %v14867_v44 = vld [vmem:[#allocation17_spill] sm:$0xff]  ;;  %v4441_v0 = vadd.f32 %v4440_v16, %v12492_v4 }
 0x62c   :  { %v12854_v10 = vadd.f32 %v4729_v53, %v14865_v61  ;;  %v4698_v43 = vsub.f32 %v4525_v23, %v14867_v44  ;;  %v4439_v61 = vadd.f32 %v4438_v57, %v12492_v4 }
 0x62d   :  { %v10337_v6 = vpop.eup %10336  ;;  %v4571_v41 = vmul.f32 0.5, %v4350_v55 }
 0x62e   :  { %14866 = vst [vmem:[#allocation32_spill] sm:$0xff] %v12854_v10  ;;  %v4922_v14 = vpack.c.bf16 %v12854_v10, %v12854_v10  ;;  %v4634_v2 = vmul.f32 0.5, %v10337_v6  ;;  %v12859_v49 = vpop.f32.mrf.mxu3  ;;  %v4528_v57 = vadd.f32 %v12641_v24, %v4439_v61 }
 0x62f   :  { %10338 = vtanh.f32 %v4571_v41 }
 0x630   :  { %4954 = vst [vmem:[#allocation2 + $0xb8] sm:$0xf] %v4922_v14  ;;  %v4666_v19 = vadd.f32 0.5, %v4634_v2  ;;  %v12863_v53 = vpop.f32.mrf.mxu1  ;;  %v4262_v58 = vpop.f32.mrf.mxu2  ;;  %v9214_v32 = vld [vmem:[#allocation2 + $0xa8] sm:$0xf0] }
 0x631   :  { %5017 = vst [vmem:[#allocation2 + $0xb4] sm:$0xf] %v4922_v14  ;;  %v4263_v35 = vadd.f32 %v4262_v58, %v12483_v17  ;;  %v9217_v55 = vor.u32 %v10000_v29, %v9214_v32  ;;  %v9548_v58 = vld [vmem:[#allocation6 + $0x440] sm:$0xf] }
 0x632   :  { %v4730_v6 = vmul.f32 %v4698_v43, %v4666_v19  ;;  %v4443_v10 = vpop.f32.mrf.mxu0 }
 0x633   :  { %v4352_v41 = vadd.f32 %v12675_v30, %v4263_v35  ;;  %5566 = vmatmul.bf16.gmra.mxu3 %v9217_v55  ;;  %5744 = vmatmul.bf16.gmra.mxu1 %v9217_v55  ;;  %v14869_v30 = vld [vmem:[#allocation18_spill] sm:$0xff] }
 0x634   :  { %v12868_v23 = vadd.f32 %v4730_v6, %v14867_v44  ;;  %v4699_v19 = vsub.f32 %v4528_v57, %v14869_v30 }
 0x635   :  { %v10339_v2 = vpop.eup %10338  ;;  %v4572_v15 = vmul.f32 0.5, %v4352_v41  ;;  %5452 = vmatmul.bf16.gmra.mxu2 %v9173_v26  ;;  %5630 = vmatmul.bf16.gmra.mxu0 %v9173_v26  ;;  %v10085_v26 = vld [vmem:[#allocation6 + $0x444] sm:$0xf0]  ;;  %v4530_v41 = vadd.f32 %v12664_v47, %v4441_v0 }
 0x636   :  { %14868 = vst [vmem:[#allocation34_spill] sm:$0xff] %v12868_v23  ;;  %v4986_v14 = vpack.c.bf16 %v12868_v23, %v12868_v23  ;;  %v4635_v29 = vmul.f32 0.5, %v10339_v2  ;;  %v12873_v43 = vpop.f32.mrf.mxu3  ;;  %v9549_v55 = vor.u32 %v10085_v26, %v9548_v58 }
 0x637   :  { %10340 = vtanh.f32 %v4572_v15 }
 0x638   :  { %5018 = vst [vmem:[#allocation2 + $0xbc] sm:$0xf] %v4986_v14  ;;  %v4667_v20 = vadd.f32 0.5, %v4635_v29  ;;  %v12877_v44 = vpop.f32.mrf.mxu1  ;;  %v4265_v24 = vpop.f32.mrf.mxu2  ;;  %6650 = vmatpush.bf16.msrb.mxu2 %v9549_v55 }
 0x639   :  { %v4266_v61 = vadd.f32 %v4265_v24, %v12483_v17  ;;  %v14871_v24 = vld [vmem:[#allocation19_spill] sm:$0xff] }
 0x63a   :  { %v4731_v32 = vmul.f32 %v4699_v19, %v4667_v20  ;;  %v4445_v35 = vpop.f32.mrf.mxu0  ;;  %v10002_v19 = vld [vmem:[#allocation2 + $0xb4] sm:$0xf] }
 0x63b   :  { %v4355_v6 = vadd.f32 %v12690_v37, %v4266_v61  ;;  %v4700_v37 = vsub.f32 %v4530_v41, %v14871_v24 }
 0x63c   :  { %v12882_v15 = vadd.f32 %v4731_v32, %v14869_v30  ;;  %v4444_v30 = vadd.f32 %v4443_v10, %v12492_v4 }
 0x63d   :  { %v10341_v57 = vpop.eup %10340  ;;  %v4573_v16 = vmul.f32 0.5, %v4355_v6 }
 0x63e   :  { %14870 = vst [vmem:[#allocation13_spill] sm:$0xff] %v12882_v15  ;;  %v4924_v2 = vpack.c.bf16 %v12882_v15, %v12882_v15  ;;  %v4636_v14 = vmul.f32 0.5, %v10341_v57  ;;  %v12887_v29 = vpop.f32.mrf.mxu3  ;;  %v4533_v41 = vadd.f32 %v12682_v31, %v4444_v30  ;;  %v9638_v15 = vld [vmem:[#allocation6 + $0x4f8] sm:$0xf0] }
 0x63f   :  { %10342 = vtanh.f32 %v4573_v16  ;;  %v9222_v20 = vld [vmem:[#allocation2 + $0xb8] sm:$0xf0] }
 0x640   :  { %5019 = vst [vmem:[#allocation2 + $0xc4] sm:$0xf] %v4924_v2  ;;  %v4668_v61 = vadd.f32 0.5, %v4636_v14  ;;  %v12891_v58 = vpop.f32.mrf.mxu1  ;;  %v4267_v47 = vpop.f32.mrf.mxu2  ;;  %v9225_v0 = vor.u32 %v10002_v19, %v9222_v20 }
 0x641   :  { %4956 = vst [vmem:[#allocation2 + $0xc8] sm:$0xf] %v4924_v2  ;;  %v4268_v26 = vadd.f32 %v4267_v47, %v12483_v17  ;;  %v9612_v47 = vld [vmem:[#allocation6 + $0x4c0] sm:$0xf] }
 0x642   :  { %v4732_v32 = vmul.f32 %v4700_v37, %v4668_v61  ;;  %v4448_v55 = vpop.f32.mrf.mxu0  ;;  %v4446_v37 = vadd.f32 %v4445_v35, %v12492_v4 }
 0x643   :  { %v4357_v6 = vadd.f32 %v12710_v22, %v4268_v26  ;;  %5571 = vmatmul.bf16.gmra.mxu3 %v9225_v0  ;;  %5749 = vmatmul.bf16.gmra.mxu1 %v9225_v0  ;;  %v14873_v22 = vld [vmem:[#allocation21_spill] sm:$0xff]  ;;  %v10101_v0 = vld [vmem:[#allocation6 + $0x4c4] sm:$0xf0] }
 0x644   :  { %v12896_v57 = vadd.f32 %v4732_v32, %v14871_v24  ;;  %v4701_v20 = vsub.f32 %v4533_v41, %v14873_v22  ;;  %v9574_v41 = vld [vmem:[#allocation6 + $0x478] sm:$0xf0] }
 0x645   :  { %v10343_v16 = vpop.eup %10342  ;;  %v4574_v10 = vmul.f32 0.5, %v4357_v6  ;;  %5457 = vmatmul.bf16.gmra.mxu2 %v12718_v48  ;;  %5635 = vmatmul.bf16.gmra.mxu0 %v12718_v48 }
 0x646   :  { %14872 = vst [vmem:[#allocation14_spill] sm:$0xff] %v12896_v57  ;;  %v4925_v2 = vpack.c.bf16 %v12896_v57, %v12896_v57  ;;  %v4637_v14 = vmul.f32 0.5, %v10343_v16  ;;  %v12903_v19 = vpop.f32.mrf.mxu3  ;;  %v9613_v16 = vor.u32 %v10101_v0, %v9612_v47 }
 0x647   :  { %10344 = vtanh.f32 %v4574_v10  ;;  %v10090_v10 = vld [vmem:[#allocation6 + $0x474] sm:$0xf]  ;;  %v10004_v0 = vld [vmem:[#allocation2 + $0xc4] sm:$0xf] }
 0x648   :  { %4957 = vst [vmem:[#allocation2 + $0xd0] sm:$0xf] %v4925_v2  ;;  %v4669_v24 = vadd.f32 0.5, %v4637_v14  ;;  %v12907_v31 = vpop.f32.mrf.mxu1  ;;  %v4270_v61 = vpop.f32.mrf.mxu2  ;;  %v10005_v30 = vld [vmem:[#allocation2 + $0xc4] sm:$0xf0]  ;;  %v9577_v57 = vor.u32 %v10090_v10, %v9574_v41  ;;  %6739 = vmatpush.bf16.msrb.mxu3 %v9613_v16 }
 0x649   :  { %5020 = vst [vmem:[#allocation2 + $0xcc] sm:$0xf] %v4925_v2  ;;  %v4271_v48 = vadd.f32 %v4270_v61, %v12483_v17  ;;  %v12911_v26 = vor.u32 %v10005_v30, %v12849_v51  ;;  %v10106_v14 = vld [vmem:[#allocation6 + $0x4f4] sm:$0xf]  ;;  %v12915_v2 = vld [vmem:[#allocation2 + $0xe0] sm:$0xf]  ;;  %v4535_v51 = vadd.f32 %v12698_v11, %v4446_v37 }
 0x64a   :  { %v4733_v32 = vmul.f32 %v4701_v20, %v4669_v24  ;;  %v4450_v6 = vpop.f32.mrf.mxu0  ;;  %6184 = vst [vmem:[#allocation2 + $0xc8] sm:$0xf] %v14831_v36  ;;  %v9641_v20 = vor.u32 %v10106_v14, %v9638_v15  ;;  %6825 = vmatpush.bf16.msrb.mxu0 %v9577_v57  ;;  %v4449_v15 = vadd.f32 %v4448_v55, %v12492_v4 }
 0x64b   :  { %v4360_v35 = vadd.f32 %v12733_v56, %v4271_v48  ;;  %6187 = vst [vmem:[#allocation2 + $0xe0] sm:$0xf] %v14831_v36 }
 0x64c   :  { %v12918_v61 = vadd.f32 %v4733_v32, %v14873_v22  ;;  %6914 = vmatpush.bf16.msrb.mxu1 %v9641_v20  ;;  %v9995_v22 = vld [vmem:[#allocation2 + $0x74] sm:$0xf0]  ;;  %v14875_v32 = vld [vmem:[#allocation20_spill] sm:$0xff]  ;;  %v9188_v20 = vld [vmem:[#allocation2 + $0x70] sm:$0xf]  ;;  %v4538_v55 = vadd.f32 %v12720_v12, %v4449_v15  ;;  %v4451_v12 = vadd.f32 %v4450_v6, %v12492_v4 }
 0x64d   :  { %v10345_v24 = vpop.eup %10344  ;;  %v4575_v30 = vmul.f32 0.5, %v4360_v35  ;;  %v4702_v11 = vsub.f32 %v4535_v51, %v14875_v32 }
 0x64e   :  { %14874 = vst [vmem:[#allocation16_spill] sm:$0xff] %v12918_v61  ;;  %v4926_v56 = vpack.c.bf16 %v12918_v61, %v12918_v61  ;;  %v4638_v48 = vmul.f32 0.5, %v10345_v24  ;;  %v12924_v47 = vpop.f32.mrf.mxu3  ;;  %v9189_v61 = vor.u32 %v9995_v22, %v9188_v20  ;;  %v14877_v22 = vld [vmem:[#allocation22_spill] sm:$0xff]  ;;  %v4540_v6 = vadd.f32 %v12739_v42, %v4451_v12 }
 0x64f   :  { %10346 = vtanh.f32 %v4575_v30  ;;  %v10102_v20 = vld [vmem:[#allocation6 + $0x4d4] sm:$0xf] }
 0x650   :  { %4958 = vst [vmem:[#allocation2 + $0xd8] sm:$0xf] %v4926_v56  ;;  %v4670_v37 = vadd.f32 0.5, %v4638_v48  ;;  %v12928_v16 = vpop.f32.mrf.mxu1  ;;  %v4272_v10 = vpop.f32.mrf.mxu2  ;;  %v9230_v57 = vld [vmem:[#allocation2 + $0xc8] sm:$0xf0] }
 0x651   :  { %5021 = vst [vmem:[#allocation2 + $0xd4] sm:$0xf] %v4926_v56  ;;  %v4273_v41 = vadd.f32 %v4272_v10, %v12483_v17  ;;  %v9233_v14 = vor.u32 %v10004_v0, %v9230_v57  ;;  %v10104_v56 = vld [vmem:[#allocation6 + $0x4e4] sm:$0xf]  ;;  %v9630_v10 = vld [vmem:[#allocation6 + $0x4e8] sm:$0xf0] }
 0x652   :  { %v4734_v35 = vmul.f32 %v4702_v11, %v4670_v37  ;;  %v4453_v24 = vpop.f32.mrf.mxu0 }
 0x653   :  { %v4362_v30 = vadd.f32 %v12750_v5, %v4273_v41  ;;  %5576 = vmatmul.bf16.gmra.mxu3 %v9233_v14  ;;  %5754 = vmatmul.bf16.gmra.mxu1 %v9233_v14  ;;  %v9633_v5 = vor.u32 %v10104_v56, %v9630_v10  ;;  %v9540_v14 = vld [vmem:[#allocation6 + $0x430] sm:$0xf]  ;;  %v4454_v12 = vadd.f32 %v4453_v24, %v12492_v4 }
 0x654   :  { %v12933_v51 = vadd.f32 %v4734_v35, %v14875_v32  ;;  %v4703_v32 = vsub.f32 %v4538_v55, %v14877_v22  ;;  %v10083_v35 = vld [vmem:[#allocation6 + $0x434] sm:$0xf0] }
 0x655   :  { %v10347_v48 = vpop.eup %10346  ;;  %v4576_v23 = vmul.f32 0.5, %v4362_v30  ;;  %5462 = vmatmul.bf16.gmra.mxu2 %v9189_v61  ;;  %5640 = vmatmul.bf16.gmra.mxu0 %v9189_v61  ;;  %v9541_v56 = vor.u32 %v10083_v35, %v9540_v14 }
 0x656   :  { %14876 = vst [vmem:[#allocation15_spill] sm:$0xff] %v12933_v51  ;;  %v4990_v0 = vpack.c.bf16 %v12933_v51, %v12933_v51  ;;  %v4639_v11 = vmul.f32 0.5, %v10347_v48  ;;  %v12938_v37 = vpop.f32.mrf.mxu3  ;;  %6915 = vmatpush.bf16.msrb.mxu1 %v9633_v5  ;;  %v9614_v51 = vld [vmem:[#allocation6 + $0x4c8] sm:$0xf0] }
 0x657   :  { %10348 = vtanh.f32 %v4576_v23  ;;  %v9622_v23 = vld [vmem:[#allocation6 + $0x4d8] sm:$0xf0]  ;;  %6651 = vmatpush.bf16.msrb.mxu2 %v9541_v56 }
 0x658   :  { %5022 = vst [vmem:[#allocation2 + $0xdc] sm:$0xf] %v4990_v0  ;;  %v4671_v57 = vadd.f32 0.5, %v4639_v11  ;;  %v12942_v15 = vpop.f32.mrf.mxu1  ;;  %v4275_v41 = vpop.f32.mrf.mxu2  ;;  %v9625_v55 = vor.u32 %v10102_v20, %v9622_v23 }
 0x659   :  { %v4276_v61 = vadd.f32 %v4275_v41, %v12483_v17  ;;  %v10100_v41 = vld [vmem:[#allocation6 + $0x4c4] sm:$0xf] }
 0x65a   :  { %v4735_v30 = vmul.f32 %v4703_v32, %v4671_v57  ;;  %v12945_v48 = vpop.f32.mrf.mxu0  ;;  %6916 = vmatpush.bf16.msrb.mxu1 %v9625_v55  ;;  %v9617_v35 = vor.u32 %v10100_v41, %v9614_v51  ;;  %v9604_v55 = vld [vmem:[#allocation6 + $0x4b0] sm:$0xf] }
 0x65b   :  { %v4365_v10 = vadd.f32 %v12765_v52, %v4276_v61  ;;  %v10006_v52 = vld [vmem:[#allocation2 + $0xd4] sm:$0xf] }
 0x65c   :  { %v12949_v0 = vadd.f32 %v4735_v30, %v14877_v22  ;;  %v14879_v22 = vld [vmem:[#allocation23_spill] sm:$0xff] }
 0x65d   :  { %v10349_v11 = vpop.eup %10348  ;;  %v4577_v5 = vmul.f32 0.5, %v4365_v10  ;;  %v4704_v20 = vsub.f32 %v4540_v6, %v14879_v22 }
 0x65e   :  { %14878 = vst [vmem:[#allocation17_spill] sm:$0xff] %v12949_v0  ;;  %v4928_v32 = vpack.c.bf16 %v12949_v0, %v12949_v0  ;;  %v4640_v57 = vmul.f32 0.5, %v10349_v11  ;;  %v12954_v14 = vpop.f32.mrf.mxu3  ;;  %v10099_v11 = vld [vmem:[#allocation6 + $0x4b4] sm:$0xf0]  ;;  %6917 = vmatpush.bf16.msrb.mxu1 %v9617_v35  ;;  %v10098_v0 = vld [vmem:[#allocation6 + $0x4b4] sm:$0xf] }
 0x65f   :  { %10350 = vtanh.f32 %v4577_v5  ;;  %v9238_v61 = vld [vmem:[#allocation2 + $0xd8] sm:$0xf0]  ;;  %v9605_v41 = vor.u32 %v10099_v11, %v9604_v55  ;;  %v9609_v24 = vor.u32 %v10098_v0, %v9606_v45  ;;  %v4456_v55 = vadd.f32 %v12945_v48, %v12492_v4  ;;  %v10094_v48 = vld [vmem:[#allocation6 + $0x494] sm:$0xf] }
 0x660   :  { %5023 = vst [vmem:[#allocation2 + $0xe4] sm:$0xf] %v4928_v32  ;;  %v4672_v42 = vadd.f32 0.5, %v4640_v57  ;;  %v12958_v30 = vpop.f32.mrf.mxu1  ;;  %v4277_v56 = vpop.f32.mrf.mxu2  ;;  %v9241_v23 = vor.u32 %v10006_v52, %v9238_v61  ;;  %v10095_v4 = vld [vmem:[#allocation6 + $0x494] sm:$0xf0] }
 0x661   :  { %4960 = vst [vmem:[#allocation2 + $0xe8] sm:$0xf] %v4928_v32  ;;  %v4278_v10 = vadd.f32 %v4277_v56, %v12483_v17  ;;  %v4543_v32 = vadd.f32 %v12757_v21, %v4454_v12  ;;  %v5093_v17 = vld [vmem:[#allocation8 + $0x6] sm:$0x3]  ;;  %6740 = vmatpush.bf16.msrb.mxu3 %v9605_v41  ;;  %v9598_v12 = vld [vmem:[#allocation6 + $0x4a8] sm:$0xf0] }
 0x662   :  { %v4736_v51 = vmul.f32 %v4704_v20, %v4672_v42  ;;  %v12961_v5 = vpop.f32.mrf.mxu0  ;;  %v12970_v61 = vperm.slane %v5093_v17, 0  ;;  %v9596_v20 = vld [vmem:[#allocation6 + $0x4a0] sm:$0xf]  ;;  %6918 = vmatpush.bf16.msrb.mxu1 %v9609_v24  ;;  %v10096_v42 = vld [vmem:[#allocation6 + $0x4a4] sm:$0xf] }
 0x663   :  { %v4367_v6 = vadd.f32 %v12792_v13, %v4278_v10  ;;  %5581 = vmatmul.bf16.gmra.mxu3 %v9241_v23  ;;  %5759 = vmatmul.bf16.gmra.mxu1 %v9241_v23  ;;  %v10097_v13 = vld [vmem:[#allocation6 + $0x4a4] sm:$0xf0]  ;;  %v9601_v56 = vor.u32 %v10096_v42, %v9598_v12  ;;  %v9566_v24 = vld [vmem:[#allocation6 + $0x468] sm:$0xf0]  ;;  %v9590_v42 = vld [vmem:[#allocation6 + $0x498] sm:$0xf0] }
 0x664   :  { %v12965_v57 = vadd.f32 %v4736_v51, %v14879_v22  ;;  %v9597_v21 = vor.u32 %v10097_v13, %v9596_v20  ;;  %v14880_v23 = vld [vmem:[#allocation24_spill] sm:$0xff] }
 0x665   :  { %v10351_v52 = vpop.eup %10350  ;;  %v4578_v35 = vmul.f32 0.5, %v4367_v6  ;;  %5467 = vmatmul.bf16.gmra.mxu2 %v12781_v27  ;;  %5645 = vmatmul.bf16.gmra.mxu0 %v12781_v27  ;;  %v4705_v10 = vsub.f32 %v4543_v32, %v14880_v23  ;;  %v10088_v6 = vld [vmem:[#allocation6 + $0x464] sm:$0xf] }
 0x666   :  { %v4929_v45 = vpack.c.bf16 %v12965_v57, %v12965_v57  ;;  %v4641_v0 = vmul.f32 0.5, %v10351_v52  ;;  %v12974_v22 = vpop.f32.mrf.mxu3  ;;  %6741 = vmatpush.bf16.msrb.mxu3 %v9597_v21  ;;  %v9569_v32 = vor.u32 %v10088_v6, %v9566_v24  ;;  %6919 = vmatpush.bf16.msrb.mxu1 %v9601_v56  ;;  %v10093_v6 = vld [vmem:[#allocation6 + $0x484] sm:$0xf0] }
 0x667   :  { %10352 = vtanh.f32 %v4578_v35 }
 0x668   :  { %4961 = vst [vmem:[#allocation2 + $0xf0] sm:$0xf] %v4929_v45  ;;  %v4673_v27 = vadd.f32 0.5, %v4641_v0  ;;  %v5428_v11 = vpop.f32.mrf.mxu2  ;;  %v10009_v51 = vld [vmem:[#allocation2 + $0xe4] sm:$0xf0]  ;;  %v12983_v20 = vpop.f32.mrf.mxu1  ;;  %6826 = vmatpush.bf16.msrb.mxu0 %v9569_v32  ;;  %v14881_v32 = vld [vmem:[#allocation26_spill] sm:$0xff] }
 0x669   :  { %5024 = vst [vmem:[#allocation2 + $0xec] sm:$0xf] %v4929_v45  ;;  %v5429_v41 = vadd.f32 %v5428_v11, %v12970_v61  ;;  %v12981_v52 = vor.u32 %v10009_v51, %v12915_v2  ;;  %v9588_v0 = vld [vmem:[#allocation6 + $0x490] sm:$0xf]  ;;  %v4545_v2 = vadd.f32 %v12775_v59, %v4456_v55  ;;  %v9580_v51 = vld [vmem:[#allocation6 + $0x480] sm:$0xf] }
 0x66a   :  { %v4737_v35 = vmul.f32 %v4705_v10, %v4673_v27  ;;  %v12985_v13 = vpop.f32.mrf.mxu0  ;;  %v9589_v45 = vor.u32 %v10095_v4, %v9588_v0  ;;  %6188 = vst [vmem:[#allocation2 + $0xe8] sm:$0xf] %v14831_v36  ;;  %v12993_v10 = vperm.slane %v5093_v17, 1  ;;  %v9593_v27 = vor.u32 %v10094_v48, %v9590_v42  ;;  %v10008_v59 = vld [vmem:[#allocation2 + $0xe4] sm:$0xf] }
 0x66b   :  { %v5518_v21 = vadd.f32 %v12808_v8, %v5429_v41  ;;  %v9581_v36 = vor.u32 %v10093_v6, %v9580_v51  ;;  %v9999_v17 = vld [vmem:[#allocation2 + $0x94] sm:$0xf0]  ;;  %v4706_v0 = vsub.f32 %v4545_v2, %v14881_v32 }
 0x66c   :  { %v12990_v12 = vadd.f32 %v4737_v35, %v14880_v23  ;;  %6742 = vmatpush.bf16.msrb.mxu3 %v9589_v45  ;;  %6920 = vmatpush.bf16.msrb.mxu1 %v9593_v27  ;;  %v10092_v23 = vld [vmem:[#allocation6 + $0x484] sm:$0xf]  ;;  %v9582_v35 = vld [vmem:[#allocation6 + $0x488] sm:$0xf0]  ;;  %v5607_v48 = vadd.f32 %v12961_v5, %v12993_v10 }
 0x66d   :  { %v10353_v11 = vpop.eup %10352  ;;  %v5775_v56 = vmul.f32 0.5, %v5518_v21  ;;  %v9585_v55 = vor.u32 %v10092_v23, %v9582_v35 }
 0x66e   :  { %v4930_v8 = vpack.c.bf16 %v12990_v12, %v12990_v12  ;;  %v4642_v41 = vmul.f32 0.5, %v10353_v11  ;;  %v12997_v24 = vpop.f32.mrf.mxu3  ;;  %v5696_v5 = vadd.f32 %v12798_v7, %v5607_v48  ;;  %v5609_v7 = vadd.f32 %v12985_v13, %v12993_v10  ;;  %v10081_v48 = vld [vmem:[#allocation6 + $0x424] sm:$0xf0] }
 0x66f   :  { %10354 = vtanh.f32 %v5775_v56  ;;  %v9204_v56 = vld [vmem:[#allocation2 + $0x90] sm:$0xf] }
 0x670   :  { %4962 = vst [vmem:[#allocation2 + $0xf8] sm:$0xf] %v4930_v8  ;;  %v4674_v4 = vadd.f32 0.5, %v4642_v41  ;;  %v5430_v21 = vpop.f32.mrf.mxu2  ;;  %v9246_v45 = vld [vmem:[#allocation2 + $0xe8] sm:$0xf0]  ;;  %6743 = vmatpush.bf16.msrb.mxu3 %v9581_v36  ;;  %6921 = vmatpush.bf16.msrb.mxu1 %v9585_v55  ;;  %v9205_v2 = vor.u32 %v9999_v17, %v9204_v56  ;;  %v13008_v23 = vpop.f32.mrf.mxu1  ;;  %v5698_v56 = vadd.f32 %v12812_v9, %v5609_v7 }
 0x671   :  { %5025 = vst [vmem:[#allocation2 + $0xf4] sm:$0xf] %v4930_v8  ;;  %v5431_v42 = vadd.f32 %v5430_v21, %v12970_v61  ;;  %v9249_v27 = vor.u32 %v10008_v59, %v9246_v45 }
 0x672   :  { %v4738_v11 = vmul.f32 %v4706_v0, %v4674_v4  ;;  %v5611_v51 = vpop.f32.mrf.mxu0  ;;  %v9532_v4 = vld [vmem:[#allocation6 + $0x420] sm:$0xf] }
 0x673   :  { %v5520_v6 = vadd.f32 %v12822_v18, %v5431_v42  ;;  %5586 = vmatmul.bf16.gmra.mxu3 %v9249_v27  ;;  %5764 = vmatmul.bf16.gmra.mxu1 %v9249_v27  ;;  %v5903_v18 = vsub.f32 %v5696_v5, %v12511_v39  ;;  %v9533_v42 = vor.u32 %v10081_v48, %v9532_v4 }
 0x674   :  { %v13005_v41 = vadd.f32 %v4738_v11, %v14881_v32  ;;  %v5612_v9 = vadd.f32 %v5611_v51, %v12993_v10 }
 0x675   :  { %v10355_v8 = vpop.eup %10354  ;;  %v5776_v35 = vmul.f32 0.5, %v5520_v6  ;;  %5472 = vmatmul.bf16.gmra.mxu2 %v9205_v2  ;;  %5650 = vmatmul.bf16.gmra.mxu0 %v9205_v2 }
 0x676   :  { %v4994_v36 = vpack.c.bf16 %v13005_v41, %v13005_v41  ;;  %v5839_v59 = vmul.f32 0.5, %v10355_v8  ;;  %v13012_v55 = vpop.f32.mrf.mxu3  ;;  %6652 = vmatpush.bf16.msrb.mxu2 %v9533_v42 }
 0x677   :  { %10356 = vtanh.f32 %v5776_v35 }
 0x678   :  { %5026 = vst [vmem:[#allocation2 + $0xfc] sm:$0xf] %v4994_v36  ;;  %v5871_v17 = vadd.f32 0.5, %v5839_v59  ;;  %v5433_v32 = vpop.f32.mrf.mxu2  ;;  %v13025_v8 = vpop.f32.mrf.mxu1  ;;  %v10010_v36 = vld [vmem:[#allocation2 + $0xf4] sm:$0xf] }
 0x679   :  { %v5434_v0 = vadd.f32 %v5433_v32, %v12970_v61 }
 0x67a   :  { %v5935_v21 = vmul.f32 %v5903_v18, %v5871_v17  ;;  %v5613_v45 = vpop.f32.mrf.mxu0 }
 0x67b   :  { %v5523_v27 = vadd.f32 %v12838_v50, %v5434_v0 }
 0x67c   :  { %v13020_v11 = vadd.f32 %v5935_v21, %v12511_v39  ;;  %v5904_v39 = vsub.f32 %v5698_v56, %v12524_v54  ;;  %v5701_v21 = vadd.f32 %v12826_v63, %v5612_v9 }
 0x67d   :  { %v10357_v6 = vpop.eup %10356  ;;  %v5777_v2 = vmul.f32 0.5, %v5523_v27 }
 0x67e   :  { %v6129_v13 = vpack.c.bf16 %v13020_v11, %v13020_v11  ;;  %v5840_v5 = vmul.f32 0.5, %v10357_v6  ;;  %v13027_v35 = vpop.f32.mrf.mxu3 }
 0x67f   :  { %10358 = vtanh.f32 %v5777_v2  ;;  %v9254_v59 = vld [vmem:[#allocation2 + $0xf8] sm:$0xf0]  ;;  %v5614_v2 = vadd.f32 %v5613_v45, %v12993_v10 }
 0x680   :  { %6223 = vst [vmem:[#allocation2 + $0x4] sm:$0xf] %v6129_v13  ;;  %v5872_v50 = vadd.f32 0.5, %v5840_v5  ;;  %v5435_v18 = vpop.f32.mrf.mxu2  ;;  %v9257_v17 = vor.u32 %v10010_v36, %v9254_v59  ;;  %v13045_v63 = vpop.f32.mrf.mxu1  ;;  %v9558_v36 = vld [vmem:[#allocation6 + $0x458] sm:$0xf0] }
 0x681   :  { %6161 = vst [vmem:[#allocation2 + $0x10] sm:$0xf] %v6129_v13  ;;  %v5436_v7 = vadd.f32 %v5435_v18, %v12970_v61 }
 0x682   :  { %v5936_v32 = vmul.f32 %v5904_v39, %v5872_v50  ;;  %v5616_v0 = vpop.f32.mrf.mxu0 }
 0x683   :  { %v5525_v4 = vadd.f32 %v12859_v49, %v5436_v7  ;;  %5591 = vmatmul.bf16.gmra.mxu3 %v9257_v17  ;;  %5769 = vmatmul.bf16.gmra.mxu1 %v9257_v17  ;;  %v5905_v49 = vsub.f32 %v5701_v21, %v12545_v3  ;;  %v5703_v17 = vadd.f32 %v12842_v46, %v5614_v2 }
 0x684   :  { %v13034_v48 = vadd.f32 %v5936_v32, %v12524_v54 }
 0x685   :  { %v10359_v42 = vpop.eup %10358  ;;  %v5778_v27 = vmul.f32 0.5, %v5525_v4  ;;  %5477 = vmatmul.bf16.gmra.mxu2 %v12846_v34  ;;  %5655 = vmatmul.bf16.gmra.mxu0 %v12846_v34  ;;  %v10086_v34 = vld [vmem:[#allocation6 + $0x454] sm:$0xf] }
 0x686   :  { %v6130_v51 = vpack.c.bf16 %v13034_v48, %v13034_v48  ;;  %v5841_v56 = vmul.f32 0.5, %v10359_v42  ;;  %v13041_v6 = vpop.f32.mrf.mxu3  ;;  %v9561_v50 = vor.u32 %v10086_v34, %v9558_v36  ;;  %v9220_v34 = vld [vmem:[#allocation2 + $0xb0] sm:$0xf] }
 0x687   :  { %10360 = vtanh.f32 %v5778_v27  ;;  %v10044_v42 = vld [vmem:[#allocation2 + $0x4] sm:$0xf] }
 0x688   :  { %6224 = vst [vmem:[#allocation2 + $0xc] sm:$0xf] %v6130_v51  ;;  %v5873_v54 = vadd.f32 0.5, %v5841_v56  ;;  %v5438_v13 = vpop.f32.mrf.mxu2  ;;  %6827 = vmatpush.bf16.msrb.mxu0 %v9561_v50 }
 0x689   :  { %6162 = vst [vmem:[#allocation2 + $0x18] sm:$0xf] %v6130_v51  ;;  %v5439_v5 = vadd.f32 %v5438_v13, %v12970_v61  ;;  %v13060_v13 = vpop.f32.mrf.mxu1 }
 0x68a   :  { %v5937_v59 = vmul.f32 %v5905_v49, %v5873_v54  ;;  %v5618_v39 = vpop.f32.mrf.mxu0  ;;  %v10003_v49 = vld [vmem:[#allocation2 + $0xb4] sm:$0xf0] }
 0x68b   :  { %v5528_v9 = vadd.f32 %v12873_v43, %v5439_v5  ;;  %v5906_v43 = vsub.f32 %v5703_v17, %v12557_v28 }
 0x68c   :  { %v13050_v18 = vadd.f32 %v5937_v59, %v12545_v3  ;;  %v5617_v3 = vadd.f32 %v5616_v0, %v12993_v10  ;;  %v9221_v59 = vor.u32 %v10003_v49, %v9220_v34 }
 0x68d   :  { %v10361_v45 = vpop.eup %10360  ;;  %v5779_v7 = vmul.f32 0.5, %v5528_v9 }
 0x68e   :  { %v6193_v32 = vpack.c.bf16 %v13050_v18, %v13050_v18  ;;  %v5842_v4 = vmul.f32 0.5, %v10361_v45  ;;  %v13055_v21 = vpop.f32.mrf.mxu3  ;;  %v5706_v0 = vadd.f32 %v12863_v53, %v5617_v3 }
 0x68f   :  { %10362 = vtanh.f32 %v5779_v7  ;;  %v9390_v27 = vld [vmem:[#allocation2 + $0x8] sm:$0xf0] }
 0x690   :  { %6225 = vst [vmem:[#allocation2 + $0x14] sm:$0xf] %v6193_v32  ;;  %v5874_v51 = vadd.f32 0.5, %v5842_v4  ;;  %v5440_v56 = vpop.f32.mrf.mxu2  ;;  %v9393_v46 = vor.u32 %v10044_v42, %v9390_v27  ;;  %v9524_v27 = vld [vmem:[#allocation6 + $0x410] sm:$0xf] }
 0x691   :  { %v5441_v54 = vadd.f32 %v5440_v56, %v12970_v61 }
 0x692   :  { %v5938_v2 = vmul.f32 %v5906_v43, %v5874_v51  ;;  %v5621_v5 = vpop.f32.mrf.mxu0  ;;  %v10079_v43 = vld [vmem:[#allocation6 + $0x414] sm:$0xf0] }
 0x693   :  { %v5530_v36 = vadd.f32 %v12887_v29, %v5441_v54  ;;  %6744 = vmatmul.bf16.vlgmr.msrb.gmra.mxu3 %v9393_v46  ;;  %6922 = vmatmul.bf16.vlgmr.msrb.gmra.mxu1 %v9393_v46  ;;  %v5907_v29 = vsub.f32 %v5706_v0, %v12571_v40  ;;  %v9525_v56 = vor.u32 %v10079_v43, %v9524_v27 }
 0x694   :  { %v13064_v50 = vadd.f32 %v5938_v2, %v12557_v28  ;;  %v5619_v28 = vadd.f32 %v5618_v39, %v12993_v10  ;;  %v13079_v2 = vpop.f32.mrf.mxu1 }
 0x695   :  { %v10363_v9 = vpop.eup %10362  ;;  %v5780_v17 = vmul.f32 0.5, %v5530_v36  ;;  %5482 = vmatmul.bf16.gmra.mxu2 %v9221_v59  ;;  %5660 = vmatmul.bf16.gmra.mxu0 %v9221_v59 }
 0x696   :  { %v6194_v45 = vpack.c.bf16 %v13064_v50, %v13064_v50  ;;  %v5843_v7 = vmul.f32 0.5, %v10363_v9  ;;  %v13069_v32 = vpop.f32.mrf.mxu3  ;;  %v5708_v54 = vadd.f32 %v12877_v44, %v5619_v28  ;;  %6653 = vmatpush.bf16.msrb.mxu2 %v9525_v56  ;;  %v5622_v44 = vadd.f32 %v5621_v5, %v12993_v10 }
 0x697   :  { %10364 = vtanh.f32 %v5780_v17  ;;  %v10046_v9 = vld [vmem:[#allocation2 + $0x14] sm:$0xf] }
 0x698   :  { %6226 = vst [vmem:[#allocation2 + $0x1c] sm:$0xf] %v6194_v45  ;;  %v5875_v4 = vadd.f32 0.5, %v5843_v7  ;;  %v5443_v42 = vpop.f32.mrf.mxu2 }
 0x699   :  { %v5444_v53 = vadd.f32 %v5443_v42, %v12970_v61 }
 0x69a   :  { %v5939_v51 = vmul.f32 %v5907_v29, %v5875_v4  ;;  %v5623_v3 = vpop.f32.mrf.mxu0 }
 0x69b   :  { %v5533_v46 = vadd.f32 %v12903_v19, %v5444_v53  ;;  %v5711_v53 = vadd.f32 %v12891_v58, %v5622_v44  ;;  %v5624_v58 = vadd.f32 %v5623_v3, %v12993_v10 }
 0x69c   :  { %v13076_v49 = vadd.f32 %v5939_v51, %v12571_v40  ;;  %v5908_v40 = vsub.f32 %v5708_v54, %v12586_v1  ;;  %v13097_v56 = vpop.f32.mrf.mxu1 }
 0x69d   :  { %v10365_v34 = vpop.eup %10364  ;;  %v5781_v39 = vmul.f32 0.5, %v5533_v46  ;;  %v5713_v44 = vadd.f32 %v12907_v31, %v5624_v58 }
 0x69e   :  { %v6133_v36 = vpack.c.bf16 %v13076_v49, %v13076_v49  ;;  %v5844_v59 = vmul.f32 0.5, %v10365_v34  ;;  %v13083_v0 = vpop.f32.mrf.mxu3 }
 0x69f   :  { %10366 = vtanh.f32 %v5781_v39  ;;  %v9398_v17 = vld [vmem:[#allocation2 + $0x18] sm:$0xf0] }
 0x6a0   :  { %6165 = vst [vmem:[#allocation2 + $0x30] sm:$0xf] %v6133_v36  ;;  %v5876_v19 = vadd.f32 0.5, %v5844_v59  ;;  %v5445_v45 = vpop.f32.mrf.mxu2  ;;  %v9401_v7 = vor.u32 %v10046_v9, %v9398_v17 }
 0x6a1   :  { %6227 = vst [vmem:[#allocation2 + $0x24] sm:$0xf] %v6133_v36  ;;  %v5446_v29 = vadd.f32 %v5445_v45, %v12970_v61  ;;  %v9550_v36 = vld [vmem:[#allocation6 + $0x448] sm:$0xf0] }
 0x6a2   :  { %v5940_v4 = vmul.f32 %v5908_v40, %v5876_v19  ;;  %v5626_v28 = vpop.f32.mrf.mxu0 }
 0x6a3   :  { %v5535_v42 = vadd.f32 %v12924_v47, %v5446_v29  ;;  %6749 = vmatmul.bf16.gmra.mxu3 %v9401_v7  ;;  %6927 = vmatmul.bf16.gmra.mxu1 %v9401_v7  ;;  %v5627_v31 = vadd.f32 %v5626_v28, %v12993_v10  ;;  %v9542_v28 = vld [vmem:[#allocation6 + $0x438] sm:$0xf0] }
 0x6a4   :  { %v13090_v27 = vadd.f32 %v5940_v4, %v12586_v1  ;;  %v5909_v1 = vsub.f32 %v5711_v53, %v12605_v62  ;;  %v10007_v53 = vld [vmem:[#allocation2 + $0xd4] sm:$0xf0] }
 0x6a5   :  { %v10367_v43 = vpop.eup %10366  ;;  %v5782_v51 = vmul.f32 0.5, %v5535_v42  ;;  %5487 = vmatmul.bf16.gmra.mxu2 %v12911_v26  ;;  %5665 = vmatmul.bf16.gmra.mxu0 %v12911_v26  ;;  %v10084_v26 = vld [vmem:[#allocation6 + $0x444] sm:$0xf] }
 0x6a6   :  { %v6134_v5 = vpack.c.bf16 %v13090_v27, %v13090_v27  ;;  %v5845_v46 = vmul.f32 0.5, %v10367_v43  ;;  %v13099_v47 = vpop.f32.mrf.mxu3  ;;  %v9553_v17 = vor.u32 %v10084_v26, %v9550_v36  ;;  %v13114_v43 = vpop.f32.mrf.mxu1 }
 0x6a7   :  { %10368 = vtanh.f32 %v5782_v51 }
 0x6a8   :  { %6166 = vst [vmem:[#allocation2 + $0x38] sm:$0xf] %v6134_v5  ;;  %v5877_v54 = vadd.f32 0.5, %v5845_v46  ;;  %v5448_v34 = vpop.f32.mrf.mxu2  ;;  %6828 = vmatpush.bf16.msrb.mxu0 %v9553_v17  ;;  %v10048_v42 = vld [vmem:[#allocation2 + $0x24] sm:$0xf] }
 0x6a9   :  { %6228 = vst [vmem:[#allocation2 + $0x2c] sm:$0xf] %v6134_v5  ;;  %v5449_v39 = vadd.f32 %v5448_v34, %v12970_v61  ;;  %v9236_v34 = vld [vmem:[#allocation2 + $0xd0] sm:$0xf]  ;;  %v10082_v17 = vld [vmem:[#allocation6 + $0x434] sm:$0xf] }
 0x6aa   :  { %v5941_v59 = vmul.f32 %v5909_v1, %v5877_v54  ;;  %v5628_v9 = vpop.f32.mrf.mxu0  ;;  %v9237_v26 = vor.u32 %v10007_v53, %v9236_v34  ;;  %v9516_v53 = vld [vmem:[#allocation6 + $0x400] sm:$0xf] }
 0x6ab   :  { %v5538_v40 = vadd.f32 %v12938_v37, %v5449_v39  ;;  %v5910_v37 = vsub.f32 %v5713_v44, %v12619_v38 }
 0x6ac   :  { %v13106_v19 = vadd.f32 %v5941_v59, %v12605_v62  ;;  %v5716_v59 = vadd.f32 %v12928_v16, %v5627_v31  ;;  %v5629_v16 = vadd.f32 %v5628_v9, %v12993_v10  ;;  %v10080_v31 = vld [vmem:[#allocation6 + $0x424] sm:$0xf] }
 0x6ad   :  { %v10369_v45 = vpop.eup %10368  ;;  %v5783_v7 = vmul.f32 0.5, %v5538_v40 }
 0x6ae   :  { %v6197_v3 = vpack.c.bf16 %v13106_v19, %v13106_v19  ;;  %v5846_v29 = vmul.f32 0.5, %v10369_v45  ;;  %v13111_v4 = vpop.f32.mrf.mxu3  ;;  %v9545_v45 = vor.u32 %v10082_v17, %v9542_v28  ;;  %v5718_v9 = vadd.f32 %v12942_v15, %v5629_v16  ;;  %v9526_v17 = vld [vmem:[#allocation6 + $0x418] sm:$0xf0] }
 0x6af   :  { %10370 = vtanh.f32 %v5783_v7 }
 0x6b0   :  { %6229 = vst [vmem:[#allocation2 + $0x34] sm:$0xf] %v6197_v3  ;;  %v5878_v62 = vadd.f32 0.5, %v5846_v29  ;;  %v5450_v51 = vpop.f32.mrf.mxu2  ;;  %v9406_v5 = vld [vmem:[#allocation2 + $0x28] sm:$0xf0]  ;;  %6829 = vmatpush.bf16.msrb.mxu0 %v9545_v45 }
 0x6b1   :  { %v5451_v46 = vadd.f32 %v5450_v51, %v12970_v61  ;;  %v9409_v1 = vor.u32 %v10048_v42, %v9406_v5  ;;  %v9534_v51 = vld [vmem:[#allocation6 + $0x428] sm:$0xf0]  ;;  %v13130_v5 = vpop.f32.mrf.mxu1 }
 0x6b2   :  { %v5942_v54 = vmul.f32 %v5910_v37, %v5878_v62  ;;  %v5631_v58 = vpop.f32.mrf.mxu0  ;;  %v10077_v62 = vld [vmem:[#allocation6 + $0x404] sm:$0xf0]  ;;  %v9537_v34 = vor.u32 %v10080_v31, %v9534_v51 }
 0x6b3   :  { %v5540_v39 = vadd.f32 %v12954_v14, %v5451_v46  ;;  %6754 = vmatmul.bf16.gmra.mxu3 %v9409_v1  ;;  %6932 = vmatmul.bf16.gmra.mxu1 %v9409_v1 }
 0x6b4   :  { %v13120_v36 = vadd.f32 %v5942_v54, %v12619_v38  ;;  %v5911_v38 = vsub.f32 %v5716_v59, %v12631_v33  ;;  %v9517_v54 = vor.u32 %v10077_v62, %v9516_v53  ;;  %6830 = vmatpush.bf16.msrb.mxu0 %v9537_v34  ;;  %v10078_v59 = vld [vmem:[#allocation6 + $0x414] sm:$0xf]  ;;  %v10076_v53 = vld [vmem:[#allocation6 + $0x404] sm:$0xf]  ;;  %v9518_v62 = vld [vmem:[#allocation6 + $0x408] sm:$0xf0] }
 0x6b5   :  { %v10371_v40 = vpop.eup %10370  ;;  %v5784_v44 = vmul.f32 0.5, %v5540_v39  ;;  %5492 = vmatmul.bf16.gmra.mxu2 %v9237_v26  ;;  %5670 = vmatmul.bf16.gmra.mxu0 %v9237_v26 }
 0x6b6   :  { %v6198_v7 = vpack.c.bf16 %v13120_v36, %v13120_v36  ;;  %v5847_v3 = vmul.f32 0.5, %v10371_v40  ;;  %v13125_v14 = vpop.f32.mrf.mxu3  ;;  %6654 = vmatpush.bf16.msrb.mxu2 %v9517_v54 }
 0x6b7   :  { %10372 = vtanh.f32 %v5784_v44  ;;  %v9529_v44 = vor.u32 %v10078_v59, %v9526_v17 }
 0x6b8   :  { %6230 = vst [vmem:[#allocation2 + $0x3c] sm:$0xf] %v6198_v7  ;;  %v5879_v29 = vadd.f32 0.5, %v5847_v3  ;;  %v5453_v42 = vpop.f32.mrf.mxu2 }
 0x6b9   :  { %v5454_v37 = vadd.f32 %v5453_v42, %v12970_v61  ;;  %6831 = vmatpush.bf16.msrb.mxu0 %v9529_v44  ;;  %v13145_v34 = vpop.f32.mrf.mxu1 }
 0x6ba   :  { %v5943_v46 = vmul.f32 %v5911_v38, %v5879_v29  ;;  %v5633_v1 = vpop.f32.mrf.mxu0  ;;  %v5632_v29 = vadd.f32 %v5631_v58, %v12993_v10 }
 0x6bb   :  { %v5543_v39 = vadd.f32 %v12974_v22, %v5454_v37  ;;  %v10050_v22 = vld [vmem:[#allocation2 + $0x34] sm:$0xf] }
 0x6bc   :  { %v13134_v26 = vadd.f32 %v5943_v46, %v12631_v33  ;;  %v5912_v33 = vsub.f32 %v5718_v9, %v12646_v25  ;;  %v9521_v46 = vor.u32 %v10076_v53, %v9518_v62  ;;  %v5721_v58 = vadd.f32 %v12958_v30, %v5632_v29  ;;  %v10011_v62 = vld [vmem:[#allocation2 + $0xf4] sm:$0xf0] }
 0x6bd   :  { %v10373_v28 = vpop.eup %10372  ;;  %v5785_v40 = vmul.f32 0.5, %v5543_v39  ;;  %v5634_v30 = vadd.f32 %v5633_v1, %v12993_v10 }
 0x6be   :  { %v6137_v45 = vpack.c.bf16 %v13134_v26, %v13134_v26  ;;  %v5848_v7 = vmul.f32 0.5, %v10373_v28  ;;  %v13139_v3 = vpop.f32.mrf.mxu3  ;;  %6832 = vmatpush.bf16.msrb.mxu0 %v9521_v46 }
 0x6bf   :  { %10374 = vtanh.f32 %v5785_v40  ;;  %v9414_v38 = vld [vmem:[#allocation2 + $0x38] sm:$0xf0] }
 0x6c0   :  { %6169 = vst [vmem:[#allocation2 + $0x50] sm:$0xf] %v6137_v45  ;;  %v5880_v15 = vadd.f32 0.5, %v5848_v7  ;;  %v5455_v16 = vpop.f32.mrf.mxu2  ;;  %v9417_v42 = vor.u32 %v10050_v22, %v9414_v38 }
 0x6c1   :  { %6231 = vst [vmem:[#allocation2 + $0x44] sm:$0xf] %v6137_v45  ;;  %v5456_v37 = vadd.f32 %v5455_v16, %v12970_v61  ;;  %v13165_v16 = vpop.f32.mrf.mxu1 }
 0x6c2   :  { %v5944_v31 = vmul.f32 %v5912_v33, %v5880_v15  ;;  %v5636_v51 = vpop.f32.mrf.mxu0  ;;  %v5723_v33 = vadd.f32 %v12983_v20, %v5634_v30 }
 0x6c3   :  { %v5545_v54 = vadd.f32 %v12997_v24, %v5456_v37  ;;  %6759 = vmatmul.bf16.gmra.mxu3 %v9417_v42  ;;  %6937 = vmatmul.bf16.gmra.mxu1 %v9417_v42  ;;  %v5637_v46 = vadd.f32 %v5636_v51, %v12993_v10 }
 0x6c4   :  { %v13148_v39 = vadd.f32 %v5944_v31, %v12646_v25  ;;  %v5913_v25 = vsub.f32 %v5721_v58, %v12667_v60 }
 0x6c5   :  { %v10375_v9 = vpop.eup %10374  ;;  %v5786_v59 = vmul.f32 0.5, %v5545_v54  ;;  %5497 = vmatmul.bf16.gmra.mxu2 %v12981_v52  ;;  %5675 = vmatmul.bf16.gmra.mxu0 %v12981_v52 }
 0x6c6   :  { %v6138_v17 = vpack.c.bf16 %v13148_v39, %v13148_v39  ;;  %v5849_v24 = vmul.f32 0.5, %v10375_v9  ;;  %v13155_v28 = vpop.f32.mrf.mxu3 }
 0x6c7   :  { %10376 = vtanh.f32 %v5786_v59 }
 0x6c8   :  { %6170 = vst [vmem:[#allocation2 + $0x58] sm:$0xf] %v6138_v17  ;;  %v5881_v40 = vadd.f32 0.5, %v5849_v24  ;;  %v5458_v44 = vpop.f32.mrf.mxu2  ;;  %v10052_v37 = vld [vmem:[#allocation2 + $0x44] sm:$0xf] }
 0x6c9   :  { %6232 = vst [vmem:[#allocation2 + $0x4c] sm:$0xf] %v6138_v17  ;;  %v5459_v45 = vadd.f32 %v5458_v44, %v12970_v61  ;;  %v9252_v24 = vld [vmem:[#allocation2 + $0xf0] sm:$0xf]  ;;  %v5726_v44 = vadd.f32 %v13008_v23, %v5637_v46 }
 0x6ca   :  { %v5945_v7 = vmul.f32 %v5913_v25, %v5881_v40  ;;  %v5638_v22 = vpop.f32.mrf.mxu0  ;;  %v9253_v40 = vor.u32 %v10011_v62, %v9252_v24 }
 0x6cb   :  { %v5548_v52 = vadd.f32 %v13012_v55, %v5459_v45  ;;  %v14882_v55 = vld [vmem:[#allocation28_spill] sm:$0xff] }
 0x6cc   :  { %v13162_v38 = vadd.f32 %v5945_v7, %v12667_v60  ;;  %v5914_v31 = vsub.f32 %v5723_v33, %v14882_v55 }
 0x6cd   :  { %v10377_v15 = vpop.eup %10376  ;;  %v5787_v29 = vmul.f32 0.5, %v5548_v52 }
 0x6ce   :  { %v6201_v1 = vpack.c.bf16 %v13162_v38, %v13162_v38  ;;  %v5850_v42 = vmul.f32 0.5, %v10377_v15  ;;  %v13169_v53 = vpop.f32.mrf.mxu3  ;;  %v14883_v15 = vld [vmem:[#allocation25_spill] sm:$0xff] }
 0x6cf   :  { %10378 = vtanh.f32 %v5787_v29  ;;  %v5915_v29 = vsub.f32 %v5726_v44, %v14883_v15  ;;  %v10045_v44 = vld [vmem:[#allocation2 + $0x4] sm:$0xf0] }
 0x6d0   :  { %6233 = vst [vmem:[#allocation2 + $0x54] sm:$0xf] %v6201_v1  ;;  %v5882_v60 = vadd.f32 0.5, %v5850_v42  ;;  %v5460_v20 = vpop.f32.mrf.mxu2  ;;  %v9422_v54 = vld [vmem:[#allocation2 + $0x48] sm:$0xf0]  ;;  %v5639_v42 = vadd.f32 %v5638_v22, %v12993_v10 }
 0x6d1   :  { %v5461_v58 = vadd.f32 %v5460_v20, %v12970_v61  ;;  %v9425_v9 = vor.u32 %v10052_v37, %v9422_v54  ;;  %v9700_v37 = vld [vmem:[%s14534_s6 + $0x70] sm:$0xf] }
 0x6d2   :  { %v5946_v59 = vmul.f32 %v5914_v31, %v5882_v60  ;;  %v5641_v17 = vpop.f32.mrf.mxu0  ;;  %v5728_v22 = vadd.f32 %v13025_v8, %v5639_v42 }
 0x6d3   :  { %v5550_v25 = vadd.f32 %v13027_v35, %v5461_v58  ;;  %6764 = vmatmul.bf16.gmra.mxu3 %v9425_v9  ;;  %6942 = vmatmul.bf16.gmra.mxu1 %v9425_v9  ;;  %v13183_v35 = vpop.f32.mrf.mxu1  ;;  %v5642_v8 = vadd.f32 %v5641_v17, %v12993_v10 }
 0x6d4   :  { %v13176_v30 = vadd.f32 %v5946_v59, %v14882_v55  ;;  %v10123_v55 = vld [vmem:[%s14534_s6 + $0x74] sm:$0xf0] }
 0x6d5   :  { %v10379_v45 = vpop.eup %10378  ;;  %v5788_v51 = vmul.f32 0.5, %v5550_v25  ;;  %5502 = vmatmul.bf16.gmra.mxu2 %v9253_v40  ;;  %5680 = vmatmul.bf16.gmra.mxu0 %v9253_v40  ;;  %v9701_v46 = vor.u32 %v10123_v55, %v9700_v37  ;;  %v9388_v40 = vld [vmem:[#allocation2] sm:$0xf] }
 0x6d6   :  { %v6202_v7 = vpack.c.bf16 %v13176_v30, %v13176_v30  ;;  %v5851_v52 = vmul.f32 0.5, %v10379_v45  ;;  %v13181_v33 = vpop.f32.mrf.mxu3  ;;  %v9389_v42 = vor.u32 %v10045_v44, %v9388_v40 }
 0x6d7   :  { %10380 = vtanh.f32 %v5788_v51  ;;  %7346 = vmatpush.bf16.msra.mxu2 %v9701_v46  ;;  %v10054_v45 = vld [vmem:[#allocation2 + $0x54] sm:$0xf]  ;;  %v5731_v46 = vadd.f32 %v13045_v63, %v5642_v8 }
 0x6d8   :  { %6234 = vst [vmem:[#allocation2 + $0x5c] sm:$0xf] %v6202_v7  ;;  %v5883_v1 = vadd.f32 0.5, %v5851_v52  ;;  %v5463_v23 = vpop.f32.mrf.mxu2 }
 0x6d9   :  { %v5464_v62 = vadd.f32 %v5463_v23, %v12970_v61 }
 0x6da   :  { %v5947_v31 = vmul.f32 %v5915_v29, %v5883_v1  ;;  %v5643_v60 = vpop.f32.mrf.mxu0 }
 0x6db   :  { %v5553_v20 = vadd.f32 %v13041_v6, %v5464_v62  ;;  %v14884_v6 = vld [vmem:[#allocation35_spill] sm:$0xff]  ;;  %v13206_v23 = vpop.f32.mrf.mxu1  ;;  %v5644_v40 = vadd.f32 %v5643_v60, %v12993_v10 }
 0x6dc   :  { %v13196_v54 = vadd.f32 %v5947_v31, %v14883_v15  ;;  %v5916_v7 = vsub.f32 %v5728_v22, %v14884_v6 }
 0x6dd   :  { %v10381_v58 = vpop.eup %10380  ;;  %v5789_v9 = vmul.f32 0.5, %v5553_v20 }
 0x6de   :  { %v6141_v59 = vpack.c.bf16 %v13196_v54, %v13196_v54  ;;  %v5852_v24 = vmul.f32 0.5, %v10381_v58  ;;  %v13201_v25 = vpop.f32.mrf.mxu3 }
 0x6df   :  { %10382 = vtanh.f32 %v5789_v9  ;;  %v9430_v51 = vld [vmem:[#allocation2 + $0x58] sm:$0xf0] }
 0x6e0   :  { %6173 = vst [vmem:[#allocation2 + $0x70] sm:$0xf] %v6141_v59  ;;  %v5884_v52 = vadd.f32 0.5, %v5852_v24  ;;  %v5465_v15 = vpop.f32.mrf.mxu2  ;;  %v9433_v29 = vor.u32 %v10054_v45, %v9430_v51  ;;  %v10122_v45 = vld [vmem:[%s14534_s6 + $0x74] sm:$0xf] }
 0x6e1   :  { %6235 = vst [vmem:[#allocation2 + $0x64] sm:$0xf] %v6141_v59  ;;  %v5466_v1 = vadd.f32 %v5465_v15, %v12970_v61  ;;  %v9702_v51 = vld [vmem:[%s14534_s6 + $0x78] sm:$0xf0] }
 0x6e2   :  { %v5948_v37 = vmul.f32 %v5916_v7, %v5884_v52  ;;  %v5646_v62 = vpop.f32.mrf.mxu0  ;;  %v9705_v52 = vor.u32 %v10122_v45, %v9702_v51  ;;  %v9396_v45 = vld [vmem:[#allocation2 + $0x10] sm:$0xf] }
 0x6e3   :  { %v5555_v55 = vadd.f32 %v13055_v21, %v5466_v1  ;;  %6769 = vmatmul.bf16.gmra.mxu3 %v9433_v29  ;;  %6947 = vmatmul.bf16.gmra.mxu1 %v9433_v29  ;;  %v14885_v21 = vld [vmem:[#allocation29_spill] sm:$0xff]  ;;  %v13227_v15 = vpop.f32.mrf.mxu1  ;;  %v5733_v29 = vadd.f32 %v13060_v13, %v5644_v40 }
 0x6e4   :  { %v13210_v31 = vadd.f32 %v5948_v37, %v14884_v6  ;;  %v5917_v59 = vsub.f32 %v5731_v46, %v14885_v21  ;;  %7435 = vmatpush.bf16.msra.mxu3 %v9705_v52 }
 0x6e5   :  { %v10383_v17 = vpop.eup %10382  ;;  %v5790_v20 = vmul.f32 0.5, %v5555_v55  ;;  %6655 = vmatmul.bf16.vlgmr.msrb.gmra.mxu2 %v9389_v42  ;;  %6833 = vmatmul.bf16.vlgmr.msrb.gmra.mxu0 %v9389_v42 }
 0x6e6   :  { %v6142_v22 = vpack.c.bf16 %v13210_v31, %v13210_v31  ;;  %v5853_v58 = vmul.f32 0.5, %v10383_v17  ;;  %v13215_v9 = vpop.f32.mrf.mxu3 }
 0x6e7   :  { %10384 = vtanh.f32 %v5790_v20  ;;  %v10047_v20 = vld [vmem:[#allocation2 + $0x14] sm:$0xf0] }
 0x6e8   :  { %6174 = vst [vmem:[#allocation2 + $0x78] sm:$0xf] %v6142_v22  ;;  %v5885_v24 = vadd.f32 0.5, %v5853_v58  ;;  %v5468_v44 = vpop.f32.mrf.mxu2  ;;  %v10056_v17 = vld [vmem:[#allocation2 + $0x64] sm:$0xf] }
 0x6e9   :  { %6236 = vst [vmem:[#allocation2 + $0x6c] sm:$0xf] %v6142_v22  ;;  %v5469_v63 = vadd.f32 %v5468_v44, %v12970_v61 }
 0x6ea   :  { %v5949_v6 = vmul.f32 %v5917_v59, %v5885_v24  ;;  %v5648_v7 = vpop.f32.mrf.mxu0 }
 0x6eb   :  { %v5558_v8 = vadd.f32 %v13069_v32, %v5469_v63  ;;  %v14886_v32 = vld [vmem:[#allocation27_spill] sm:$0xff] }
 0x6ec   :  { %v13230_v60 = vadd.f32 %v5949_v6, %v14885_v21  ;;  %v5918_v22 = vsub.f32 %v5733_v29, %v14886_v32  ;;  %v5647_v21 = vadd.f32 %v5646_v62, %v12993_v10  ;;  %v9397_v6 = vor.u32 %v10047_v20, %v9396_v45 }
 0x6ed   :  { %v10385_v1 = vpop.eup %10384  ;;  %v5791_v42 = vmul.f32 0.5, %v5558_v8 }
 0x6ee   :  { %v6205_v37 = vpack.c.bf16 %v13230_v60, %v13230_v60  ;;  %v5854_v55 = vmul.f32 0.5, %v10385_v1  ;;  %v13235_v46 = vpop.f32.mrf.mxu3  ;;  %v5736_v8 = vadd.f32 %v13079_v2, %v5647_v21  ;;  %v13245_v1 = vpop.f32.mrf.mxu1  ;;  %v10121_v21 = vld [vmem:[%s14534_s6 + $0x64] sm:$0xf0] }
 0x6ef   :  { %10386 = vtanh.f32 %v5791_v42 }
 0x6f0   :  { %6237 = vst [vmem:[#allocation2 + $0x74] sm:$0xf] %v6205_v37  ;;  %v5886_v58 = vadd.f32 0.5, %v5854_v55  ;;  %v5470_v59 = vpop.f32.mrf.mxu2  ;;  %v9438_v13 = vld [vmem:[#allocation2 + $0x68] sm:$0xf0] }
 0x6f1   :  { %v5471_v24 = vadd.f32 %v5470_v59, %v12970_v61  ;;  %v9441_v40 = vor.u32 %v10056_v17, %v9438_v13 }
 0x6f2   :  { %v5950_v44 = vmul.f32 %v5918_v22, %v5886_v58  ;;  %v5651_v63 = vpop.f32.mrf.mxu0  ;;  %v9692_v22 = vld [vmem:[%s14534_s6 + $0x60] sm:$0xf] }
 0x6f3   :  { %v5560_v51 = vadd.f32 %v13083_v0, %v5471_v24  ;;  %6774 = vmatmul.bf16.gmra.mxu3 %v9441_v40  ;;  %6952 = vmatmul.bf16.gmra.mxu1 %v9441_v40  ;;  %v14887_v0 = vld [vmem:[#allocation36_spill] sm:$0xff]  ;;  %v9693_v24 = vor.u32 %v10121_v21, %v9692_v22 }
 0x6f4   :  { %v13242_v52 = vadd.f32 %v5950_v44, %v14886_v32  ;;  %v5919_v17 = vsub.f32 %v5736_v8, %v14887_v0  ;;  %v5649_v32 = vadd.f32 %v5648_v7, %v12993_v10 }
 0x6f5   :  { %v10387_v29 = vpop.eup %10386  ;;  %v5792_v62 = vmul.f32 0.5, %v5560_v51  ;;  %6660 = vmatmul.bf16.gmra.mxu2 %v9397_v6  ;;  %6838 = vmatmul.bf16.gmra.mxu0 %v9397_v6 }
 0x6f6   :  { %v6206_v42 = vpack.c.bf16 %v13242_v52, %v13242_v52  ;;  %v5855_v37 = vmul.f32 0.5, %v10387_v29  ;;  %v13249_v55 = vpop.f32.mrf.mxu3  ;;  %v5738_v7 = vadd.f32 %v13097_v56, %v5649_v32  ;;  %7347 = vmatpush.bf16.msra.mxu2 %v9693_v24  ;;  %v5652_v32 = vadd.f32 %v5651_v63, %v12993_v10 }
 0x6f7   :  { %10388 = vtanh.f32 %v5792_v62  ;;  %v9404_v62 = vld [vmem:[#allocation2 + $0x20] sm:$0xf] }
 0x6f8   :  { %6238 = vst [vmem:[#allocation2 + $0x7c] sm:$0xf] %v6206_v42  ;;  %v5887_v20 = vadd.f32 0.5, %v5855_v37  ;;  %v5473_v2 = vpop.f32.mrf.mxu2  ;;  %v10049_v42 = vld [vmem:[#allocation2 + $0x24] sm:$0xf0] }
 0x6f9   :  { %v5474_v58 = vadd.f32 %v5473_v2, %v12970_v61  ;;  %v10058_v37 = vld [vmem:[#allocation2 + $0x74] sm:$0xf]  ;;  %v9405_v21 = vor.u32 %v10049_v42, %v9404_v62 }
 0x6fa   :  { %v5951_v59 = vmul.f32 %v5919_v17, %v5887_v20  ;;  %v5653_v13 = vpop.f32.mrf.mxu0 }
 0x6fb   :  { %v5563_v40 = vadd.f32 %v13099_v47, %v5474_v58  ;;  %v13269_v47 = vpop.f32.mrf.mxu1 }
 0x6fc   :  { %v13262_v44 = vadd.f32 %v5951_v59, %v14887_v0  ;;  %v14888_v0 = vld [vmem:[#allocation30_spill] sm:$0xff] }
 0x6fd   :  { %v10389_v45 = vpop.eup %10388  ;;  %v5793_v51 = vmul.f32 0.5, %v5563_v40  ;;  %v5920_v20 = vsub.f32 %v5738_v7, %v14888_v0  ;;  %v5741_v7 = vadd.f32 %v13114_v43, %v5652_v32 }
 0x6fe   :  { %v6145_v6 = vpack.c.bf16 %v13262_v44, %v13262_v44  ;;  %v5856_v8 = vmul.f32 0.5, %v10389_v45  ;;  %v13267_v29 = vpop.f32.mrf.mxu3 }
 0x6ff   :  { %10390 = vtanh.f32 %v5793_v51  ;;  %v9446_v17 = vld [vmem:[#allocation2 + $0x78] sm:$0xf0] }
 0x700   :  { %6177 = vst [vmem:[#allocation2 + $0x90] sm:$0xf] %v6145_v6  ;;  %v5888_v56 = vadd.f32 0.5, %v5856_v8  ;;  %v5475_v2 = vpop.f32.mrf.mxu2  ;;  %v9449_v22 = vor.u32 %v10058_v37, %v9446_v17  ;;  %v5654_v17 = vadd.f32 %v5653_v13, %v12993_v10 }
 0x701   :  { %6239 = vst [vmem:[#allocation2 + $0x84] sm:$0xf] %v6145_v6  ;;  %v5476_v58 = vadd.f32 %v5475_v2, %v12970_v61 }
 0x702   :  { %v5952_v59 = vmul.f32 %v5920_v20, %v5888_v56  ;;  %v5656_v24 = vpop.f32.mrf.mxu0  ;;  %v10120_v20 = vld [vmem:[%s14534_s6 + $0x64] sm:$0xf]  ;;  %v9694_v56 = vld [vmem:[%s14534_s6 + $0x68] sm:$0xf0] }
 0x703   :  { %v5565_v40 = vadd.f32 %v13111_v4, %v5476_v58  ;;  %6779 = vmatmul.bf16.gmra.mxu3 %v9449_v22  ;;  %6957 = vmatmul.bf16.gmra.mxu1 %v9449_v22  ;;  %v14889_v4 = vld [vmem:[#allocation37_spill] sm:$0xff]  ;;  %v13292_v32 = vpop.f32.mrf.mxu1  ;;  %v9697_v58 = vor.u32 %v10120_v20, %v9694_v56 }
 0x704   :  { %v13276_v45 = vadd.f32 %v5952_v59, %v14888_v0  ;;  %v5921_v42 = vsub.f32 %v5741_v7, %v14889_v4  ;;  %v5743_v59 = vadd.f32 %v13130_v5, %v5654_v17 }
 0x705   :  { %v10391_v51 = vpop.eup %10390  ;;  %v5794_v8 = vmul.f32 0.5, %v5565_v40  ;;  %6665 = vmatmul.bf16.gmra.mxu2 %v9405_v21  ;;  %6843 = vmatmul.bf16.gmra.mxu0 %v9405_v21 }
 0x706   :  { %v6146_v63 = vpack.c.bf16 %v13276_v45, %v13276_v45  ;;  %v5857_v6 = vmul.f32 0.5, %v10391_v51  ;;  %v13281_v62 = vpop.f32.mrf.mxu3  ;;  %7436 = vmatpush.bf16.msra.mxu3 %v9697_v58  ;;  %v9412_v58 = vld [vmem:[#allocation2 + $0x30] sm:$0xf] }
 0x707   :  { %10392 = vtanh.f32 %v5794_v8 }
 0x708   :  { %6178 = vst [vmem:[#allocation2 + $0x98] sm:$0xf] %v6146_v63  ;;  %v5889_v37 = vadd.f32 0.5, %v5857_v6  ;;  %v5478_v0 = vpop.f32.mrf.mxu2  ;;  %v10060_v6 = vld [vmem:[#allocation2 + $0x84] sm:$0xf] }
 0x709   :  { %6240 = vst [vmem:[#allocation2 + $0x8c] sm:$0xf] %v6146_v63  ;;  %v5479_v43 = vadd.f32 %v5478_v0, %v12970_v61 }
 0x70a   :  { %v5953_v2 = vmul.f32 %v5921_v42, %v5889_v37  ;;  %v5658_v22 = vpop.f32.mrf.mxu0  ;;  %v10051_v42 = vld [vmem:[#allocation2 + $0x34] sm:$0xf0] }
 0x70b   :  { %v5568_v21 = vadd.f32 %v13125_v14, %v5479_v43  ;;  %v14891_v37 = vld [vmem:[#allocation38_spill] sm:$0xff] }
 0x70c   :  { %v13296_v13 = vadd.f32 %v5953_v2, %v14889_v4  ;;  %v5922_v14 = vsub.f32 %v5743_v59, %v14891_v37  ;;  %v5657_v4 = vadd.f32 %v5656_v24, %v12993_v10 }
 0x70d   :  { %v10393_v40 = vpop.eup %10392  ;;  %v5795_v7 = vmul.f32 0.5, %v5568_v21 }
 0x70e   :  { %14890 = vst [vmem:[#allocation18_spill] sm:$0xff] %v13296_v13  ;;  %v6209_v51 = vpack.c.bf16 %v13296_v13, %v13296_v13  ;;  %v5858_v8 = vmul.f32 0.5, %v10393_v40  ;;  %v13301_v63 = vpop.f32.mrf.mxu3  ;;  %v9413_v40 = vor.u32 %v10051_v42, %v9412_v58  ;;  %v5746_v24 = vadd.f32 %v13145_v34, %v5657_v4  ;;  %v9684_v34 = vld [vmem:[%s14534_s6 + $0x50] sm:$0xf] }
 0x70f   :  { %10394 = vtanh.f32 %v5795_v7  ;;  %v13307_v7 = vpop.f32.mrf.mxu1 }
 0x710   :  { %6241 = vst [vmem:[#allocation2 + $0x94] sm:$0xf] %v6209_v51  ;;  %v5890_v0 = vadd.f32 0.5, %v5858_v8  ;;  %v5480_v43 = vpop.f32.mrf.mxu2  ;;  %v9454_v5 = vld [vmem:[#allocation2 + $0x88] sm:$0xf0] }
 0x711   :  { %v5481_v17 = vadd.f32 %v5480_v43, %v12970_v61  ;;  %v9457_v20 = vor.u32 %v10060_v6, %v9454_v5 }
 0x712   :  { %v5954_v56 = vmul.f32 %v5922_v14, %v5890_v0  ;;  %v5661_v2 = vpop.f32.mrf.mxu0 }
 0x713   :  { %v5570_v21 = vadd.f32 %v13139_v3, %v5481_v17  ;;  %6784 = vmatmul.bf16.gmra.mxu3 %v9457_v20  ;;  %6962 = vmatmul.bf16.gmra.mxu1 %v9457_v20  ;;  %v14893_v3 = vld [vmem:[#allocation31_spill] sm:$0xff]  ;;  %v10119_v17 = vld [vmem:[%s14534_s6 + $0x54] sm:$0xf0] }
 0x714   :  { %v13310_v59 = vadd.f32 %v5954_v56, %v14891_v37  ;;  %v5923_v42 = vsub.f32 %v5746_v24, %v14893_v3  ;;  %v5659_v37 = vadd.f32 %v5658_v22, %v12993_v10  ;;  %v9685_v58 = vor.u32 %v10119_v17, %v9684_v34 }
 0x715   :  { %v10395_v51 = vpop.eup %10394  ;;  %v5796_v8 = vmul.f32 0.5, %v5570_v21  ;;  %6670 = vmatmul.bf16.gmra.mxu2 %v9413_v40  ;;  %6848 = vmatmul.bf16.gmra.mxu0 %v9413_v40 }
 0x716   :  { %14892 = vst [vmem:[#allocation19_spill] sm:$0xff] %v13310_v59  ;;  %v6210_v6 = vpack.c.bf16 %v13310_v59, %v13310_v59  ;;  %v5859_v14 = vmul.f32 0.5, %v10395_v51  ;;  %v13315_v0 = vpop.f32.mrf.mxu3  ;;  %v5748_v22 = vadd.f32 %v13165_v16, %v5659_v37  ;;  %7348 = vmatpush.bf16.msra.mxu2 %v9685_v58  ;;  %v5662_v37 = vadd.f32 %v5661_v2, %v12993_v10 }
 0x717   :  { %10396 = vtanh.f32 %v5796_v8  ;;  %v13331_v8 = vpop.f32.mrf.mxu1 }
 0x718   :  { %6242 = vst [vmem:[#allocation2 + $0x9c] sm:$0xf] %v6210_v6  ;;  %v5891_v43 = vadd.f32 0.5, %v5859_v14  ;;  %v5483_v5 = vpop.f32.mrf.mxu2 }
 0x719   :  { %v5484_v4 = vadd.f32 %v5483_v5, %v12970_v61 }
 0x71a   :  { %v5955_v20 = vmul.f32 %v5923_v42, %v5891_v43  ;;  %v5663_v56 = vpop.f32.mrf.mxu0  ;;  %v9420_v42 = vld [vmem:[#allocation2 + $0x40] sm:$0xf]  ;;  %v10053_v43 = vld [vmem:[#allocation2 + $0x44] sm:$0xf0] }
 0x71b   :  { %v5573_v21 = vadd.f32 %v13155_v28, %v5484_v4  ;;  %v10062_v28 = vld [vmem:[#allocation2 + $0x94] sm:$0xf] }
 0x71c   :  { %v13328_v40 = vadd.f32 %v5955_v20, %v14893_v3  ;;  %v14895_v3 = vld [vmem:[#allocation33_spill] sm:$0xff] }
 0x71d   :  { %v10397_v24 = vpop.eup %10396  ;;  %v5797_v51 = vmul.f32 0.5, %v5573_v21  ;;  %v5924_v4 = vsub.f32 %v5748_v22, %v14895_v3  ;;  %v9421_v21 = vor.u32 %v10053_v43, %v9420_v42  ;;  %v5751_v22 = vadd.f32 %v13183_v35, %v5662_v37 }
 0x71e   :  { %14894 = vst [vmem:[#allocation21_spill] sm:$0xff] %v13328_v40  ;;  %v6149_v6 = vpack.c.bf16 %v13328_v40, %v13328_v40  ;;  %v5860_v14 = vmul.f32 0.5, %v10397_v24  ;;  %v13335_v5 = vpop.f32.mrf.mxu3 }
 0x71f   :  { %10398 = vtanh.f32 %v5797_v51  ;;  %v9462_v34 = vld [vmem:[#allocation2 + $0x98] sm:$0xf0]  ;;  %v13349_v43 = vpop.f32.mrf.mxu1 }
 0x720   :  { %6181 = vst [vmem:[#allocation2 + $0xb0] sm:$0xf] %v6149_v6  ;;  %v5892_v16 = vadd.f32 0.5, %v5860_v14  ;;  %v5485_v17 = vpop.f32.mrf.mxu2  ;;  %v9465_v20 = vor.u32 %v10062_v28, %v9462_v34 }
 0x721   :  { %6243 = vst [vmem:[#allocation2 + $0xa4] sm:$0xf] %v6149_v6  ;;  %v5486_v58 = vadd.f32 %v5485_v17, %v12970_v61 }
 0x722   :  { %v5956_v24 = vmul.f32 %v5924_v4, %v5892_v16  ;;  %v5666_v40 = vpop.f32.mrf.mxu0  ;;  %v10118_v4 = vld [vmem:[%s14534_s6 + $0x54] sm:$0xf] }
 0x723   :  { %v5575_v13 = vadd.f32 %v13169_v53, %v5486_v58  ;;  %6789 = vmatmul.bf16.gmra.mxu3 %v9465_v20  ;;  %6967 = vmatmul.bf16.gmra.mxu1 %v9465_v20  ;;  %v14896_v53 = vld [vmem:[#allocation32_spill] sm:$0xff] }
 0x724   :  { %v13342_v51 = vadd.f32 %v5956_v24, %v14895_v3  ;;  %v5925_v28 = vsub.f32 %v5751_v22, %v14896_v53  ;;  %v5664_v3 = vadd.f32 %v5663_v56, %v12993_v10 }
 0x725   :  { %v10399_v14 = vpop.eup %10398  ;;  %v5798_v59 = vmul.f32 0.5, %v5575_v13  ;;  %6675 = vmatmul.bf16.gmra.mxu2 %v9421_v21  ;;  %6853 = vmatmul.bf16.gmra.mxu0 %v9421_v21 }
 0x726   :  { %v6150_v2 = vpack.c.bf16 %v13342_v51, %v13342_v51  ;;  %v5861_v6 = vmul.f32 0.5, %v10399_v14  ;;  %v13347_v42 = vpop.f32.mrf.mxu3  ;;  %v5753_v56 = vadd.f32 %v13206_v23, %v5664_v3 }
 0x727   :  { %10400 = vtanh.f32 %v5798_v59  ;;  %v9686_v59 = vld [vmem:[%s14534_s6 + $0x58] sm:$0xf0] }
 0x728   :  { %6182 = vst [vmem:[#allocation2 + $0xb8] sm:$0xf] %v6150_v2  ;;  %v5893_v34 = vadd.f32 0.5, %v5861_v6  ;;  %v5488_v35 = vpop.f32.mrf.mxu2  ;;  %v9689_v17 = vor.u32 %v10118_v4, %v9686_v59  ;;  %v10064_v6 = vld [vmem:[#allocation2 + $0xa4] sm:$0xf]  ;;  %v13372_v59 = vpop.f32.mrf.mxu1 }
 0x729   :  { %6244 = vst [vmem:[#allocation2 + $0xac] sm:$0xf] %v6150_v2  ;;  %v5489_v13 = vadd.f32 %v5488_v35, %v12970_v61 }
 0x72a   :  { %v5957_v16 = vmul.f32 %v5925_v28, %v5893_v34  ;;  %v5668_v37 = vpop.f32.mrf.mxu0  ;;  %7437 = vmatpush.bf16.msra.mxu3 %v9689_v17  ;;  %v10055_v28 = vld [vmem:[#allocation2 + $0x54] sm:$0xf0] }
 0x72b   :  { %v5578_v20 = vadd.f32 %v13181_v33, %v5489_v13  ;;  %v14898_v34 = vld [vmem:[#allocation34_spill] sm:$0xff] }
 0x72c   :  { %v13362_v58 = vadd.f32 %v5957_v16, %v14896_v53  ;;  %v5926_v33 = vsub.f32 %v5753_v56, %v14898_v34  ;;  %v5667_v53 = vadd.f32 %v5666_v40, %v12993_v10 }
 0x72d   :  { %v10401_v21 = vpop.eup %10400  ;;  %v5799_v24 = vmul.f32 0.5, %v5578_v20  ;;  %v9428_v20 = vld [vmem:[#allocation2 + $0x50] sm:$0xf] }
 0x72e   :  { %14897 = vst [vmem:[#allocation20_spill] sm:$0xff] %v13362_v58  ;;  %v6213_v22 = vpack.c.bf16 %v13362_v58, %v13362_v58  ;;  %v5862_v14 = vmul.f32 0.5, %v10401_v21  ;;  %v13367_v2 = vpop.f32.mrf.mxu3  ;;  %v5756_v40 = vadd.f32 %v13227_v15, %v5667_v53  ;;  %v9676_v15 = vld [vmem:[%s14534_s6 + $0x40] sm:$0xf] }
 0x72f   :  { %10402 = vtanh.f32 %v5799_v24  ;;  %v9429_v24 = vor.u32 %v10055_v28, %v9428_v20 }
 0x730   :  { %6245 = vst [vmem:[#allocation2 + $0xb4] sm:$0xf] %v6213_v22  ;;  %v5894_v35 = vadd.f32 0.5, %v5862_v14  ;;  %v5490_v13 = vpop.f32.mrf.mxu2  ;;  %v9470_v23 = vld [vmem:[#allocation2 + $0xa8] sm:$0xf0] }
 0x731   :  { %v5491_v3 = vadd.f32 %v5490_v13, %v12970_v61  ;;  %v9473_v4 = vor.u32 %v10064_v6, %v9470_v23 }
 0x732   :  { %v5958_v16 = vmul.f32 %v5926_v33, %v5894_v35  ;;  %v5671_v17 = vpop.f32.mrf.mxu0 }
 0x733   :  { %v5580_v21 = vadd.f32 %v13201_v25, %v5491_v3  ;;  %6794 = vmatmul.bf16.gmra.mxu3 %v9473_v4  ;;  %6972 = vmatmul.bf16.gmra.mxu1 %v9473_v4  ;;  %v14900_v25 = vld [vmem:[#allocation13_spill] sm:$0xff]  ;;  %v10117_v3 = vld [vmem:[%s14534_s6 + $0x44] sm:$0xf0] }
 0x734   :  { %v13376_v56 = vadd.f32 %v5958_v16, %v14898_v34  ;;  %v5927_v13 = vsub.f32 %v5756_v40, %v14900_v25  ;;  %v5669_v34 = vadd.f32 %v5668_v37, %v12993_v10  ;;  %v9677_v20 = vor.u32 %v10117_v3, %v9676_v15 }
 0x735   :  { %v10403_v22 = vpop.eup %10402  ;;  %v5800_v14 = vmul.f32 0.5, %v5580_v21  ;;  %6680 = vmatmul.bf16.gmra.mxu2 %v9429_v24  ;;  %6858 = vmatmul.bf16.gmra.mxu0 %v9429_v24  ;;  %v13393_v24 = vpop.f32.mrf.mxu1 }
 0x736   :  { %14899 = vst [vmem:[#allocation22_spill] sm:$0xff] %v13376_v56  ;;  %v6214_v6 = vpack.c.bf16 %v13376_v56, %v13376_v56  ;;  %v5863_v33 = vmul.f32 0.5, %v10403_v22  ;;  %v13381_v35 = vpop.f32.mrf.mxu3  ;;  %v5758_v40 = vadd.f32 %v13245_v1, %v5669_v34  ;;  %7349 = vmatpush.bf16.msra.mxu2 %v9677_v20  ;;  %v5672_v1 = vadd.f32 %v5671_v17, %v12993_v10 }
 0x737   :  { %10404 = vtanh.f32 %v5800_v14 }
 0x738   :  { %6246 = vst [vmem:[#allocation2 + $0xbc] sm:$0xf] %v6214_v6  ;;  %v5895_v28 = vadd.f32 0.5, %v5863_v33  ;;  %v5493_v23 = vpop.f32.mrf.mxu2 }
 0x739   :  { %v5494_v53 = vadd.f32 %v5493_v23, %v12970_v61 }
 0x73a   :  { %v5959_v4 = vmul.f32 %v5927_v13, %v5895_v28  ;;  %v5673_v16 = vpop.f32.mrf.mxu0  ;;  %v9436_v13 = vld [vmem:[#allocation2 + $0x60] sm:$0xf]  ;;  %v10057_v28 = vld [vmem:[#allocation2 + $0x64] sm:$0xf0] }
 0x73b   :  { %v5583_v21 = vadd.f32 %v13215_v9, %v5494_v53  ;;  %v10066_v9 = vld [vmem:[#allocation2 + $0xb4] sm:$0xf]  ;;  %v14902_v53 = vld [vmem:[#allocation14_spill] sm:$0xff] }
 0x73c   :  { %v13396_v37 = vadd.f32 %v5959_v4, %v14900_v25  ;;  %v5928_v25 = vsub.f32 %v5758_v40, %v14902_v53  ;;  %v5761_v40 = vadd.f32 %v13269_v47, %v5672_v1 }
 0x73d   :  { %v10405_v22 = vpop.eup %10404  ;;  %v5801_v14 = vmul.f32 0.5, %v5583_v21  ;;  %v9437_v21 = vor.u32 %v10057_v28, %v9436_v13  ;;  %v13411_v17 = vpop.f32.mrf.mxu1 }
 0x73e   :  { %14901 = vst [vmem:[#allocation23_spill] sm:$0xff] %v13396_v37  ;;  %v6153_v6 = vpack.c.bf16 %v13396_v37, %v13396_v37  ;;  %v5864_v33 = vmul.f32 0.5, %v10405_v22  ;;  %v13401_v23 = vpop.f32.mrf.mxu3 }
 0x73f   :  { %10406 = vtanh.f32 %v5801_v14  ;;  %v9478_v15 = vld [vmem:[#allocation2 + $0xb8] sm:$0xf0] }
 0x740   :  { %6185 = vst [vmem:[#allocation2 + $0xd0] sm:$0xf] %v6153_v6  ;;  %v5896_v3 = vadd.f32 0.5, %v5864_v33  ;;  %v5495_v34 = vpop.f32.mrf.mxu2  ;;  %v9481_v4 = vor.u32 %v10066_v9, %v9478_v15 }
 0x741   :  { %6247 = vst [vmem:[#allocation2 + $0xc4] sm:$0xf] %v6153_v6  ;;  %v5496_v20 = vadd.f32 %v5495_v34, %v12970_v61 }
 0x742   :  { %v5960_v22 = vmul.f32 %v5928_v25, %v5896_v3  ;;  %v5676_v37 = vpop.f32.mrf.mxu0  ;;  %v10116_v25 = vld [vmem:[%s14534_s6 + $0x44] sm:$0xf]  ;;  %v9678_v3 = vld [vmem:[%s14534_s6 + $0x48] sm:$0xf0] }
 0x743   :  { %v5585_v58 = vadd.f32 %v13235_v46, %v5496_v20  ;;  %6799 = vmatmul.bf16.gmra.mxu3 %v9481_v4  ;;  %6977 = vmatmul.bf16.gmra.mxu1 %v9481_v4  ;;  %v14903_v46 = vld [vmem:[#allocation16_spill] sm:$0xff]  ;;  %v9681_v34 = vor.u32 %v10116_v25, %v9678_v3 }
 0x744   :  { %v13408_v14 = vadd.f32 %v5960_v22, %v14902_v53  ;;  %v5929_v9 = vsub.f32 %v5761_v40, %v14903_v46  ;;  %v5674_v53 = vadd.f32 %v5673_v16, %v12993_v10 }
 0x745   :  { %v10407_v33 = vpop.eup %10406  ;;  %v5802_v56 = vmul.f32 0.5, %v5585_v58  ;;  %6685 = vmatmul.bf16.gmra.mxu2 %v9437_v21  ;;  %6863 = vmatmul.bf16.gmra.mxu0 %v9437_v21 }
 0x746   :  { %v6154_v6 = vpack.c.bf16 %v13408_v14, %v13408_v14  ;;  %v5865_v13 = vmul.f32 0.5, %v10407_v33  ;;  %v13415_v28 = vpop.f32.mrf.mxu3  ;;  %v5763_v16 = vadd.f32 %v13292_v32, %v5674_v53  ;;  %7438 = vmatpush.bf16.msra.mxu3 %v9681_v34  ;;  %v5677_v32 = vadd.f32 %v5676_v37, %v12993_v10 }
 0x747   :  { %10408 = vtanh.f32 %v5802_v56 }
 0x748   :  { %6186 = vst [vmem:[#allocation2 + $0xd8] sm:$0xf] %v6154_v6  ;;  %v5897_v15 = vadd.f32 0.5, %v5865_v13  ;;  %v5498_v47 = vpop.f32.mrf.mxu2  ;;  %v10068_v13 = vld [vmem:[#allocation2 + $0xc4] sm:$0xf] }
 0x749   :  { %6248 = vst [vmem:[#allocation2 + $0xcc] sm:$0xf] %v6154_v6  ;;  %v5499_v58 = vadd.f32 %v5498_v47, %v12970_v61 }
 0x74a   :  { %v5961_v1 = vmul.f32 %v5929_v9, %v5897_v15  ;;  %v5678_v56 = vpop.f32.mrf.mxu0  ;;  %v10059_v9 = vld [vmem:[#allocation2 + $0x74] sm:$0xf0]  ;;  %v13435_v15 = vpop.f32.mrf.mxu1 }
 0x74b   :  { %v5588_v4 = vadd.f32 %v13249_v55, %v5499_v58  ;;  %v14905_v55 = vld [vmem:[#allocation15_spill] sm:$0xff] }
 0x74c   :  { %v13428_v20 = vadd.f32 %v5961_v1, %v14903_v46  ;;  %v5930_v46 = vsub.f32 %v5763_v16, %v14905_v55  ;;  %v5766_v16 = vadd.f32 %v13307_v7, %v5677_v32  ;;  %v9668_v7 = vld [vmem:[%s14534_s6 + $0x30] sm:$0xf] }
 0x74d   :  { %v10409_v21 = vpop.eup %10408  ;;  %v5803_v22 = vmul.f32 0.5, %v5588_v4  ;;  %v9444_v4 = vld [vmem:[#allocation2 + $0x70] sm:$0xf] }
 0x74e   :  { %14904 = vst [vmem:[#allocation24_spill] sm:$0xff] %v13428_v20  ;;  %v6217_v40 = vpack.c.bf16 %v13428_v20, %v13428_v20  ;;  %v5866_v33 = vmul.f32 0.5, %v10409_v21  ;;  %v13433_v6 = vpop.f32.mrf.mxu3  ;;  %v9452_v20 = vld [vmem:[#allocation2 + $0x80] sm:$0xf] }
 0x74f   :  { %10410 = vtanh.f32 %v5803_v22  ;;  %v9445_v22 = vor.u32 %v10059_v9, %v9444_v4 }
 0x750   :  { %6249 = vst [vmem:[#allocation2 + $0xd4] sm:$0xf] %v6217_v40  ;;  %v5898_v47 = vadd.f32 0.5, %v5866_v33  ;;  %v5500_v53 = vpop.f32.mrf.mxu2  ;;  %v9486_v58 = vld [vmem:[#allocation2 + $0xc8] sm:$0xf0] }
 0x751   :  { %v5501_v25 = vadd.f32 %v5500_v53, %v12970_v61  ;;  %v9489_v3 = vor.u32 %v10068_v13, %v9486_v58 }
 0x752   :  { %v5962_v1 = vmul.f32 %v5930_v46, %v5898_v47  ;;  %v5681_v34 = vpop.f32.mrf.mxu0 }
 0x753   :  { %v5590_v21 = vadd.f32 %v13267_v29, %v5501_v25  ;;  %6804 = vmatmul.bf16.gmra.mxu3 %v9489_v3  ;;  %6982 = vmatmul.bf16.gmra.mxu1 %v9489_v3  ;;  %v14906_v29 = vld [vmem:[#allocation17_spill] sm:$0xff]  ;;  %v10115_v25 = vld [vmem:[%s14534_s6 + $0x34] sm:$0xf0]  ;;  %v13458_v3 = vpop.f32.mrf.mxu1 }
 0x754   :  { %v13442_v40 = vadd.f32 %v5962_v1, %v14905_v55  ;;  %v5931_v53 = vsub.f32 %v5766_v16, %v14906_v29  ;;  %v5679_v55 = vadd.f32 %v5678_v56, %v12993_v10 }
 0x755   :  { %v10411_v33 = vpop.eup %10410  ;;  %v5804_v37 = vmul.f32 0.5, %v5590_v21  ;;  %6690 = vmatmul.bf16.gmra.mxu2 %v9445_v22  ;;  %6868 = vmatmul.bf16.gmra.mxu0 %v9445_v22  ;;  %v9669_v21 = vor.u32 %v10115_v25, %v9668_v7 }
 0x756   :  { %v6218_v13 = vpack.c.bf16 %v13442_v40, %v13442_v40  ;;  %v5867_v46 = vmul.f32 0.5, %v10411_v33  ;;  %v13447_v47 = vpop.f32.mrf.mxu3  ;;  %v5768_v16 = vadd.f32 %v13331_v8, %v5679_v55  ;;  %v5682_v8 = vadd.f32 %v5681_v34, %v12993_v10 }
 0x757   :  { %10412 = vtanh.f32 %v5804_v37  ;;  %7350 = vmatpush.bf16.msra.mxu2 %v9669_v21  ;;  %v10114_v21 = vld [vmem:[%s14534_s6 + $0x34] sm:$0xf] }
 0x758   :  { %6250 = vst [vmem:[#allocation2 + $0xdc] sm:$0xf] %v6218_v13  ;;  %v5899_v9 = vadd.f32 0.5, %v5867_v46  ;;  %v5503_v58 = vpop.f32.mrf.mxu2 }
 0x759   :  { %v5504_v32 = vadd.f32 %v5503_v58, %v12970_v61 }
 0x75a   :  { %v5963_v1 = vmul.f32 %v5931_v53, %v5899_v9  ;;  %v5683_v4 = vpop.f32.mrf.mxu0  ;;  %v10061_v53 = vld [vmem:[#allocation2 + $0x84] sm:$0xf0]  ;;  %v10070_v9 = vld [vmem:[#allocation2 + $0xd4] sm:$0xf] }
 0x75b   :  { %v5593_v22 = vadd.f32 %v13281_v62, %v5504_v32  ;;  %v5932_v62 = vsub.f32 %v5768_v16, %v12965_v57 }
 0x75c   :  { %v13462_v56 = vadd.f32 %v5963_v1, %v14906_v29  ;;  %v9453_v1 = vor.u32 %v10061_v53, %v9452_v20  ;;  %v5771_v20 = vadd.f32 %v13349_v43, %v5682_v8 }
 0x75d   :  { %v10413_v33 = vpop.eup %10412  ;;  %v5805_v37 = vmul.f32 0.5, %v5593_v22  ;;  %v9670_v22 = vld [vmem:[%s14534_s6 + $0x38] sm:$0xf0] }
 0x75e   :  { %14907 = vst [vmem:[#allocation26_spill] sm:$0xff] %v13462_v56  ;;  %v6157_v13 = vpack.c.bf16 %v13462_v56, %v13462_v56  ;;  %v5868_v46 = vmul.f32 0.5, %v10413_v33  ;;  %v13467_v58 = vpop.f32.mrf.mxu3  ;;  %v9673_v16 = vor.u32 %v10114_v21, %v9670_v22  ;;  %v9654_v21 = vld [vmem:[%s14534_s6 + $0x18] sm:$0xf0]  ;;  %v9460_v56 = vld [vmem:[#allocation2 + $0x90] sm:$0xf] }
 0x75f   :  { %10414 = vtanh.f32 %v5805_v37  ;;  %v9494_v7 = vld [vmem:[#allocation2 + $0xd8] sm:$0xf0] }
 0x760   :  { %6189 = vst [vmem:[#allocation2 + $0xf0] sm:$0xf] %v6157_v13  ;;  %v5900_v29 = vadd.f32 0.5, %v5868_v46  ;;  %v5505_v55 = vpop.f32.mrf.mxu2  ;;  %v9497_v32 = vor.u32 %v10070_v9, %v9494_v7  ;;  %7439 = vmatpush.bf16.msra.mxu3 %v9673_v16  ;;  %v10112_v9 = vld [vmem:[%s14534_s6 + $0x24] sm:$0xf] }
 0x761   :  { %6251 = vst [vmem:[#allocation2 + $0xe4] sm:$0xf] %v6157_v13  ;;  %v5506_v25 = vadd.f32 %v5505_v55, %v12970_v61  ;;  %v13481_v13 = vpop.f32.mrf.mxu1  ;;  %v5684_v55 = vadd.f32 %v5683_v4, %v12993_v10 }
 0x762   :  { %v5964_v33 = vmul.f32 %v5932_v62, %v5900_v29  ;;  %v13478_v37 = vpop.f32.mrf.mxu0  ;;  %v5933_v29 = vsub.f32 %v5771_v20, %v12990_v12 }
 0x763   :  { %v5595_v34 = vadd.f32 %v13301_v63, %v5506_v25  ;;  %6809 = vmatmul.bf16.gmra.mxu3 %v9497_v32  ;;  %6987 = vmatmul.bf16.gmra.mxu1 %v9497_v32  ;;  %v9662_v63 = vld [vmem:[%s14534_s6 + $0x28] sm:$0xf0]  ;;  %v6321_v32 = vld [vmem:[#allocation8 + $0x8] sm:$0x3]  ;;  %v5773_v10 = vadd.f32 %v13372_v59, %v5684_v55 }
 0x764   :  { %v13484_v61 = vadd.f32 %v5964_v33, %v12965_v57  ;;  %v9665_v43 = vor.u32 %v10112_v9, %v9662_v63  ;;  %v13505_v33 = vperm.slane %v6321_v32, 0 }
 0x765   :  { %v10415_v46 = vpop.eup %10414  ;;  %v5806_v53 = vmul.f32 0.5, %v5595_v34  ;;  %6695 = vmatmul.bf16.gmra.mxu2 %v9453_v1  ;;  %6873 = vmatmul.bf16.gmra.mxu0 %v9453_v1  ;;  %v10110_v1 = vld [vmem:[%s14534_s6 + $0x14] sm:$0xf] }
 0x766   :  { %14908 = vst [vmem:[#allocation28_spill] sm:$0xff] %v13484_v61  ;;  %v6158_v7 = vpack.c.bf16 %v13484_v61, %v13484_v61  ;;  %v5869_v57 = vmul.f32 0.5, %v10415_v46  ;;  %v13495_v62 = vpop.f32.mrf.mxu3  ;;  %7440 = vmatpush.bf16.msra.mxu3 %v9665_v43  ;;  %v9657_v34 = vor.u32 %v10110_v1, %v9654_v21  ;;  %v10108_v46 = vld [vmem:[%s14534_s6 + $0x4] sm:$0xf] }
 0x767   :  { %10416 = vtanh.f32 %v5806_v53  ;;  %v9646_v53 = vld [vmem:[%s14534_s6 + $0x8] sm:$0xf0] }
 0x768   :  { %6190 = vst [vmem:[#allocation2 + $0xf8] sm:$0xf] %v6158_v7  ;;  %v5901_v8 = vadd.f32 0.5, %v5869_v57  ;;  %v6656_v25 = vpop.f32.mrf.mxu2  ;;  %v9649_v59 = vor.u32 %v10108_v46, %v9646_v53  ;;  %v10072_v43 = vld [vmem:[#allocation2 + $0xe4] sm:$0xf] }
 0x769   :  { %6252 = vst [vmem:[#allocation2 + $0xec] sm:$0xf] %v6158_v7  ;;  %v13517_v9 = vpop.f32.mrf.mxu1  ;;  %v9660_v46 = vld [vmem:[%s14534_s6 + $0x20] sm:$0xf]  ;;  %v9780_v53 = vld [vmem:[%s14534_s6 + $0xf0] sm:$0xf] }
 0x76a   :  { %v5965_v22 = vmul.f32 %v5933_v29, %v5901_v8  ;;  %v6836_v16 = vpop.f32.mrf.mxu0  ;;  %7441 = vmatpush.bf16.msra.mxu3 %v9657_v34  ;;  %v10063_v29 = vld [vmem:[#allocation2 + $0x94] sm:$0xf0]  ;;  %v5934_v8 = vsub.f32 %v5773_v10, %v13005_v41  ;;  %v10113_v10 = vld [vmem:[%s14534_s6 + $0x24] sm:$0xf0] }
 0x76c   :  { %v13508_v20 = vadd.f32 %v5965_v22, %v12990_v12  ;;  %v6657_v12 = vadd.f32 %v6656_v25, %v13505_v33 }
 0x76d   :  { %v10417_v4 = vpop.eup %10416 }
 0x76e   :  { %14909 = vst [vmem:[#allocation25_spill] sm:$0xff] %v13508_v20  ;;  %v6221_v63 = vpack.c.bf16 %v13508_v20, %v13508_v20  ;;  %v5870_v7 = vmul.f32 0.5, %v10417_v4  ;;  %v13522_v57 = vpop.f32.mrf.mxu3  ;;  %7442 = vmatpush.bf16.msra.mxu3 %v9649_v59  ;;  %v6746_v4 = vadd.f32 %v13315_v0, %v6657_v12  ;;  %v9661_v0 = vor.u32 %v10113_v10, %v9660_v46  ;;  %v10139_v12 = vld [vmem:[%s14534_s6 + $0xf4] sm:$0xf0]  ;;  %v9468_v46 = vld [vmem:[#allocation2 + $0xa0] sm:$0xf] }
 0x770   :  { %6253 = vst [vmem:[#allocation2 + $0xf4] sm:$0xf] %v6221_v63  ;;  %v5902_v55 = vadd.f32 0.5, %v5870_v7  ;;  %v6658_v1 = vpop.f32.mrf.mxu2  ;;  %v9502_v21 = vld [vmem:[#allocation2 + $0xe8] sm:$0xf0]  ;;  %v9461_v7 = vor.u32 %v10063_v29, %v9460_v56  ;;  %7351 = vmatpush.bf16.msra.mxu2 %v9661_v0 }
 0x771   :  { %v6659_v22 = vadd.f32 %v6658_v1, %v13505_v33  ;;  %v9505_v34 = vor.u32 %v10072_v43, %v9502_v21  ;;  %v9781_v43 = vor.u32 %v10139_v12, %v9780_v53  ;;  %v7003_v1 = vmul.f32 0.5, %v6746_v4  ;;  %v13549_v56 = vpop.f32.mrf.mxu1  ;;  %v10065_v4 = vld [vmem:[#allocation2 + $0xa4] sm:$0xf0] }
 0x772   :  { %v5966_v20 = vmul.f32 %v5934_v8, %v5902_v55  ;;  %v13527_v25 = vpop.f32.mrf.mxu0  ;;  %v13552_v21 = vperm.slane %v6321_v32, 1 }
 0x773   :  { %v6748_v63 = vadd.f32 %v13335_v5, %v6659_v22  ;;  %6814 = vmatmul.bf16.gmra.mxu3 %v9505_v34  ;;  %6992 = vmatmul.bf16.gmra.mxu1 %v9505_v34 }
 0x774   :  { %v13543_v59 = vadd.f32 %v5966_v20, %v13005_v41  ;;  %7868 = vmatpush.bf16.msra.mxu0 %v9781_v43  ;;  %v6837_v10 = vadd.f32 %v6836_v16, %v13552_v21 }
 0x775   :  { %v7004_v8 = vmul.f32 0.5, %v6748_v63  ;;  %6700 = vmatmul.bf16.gmra.mxu2 %v9461_v7  ;;  %6878 = vmatmul.bf16.gmra.mxu0 %v9461_v7 }
 0x776   :  { %14910 = vst [vmem:[#allocation35_spill] sm:$0xff] %v13543_v59  ;;  %v6222_v55 = vpack.c.bf16 %v13543_v59, %v13543_v59  ;;  %v13547_v5 = vpop.f32.mrf.mxu3  ;;  %v6926_v16 = vadd.f32 %v13411_v17, %v6837_v10 }
 0x777   :  { %10418 = vtanh.f32 %v7004_v8  ;;  %v10074_v63 = vld [vmem:[#allocation2 + $0xf4] sm:$0xf]  ;;  %v6835_v8 = vadd.f32 %v13478_v37, %v13552_v21 }
 0x778   :  { %6254 = vst [vmem:[#allocation2 + $0xfc] sm:$0xf] %v6222_v55  ;;  %v6661_v29 = vpop.f32.mrf.mxu2  ;;  %10420 = vtanh.f32 %v7003_v1  ;;  %v9469_v1 = vor.u32 %v10065_v4, %v9468_v46  ;;  %v7132_v4 = vsub.f32 %v6926_v16, %v13034_v48  ;;  %v6840_v16 = vadd.f32 %v13527_v25, %v13552_v21  ;;  %v9782_v25 = vld [vmem:[%s14534_s6 + $0xf8] sm:$0xf0] }
 0x779   :  { %v6662_v20 = vadd.f32 %v6661_v29, %v13505_v33  ;;  %v13561_v29 = vpop.f32.mrf.mxu1 }
 0x77a   :  { %v6841_v41 = vpop.f32.mrf.mxu0 }
 0x77b   :  { %v6751_v53 = vadd.f32 %v13347_v42, %v6662_v20 }
 0x77d   :  { %v10419_v22 = vpop.eup %10418  ;;  %v7005_v42 = vmul.f32 0.5, %v6751_v53 }
 0x77e   :  { %v13554_v34 = vpop.f32.mrf.mxu3  ;;  %v10421_v0 = vpop.eup %10420  ;;  %v7068_v55 = vmul.f32 0.5, %v10419_v22 }
 0x77f   :  { %v9510_v7 = vld [vmem:[#allocation2 + $0xf8] sm:$0xf0]  ;;  %v7067_v61 = vmul.f32 0.5, %v10421_v0  ;;  %10422 = vtanh.f32 %v7005_v42 }
 0x780   :  { %v6663_v12 = vpop.f32.mrf.mxu2  ;;  %v9513_v43 = vor.u32 %v10074_v63, %v9510_v7  ;;  %v6924_v63 = vadd.f32 %v13393_v24, %v6835_v8  ;;  %v7100_v7 = vadd.f32 0.5, %v7068_v55 }
 0x781   :  { %v6664_v32 = vadd.f32 %v6663_v12, %v13505_v33  ;;  %v7099_v46 = vadd.f32 0.5, %v7067_v61  ;;  %v13572_v12 = vpop.f32.mrf.mxu1 }
 0x782   :  { %v13563_v59 = vpop.f32.mrf.mxu0  ;;  %v7131_v17 = vsub.f32 %v6924_v63, %v13020_v11  ;;  %v7164_v10 = vmul.f32 %v7132_v4, %v7100_v7 }
 0x783   :  { %v6753_v20 = vadd.f32 %v13367_v2, %v6664_v32  ;;  %6819 = vmatmul.bf16.gmra.mxu3 %v9513_v43  ;;  %6997 = vmatmul.bf16.gmra.mxu1 %v9513_v43 }
 0x784   :  { %v7163_v53 = vmul.f32 %v7131_v17, %v7099_v46  ;;  %v13575_v43 = vadd.f32 %v7164_v10, %v13034_v48  ;;  %v9476_v46 = vld [vmem:[#allocation2 + $0xb0] sm:$0xf] }
 0x785   :  { %v7006_v37 = vmul.f32 0.5, %v6753_v20  ;;  %6705 = vmatmul.bf16.gmra.mxu2 %v9469_v1  ;;  %6883 = vmatmul.bf16.gmra.mxu0 %v9469_v1  ;;  %v10423_v24 = vpop.eup %10422  ;;  %v6842_v1 = vadd.f32 %v6841_v41, %v13552_v21  ;;  %v10067_v20 = vld [vmem:[#allocation2 + $0xb4] sm:$0xf0]  ;;  %v10138_v41 = vld [vmem:[%s14534_s6 + $0xf4] sm:$0xf] }
 0x786   :  { %v13568_v22 = vpop.f32.mrf.mxu3  ;;  %14911 = vst [vmem:[#allocation29_spill] sm:$0xff] %v13575_v43  ;;  %v13581_v32 = vadd.f32 %v7163_v53, %v13020_v11  ;;  %v7069_v63 = vmul.f32 0.5, %v10423_v24  ;;  %v9785_v53 = vor.u32 %v10138_v41, %v9782_v25  ;;  %v10111_v24 = vld [vmem:[%s14534_s6 + $0x14] sm:$0xf0] }
 0x787   :  { %10424 = vtanh.f32 %v7006_v37  ;;  %v6931_v17 = vadd.f32 %v13458_v3, %v6842_v1 }
 0x788   :  { %v6666_v0 = vpop.f32.mrf.mxu2  ;;  %v13589_v37 = vpack.c.bf16 %v13575_v43, %v13581_v32  ;;  %7957 = vmatpush.bf16.msra.mxu1 %v9785_v53  ;;  %v7101_v25 = vadd.f32 0.5, %v7069_v63  ;;  %10143 = vmatpush.bf16.msrb.mxu3 %v9785_v53  ;;  %v9484_v63 = vld [vmem:[#allocation2 + $0xc0] sm:$0xf] }
 0x789   :  { %v6667_v55 = vadd.f32 %v6666_v0, %v13505_v33  ;;  %v9652_v0 = vld [vmem:[%s14534_s6 + $0x10] sm:$0xf]  ;;  %v7134_v43 = vsub.f32 %v6931_v17, %v13064_v50  ;;  %v10069_v17 = vld [vmem:[#allocation2 + $0xc4] sm:$0xf0] }
 0x78a   :  { %v6846_v2 = vpop.f32.mrf.mxu0 }
 0x78b   :  { %v6756_v4 = vadd.f32 %v13381_v35, %v6667_v55  ;;  %v9477_v35 = vor.u32 %v10067_v20, %v9476_v46  ;;  %v10137_v55 = vld [vmem:[%s14534_s6 + $0xe4] sm:$0xf0]  ;;  %v13616_v20 = vpop.f32.mrf.mxu1  ;;  %v6847_v53 = vadd.f32 %v6846_v2, %v13552_v21  ;;  %v9485_v2 = vor.u32 %v10069_v17, %v9484_v63 }
 0x78d   :  { %v10425_v8 = vpop.eup %10424  ;;  %v7007_v46 = vmul.f32 0.5, %v6756_v4 }
 0x78e   :  { %v13578_v61 = vpop.f32.mrf.mxu3  ;;  %v7070_v7 = vmul.f32 0.5, %v10425_v8  ;;  %v9772_v8 = vld [vmem:[%s14534_s6 + $0xe0] sm:$0xf] }
 0x78f   :  { %v9773_v3 = vor.u32 %v10137_v55, %v9772_v8 }
 0x790   :  { %v6668_v42 = vpop.f32.mrf.mxu2  ;;  %v7102_v1 = vadd.f32 0.5, %v7070_v7 }
 0x791   :  { %v6669_v48 = vadd.f32 %v6668_v42, %v13505_v33  ;;  %v9653_v42 = vor.u32 %v10111_v24, %v9652_v0  ;;  %7869 = vmatpush.bf16.msra.mxu0 %v9773_v3 }
 0x792   :  { %v13592_v11 = vpop.f32.mrf.mxu0 }
 0x793   :  { %v6758_v10 = vadd.f32 %v13401_v23, %v6669_v48  ;;  %7443 = vmatmul.bf16.vlgmr.msra.gmra.mxu3 %v13589_v37  ;;  %v6929_v23 = vadd.f32 %v13435_v15, %v6840_v16  ;;  %7352 = vmatpush.bf16.msra.mxu2 %v9653_v42  ;;  %v7166_v16 = vmul.f32 %v7134_v43, %v7102_v1  ;;  %v13633_v3 = vpop.f32.mrf.mxu1 }
 0x795   :  { %v7008_v48 = vmul.f32 0.5, %v6758_v10  ;;  %6710 = vmatmul.bf16.gmra.mxu2 %v9477_v35  ;;  %6888 = vmatmul.bf16.gmra.mxu0 %v9477_v35  ;;  %v7133_v15 = vsub.f32 %v6929_v23, %v13050_v18  ;;  %v13624_v4 = vadd.f32 %v7166_v16, %v13064_v50  ;;  %v6845_v23 = vadd.f32 %v13563_v59, %v13552_v21 }
 0x796   :  { %v13618_v41 = vpop.f32.mrf.mxu3 }
 0x797   :  { %10426 = vtanh.f32 %v7008_v48  ;;  %v7165_v10 = vmul.f32 %v7133_v15, %v7101_v25  ;;  %v6934_v59 = vadd.f32 %v13481_v13, %v6845_v23 }
 0x798   :  { %v6671_v0 = vpop.f32.mrf.mxu2  ;;  %10428 = vtanh.f32 %v7007_v46 }
 0x799   :  { %v6672_v35 = vadd.f32 %v6671_v0, %v13505_v33  ;;  %v13631_v42 = vadd.f32 %v7165_v10, %v13050_v18  ;;  %v6936_v18 = vadd.f32 %v13517_v9, %v6847_v53  ;;  %v7135_v9 = vsub.f32 %v6934_v59, %v13076_v49 }
 0x79a   :  { %v6851_v7 = vpop.f32.mrf.mxu0 }
 0x79b   :  { %v6761_v55 = vadd.f32 %v13415_v28, %v6672_v35  ;;  %v13640_v46 = vpack.c.bf16 %v13624_v4, %v13631_v42  ;;  %v7136_v63 = vsub.f32 %v6936_v18, %v13090_v27  ;;  %v6850_v18 = vadd.f32 %v13592_v11, %v13552_v21  ;;  %v9774_v11 = vld [vmem:[%s14534_s6 + $0xe8] sm:$0xf0] }
 0x79d   :  { %v10427_v24 = vpop.eup %10426  ;;  %v7009_v0 = vmul.f32 0.5, %v6761_v55 }
 0x79e   :  { %v13626_v8 = vpop.f32.mrf.mxu3  ;;  %v10429_v43 = vpop.eup %10428  ;;  %v7072_v1 = vmul.f32 0.5, %v10427_v24 }
 0x79f   :  { %v7071_v28 = vmul.f32 0.5, %v10429_v43  ;;  %10430 = vtanh.f32 %v7009_v0 }
 0x7a0   :  { %v6673_v50 = vpop.f32.mrf.mxu2  ;;  %v7104_v16 = vadd.f32 0.5, %v7072_v1 }
 0x7a1   :  { %v6674_v48 = vadd.f32 %v6673_v50, %v13505_v33  ;;  %v7103_v24 = vadd.f32 0.5, %v7071_v28 }
 0x7a2   :  { %v13642_v25 = vpop.f32.mrf.mxu0  ;;  %v7168_v53 = vmul.f32 %v7136_v63, %v7104_v16 }
 0x7a3   :  { %v6763_v15 = vadd.f32 %v13433_v6, %v6674_v48  ;;  %7448 = vmatmul.bf16.gmra.mxu3 %v13640_v46  ;;  %v13652_v6 = vpop.f32.mrf.mxu1  ;;  %v7167_v43 = vmul.f32 %v7135_v9, %v7103_v24  ;;  %v9492_v24 = vld [vmem:[#allocation2 + $0xd0] sm:$0xf] }
 0x7a4   :  { %v13655_v23 = vadd.f32 %v7168_v53, %v13090_v27 }
 0x7a5   :  { %v7010_v10 = vmul.f32 0.5, %v6763_v15  ;;  %6715 = vmatmul.bf16.gmra.mxu2 %v9485_v2  ;;  %6893 = vmatmul.bf16.gmra.mxu0 %v9485_v2  ;;  %v10431_v13 = vpop.eup %10430  ;;  %v6852_v2 = vadd.f32 %v6851_v7, %v13552_v21  ;;  %v13662_v28 = vadd.f32 %v7167_v43, %v13076_v49  ;;  %v10071_v15 = vld [vmem:[#allocation2 + $0xd4] sm:$0xf0]  ;;  %v10136_v49 = vld [vmem:[%s14534_s6 + $0xe4] sm:$0xf] }
 0x7a6   :  { %v13648_v35 = vpop.f32.mrf.mxu3  ;;  %14912 = vst [vmem:[#allocation27_spill] sm:$0xff] %v13655_v23  ;;  %v7073_v59 = vmul.f32 0.5, %v10431_v13  ;;  %v9777_v43 = vor.u32 %v10136_v49, %v9774_v11  ;;  %v10109_v13 = vld [vmem:[%s14534_s6 + $0x4] sm:$0xf0] }
 0x7a7   :  { %10432 = vtanh.f32 %v7010_v10  ;;  %14913 = vst [vmem:[#allocation36_spill] sm:$0xff] %v13662_v28  ;;  %v13669_v10 = vpack.c.bf16 %v13655_v23, %v13662_v28  ;;  %v6941_v9 = vadd.f32 %v13561_v29, %v6852_v2  ;;  %v6939_v2 = vadd.f32 %v13549_v56, %v6850_v18 }
 0x7a8   :  { %v6676_v17 = vpop.f32.mrf.mxu2  ;;  %7958 = vmatpush.bf16.msra.mxu1 %v9777_v43  ;;  %v7105_v49 = vadd.f32 0.5, %v7073_v59  ;;  %10144 = vmatpush.bf16.msrb.mxu3 %v9777_v43 }
 0x7a9   :  { %v6677_v1 = vadd.f32 %v6676_v17, %v13505_v33  ;;  %v9644_v17 = vld [vmem:[%s14534_s6] sm:$0xf]  ;;  %v7138_v11 = vsub.f32 %v6941_v9, %v13120_v36 }
 0x7aa   :  { %v6856_v55 = vpop.f32.mrf.mxu0  ;;  %v9645_v29 = vor.u32 %v10109_v13, %v9644_v17  ;;  %v7137_v17 = vsub.f32 %v6939_v2, %v13106_v19  ;;  %v9500_v9 = vld [vmem:[#allocation2 + $0xe0] sm:$0xf] }
 0x7ab   :  { %v6766_v63 = vadd.f32 %v13447_v47, %v6677_v1  ;;  %v9493_v47 = vor.u32 %v10071_v15, %v9492_v24  ;;  %v10135_v1 = vld [vmem:[%s14534_s6 + $0xd4] sm:$0xf0]  ;;  %v6857_v43 = vadd.f32 %v6856_v55, %v13552_v21 }
 0x7ac   :  { %7353 = vmatpush.bf16.msra.mxu2 %v9645_v29  ;;  %v7169_v18 = vmul.f32 %v7137_v17, %v7105_v49  ;;  %v6855_v29 = vadd.f32 %v13642_v25, %v13552_v21 }
 0x7ad   :  { %v10433_v50 = vpop.eup %10432  ;;  %v7011_v24 = vmul.f32 0.5, %v6766_v63  ;;  %v6946_v49 = vadd.f32 %v13616_v20, %v6857_v43 }
 0x7ae   :  { %v13658_v48 = vpop.f32.mrf.mxu3  ;;  %v7074_v16 = vmul.f32 0.5, %v10433_v50  ;;  %v9764_v50 = vld [vmem:[%s14534_s6 + $0xd0] sm:$0xf] }
 0x7b0   :  { %v6678_v0 = vpop.f32.mrf.mxu2  ;;  %v7106_v15 = vadd.f32 0.5, %v7074_v16 }
 0x7b1   :  { %v6679_v27 = vadd.f32 %v6678_v0, %v13505_v33  ;;  %v13695_v0 = vpop.f32.mrf.mxu1 }
 0x7b2   :  { %v13672_v7 = vpop.f32.mrf.mxu0  ;;  %v7170_v13 = vmul.f32 %v7138_v11, %v7106_v15  ;;  %v6944_v11 = vadd.f32 %v13572_v12, %v6855_v29 }
 0x7b3   :  { %v6768_v53 = vadd.f32 %v13467_v58, %v6679_v27  ;;  %7453 = vmatmul.bf16.gmra.mxu3 %v13669_v10  ;;  %v9765_v58 = vor.u32 %v10135_v1, %v9764_v50  ;;  %v13710_v50 = vadd.f32 %v7169_v18, %v13106_v19 }
 0x7b4   :  { %v13703_v16 = vadd.f32 %v7170_v13, %v13120_v36  ;;  %v7139_v20 = vsub.f32 %v6944_v11, %v13134_v26 }
 0x7b5   :  { %v7012_v27 = vmul.f32 0.5, %v6768_v53  ;;  %6720 = vmatmul.bf16.gmra.mxu2 %v9493_v47  ;;  %6898 = vmatmul.bf16.gmra.mxu0 %v9493_v47  ;;  %v10073_v47 = vld [vmem:[#allocation2 + $0xe4] sm:$0xf0] }
 0x7b6   :  { %v13699_v23 = vpop.f32.mrf.mxu3  ;;  %7870 = vmatpush.bf16.msra.mxu0 %v9765_v58 }
 0x7b7   :  { %10434 = vtanh.f32 %v7012_v27  ;;  %v9501_v27 = vor.u32 %v10073_v47, %v9500_v9  ;;  %v7140_v9 = vsub.f32 %v6946_v49, %v13148_v39  ;;  %v6860_v49 = vadd.f32 %v13672_v7, %v13552_v21  ;;  %v9766_v7 = vld [vmem:[%s14534_s6 + $0xd8] sm:$0xf0] }
 0x7b8   :  { %v6681_v28 = vpop.f32.mrf.mxu2  ;;  %10436 = vtanh.f32 %v7011_v24 }
 0x7b9   :  { %v13705_v53 = vpop.f32.mrf.mxu1  ;;  %v6682_v59 = vadd.f32 %v6681_v28, %v13505_v33  ;;  %v13719_v28 = vpack.c.bf16 %v13703_v16, %v13710_v50 }
 0x7ba   :  { %v6861_v56 = vpop.f32.mrf.mxu0 }
 0x7bb   :  { %v6771_v55 = vadd.f32 %v13495_v62, %v6682_v59 }
 0x7bd   :  { %v10435_v63 = vpop.eup %10434  ;;  %v7013_v18 = vmul.f32 0.5, %v6771_v55 }
 0x7be   :  { %v10437_v1 = vpop.eup %10436  ;;  %v7076_v2 = vmul.f32 0.5, %v10435_v63  ;;  %v13714_v36 = vpop.f32.mrf.mxu3 }
 0x7bf   :  { %v7075_v19 = vmul.f32 0.5, %v10437_v1 }
 0x7c0   :  { %v6683_v58 = vpop.f32.mrf.mxu2  ;;  %v7108_v17 = vadd.f32 0.5, %v7076_v2  ;;  %v6862_v2 = vadd.f32 %v6861_v56, %v13552_v21 }
 0x7c1   :  { %v6684_v15 = vadd.f32 %v6683_v58, %v13505_v33  ;;  %v7107_v63 = vadd.f32 0.5, %v7075_v19  ;;  %v13729_v62 = vpop.f32.mrf.mxu1 }
 0x7c2   :  { %v13722_v24 = vpop.f32.mrf.mxu0  ;;  %v7172_v47 = vmul.f32 %v7140_v9, %v7108_v17  ;;  %v9508_v17 = vld [vmem:[#allocation2 + $0xf0] sm:$0xf]  ;;  %v9756_v9 = vld [vmem:[%s14534_s6 + $0xc0] sm:$0xf] }
 0x7c3   :  { %v6773_v25 = vadd.f32 %v13522_v57, %v6684_v15  ;;  %7458 = vmatmul.bf16.gmra.mxu3 %v13719_v28  ;;  %v7171_v43 = vmul.f32 %v7139_v20, %v7107_v63  ;;  %v10134_v63 = vld [vmem:[%s14534_s6 + $0xd4] sm:$0xf]  ;;  %v6951_v20 = vadd.f32 %v13652_v6, %v6862_v2 }
 0x7c4   :  { %v13735_v12 = vadd.f32 %v7172_v47, %v13148_v39  ;;  %v9769_v47 = vor.u32 %v10134_v63, %v9766_v7 }
 0x7c5   :  { %v7014_v13 = vmul.f32 0.5, %v6773_v25  ;;  %6725 = vmatmul.bf16.gmra.mxu2 %v9501_v27  ;;  %6903 = vmatmul.bf16.gmra.mxu0 %v9501_v27  ;;  %v13740_v15 = vadd.f32 %v7171_v43, %v13134_v26  ;;  %v10075_v27 = vld [vmem:[#allocation2 + $0xf4] sm:$0xf0]  ;;  %v10133_v43 = vld [vmem:[%s14534_s6 + $0xc4] sm:$0xf0]  ;;  %v7142_v6 = vsub.f32 %v6951_v20, %v13176_v30 }
 0x7c6   :  { %v13732_v1 = vpop.f32.mrf.mxu3  ;;  %7959 = vmatpush.bf16.msra.mxu1 %v9769_v47  ;;  %10145 = vmatpush.bf16.msrb.mxu3 %v9769_v47 }
 0x7c7   :  { %10438 = vtanh.f32 %v7014_v13  ;;  %v13747_v39 = vpack.c.bf16 %v13735_v12, %v13740_v15 }
 0x7c8   :  { %v6686_v59 = vpop.f32.mrf.mxu2  ;;  %10440 = vtanh.f32 %v7013_v18  ;;  %v9509_v18 = vor.u32 %v10075_v27, %v9508_v17 }
 0x7c9   :  { %v6687_v58 = vadd.f32 %v6686_v59, %v13505_v33  ;;  %v13749_v13 = vpop.f32.mrf.mxu1 }
 0x7ca   :  { %v6866_v57 = vpop.f32.mrf.mxu0 }
 0x7cb   :  { %v6776_v56 = vadd.f32 %v13547_v5, %v6687_v58  ;;  %v6949_v58 = vadd.f32 %v13633_v3, %v6860_v49 }
 0x7cd   :  { %v10439_v29 = vpop.eup %10438 }
 0x7ce   :  { %v10441_v55 = vpop.eup %10440  ;;  %v7078_v25 = vmul.f32 0.5, %v10439_v29  ;;  %v9757_v29 = vor.u32 %v10133_v43, %v9756_v9  ;;  %v6867_v9 = vadd.f32 %v6866_v57, %v13552_v21  ;;  %v6865_v43 = vadd.f32 %v13722_v24, %v13552_v21 }
 0x7cf   :  { %v7077_v59 = vmul.f32 0.5, %v10441_v55  ;;  %v7015_v55 = vmul.f32 0.5, %v6776_v56 }
 0x7d0   :  { %v6688_v19 = vpop.f32.mrf.mxu2  ;;  %v7110_v27 = vadd.f32 0.5, %v7078_v25  ;;  %7871 = vmatpush.bf16.msra.mxu0 %v9757_v29  ;;  %v6954_v24 = vadd.f32 %v13695_v0, %v6865_v43 }
 0x7d1   :  { %v6689_v11 = vadd.f32 %v6688_v19, %v13505_v33  ;;  %v13770_v19 = vpop.f32.mrf.mxu3  ;;  %v13774_v25 = vpop.f32.mrf.mxu1 }
 0x7d2   :  { %v13752_v26 = vpop.f32.mrf.mxu0  ;;  %v7174_v63 = vmul.f32 %v7142_v6, %v7110_v27 }
 0x7d3   :  { %v6778_v5 = vadd.f32 %v13554_v34, %v6689_v11  ;;  %7463 = vmatmul.bf16.gmra.mxu3 %v13747_v39  ;;  %v7109_v34 = vadd.f32 0.5, %v7077_v59  ;;  %v7141_v11 = vsub.f32 %v6949_v58, %v13162_v38 }
 0x7d4   :  { %v13777_v7 = vadd.f32 %v7174_v63, %v13176_v30 }
 0x7d5   :  { %v7016_v17 = vmul.f32 0.5, %v6778_v5  ;;  %6730 = vmatmul.bf16.gmra.mxu2 %v9509_v18  ;;  %6908 = vmatmul.bf16.gmra.mxu0 %v9509_v18  ;;  %v7173_v49 = vmul.f32 %v7141_v11, %v7109_v34 }
 0x7d7   :  { %10442 = vtanh.f32 %v7016_v17  ;;  %v13784_v20 = vadd.f32 %v7173_v49, %v13162_v38  ;;  %v6956_v38 = vadd.f32 %v13705_v53, %v6867_v9  ;;  %v7143_v53 = vsub.f32 %v6954_v24, %v13196_v54 }
 0x7d8   :  { %v6691_v2 = vpop.f32.mrf.mxu2  ;;  %10444 = vtanh.f32 %v7015_v55 }
 0x7d9   :  { %v6692_v18 = vadd.f32 %v6691_v2, %v13505_v33  ;;  %v13781_v59 = vpop.f32.mrf.mxu3  ;;  %v13791_v30 = vpack.c.bf16 %v13777_v7, %v13784_v20  ;;  %v13801_v2 = vpop.f32.mrf.mxu1 }
 0x7da   :  { %v6871_v3 = vpop.f32.mrf.mxu0 }
 0x7db   :  { %v6781_v27 = vadd.f32 %v13568_v22, %v6692_v18  ;;  %v7144_v22 = vsub.f32 %v6956_v38, %v13210_v31 }
 0x7dd   :  { %v10443_v56 = vpop.eup %10442  ;;  %v7017_v11 = vmul.f32 0.5, %v6781_v27 }
 0x7de   :  { %v10445_v5 = vpop.eup %10444  ;;  %v7080_v29 = vmul.f32 0.5, %v10443_v56 }
 0x7df   :  { %v7079_v17 = vmul.f32 0.5, %v10445_v5 }
 0x7e0   :  { %v6693_v47 = vpop.f32.mrf.mxu2  ;;  %v7112_v34 = vadd.f32 0.5, %v7080_v29 }
 0x7e1   :  { %v6694_v58 = vadd.f32 %v6693_v47, %v13505_v33  ;;  %v7111_v63 = vadd.f32 0.5, %v7079_v17  ;;  %v6872_v47 = vadd.f32 %v6871_v3, %v13552_v21  ;;  %v6870_v17 = vadd.f32 %v13752_v26, %v13552_v21  ;;  %v9748_v26 = vld [vmem:[%s14534_s6 + $0xb0] sm:$0xf] }
 0x7e2   :  { %v13794_v57 = vpop.f32.mrf.mxu0  ;;  %v7176_v56 = vmul.f32 %v7144_v22, %v7112_v34  ;;  %v9758_v34 = vld [vmem:[%s14534_s6 + $0xc8] sm:$0xf0] }
 0x7e3   :  { %v6783_v55 = vadd.f32 %v13578_v61, %v6694_v58  ;;  %7468 = vmatmul.bf16.gmra.mxu3 %v13791_v30  ;;  %v13805_v61 = vpop.f32.mrf.mxu3  ;;  %v7175_v0 = vmul.f32 %v7143_v53, %v7111_v63  ;;  %v13815_v58 = vpop.f32.mrf.mxu1 }
 0x7e4   :  { %v13808_v9 = vadd.f32 %v7176_v56, %v13210_v31  ;;  %v6959_v56 = vadd.f32 %v13729_v62, %v6870_v17 }
 0x7e5   :  { %v7018_v6 = vmul.f32 0.5, %v6783_v55  ;;  %7354 = vmatmul.bf16.vlgmr.msra.gmra.mxu2 %v13589_v37  ;;  %v13813_v43 = vadd.f32 %v7175_v0, %v13196_v54  ;;  %v10132_v54 = vld [vmem:[%s14534_s6 + $0xc4] sm:$0xf] }
 0x7e6   :  { %v9761_v22 = vor.u32 %v10132_v54, %v9758_v34 }
 0x7e7   :  { %10446 = vtanh.f32 %v7018_v6  ;;  %v13822_v31 = vpack.c.bf16 %v13808_v9, %v13813_v43 }
 0x7e8   :  { %v6696_v49 = vpop.f32.mrf.mxu2  ;;  %10448 = vtanh.f32 %v7017_v11  ;;  %v6961_v11 = vadd.f32 %v13749_v13, %v6872_v47  ;;  %7960 = vmatpush.bf16.msra.mxu1 %v9761_v22  ;;  %10146 = vmatpush.bf16.msrb.mxu3 %v9761_v22 }
 0x7e9   :  { %v6697_v5 = vadd.f32 %v6696_v49, %v13505_v33  ;;  %v10131_v49 = vld [vmem:[%s14534_s6 + $0xb4] sm:$0xf0] }
 0x7ea   :  { %v6876_v18 = vpop.f32.mrf.mxu0  ;;  %v9749_v53 = vor.u32 %v10131_v49, %v9748_v26 }
 0x7eb   :  { %v6786_v24 = vadd.f32 %v13618_v41, %v6697_v5  ;;  %v13837_v63 = vpop.f32.mrf.mxu3  ;;  %v6877_v34 = vadd.f32 %v6876_v18, %v13552_v21 }
 0x7ec   :  { %7872 = vmatpush.bf16.msra.mxu0 %v9749_v53 }
 0x7ed   :  { %v10447_v37 = vpop.eup %10446  ;;  %v7019_v13 = vmul.f32 0.5, %v6786_v24 }
 0x7ee   :  { %v10449_v29 = vpop.eup %10448  ;;  %v7082_v38 = vmul.f32 0.5, %v10447_v37 }
 0x7ef   :  { %v7081_v6 = vmul.f32 0.5, %v10449_v29  ;;  %v7145_v29 = vsub.f32 %v6959_v56, %v13230_v60 }
 0x7f0   :  { %v6698_v27 = vpop.f32.mrf.mxu2  ;;  %v7114_v0 = vadd.f32 0.5, %v7082_v38 }
 0x7f1   :  { %v6699_v55 = vadd.f32 %v6698_v27, %v13505_v33  ;;  %v7113_v5 = vadd.f32 0.5, %v7081_v6 }
 0x7f2   :  { %v13825_v3 = vpop.f32.mrf.mxu0 }
 0x7f3   :  { %v6788_v41 = vadd.f32 %v13626_v8, %v6699_v55  ;;  %7473 = vmatmul.bf16.gmra.mxu3 %v13822_v31  ;;  %v7146_v8 = vsub.f32 %v6961_v11, %v13242_v52  ;;  %v6970_v55 = vpop.f32.mrf.mxu1  ;;  %v7177_v62 = vmul.f32 %v7145_v29, %v7113_v5  ;;  %v13848_v17 = vpop.f32.mrf.mxu3 }
 0x7f5   :  { %v7020_v37 = vmul.f32 0.5, %v6788_v41  ;;  %7359 = vmatmul.bf16.gmra.mxu2 %v13640_v46  ;;  %v7178_v27 = vmul.f32 %v7146_v8, %v7114_v0  ;;  %v13856_v26 = vadd.f32 %v7177_v62, %v13230_v60  ;;  %v6875_v41 = vadd.f32 %v13794_v57, %v13552_v21 }
 0x7f6   :  { %v6966_v60 = vadd.f32 %v13801_v2, %v6877_v34 }
 0x7f7   :  { %10450 = vtanh.f32 %v7020_v37  ;;  %v13851_v46 = vadd.f32 %v7178_v27, %v13242_v52  ;;  %v6964_v57 = vadd.f32 %v13774_v25, %v6875_v41 }
 0x7f8   :  { %v6701_v47 = vpop.f32.mrf.mxu2  ;;  %10452 = vtanh.f32 %v7019_v13 }
 0x7f9   :  { %v6702_v24 = vadd.f32 %v6701_v47, %v13505_v33  ;;  %v13863_v52 = vpack.c.bf16 %v13851_v46, %v13856_v26 }
 0x7fa   :  { %v6881_v54 = vpop.f32.mrf.mxu0 }
 0x7fb   :  { %v6791_v53 = vadd.f32 %v13648_v35, %v6702_v24  ;;  %v13871_v37 = vpop.f32.mrf.mxu1  ;;  %v7148_v35 = vsub.f32 %v6966_v60, %v13276_v45  ;;  %v13876_v29 = vpop.f32.mrf.mxu3 }
 0x7fd   :  { %v10451_v38 = vpop.eup %10450  ;;  %v7021_v8 = vmul.f32 0.5, %v6791_v53 }
 0x7fe   :  { %v10453_v6 = vpop.eup %10452  ;;  %v7084_v22 = vmul.f32 0.5, %v10451_v38 }
 0x7ff   :  { %v7083_v18 = vmul.f32 0.5, %v10453_v6  ;;  %v6882_v6 = vadd.f32 %v6881_v54, %v13552_v21 }
 0x800   :  { %v6703_v11 = vpop.f32.mrf.mxu2  ;;  %v7116_v13 = vadd.f32 0.5, %v7084_v22 }
 0x801   :  { %v6704_v49 = vadd.f32 %v6703_v11, %v13505_v33  ;;  %v7115_v47 = vadd.f32 0.5, %v7083_v18 }
 0x802   :  { %v13866_v56 = vpop.f32.mrf.mxu0  ;;  %v7180_v27 = vmul.f32 %v7148_v35, %v7116_v13 }
 0x803   :  { %v6793_v0 = vadd.f32 %v13658_v48, %v6704_v49  ;;  %7478 = vmatmul.bf16.gmra.mxu3 %v13863_v52  ;;  %v7147_v48 = vsub.f32 %v6964_v57, %v13262_v44  ;;  %v6975_v34 = vpop.f32.mrf.mxu1  ;;  %v6880_v49 = vadd.f32 %v13825_v3, %v13552_v21  ;;  %v13889_v53 = vpop.f32.mrf.mxu3  ;;  %v9750_v3 = vld [vmem:[%s14534_s6 + $0xb8] sm:$0xf0]  ;;  %v9740_v57 = vld [vmem:[%s14534_s6 + $0xa0] sm:$0xf] }
 0x804   :  { %v13880_v25 = vadd.f32 %v7180_v27, %v13276_v45 }
 0x805   :  { %v7022_v5 = vmul.f32 0.5, %v6793_v0  ;;  %7364 = vmatmul.bf16.gmra.mxu2 %v13669_v10  ;;  %v7179_v38 = vmul.f32 %v7147_v48, %v7115_v47  ;;  %v10129_v47 = vld [vmem:[%s14534_s6 + $0xa4] sm:$0xf0] }
 0x806   :  { %v9741_v35 = vor.u32 %v10129_v47, %v9740_v57 }
 0x807   :  { %10454 = vtanh.f32 %v7022_v5  ;;  %v13885_v11 = vadd.f32 %v7179_v38, %v13262_v44  ;;  %v10130_v44 = vld [vmem:[%s14534_s6 + $0xb4] sm:$0xf]  ;;  %v6971_v5 = vadd.f32 %v6970_v55, %v6882_v6 }
 0x808   :  { %v6706_v2 = vpop.f32.mrf.mxu2  ;;  %10456 = vtanh.f32 %v7021_v8  ;;  %7873 = vmatpush.bf16.msra.mxu0 %v9741_v35 }
 0x809   :  { %v6707_v10 = vadd.f32 %v6706_v2, %v13505_v33  ;;  %v13894_v60 = vpack.c.bf16 %v13880_v25, %v13885_v11  ;;  %v6969_v2 = vadd.f32 %v13815_v58, %v6880_v49 }
 0x80a   :  { %v6886_v62 = vpop.f32.mrf.mxu0 }
 0x80b   :  { %v6796_v0 = vadd.f32 %v13699_v23, %v6707_v10  ;;  %v9753_v23 = vor.u32 %v10130_v44, %v9750_v3  ;;  %v13916_v10 = vpop.f32.mrf.mxu1  ;;  %v13919_v49 = vpop.f32.mrf.mxu3  ;;  %v6887_v3 = vadd.f32 %v6886_v62, %v13552_v21 }
 0x80d   :  { %v10455_v24 = vpop.eup %10454  ;;  %7961 = vmatpush.bf16.msra.mxu1 %v9753_v23  ;;  %v7023_v38 = vmul.f32 0.5, %v6796_v0  ;;  %10147 = vmatpush.bf16.msrb.mxu3 %v9753_v23  ;;  %v6976_v62 = vadd.f32 %v6975_v34, %v6887_v3  ;;  %v14916_v34 = vld [vmem:[#allocation21_spill] sm:$0xff] }
 0x80e   :  { %v10457_v41 = vpop.eup %10456  ;;  %v7086_v18 = vmul.f32 0.5, %v10455_v24 }
 0x80f   :  { %v7085_v13 = vmul.f32 0.5, %v10457_v41  ;;  %v14915_v41 = vld [vmem:[#allocation18_spill] sm:$0xff] }
 0x810   :  { %v6708_v22 = vpop.f32.mrf.mxu2  ;;  %v7118_v48 = vadd.f32 0.5, %v7086_v18 }
 0x811   :  { %v6709_v45 = vadd.f32 %v6708_v22, %v13505_v33  ;;  %v7117_v55 = vadd.f32 0.5, %v7085_v13  ;;  %v7149_v22 = vsub.f32 %v6969_v2, %v14915_v41 }
 0x812   :  { %v13897_v54 = vpop.f32.mrf.mxu0 }
 0x813   :  { %v6798_v8 = vadd.f32 %v13714_v36, %v6709_v45  ;;  %7483 = vmatmul.bf16.gmra.mxu3 %v13894_v60  ;;  %v14914_v36 = vld [vmem:[#allocation19_spill] sm:$0xff]  ;;  %v7181_v58 = vmul.f32 %v7149_v22, %v7117_v55  ;;  %v6980_v2 = vpop.f32.mrf.mxu1 }
 0x814   :  { %v7150_v24 = vsub.f32 %v6971_v5, %v14914_v36 }
 0x815   :  { %v7024_v27 = vmul.f32 0.5, %v6798_v8  ;;  %7369 = vmatmul.bf16.gmra.mxu2 %v13719_v28  ;;  %v13927_v57 = vadd.f32 %v7181_v58, %v14915_v41  ;;  %v6885_v8 = vadd.f32 %v13866_v56, %v13552_v21 }
 0x816   :  { %v7182_v45 = vmul.f32 %v7150_v24, %v7118_v48 }
 0x817   :  { %10458 = vtanh.f32 %v7024_v27  ;;  %v6974_v55 = vadd.f32 %v13871_v37, %v6885_v8 }
 0x818   :  { %v6711_v6 = vpop.f32.mrf.mxu2  ;;  %10460 = vtanh.f32 %v7023_v38  ;;  %v13922_v28 = vadd.f32 %v7182_v45, %v14914_v36  ;;  %v13940_v36 = vpop.f32.mrf.mxu3  ;;  %v7152_v45 = vsub.f32 %v6976_v62, %v13342_v51 }
 0x819   :  { %v6712_v44 = vadd.f32 %v6711_v6, %v13505_v33  ;;  %v7151_v58 = vsub.f32 %v6974_v55, %v14916_v34 }
 0x81a   :  { %v6891_v18 = vpop.f32.mrf.mxu0  ;;  %v13934_v35 = vpack.c.bf16 %v13922_v28, %v13927_v57 }
 0x81b   :  { %v6801_v48 = vadd.f32 %v13732_v1, %v6712_v44  ;;  %v13945_v44 = vpop.f32.mrf.mxu1 }
 0x81d   :  { %v10459_v0 = vpop.eup %10458  ;;  %v7025_v6 = vmul.f32 0.5, %v6801_v48 }
 0x81e   :  { %v10461_v13 = vpop.eup %10460  ;;  %v7088_v23 = vmul.f32 0.5, %v10459_v0 }
 0x81f   :  { %v7087_v27 = vmul.f32 0.5, %v10461_v13 }
 0x820   :  { %v6713_v5 = vpop.f32.mrf.mxu2  ;;  %v7120_v56 = vadd.f32 0.5, %v7088_v23  ;;  %v13951_v13 = vpop.f32.mrf.mxu3 }
 0x821   :  { %v6714_v47 = vadd.f32 %v6713_v5, %v13505_v33  ;;  %v7119_v22 = vadd.f32 0.5, %v7087_v27  ;;  %v6892_v5 = vadd.f32 %v6891_v18, %v13552_v21  ;;  %v6890_v27 = vadd.f32 %v13897_v54, %v13552_v21  ;;  %v10128_v18 = vld [vmem:[%s14534_s6 + $0xa4] sm:$0xf]  ;;  %v9732_v54 = vld [vmem:[%s14534_s6 + $0x90] sm:$0xf] }
 0x822   :  { %v6894_v41 = vpop.f32.mrf.mxu0 }
 0x823   :  { %v6803_v38 = vadd.f32 %v13770_v19, %v6714_v47  ;;  %7488 = vmatmul.bf16.gmra.mxu3 %v13934_v35  ;;  %v7184_v19 = vmul.f32 %v7152_v45, %v7120_v56  ;;  %v7183_v0 = vmul.f32 %v7151_v58, %v7119_v22  ;;  %v9742_v56 = vld [vmem:[%s14534_s6 + $0xa8] sm:$0xf0] }
 0x824   :  { %v9745_v45 = vor.u32 %v10128_v18, %v9742_v56 }
 0x825   :  { %v7026_v24 = vmul.f32 0.5, %v6803_v38  ;;  %7374 = vmatmul.bf16.gmra.mxu2 %v13747_v39  ;;  %v13948_v37 = vadd.f32 %v7184_v19, %v13342_v51  ;;  %v13955_v8 = vadd.f32 %v7183_v0, %v14916_v34  ;;  %v6979_v34 = vadd.f32 %v13916_v10, %v6890_v27  ;;  %v6985_v0 = vpop.f32.mrf.mxu1 }
 0x826   :  { %7962 = vmatpush.bf16.msra.mxu1 %v9745_v45  ;;  %10148 = vmatpush.bf16.msrb.mxu3 %v9745_v45  ;;  %v6895_v45 = vadd.f32 %v6894_v41, %v13552_v21 }
 0x827   :  { %10462 = vtanh.f32 %v7026_v24  ;;  %v13962_v38 = vpack.c.bf16 %v13948_v37, %v13955_v8 }
 0x828   :  { %v6716_v1 = vpop.f32.mrf.mxu2  ;;  %10464 = vtanh.f32 %v7025_v6  ;;  %v6981_v6 = vadd.f32 %v6980_v2, %v6892_v5  ;;  %v14917_v2 = vld [vmem:[#allocation22_spill] sm:$0xff]  ;;  %v6984_v41 = vadd.f32 %v13945_v44, %v6895_v45 }
 0x829   :  { %v6717_v39 = vadd.f32 %v6716_v1, %v13505_v33 }
 0x82a   :  { %v6896_v47 = vpop.f32.mrf.mxu0 }
 0x82b   :  { %v6806_v55 = vadd.f32 %v13781_v59, %v6717_v39  ;;  %v10127_v59 = vld [vmem:[%s14534_s6 + $0x94] sm:$0xf0]  ;;  %v7154_v39 = vsub.f32 %v6981_v6, %v14917_v2  ;;  %v6897_v56 = vadd.f32 %v6896_v47, %v13552_v21 }
 0x82c   :  { %v9733_v1 = vor.u32 %v10127_v59, %v9732_v54 }
 0x82d   :  { %v10463_v3 = vpop.eup %10462  ;;  %v6988_v6 = vpop.f32.mrf.mxu1 }
 0x82e   :  { %v10465_v23 = vpop.eup %10464  ;;  %v7090_v62 = vmul.f32 0.5, %v10463_v3  ;;  %v7027_v3 = vmul.f32 0.5, %v6806_v55  ;;  %7874 = vmatpush.bf16.msra.mxu0 %v9733_v1 }
 0x82f   :  { %v7089_v24 = vmul.f32 0.5, %v10465_v23  ;;  %v14918_v23 = vld [vmem:[#allocation20_spill] sm:$0xff] }
 0x830   :  { %v6718_v48 = vpop.f32.mrf.mxu2  ;;  %v7122_v58 = vadd.f32 0.5, %v7090_v62 }
 0x831   :  { %v6719_v51 = vadd.f32 %v6718_v48, %v13505_v33  ;;  %v7153_v48 = vsub.f32 %v6979_v34, %v14918_v23 }
 0x832   :  { %v7186_v18 = vmul.f32 %v7154_v39, %v7122_v58  ;;  %v6899_v10 = vpop.f32.mrf.mxu0 }
 0x833   :  { %v6808_v22 = vadd.f32 %v13805_v61, %v6719_v51  ;;  %7493 = vmatmul.bf16.gmra.mxu3 %v13962_v38  ;;  %v7121_v61 = vadd.f32 0.5, %v7089_v24  ;;  %v13983_v51 = vpop.f32.mrf.mxu3 }
 0x835   :  { %v7028_v19 = vmul.f32 0.5, %v6808_v22  ;;  %7379 = vmatmul.bf16.gmra.mxu2 %v13791_v30  ;;  %v7185_v27 = vmul.f32 %v7153_v48, %v7121_v61  ;;  %v13986_v30 = vadd.f32 %v7186_v18, %v14917_v2 }
 0x837   :  { %10466 = vtanh.f32 %v7028_v19  ;;  %v13991_v54 = vadd.f32 %v7185_v27, %v14918_v23  ;;  %v14919_v27 = vld [vmem:[#allocation23_spill] sm:$0xff] }
 0x838   :  { %v6721_v5 = vpop.f32.mrf.mxu2  ;;  %10468 = vtanh.f32 %v7027_v3  ;;  %v6986_v3 = vadd.f32 %v6985_v0, %v6897_v56 }
 0x839   :  { %v6722_v55 = vadd.f32 %v6721_v5, %v13505_v33  ;;  %v13997_v34 = vpack.c.bf16 %v13986_v30, %v13991_v54 }
 0x83a   :  { %v6901_v2 = vpop.f32.mrf.mxu0  ;;  %v7156_v18 = vsub.f32 %v6986_v3, %v13408_v14 }
 0x83b   :  { %v6811_v58 = vadd.f32 %v13837_v63, %v6722_v55  ;;  %v14000_v19 = vpop.f32.mrf.mxu3  ;;  %v6990_v55 = vpop.f32.mrf.mxu1  ;;  %v6902_v45 = vadd.f32 %v6901_v2, %v13552_v21  ;;  %v10126_v2 = vld [vmem:[%s14534_s6 + $0x94] sm:$0xf] }
 0x83d   :  { %v10467_v62 = vpop.eup %10466  ;;  %v7029_v23 = vmul.f32 0.5, %v6811_v58 }
 0x83e   :  { %v10469_v24 = vpop.eup %10468  ;;  %v7092_v59 = vmul.f32 0.5, %v10467_v62  ;;  %v7155_v62 = vsub.f32 %v6984_v41, %v14919_v27 }
 0x83f   :  { %v7091_v47 = vmul.f32 0.5, %v10469_v24 }
 0x840   :  { %v6723_v22 = vpop.f32.mrf.mxu2  ;;  %v7124_v39 = vadd.f32 0.5, %v7092_v59 }
 0x841   :  { %v6724_v1 = vadd.f32 %v6723_v22, %v13505_v33  ;;  %v7123_v48 = vadd.f32 0.5, %v7091_v47  ;;  %v6900_v47 = vadd.f32 %v6899_v10, %v13552_v21  ;;  %v9724_v10 = vld [vmem:[%s14534_s6 + $0x80] sm:$0xf] }
 0x842   :  { %v7188_v0 = vmul.f32 %v7156_v18, %v7124_v39  ;;  %v6904_v22 = vpop.f32.mrf.mxu0  ;;  %v9734_v39 = vld [vmem:[%s14534_s6 + $0x98] sm:$0xf0] }
 0x843   :  { %v6813_v61 = vadd.f32 %v13848_v17, %v6724_v1  ;;  %7498 = vmatmul.bf16.gmra.mxu3 %v13997_v34  ;;  %v7187_v17 = vmul.f32 %v7155_v62, %v7123_v48  ;;  %v14008_v56 = vpop.f32.mrf.mxu3  ;;  %v9737_v18 = vor.u32 %v10126_v2, %v9734_v39  ;;  %v6989_v62 = vadd.f32 %v6988_v6, %v6900_v47 }
 0x844   :  { %v14011_v44 = vadd.f32 %v7188_v0, %v13408_v14 }
 0x845   :  { %v7030_v5 = vmul.f32 0.5, %v6813_v61  ;;  %7384 = vmatmul.bf16.gmra.mxu2 %v13822_v31  ;;  %v14016_v59 = vadd.f32 %v7187_v17, %v14919_v27  ;;  %7963 = vmatpush.bf16.msra.mxu1 %v9737_v18 }
 0x846   :  { %10149 = vmatpush.bf16.msrb.mxu3 %v9737_v18 }
 0x847   :  { %10470 = vtanh.f32 %v7030_v5  ;;  %v14022_v14 = vpack.c.bf16 %v14011_v44, %v14016_v59 }
 0x848   :  { %v6726_v63 = vpop.f32.mrf.mxu2  ;;  %10472 = vtanh.f32 %v7029_v23  ;;  %v6991_v23 = vadd.f32 %v6990_v55, %v6902_v45 }
 0x849   :  { %v6727_v31 = vadd.f32 %v6726_v63, %v13505_v33  ;;  %v6993_v63 = vpop.f32.mrf.mxu1 }
 0x84a   :  { %v6906_v45 = vpop.f32.mrf.mxu0 }
 0x84b   :  { %v6816_v41 = vadd.f32 %v13876_v29, %v6727_v31  ;;  %v10125_v29 = vld [vmem:[%s14534_s6 + $0x84] sm:$0xf0]  ;;  %v14040_v55 = vpop.f32.mrf.mxu3  ;;  %v7158_v31 = vsub.f32 %v6991_v23, %v13442_v40  ;;  %v6907_v39 = vadd.f32 %v6906_v45, %v13552_v21  ;;  %v7260_v45 = vld [vmem:[#allocation8 + $0xa] sm:$0x3] }
 0x84c   :  { %v9725_v27 = vor.u32 %v10125_v29, %v9724_v10 }
 0x84d   :  { %v10471_v24 = vpop.eup %10470 }
 0x84e   :  { %v10473_v1 = vpop.eup %10472  ;;  %v7094_v3 = vmul.f32 0.5, %v10471_v24  ;;  %v7031_v24 = vmul.f32 0.5, %v6816_v41  ;;  %7875 = vmatpush.bf16.msra.mxu0 %v9725_v27  ;;  %v10124_v27 = vld [vmem:[%s14534_s6 + $0x84] sm:$0xf] }
 0x84f   :  { %v7093_v5 = vmul.f32 0.5, %v10473_v1 }
 0x850   :  { %v6728_v58 = vpop.f32.mrf.mxu2  ;;  %v7126_v0 = vadd.f32 0.5, %v7094_v3 }
 0x851   :  { %v6729_v61 = vadd.f32 %v6728_v58, %v13505_v33  ;;  %v14920_v58 = vld [vmem:[#allocation24_spill] sm:$0xff]  ;;  %v6995_v3 = vpop.f32.mrf.mxu1 }
 0x852   :  { %v7190_v2 = vmul.f32 %v7158_v31, %v7126_v0 }
 0x853   :  { %v6818_v48 = vadd.f32 %v13889_v53, %v6729_v61  ;;  %7503 = vmatmul.bf16.gmra.mxu3 %v14022_v14  ;;  %v7125_v53 = vadd.f32 0.5, %v7093_v5  ;;  %v7157_v61 = vsub.f32 %v6989_v62, %v14920_v58  ;;  %v9726_v62 = vld [vmem:[%s14534_s6 + $0x88] sm:$0xf0]  ;;  %v14064_v0 = vpop.f32.mrf.mxu3  ;;  %s10720_s6 = smov [#allocation9]  }
 0x854   :  { %v14045_v47 = vadd.f32 %v7190_v2, %v13442_v40  ;;  %v14070_v2 = vperm.slane %v7260_v45, 0  ;;  %s8306_s17 = sshll.u32 %s10720_s6, 4  ;;  %s8307_s17 = int_to_ptr.vmem [resolvable:$true] %s8306_s17 }
 0x855   :  { %v7032_v17 = vmul.f32 0.5, %v6818_v48  ;;  %7389 = vmatmul.bf16.gmra.mxu2 %v13863_v52  ;;  %v7189_v6 = vmul.f32 %v7157_v61, %v7125_v53  ;;  %v6905_v48 = vadd.f32 %v6904_v22, %v13552_v21 }
 0x857   :  { %10474 = vtanh.f32 %v7032_v17  ;;  %v14050_v10 = vadd.f32 %v7189_v6, %v14920_v58  ;;  %v6909_v17 = vpop.f32.mrf.mxu0 }
 0x858   :  { %v6731_v1 = vpop.f32.mrf.mxu2  ;;  %10476 = vtanh.f32 %v7031_v24  ;;  %v9729_v24 = vor.u32 %v10124_v27, %v9726_v62 }
 0x859   :  { %v6732_v41 = vadd.f32 %v6731_v1, %v13505_v33  ;;  %v14056_v40 = vpack.c.bf16 %v14045_v47, %v14050_v10  ;;  %v6994_v1 = vadd.f32 %v6993_v63, %v6905_v48 }
 0x85a   :  { %7964 = vmatpush.bf16.msra.mxu1 %v9729_v24  ;;  %10150 = vmatpush.bf16.msrb.mxu3 %v9729_v24 }
 0x85b   :  { %v6821_v22 = vadd.f32 %v13919_v49, %v6732_v41  ;;  %v14921_v49 = vld [vmem:[#allocation28_spill] sm:$0xff] }
 0x85d   :  { %v10475_v52 = vpop.eup %10474  ;;  %v7033_v6 = vmul.f32 0.5, %v6821_v22 }
 0x85e   :  { %v10477_v5 = vpop.eup %10476  ;;  %v7096_v18 = vmul.f32 0.5, %v10475_v52 }
 0x85f   :  { %v7095_v53 = vmul.f32 0.5, %v10477_v5  ;;  %v6998_v5 = vpop.f32.mrf.mxu1 }
 0x860   :  { %v6733_v23 = vpop.f32.mrf.mxu2  ;;  %v7128_v58 = vadd.f32 0.5, %v7096_v18  ;;  %v14075_v18 = vpop.f32.mrf.mxu3 }
 0x861   :  { %v6734_v29 = vadd.f32 %v6733_v23, %v13505_v33  ;;  %v6996_v33 = vadd.f32 %v6995_v3, %v6907_v39  ;;  %v7127_v52 = vadd.f32 0.5, %v7095_v53 }
 0x863   :  { %v6823_v31 = vadd.f32 %v13940_v36, %v6734_v29  ;;  %7508 = vmatmul.bf16.gmra.mxu3 %v14056_v40  ;;  %v7160_v41 = vsub.f32 %v6996_v33, %v14921_v49  ;;  %v14922_v36 = vld [vmem:[#allocation26_spill] sm:$0xff] }
 0x864   :  { %v7159_v39 = vsub.f32 %v6994_v1, %v14922_v36 }
 0x865   :  { %v7034_v61 = vmul.f32 0.5, %v6823_v31  ;;  %7394 = vmatmul.bf16.gmra.mxu2 %v13894_v60  ;;  %v7192_v23 = vmul.f32 %v7160_v41, %v7128_v58  ;;  %v6911_v60 = vpop.f32.mrf.mxu0  ;;  %v6910_v31 = vadd.f32 %v6909_v17, %v13552_v21 }
 0x866   :  { %v7191_v63 = vmul.f32 %v7159_v39, %v7127_v52  ;;  %v6912_v22 = vadd.f32 %v6911_v60, %v13552_v21 }
 0x867   :  { %10478 = vtanh.f32 %v7034_v61  ;;  %v14078_v27 = vadd.f32 %v7192_v23, %v14921_v49  ;;  %v6999_v39 = vadd.f32 %v6998_v5, %v6910_v31 }
 0x868   :  { %v7355_v3 = vpop.f32.mrf.mxu2  ;;  %10480 = vtanh.f32 %v7033_v6  ;;  %v14082_v24 = vadd.f32 %v7191_v63, %v14922_v36  ;;  %v7000_v6 = vpop.f32.mrf.mxu1  ;;  %v14091_v36 = vperm.slane %v7260_v45, 1  ;;  %v14923_v63 = vld [vmem:[#allocation35_spill] sm:$0xff] }
 0x869   :  { %v7356_v29 = vadd.f32 %v7355_v3, %v14070_v2  ;;  %v7001_v41 = vadd.f32 %v7000_v6, %v6912_v22  ;;  %v14094_v21 = vpop.f32.mrf.mxu3  ;;  %v14924_v22 = vld [vmem:[#allocation25_spill] sm:$0xff] }
 0x86a   :  { %v14088_v61 = vpack.c.bf16 %v14078_v27, %v14082_v24  ;;  %v7445_v60 = vadd.f32 %v13951_v13, %v14091_v36  ;;  %v7447_v5 = vadd.f32 %v13983_v51, %v14091_v36  ;;  %v14925_v13 = vld [vmem:[#allocation29_spill] sm:$0xff] }
 0x86b   :  { %v7524_v48 = vmul.f32 0.5, %v7356_v29 }
 0x86c   :  { %v7652_v6 = vsub.f32 %v7445_v60, %v13581_v32 }
 0x86d   :  { %10482 = vtanh.f32 %v7524_v48  ;;  %v10479_v62 = vpop.eup %10478  ;;  %v7162_v48 = vsub.f32 %v7001_v41, %v14923_v63  ;;  %v7653_v41 = vsub.f32 %v7447_v5, %v14925_v13 }
 0x86e   :  { %v10481_v53 = vpop.eup %10480  ;;  %v7098_v1 = vmul.f32 0.5, %v10479_v62 }
 0x86f   :  { %v7097_v49 = vmul.f32 0.5, %v10481_v53  ;;  %v7161_v53 = vsub.f32 %v6999_v39, %v14924_v22 }
 0x870   :  { %v7357_v33 = vpop.f32.mrf.mxu2  ;;  %v7130_v23 = vadd.f32 0.5, %v7098_v1 }
 0x871   :  { %v7358_v58 = vadd.f32 %v7357_v33, %v14070_v2  ;;  %v7129_v29 = vadd.f32 0.5, %v7097_v49 }
 0x872   :  { %v7194_v33 = vmul.f32 %v7162_v48, %v7130_v23  ;;  %v14111_v48 = vpop.f32.mrf.mxu3 }
 0x873   :  { %v10483_v52 = vpop.eup %10482  ;;  %v7525_v3 = vmul.f32 0.5, %v7358_v58  ;;  %7513 = vmatmul.bf16.gmra.mxu3 %v14088_v61  ;;  %v7193_v1 = vmul.f32 %v7161_v53, %v7129_v29 }
 0x874   :  { %v7588_v17 = vmul.f32 0.5, %v10483_v52  ;;  %v14105_v49 = vadd.f32 %v7194_v33, %v14923_v63 }
 0x875   :  { %10484 = vtanh.f32 %v7525_v3  ;;  %7399 = vmatmul.bf16.gmra.mxu2 %v13934_v35  ;;  %v14109_v23 = vadd.f32 %v7193_v1, %v14924_v22 }
 0x876   :  { %v7620_v31 = vadd.f32 0.5, %v7588_v17 }
 0x877   :  { %v14116_v60 = vpack.c.bf16 %v14105_v49, %v14109_v23 }
 0x878   :  { %v7360_v62 = vpop.f32.mrf.mxu2  ;;  %v7684_v3 = vmul.f32 %v7652_v6, %v7620_v31 }
 0x879   :  { %v7361_v45 = vadd.f32 %v7360_v62, %v14070_v2 }
 0x87a   :  { %v14119_v63 = vadd.f32 %v7684_v3, %v13581_v32  ;;  %v7450_v32 = vadd.f32 %v14000_v19, %v14091_v36  ;;  %v14133_v1 = vpop.f32.mrf.mxu3 }
 0x87b   :  { %v10485_v35 = vpop.eup %10484  ;;  %v7526_v58 = vmul.f32 0.5, %v7361_v45 }
 0x87c   :  { %v7589_v52 = vmul.f32 0.5, %v10485_v35  ;;  %v7452_v35 = vadd.f32 %v14008_v56, %v14091_v36 }
 0x87d   :  { %10486 = vtanh.f32 %v7526_v58 }
 0x87e   :  { %v7621_v39 = vadd.f32 0.5, %v7589_v52 }
 0x880   :  { %v7685_v51 = vmul.f32 %v7653_v41, %v7621_v39  ;;  %v7362_v17 = vpop.f32.mrf.mxu2  ;;  %v7655_v41 = vsub.f32 %v7452_v35, %v13624_v4 }
 0x881   :  { %v7363_v29 = vadd.f32 %v7362_v17, %v14070_v2 }
 0x882   :  { %v14122_v62 = vadd.f32 %v7685_v51, %v14925_v13  ;;  %v7654_v13 = vsub.f32 %v7450_v32, %v13631_v42 }
 0x883   :  { %v10487_v53 = vpop.eup %10486  ;;  %v7527_v33 = vmul.f32 0.5, %v7363_v29  ;;  %7518 = vmatmul.bf16.gmra.mxu3 %v14116_v60 }
 0x884   :  { %v7748_v22 = vpack.c.bf16 %v14122_v62, %v14119_v63  ;;  %v7590_v45 = vmul.f32 0.5, %v10487_v53 }
 0x885   :  { %10488 = vtanh.f32 %v7527_v33  ;;  %7404 = vmatmul.bf16.gmra.mxu2 %v13962_v38 }
 0x886   :  { %7876 = vmatmul.bf16.vlgmr.msra.gmra.mxu0 %v7748_v22  ;;  %7965 = vmatmul.bf16.vlgmr.msra.gmra.mxu1 %v7748_v22  ;;  %v7622_v58 = vadd.f32 0.5, %v7590_v45  ;;  %v14144_v22 = vpop.f32.mrf.mxu3 }
 0x888   :  { %v7365_v5 = vpop.f32.mrf.mxu2  ;;  %v7686_v3 = vmul.f32 %v7654_v13, %v7622_v58 }
 0x889   :  { %v7366_v31 = vadd.f32 %v7365_v5, %v14070_v2 }
 0x88a   :  { %v14139_v29 = vadd.f32 %v7686_v3, %v13631_v42  ;;  %v7455_v42 = vadd.f32 %v14040_v55, %v14091_v36 }
 0x88b   :  { %v10489_v6 = vpop.eup %10488  ;;  %v7528_v52 = vmul.f32 0.5, %v7366_v31  ;;  %v7457_v31 = vadd.f32 %v14064_v0, %v14091_v36 }
 0x88c   :  { %v7591_v38 = vmul.f32 0.5, %v10489_v6 }
 0x88d   :  { %10490 = vtanh.f32 %v7528_v52  ;;  %v14926_v52 = vld [vmem:[#allocation36_spill] sm:$0xff] }
 0x88e   :  { %v7623_v39 = vadd.f32 0.5, %v7591_v38  ;;  %v7656_v13 = vsub.f32 %v7455_v42, %v14926_v52  ;;  %v14156_v3 = vpop.f32.mrf.mxu3 }
 0x890   :  { %v7687_v19 = vmul.f32 %v7655_v41, %v7623_v39  ;;  %v7367_v51 = vpop.f32.mrf.mxu2 }
 0x891   :  { %v7368_v17 = vadd.f32 %v7367_v51, %v14070_v2 }
 0x892   :  { %v14142_v56 = vadd.f32 %v7687_v19, %v13624_v4 }
 0x893   :  { %v10491_v53 = vpop.eup %10490  ;;  %v7529_v33 = vmul.f32 0.5, %v7368_v17 }
 0x894   :  { %v7749_v45 = vpack.c.bf16 %v14142_v56, %v14139_v29  ;;  %v7592_v32 = vmul.f32 0.5, %v10491_v53 }
 0x895   :  { %10492 = vtanh.f32 %v7529_v33  ;;  %7409 = vmatmul.bf16.gmra.mxu2 %v13997_v34  ;;  %v14927_v34 = vld [vmem:[#allocation27_spill] sm:$0xff] }
 0x896   :  { %7881 = vmatmul.bf16.gmra.mxu0 %v7749_v45  ;;  %7970 = vmatmul.bf16.gmra.mxu1 %v7749_v45  ;;  %v7624_v35 = vadd.f32 0.5, %v7592_v32  ;;  %v7657_v41 = vsub.f32 %v7457_v31, %v14927_v34 }
 0x898   :  { %v7370_v5 = vpop.f32.mrf.mxu2  ;;  %v7688_v39 = vmul.f32 %v7656_v13, %v7624_v35 }
 0x899   :  { %v7371_v4 = vadd.f32 %v7370_v5, %v14070_v2  ;;  %v7460_v5 = vadd.f32 %v14075_v18, %v14091_v36 }
 0x89a   :  { %v14160_v53 = vadd.f32 %v7688_v39, %v14926_v52 }
 0x89b   :  { %v10493_v58 = vpop.eup %10492  ;;  %v7530_v6 = vmul.f32 0.5, %v7371_v4  ;;  %v14170_v4 = vpop.f32.mrf.mxu3 }
 0x89c   :  { %v7593_v38 = vmul.f32 0.5, %v10493_v58  ;;  %v7462_v58 = vadd.f32 %v14094_v21, %v14091_v36 }
 0x89d   :  { %10494 = vtanh.f32 %v7530_v6 }
 0x89e   :  { %v7625_v19 = vadd.f32 0.5, %v7593_v38  ;;  %v7658_v38 = vsub.f32 %v7460_v5, %v13710_v50  ;;  %v7465_v5 = vadd.f32 %v14111_v48, %v14091_v36 }
 0x8a0   :  { %v7689_v55 = vmul.f32 %v7657_v41, %v7625_v19  ;;  %v7372_v51 = vpop.f32.mrf.mxu2 }
 0x8a1   :  { %v7373_v17 = vadd.f32 %v7372_v51, %v14070_v2 }
 0x8a2   :  { %v14163_v0 = vadd.f32 %v7689_v55, %v14927_v34  ;;  %v7659_v34 = vsub.f32 %v7462_v58, %v13703_v16 }
 0x8a3   :  { %v10495_v33 = vpop.eup %10494  ;;  %v7531_v45 = vmul.f32 0.5, %v7373_v17  ;;  %v14178_v51 = vpop.f32.mrf.mxu3 }
 0x8a4   :  { %v7750_v32 = vpack.c.bf16 %v14163_v0, %v14160_v53  ;;  %v7594_v42 = vmul.f32 0.5, %v10495_v33 }
 0x8a5   :  { %10496 = vtanh.f32 %v7531_v45  ;;  %7414 = vmatmul.bf16.gmra.mxu2 %v14022_v14 }
 0x8a6   :  { %7886 = vmatmul.bf16.gmra.mxu0 %v7750_v32  ;;  %7975 = vmatmul.bf16.gmra.mxu1 %v7750_v32  ;;  %v7626_v6 = vadd.f32 0.5, %v7594_v42 }
 0x8a8   :  { %v7375_v31 = vpop.f32.mrf.mxu2  ;;  %v7690_v41 = vmul.f32 %v7658_v38, %v7626_v6 }
 0x8a9   :  { %v7376_v35 = vadd.f32 %v7375_v31, %v14070_v2 }
 0x8aa   :  { %v14181_v17 = vadd.f32 %v7690_v41, %v13710_v50 }
 0x8ab   :  { %v10497_v52 = vpop.eup %10496  ;;  %v7532_v13 = vmul.f32 0.5, %v7376_v35 }
 0x8ac   :  { %v7595_v14 = vmul.f32 0.5, %v10497_v52  ;;  %v7660_v52 = vsub.f32 %v7465_v5, %v13740_v15 }
 0x8ad   :  { %10498 = vtanh.f32 %v7532_v13  ;;  %v14195_v13 = vpop.f32.mrf.mxu3 }
 0x8ae   :  { %v7627_v39 = vadd.f32 0.5, %v7595_v14 }
 0x8b0   :  { %v7691_v18 = vmul.f32 %v7659_v34, %v7627_v39  ;;  %v7377_v19 = vpop.f32.mrf.mxu2 }
 0x8b1   :  { %v7378_v55 = vadd.f32 %v7377_v19, %v14070_v2 }
 0x8b2   :  { %v14184_v21 = vadd.f32 %v7691_v18, %v13703_v16  ;;  %v7467_v16 = vadd.f32 %v14133_v1, %v14091_v36 }
 0x8b3   :  { %v10499_v33 = vpop.eup %10498  ;;  %v7533_v45 = vmul.f32 0.5, %v7378_v55 }
 0x8b4   :  { %v7751_v32 = vpack.c.bf16 %v14184_v21, %v14181_v17  ;;  %v7596_v42 = vmul.f32 0.5, %v10499_v33  ;;  %v7661_v38 = vsub.f32 %v7467_v16, %v13735_v12 }
 0x8b5   :  { %10500 = vtanh.f32 %v7533_v45  ;;  %7419 = vmatmul.bf16.gmra.mxu2 %v14056_v40  ;;  %v7481_v45 = vpop.f32.mrf.mxu3 }
 0x8b6   :  { %7891 = vmatmul.bf16.gmra.mxu0 %v7751_v32  ;;  %7980 = vmatmul.bf16.gmra.mxu1 %v7751_v32  ;;  %v7628_v35 = vadd.f32 0.5, %v7596_v42  ;;  %v7470_v42 = vadd.f32 %v14144_v22, %v14091_v36 }
 0x8b8   :  { %v7380_v31 = vpop.f32.mrf.mxu2  ;;  %v7692_v14 = vmul.f32 %v7660_v52, %v7628_v35  ;;  %v7662_v35 = vsub.f32 %v7470_v42, %v13784_v20 }
 0x8b9   :  { %v7381_v50 = vadd.f32 %v7380_v31, %v14070_v2 }
 0x8ba   :  { %v14200_v18 = vadd.f32 %v7692_v14, %v13740_v15 }
 0x8bb   :  { %v10501_v58 = vpop.eup %10500  ;;  %v7534_v6 = vmul.f32 0.5, %v7381_v50 }
 0x8bc   :  { %v7597_v40 = vmul.f32 0.5, %v10501_v58 }
 0x8bd   :  { %10502 = vtanh.f32 %v7534_v6 }
 0x8be   :  { %v7629_v34 = vadd.f32 0.5, %v7597_v40  ;;  %v14215_v40 = vpop.f32.mrf.mxu3 }
 0x8c0   :  { %v7693_v48 = vmul.f32 %v7661_v38, %v7629_v34  ;;  %v7382_v41 = vpop.f32.mrf.mxu2 }
 0x8c1   :  { %v7383_v39 = vadd.f32 %v7382_v41, %v14070_v2 }
 0x8c2   :  { %v14203_v1 = vadd.f32 %v7693_v48, %v13735_v12  ;;  %v7472_v12 = vadd.f32 %v14156_v3, %v14091_v36 }
 0x8c3   :  { %v10503_v19 = vpop.eup %10502  ;;  %v7535_v55 = vmul.f32 0.5, %v7383_v39 }
 0x8c4   :  { %v7752_v33 = vpack.c.bf16 %v14203_v1, %v14200_v18  ;;  %v7598_v32 = vmul.f32 0.5, %v10503_v19 }
 0x8c5   :  { %10504 = vtanh.f32 %v7535_v55  ;;  %7424 = vmatmul.bf16.gmra.mxu2 %v14088_v61  ;;  %v7663_v61 = vsub.f32 %v7472_v12, %v13777_v7  ;;  %v7475_v55 = vadd.f32 %v14170_v4, %v14091_v36 }
 0x8c6   :  { %7896 = vmatmul.bf16.gmra.mxu0 %v7752_v33  ;;  %7985 = vmatmul.bf16.gmra.mxu1 %v7752_v33  ;;  %v7630_v31 = vadd.f32 0.5, %v7598_v32  ;;  %v7486_v32 = vpop.f32.mrf.mxu3 }
 0x8c7   :  { %v7664_v12 = vsub.f32 %v7475_v55, %v13813_v43 }
 0x8c8   :  { %v7385_v15 = vpop.f32.mrf.mxu2  ;;  %v7694_v6 = vmul.f32 %v7662_v35, %v7630_v31 }
 0x8c9   :  { %v7386_v5 = vadd.f32 %v7385_v15, %v14070_v2 }
 0x8ca   :  { %v14219_v34 = vadd.f32 %v7694_v6, %v13784_v20 }
 0x8cb   :  { %v10505_v50 = vpop.eup %10504  ;;  %v7536_v16 = vmul.f32 0.5, %v7386_v5 }
 0x8cc   :  { %v7599_v58 = vmul.f32 0.5, %v10505_v50 }
 0x8cd   :  { %10506 = vtanh.f32 %v7536_v16 }
 0x8ce   :  { %v7631_v52 = vadd.f32 0.5, %v7599_v58 }
 0x8d0   :  { %v7695_v22 = vmul.f32 %v7663_v61, %v7631_v52  ;;  %v7387_v38 = vpop.f32.mrf.mxu2 }
 0x8d1   :  { %v7388_v14 = vadd.f32 %v7387_v38, %v14070_v2 }
 0x8d2   :  { %v14222_v3 = vadd.f32 %v7695_v22, %v13777_v7  ;;  %v7477_v7 = vadd.f32 %v14178_v51, %v14091_v36  ;;  %v14241_v22 = vpop.f32.mrf.mxu3 }
 0x8d3   :  { %v10507_v48 = vpop.eup %10506  ;;  %v7537_v41 = vmul.f32 0.5, %v7388_v14 }
 0x8d4   :  { %v7753_v39 = vpack.c.bf16 %v14222_v3, %v14219_v34  ;;  %v7600_v19 = vmul.f32 0.5, %v10507_v48  ;;  %v7480_v48 = vadd.f32 %v14195_v13, %v14091_v36 }
 0x8d5   :  { %10508 = vtanh.f32 %v7537_v41  ;;  %7429 = vmatmul.bf16.gmra.mxu2 %v14116_v60  ;;  %v7665_v60 = vsub.f32 %v7477_v7, %v13808_v9 }
 0x8d6   :  { %7901 = vmatmul.bf16.gmra.mxu0 %v7753_v39  ;;  %7990 = vmatmul.bf16.gmra.mxu1 %v7753_v39  ;;  %v7632_v42 = vadd.f32 0.5, %v7600_v19 }
 0x8d8   :  { %v7390_v33 = vpop.f32.mrf.mxu2  ;;  %v7696_v50 = vmul.f32 %v7664_v12, %v7632_v42 }
 0x8d9   :  { %v7391_v20 = vadd.f32 %v7390_v33, %v14070_v2  ;;  %v7666_v33 = vsub.f32 %v7480_v48, %v13856_v26 }
 0x8da   :  { %v14236_v61 = vadd.f32 %v7696_v50, %v13813_v43  ;;  %v7491_v42 = vpop.f32.mrf.mxu3 }
 0x8db   :  { %v10509_v15 = vpop.eup %10508  ;;  %v7538_v5 = vmul.f32 0.5, %v7391_v20 }
 0x8dc   :  { %v7601_v31 = vmul.f32 0.5, %v10509_v15 }
 0x8dd   :  { %10510 = vtanh.f32 %v7538_v5 }
 0x8de   :  { %v7633_v16 = vadd.f32 0.5, %v7601_v31 }
 0x8e0   :  { %v7697_v35 = vmul.f32 %v7665_v60, %v7633_v16  ;;  %v7392_v4 = vpop.f32.mrf.mxu2 }
 0x8e1   :  { %v7393_v58 = vadd.f32 %v7392_v4, %v14070_v2 }
 0x8e2   :  { %v14239_v51 = vadd.f32 %v7697_v35, %v13808_v9  ;;  %v7482_v9 = vadd.f32 %v7481_v45, %v14091_v36 }
 0x8e3   :  { %v10511_v6 = vpop.eup %10510  ;;  %v7539_v52 = vmul.f32 0.5, %v7393_v58  ;;  %v7485_v58 = vadd.f32 %v14215_v40, %v14091_v36 }
 0x8e4   :  { %v7754_v38 = vpack.c.bf16 %v14239_v51, %v14236_v61  ;;  %v7602_v14 = vmul.f32 0.5, %v10511_v6  ;;  %v7667_v7 = vsub.f32 %v7482_v9, %v13851_v46  ;;  %v14262_v6 = vpop.f32.mrf.mxu3  ;;  %v7782_v9 = vld [vmem:[#allocation8 + $0xc] sm:$0x3] }
 0x8e5   :  { %10512 = vtanh.f32 %v7539_v52 }
 0x8e6   :  { %7906 = vmatmul.bf16.gmra.mxu0 %v7754_v38  ;;  %7995 = vmatmul.bf16.gmra.mxu1 %v7754_v38  ;;  %v7634_v39 = vadd.f32 0.5, %v7602_v14 }
 0x8e8   :  { %v7395_v41 = vpop.f32.mrf.mxu2  ;;  %v7698_v15 = vmul.f32 %v7666_v33, %v7634_v39 }
 0x8e9   :  { %v7396_v43 = vadd.f32 %v7395_v41, %v14070_v2  ;;  %v7668_v41 = vsub.f32 %v7485_v58, %v13885_v11 }
 0x8ea   :  { %v14253_v60 = vadd.f32 %v7698_v15, %v13856_v26 }
 0x8eb   :  { %v10513_v19 = vpop.eup %10512  ;;  %v7540_v55 = vmul.f32 0.5, %v7396_v43 }
 0x8ec   :  { %v7603_v20 = vmul.f32 0.5, %v10513_v19  ;;  %v14271_v15 = vpop.f32.mrf.mxu3 }
 0x8ed   :  { %10514 = vtanh.f32 %v7540_v55 }
 0x8ee   :  { %v7635_v5 = vadd.f32 0.5, %v7603_v20  ;;  %v14268_v20 = vperm.slane %v7782_v9, 0 }
 0x8f0   :  { %v7699_v12 = vmul.f32 %v7667_v7, %v7635_v5  ;;  %v7397_v31 = vpop.f32.mrf.mxu2 }
 0x8f1   :  { %v7398_v13 = vadd.f32 %v7397_v31, %v14070_v2 }
 0x8f2   :  { %v14256_v45 = vadd.f32 %v7699_v12, %v13851_v46  ;;  %v7487_v46 = vadd.f32 %v7486_v32, %v14091_v36 }
 0x8f3   :  { %v10515_v50 = vpop.eup %10514  ;;  %v7541_v16 = vmul.f32 0.5, %v7398_v13 }
 0x8f4   :  { %v7755_v35 = vpack.c.bf16 %v14256_v45, %v14253_v60  ;;  %v7604_v4 = vmul.f32 0.5, %v10515_v50  ;;  %v7669_v39 = vsub.f32 %v7487_v46, %v13880_v25  ;;  %v7492_v46 = vadd.f32 %v7491_v42, %v14091_v36 }
 0x8f5   :  { %10516 = vtanh.f32 %v7541_v16 }
 0x8f6   :  { %7911 = vmatmul.bf16.gmra.mxu0 %v7755_v35  ;;  %8000 = vmatmul.bf16.gmra.mxu1 %v7755_v35  ;;  %v7636_v38 = vadd.f32 0.5, %v7604_v4 }
 0x8f8   :  { %v7400_v52 = vpop.f32.mrf.mxu2  ;;  %v7700_v19 = vmul.f32 %v7668_v41, %v7636_v38 }
 0x8f9   :  { %v7401_v26 = vadd.f32 %v7400_v52, %v14070_v2  ;;  %v14284_v52 = vperm.slane %v7782_v9, 1 }
 0x8fa   :  { %v14274_v32 = vadd.f32 %v7700_v19, %v13885_v11  ;;  %v7490_v11 = vadd.f32 %v14241_v22, %v14091_v36  ;;  %v14289_v19 = vpop.f32.mrf.mxu3 }
 0x8fb   :  { %v10517_v14 = vpop.eup %10516  ;;  %v7542_v48 = vmul.f32 0.5, %v7401_v26 }
 0x8fc   :  { %v7605_v43 = vmul.f32 0.5, %v10517_v14 }
 0x8fd   :  { %10518 = vtanh.f32 %v7542_v48 }
 0x8fe   :  { %v7637_v55 = vadd.f32 0.5, %v7605_v43 }
 0x900   :  { %v7701_v40 = vmul.f32 %v7669_v39, %v7637_v55  ;;  %v7402_v33 = vpop.f32.mrf.mxu2  ;;  %v7670_v39 = vsub.f32 %v7490_v11, %v13927_v57 }
 0x901   :  { %v7403_v7 = vadd.f32 %v7402_v33, %v14070_v2  ;;  %v7671_v33 = vsub.f32 %v7492_v46, %v13922_v28 }
 0x902   :  { %v14277_v5 = vadd.f32 %v7701_v40, %v13880_v25 }
 0x903   :  { %v10519_v12 = vpop.eup %10518  ;;  %v7543_v31 = vmul.f32 0.5, %v7403_v7  ;;  %v7877_v13 = vpop.f32.mrf.mxu0 }
 0x904   :  { %v7966_v50 = vpop.f32.mrf.mxu1  ;;  %v7878_v16 = vadd.f32 %v7877_v13, %v14268_v20  ;;  %v7756_v35 = vpack.c.bf16 %v14277_v5, %v14274_v32  ;;  %v7606_v4 = vmul.f32 0.5, %v10519_v12 }
 0x905   :  { %10520 = vtanh.f32 %v7543_v31  ;;  %v7967_v40 = vadd.f32 %v7966_v50, %v14284_v52 }
 0x906   :  { %v8046_v58 = vmul.f32 0.5, %v7878_v16  ;;  %7916 = vmatmul.bf16.gmra.mxu0 %v7756_v35  ;;  %8005 = vmatmul.bf16.gmra.mxu1 %v7756_v35  ;;  %v7638_v38 = vadd.f32 0.5, %v7606_v4 }
 0x907   :  { %v8174_v4 = vsub.f32 %v7967_v40, %v14119_v63 }
 0x908   :  { %10522 = vtanh.f32 %v8046_v58  ;;  %v7405_v25 = vpop.f32.mrf.mxu2  ;;  %v7702_v7 = vmul.f32 %v7670_v39, %v7638_v38 }
 0x909   :  { %v7406_v26 = vadd.f32 %v7405_v25, %v14070_v2 }
 0x90a   :  { %v14297_v11 = vadd.f32 %v7702_v7, %v13927_v57 }
 0x90b   :  { %v10521_v14 = vpop.eup %10520  ;;  %v7544_v48 = vmul.f32 0.5, %v7406_v26  ;;  %v7879_v41 = vpop.f32.mrf.mxu0 }
 0x90c   :  { %v7968_v43 = vpop.f32.mrf.mxu1  ;;  %v7607_v55 = vmul.f32 0.5, %v10521_v14  ;;  %v7880_v22 = vadd.f32 %v7879_v41, %v14268_v20 }
 0x90d   :  { %10524 = vtanh.f32 %v7544_v48 }
 0x90e   :  { %v10523_v9 = vpop.eup %10522  ;;  %v7639_v42 = vadd.f32 0.5, %v7607_v55  ;;  %v8047_v12 = vmul.f32 0.5, %v7880_v22  ;;  %v7969_v55 = vadd.f32 %v7968_v43, %v14284_v52  ;;  %v14307_v22 = vpop.f32.mrf.mxu3 }
 0x90f   :  { %v8110_v31 = vmul.f32 0.5, %v10523_v9 }
 0x910   :  { %v7703_v13 = vmul.f32 %v7671_v33, %v7639_v42  ;;  %10526 = vtanh.f32 %v8047_v12  ;;  %v7407_v16 = vpop.f32.mrf.mxu2  ;;  %v7495_v33 = vadd.f32 %v14262_v6, %v14091_v36  ;;  %v7497_v12 = vadd.f32 %v14271_v15, %v14091_v36 }
 0x911   :  { %v8142_v35 = vadd.f32 0.5, %v8110_v31  ;;  %v7408_v58 = vadd.f32 %v7407_v16, %v14070_v2 }
 0x912   :  { %v14300_v50 = vadd.f32 %v7703_v13, %v13922_v28 }
 0x913   :  { %v10525_v25 = vpop.eup %10524  ;;  %v8206_v26 = vmul.f32 %v8174_v4, %v8142_v35  ;;  %v7545_v46 = vmul.f32 0.5, %v7408_v58  ;;  %v7882_v38 = vpop.f32.mrf.mxu0 }
 0x914   :  { %v7971_v14 = vpop.f32.mrf.mxu1  ;;  %v7883_v48 = vadd.f32 %v7882_v38, %v14268_v20  ;;  %v7757_v41 = vpack.c.bf16 %v14300_v50, %v14297_v11  ;;  %v7608_v28 = vmul.f32 0.5, %v10525_v25  ;;  %v7672_v25 = vsub.f32 %v7495_v33, %v13955_v8 }
 0x915   :  { %v8238_v39 = vadd.f32 %v8206_v26, %v14119_v63  ;;  %10528 = vtanh.f32 %v7545_v46  ;;  %v8175_v63 = vsub.f32 %v7969_v55, %v14122_v62  ;;  %v7972_v38 = vadd.f32 %v7971_v14, %v14284_v52 }
 0x916   :  { %v10527_v57 = vpop.eup %10526  ;;  %v8048_v40 = vmul.f32 0.5, %v7883_v48  ;;  %7921 = vmatmul.bf16.gmra.mxu0 %v7757_v41  ;;  %8010 = vmatmul.bf16.gmra.mxu1 %v7757_v41  ;;  %v7640_v31 = vadd.f32 0.5, %v7608_v28  ;;  %v7673_v41 = vsub.f32 %v7497_v12, %v13948_v37  ;;  %v14320_v28 = vpop.f32.mrf.mxu3 }
 0x917   :  { %8270 = vst [vmem:[#allocation9] sm:$0xff] %v8238_v39  ;;  %v8111_v9 = vmul.f32 0.5, %v10527_v57 }
 0x918   :  { %10530 = vtanh.f32 %v8048_v40  ;;  %v7410_v7 = vpop.f32.mrf.mxu2  ;;  %v7704_v15 = vmul.f32 %v7672_v25, %v7640_v31 }
 0x919   :  { %v8143_v42 = vadd.f32 0.5, %v8111_v9  ;;  %v7411_v43 = vadd.f32 %v7410_v7, %v14070_v2  ;;  %v8176_v7 = vsub.f32 %v7972_v38, %v14139_v29 }
 0x91a   :  { %v14325_v14 = vadd.f32 %v7704_v15, %v13955_v8 }
 0x91b   :  { %v10529_v13 = vpop.eup %10528  ;;  %v8207_v16 = vmul.f32 %v8175_v63, %v8143_v42  ;;  %v7546_v35 = vmul.f32 0.5, %v7411_v43  ;;  %v7884_v4 = vpop.f32.mrf.mxu0 }
 0x91c   :  { %v7973_v58 = vpop.f32.mrf.mxu1  ;;  %v7609_v26 = vmul.f32 0.5, %v10529_v13  ;;  %v7885_v6 = vadd.f32 %v7884_v4, %v14268_v20 }
 0x91d   :  { %v8239_v46 = vadd.f32 %v8207_v16, %v14122_v62  ;;  %10532 = vtanh.f32 %v7546_v35  ;;  %v7974_v25 = vadd.f32 %v7973_v58, %v14284_v52  ;;  %v7502_v58 = vadd.f32 %v14307_v22, %v14091_v36 }
 0x91e   :  { %v10531_v48 = vpop.eup %10530  ;;  %v7641_v39 = vadd.f32 0.5, %v7609_v26  ;;  %v8049_v55 = vmul.f32 0.5, %v7885_v6  ;;  %v7506_v15 = vpop.f32.mrf.mxu3 }
 0x91f   :  { %8271 = vst [vmem:[#allocation9 + $0x8] sm:$0xff] %v8239_v46  ;;  %v8112_v57 = vmul.f32 0.5, %v10531_v48  ;;  %v7500_v46 = vadd.f32 %v14289_v19, %v14091_v36  ;;  %v7675_v22 = vsub.f32 %v7502_v58, %v13986_v30 }
 0x920   :  { %v7705_v40 = vmul.f32 %v7673_v41, %v7641_v39  ;;  %10534 = vtanh.f32 %v8049_v55  ;;  %v7412_v9 = vpop.f32.mrf.mxu2  ;;  %v8177_v41 = vsub.f32 %v7974_v25, %v14142_v56 }
 0x921   :  { %v8144_v33 = vadd.f32 0.5, %v8112_v57  ;;  %v7413_v62 = vadd.f32 %v7412_v9, %v14070_v2 }
 0x922   :  { %v14328_v42 = vadd.f32 %v7705_v40, %v13948_v37 }
 0x923   :  { %v10533_v63 = vpop.eup %10532  ;;  %v8208_v43 = vmul.f32 %v8176_v7, %v8144_v33  ;;  %v7547_v12 = vmul.f32 0.5, %v7413_v62  ;;  %v7887_v31 = vpop.f32.mrf.mxu0  ;;  %v7674_v7 = vsub.f32 %v7500_v46, %v13991_v54 }
 0x924   :  { %v7976_v13 = vpop.f32.mrf.mxu1  ;;  %v7888_v16 = vadd.f32 %v7887_v31, %v14268_v20  ;;  %v7758_v35 = vpack.c.bf16 %v14328_v42, %v14325_v14  ;;  %v7610_v26 = vmul.f32 0.5, %v10533_v63 }
 0x925   :  { %v8240_v4 = vadd.f32 %v8208_v43, %v14139_v29  ;;  %10536 = vtanh.f32 %v7547_v12  ;;  %v7977_v43 = vadd.f32 %v7976_v13, %v14284_v52 }
 0x926   :  { %v10535_v8 = vpop.eup %10534  ;;  %v8050_v6 = vmul.f32 0.5, %v7888_v16  ;;  %7926 = vmatmul.bf16.gmra.mxu0 %v7758_v35  ;;  %8015 = vmatmul.bf16.gmra.mxu1 %v7758_v35  ;;  %v7642_v39 = vadd.f32 0.5, %v7610_v26  ;;  %v14354_v58 = vpop.f32.mrf.mxu3 }
 0x927   :  { %8272 = vst [vmem:[#allocation9 + $0x10] sm:$0xff] %v8240_v4  ;;  %v8113_v37 = vmul.f32 0.5, %v10535_v8 }
 0x928   :  { %10538 = vtanh.f32 %v8050_v6  ;;  %v7415_v38 = vpop.f32.mrf.mxu2  ;;  %v7706_v31 = vmul.f32 %v7674_v7, %v7642_v39  ;;  %v8178_v6 = vsub.f32 %v7977_v43, %v14160_v53 }
 0x929   :  { %v8145_v48 = vadd.f32 0.5, %v8113_v37  ;;  %v7416_v29 = vadd.f32 %v7415_v38, %v14070_v2 }
 0x92b   :  { %v10537_v55 = vpop.eup %10536  ;;  %v8209_v57 = vmul.f32 %v8177_v41, %v8145_v48  ;;  %v7548_v40 = vmul.f32 0.5, %v7416_v29  ;;  %v7889_v9 = vpop.f32.mrf.mxu0 }
 0x92c   :  { %v7978_v33 = vpop.f32.mrf.mxu1  ;;  %v7611_v19 = vmul.f32 0.5, %v10537_v55  ;;  %v7890_v62 = vadd.f32 %v7889_v9, %v14268_v20 }
 0x92d   :  { %v8241_v63 = vadd.f32 %v8209_v57, %v14142_v56  ;;  %10540 = vtanh.f32 %v7548_v40  ;;  %v14349_v56 = vadd.f32 %v7706_v31, %v13991_v54  ;;  %v7979_v54 = vadd.f32 %v7978_v33, %v14284_v52 }
 0x92e   :  { %v10539_v12 = vpop.eup %10538  ;;  %v7643_v16 = vadd.f32 0.5, %v7611_v19  ;;  %v8051_v35 = vmul.f32 0.5, %v7890_v62  ;;  %v7505_v19 = vadd.f32 %v14320_v28, %v14091_v36  ;;  %v7507_v33 = vadd.f32 %v7506_v15, %v14091_v36  ;;  %v7511_v15 = vpop.f32.mrf.mxu3 }
 0x92f   :  { %8273 = vst [vmem:[#allocation9 + $0x18] sm:$0xff] %v8241_v63  ;;  %v8114_v4 = vmul.f32 0.5, %v10539_v12  ;;  %v8179_v43 = vsub.f32 %v7979_v54, %v14163_v0 }
 0x930   :  { %v7707_v25 = vmul.f32 %v7675_v22, %v7643_v16  ;;  %10542 = vtanh.f32 %v8051_v35  ;;  %v7417_v8 = vpop.f32.mrf.mxu2 }
 0x931   :  { %v8146_v26 = vadd.f32 0.5, %v8114_v4  ;;  %v7418_v37 = vadd.f32 %v7417_v8, %v14070_v2 }
 0x932   :  { %v14352_v13 = vadd.f32 %v7707_v25, %v13986_v30  ;;  %v7676_v25 = vsub.f32 %v7505_v19, %v14016_v59 }
 0x933   :  { %v10541_v46 = vpop.eup %10540  ;;  %v8210_v38 = vmul.f32 %v8178_v6, %v8146_v26  ;;  %v7549_v48 = vmul.f32 0.5, %v7418_v37  ;;  %v7892_v41 = vpop.f32.mrf.mxu0 }
 0x934   :  { %v7981_v29 = vpop.f32.mrf.mxu1  ;;  %v7893_v39 = vadd.f32 %v7892_v41, %v14268_v20  ;;  %v7759_v55 = vpack.c.bf16 %v14352_v13, %v14349_v56  ;;  %v7612_v30 = vmul.f32 0.5, %v10541_v46  ;;  %v7677_v46 = vsub.f32 %v7507_v33, %v14011_v44 }
 0x935   :  { %v8242_v57 = vadd.f32 %v8210_v38, %v14160_v53  ;;  %10544 = vtanh.f32 %v7549_v48  ;;  %v7982_v6 = vadd.f32 %v7981_v29, %v14284_v52 }
 0x936   :  { %v10543_v40 = vpop.eup %10542  ;;  %v8052_v9 = vmul.f32 0.5, %v7893_v39  ;;  %7931 = vmatmul.bf16.gmra.mxu0 %v7759_v55  ;;  %8020 = vmatmul.bf16.gmra.mxu1 %v7759_v55  ;;  %v7644_v12 = vadd.f32 0.5, %v7612_v30 }
 0x937   :  { %8274 = vst [vmem:[#allocation9 + $0x20] sm:$0xff] %v8242_v57  ;;  %v8115_v7 = vmul.f32 0.5, %v10543_v40  ;;  %v8180_v40 = vsub.f32 %v7982_v6, %v14181_v17 }
 0x938   :  { %10546 = vtanh.f32 %v8052_v9  ;;  %v7420_v62 = vpop.f32.mrf.mxu2  ;;  %v7708_v38 = vmul.f32 %v7676_v25, %v7644_v12 }
 0x939   :  { %v8147_v63 = vadd.f32 0.5, %v8115_v7  ;;  %v7421_v53 = vadd.f32 %v7420_v62, %v14070_v2 }
 0x93a   :  { %v14374_v29 = vadd.f32 %v7708_v38, %v14016_v59 }
 0x93b   :  { %v10545_v22 = vpop.eup %10544  ;;  %v8211_v31 = vmul.f32 %v8179_v43, %v8147_v63  ;;  %v7550_v16 = vmul.f32 0.5, %v7421_v53  ;;  %v7894_v35 = vpop.f32.mrf.mxu0 }
 0x93c   :  { %v7983_v4 = vpop.f32.mrf.mxu1  ;;  %v7613_v8 = vmul.f32 0.5, %v10545_v22  ;;  %v7895_v28 = vadd.f32 %v7894_v35, %v14268_v20  ;;  %v7514_v35 = vpop.f32.mrf.mxu3 }
 0x93d   :  { %v8243_v26 = vadd.f32 %v8211_v31, %v14163_v0  ;;  %10548 = vtanh.f32 %v7550_v16  ;;  %v7984_v12 = vadd.f32 %v7983_v4, %v14284_v52  ;;  %v7510_v16 = vadd.f32 %v14354_v58, %v14091_v36 }
 0x93e   :  { %v10547_v37 = vpop.eup %10546  ;;  %v7645_v48 = vadd.f32 0.5, %v7613_v8  ;;  %v8053_v41 = vmul.f32 0.5, %v7895_v28  ;;  %v7512_v4 = vadd.f32 %v7511_v15, %v14091_v36 }
 0x93f   :  { %8275 = vst [vmem:[#allocation9 + $0x28] sm:$0xff] %v8243_v26  ;;  %v8116_v39 = vmul.f32 0.5, %v10547_v37  ;;  %v8181_v28 = vsub.f32 %v7984_v12, %v14184_v21 }
 0x940   :  { %v7709_v55 = vmul.f32 %v7677_v46, %v7645_v48  ;;  %10550 = vtanh.f32 %v8053_v41  ;;  %v7422_v57 = vpop.f32.mrf.mxu2  ;;  %v7678_v41 = vsub.f32 %v7510_v16, %v14050_v10 }
 0x941   :  { %v8148_v54 = vadd.f32 0.5, %v8116_v39  ;;  %v7423_v0 = vadd.f32 %v7422_v57, %v14070_v2 }
 0x942   :  { %v14377_v30 = vadd.f32 %v7709_v55, %v14011_v44 }
 0x943   :  { %v10549_v9 = vpop.eup %10548  ;;  %v8212_v7 = vmul.f32 %v8180_v40, %v8148_v54  ;;  %v7551_v19 = vmul.f32 0.5, %v7423_v0  ;;  %v7897_v62 = vpop.f32.mrf.mxu0  ;;  %v7679_v40 = vsub.f32 %v7512_v4, %v14045_v47 }
 0x944   :  { %v7986_v63 = vpop.f32.mrf.mxu1  ;;  %v7898_v43 = vadd.f32 %v7897_v62, %v14268_v20  ;;  %v7760_v53 = vpack.c.bf16 %v14377_v30, %v14374_v29  ;;  %v7614_v22 = vmul.f32 0.5, %v10549_v9 }
 0x945   :  { %v8244_v33 = vadd.f32 %v8212_v7, %v14181_v17  ;;  %10552 = vtanh.f32 %v7551_v19  ;;  %v7987_v57 = vadd.f32 %v7986_v63, %v14284_v52 }
 0x946   :  { %v10551_v59 = vpop.eup %10550  ;;  %v8054_v31 = vmul.f32 0.5, %v7898_v43  ;;  %7936 = vmatmul.bf16.gmra.mxu0 %v7760_v53  ;;  %8025 = vmatmul.bf16.gmra.mxu1 %v7760_v53  ;;  %v7646_v26 = vadd.f32 0.5, %v7614_v22 }
 0x947   :  { %8276 = vst [vmem:[#allocation9 + $0x30] sm:$0xff] %v8244_v33  ;;  %v8117_v44 = vmul.f32 0.5, %v10551_v59  ;;  %v8182_v53 = vsub.f32 %v7987_v57, %v14200_v18 }
 0x948   :  { %10554 = vtanh.f32 %v8054_v31  ;;  %v7425_v25 = vpop.f32.mrf.mxu2  ;;  %v7710_v15 = vmul.f32 %v7678_v41, %v7646_v26 }
 0x949   :  { %v8149_v8 = vadd.f32 0.5, %v8117_v44  ;;  %v7426_v17 = vadd.f32 %v7425_v25, %v14070_v2 }
 0x94a   :  { %v14397_v63 = vadd.f32 %v7710_v15, %v14050_v10 }
 0x94b   :  { %v10553_v6 = vpop.eup %10552  ;;  %v8213_v37 = vmul.f32 %v8181_v28, %v8149_v8  ;;  %v7552_v46 = vmul.f32 0.5, %v7426_v17  ;;  %v7899_v38 = vpop.f32.mrf.mxu0 }
 0x94c   :  { %v7988_v48 = vpop.f32.mrf.mxu1  ;;  %v7615_v39 = vmul.f32 0.5, %v10553_v6  ;;  %v7900_v58 = vadd.f32 %v7899_v38, %v14268_v20  ;;  %v7515_v6 = vadd.f32 %v7514_v35, %v14091_v36 }
 0x94d   :  { %v8245_v55 = vadd.f32 %v8213_v37, %v14184_v21  ;;  %10556 = vtanh.f32 %v7552_v46  ;;  %v7516_v21 = vpop.f32.mrf.mxu3  ;;  %v7989_v17 = vadd.f32 %v7988_v48, %v14284_v52 }
 0x94e   :  { %v10555_v54 = vpop.eup %10554  ;;  %v7647_v0 = vadd.f32 0.5, %v7615_v39  ;;  %v8055_v9 = vmul.f32 0.5, %v7900_v58 }
 0x94f   :  { %8277 = vst [vmem:[#allocation9 + $0x38] sm:$0xff] %v8245_v55  ;;  %v8118_v7 = vmul.f32 0.5, %v10555_v54  ;;  %v8183_v38 = vsub.f32 %v7989_v17, %v14203_v1 }
 0x950   :  { %v7711_v19 = vmul.f32 %v7679_v40, %v7647_v0  ;;  %10558 = vtanh.f32 %v8055_v9  ;;  %v7427_v62 = vpop.f32.mrf.mxu2  ;;  %v7680_v40 = vsub.f32 %v7515_v6, %v14082_v24 }
 0x951   :  { %v8150_v43 = vadd.f32 0.5, %v8118_v7  ;;  %v7428_v33 = vadd.f32 %v7427_v62, %v14070_v2 }
 0x952   :  { %v14400_v12 = vadd.f32 %v7711_v19, %v14045_v47 }
 0x953   :  { %v10557_v59 = vpop.eup %10556  ;;  %v8214_v22 = vmul.f32 %v8182_v53, %v8150_v43  ;;  %v7553_v31 = vmul.f32 0.5, %v7428_v33  ;;  %v7902_v44 = vpop.f32.mrf.mxu0 }
 0x954   :  { %v7991_v16 = vpop.f32.mrf.mxu1  ;;  %v7903_v25 = vadd.f32 %v7902_v44, %v14268_v20  ;;  %v7761_v8 = vpack.c.bf16 %v14400_v12, %v14397_v63  ;;  %v7616_v4 = vmul.f32 0.5, %v10557_v59 }
 0x955   :  { %v8246_v28 = vadd.f32 %v8214_v22, %v14200_v18  ;;  %10560 = vtanh.f32 %v7553_v31  ;;  %v7517_v18 = vadd.f32 %v7516_v21, %v14091_v36  ;;  %v7519_v0 = vpop.f32.mrf.mxu3  ;;  %v7992_v7 = vadd.f32 %v7991_v16, %v14284_v52 }
 0x956   :  { %v10559_v10 = vpop.eup %10558  ;;  %v8056_v26 = vmul.f32 0.5, %v7903_v25  ;;  %7941 = vmatmul.bf16.gmra.mxu0 %v7761_v8  ;;  %8030 = vmatmul.bf16.gmra.mxu1 %v7761_v8  ;;  %v7648_v48 = vadd.f32 0.5, %v7616_v4 }
 0x957   :  { %8278 = vst [vmem:[#allocation9 + $0x40] sm:$0xff] %v8246_v28  ;;  %v8119_v47 = vmul.f32 0.5, %v10559_v10  ;;  %v7681_v62 = vsub.f32 %v7517_v18, %v14078_v27  ;;  %v8184_v44 = vsub.f32 %v7992_v7, %v14219_v34 }
 0x958   :  { %10562 = vtanh.f32 %v8056_v26  ;;  %v7430_v37 = vpop.f32.mrf.mxu2  ;;  %v7712_v43 = vmul.f32 %v7680_v40, %v7648_v48 }
 0x959   :  { %v8151_v46 = vadd.f32 0.5, %v8119_v47  ;;  %v7431_v41 = vadd.f32 %v7430_v37, %v14070_v2 }
 0x95b   :  { %v10561_v39 = vpop.eup %10560  ;;  %v8215_v58 = vmul.f32 %v8183_v38, %v8151_v46  ;;  %v7554_v55 = vmul.f32 0.5, %v7431_v41  ;;  %v7904_v57 = vpop.f32.mrf.mxu0  ;;  %v7520_v41 = vadd.f32 %v7519_v0, %v14091_v36 }
 0x95c   :  { %v7993_v54 = vpop.f32.mrf.mxu1  ;;  %v7617_v15 = vmul.f32 0.5, %v10561_v39  ;;  %v7905_v35 = vadd.f32 %v7904_v57, %v14268_v20 }
 0x95d   :  { %v8247_v9 = vadd.f32 %v8215_v58, %v14203_v1  ;;  %10564 = vtanh.f32 %v7554_v55  ;;  %v14419_v1 = vadd.f32 %v7712_v43, %v14082_v24  ;;  %v7682_v40 = vsub.f32 %v7520_v41, %v14109_v23 }
 0x95e   :  { %v10563_v19 = vpop.eup %10562  ;;  %v7649_v53 = vadd.f32 0.5, %v7617_v15  ;;  %v8057_v33 = vmul.f32 0.5, %v7905_v35 }
 0x95f   :  { %8279 = vst [vmem:[#allocation9 + $0x48] sm:$0xff] %v8247_v9  ;;  %v8120_v21 = vmul.f32 0.5, %v10563_v19 }
 0x960   :  { %v7713_v59 = vmul.f32 %v7681_v62, %v7649_v53  ;;  %10566 = vtanh.f32 %v8057_v33  ;;  %v7432_v22 = vpop.f32.mrf.mxu2 }
 0x961   :  { %v8152_v31 = vadd.f32 0.5, %v8120_v21  ;;  %v7433_v25 = vadd.f32 %v7432_v22, %v14070_v2  ;;  %v7994_v2 = vadd.f32 %v7993_v54, %v14284_v52 }
 0x962   :  { %v14422_v16 = vadd.f32 %v7713_v59, %v14078_v27  ;;  %v7521_v27 = vpop.f32.mrf.mxu3 }
 0x963   :  { %v10565_v8 = vpop.eup %10564  ;;  %v8216_v28 = vmul.f32 %v8184_v44, %v8152_v31  ;;  %v7555_v17 = vmul.f32 0.5, %v7433_v25  ;;  %v7907_v10 = vpop.f32.mrf.mxu0  ;;  %v8185_v48 = vsub.f32 %v7994_v2, %v14222_v3  ;;  %v7522_v39 = vadd.f32 %v7521_v27, %v14091_v36 }
 0x964   :  { %v7996_v4 = vpop.f32.mrf.mxu1  ;;  %v7908_v26 = vadd.f32 %v7907_v10, %v14268_v20  ;;  %v7762_v47 = vpack.c.bf16 %v14422_v16, %v14419_v1  ;;  %v7618_v37 = vmul.f32 0.5, %v10565_v8 }
 0x965   :  { %v8248_v6 = vadd.f32 %v8216_v28, %v14219_v34  ;;  %10568 = vtanh.f32 %v7555_v17  ;;  %v7997_v0 = vadd.f32 %v7996_v4, %v14284_v52  ;;  %v7683_v19 = vsub.f32 %v7522_v39, %v14105_v49 }
 0x966   :  { %v10567_v24 = vpop.eup %10566  ;;  %v8058_v46 = vmul.f32 0.5, %v7908_v26  ;;  %7946 = vmatmul.bf16.gmra.mxu0 %v7762_v47  ;;  %8035 = vmatmul.bf16.gmra.mxu1 %v7762_v47  ;;  %v7650_v34 = vadd.f32 0.5, %v7618_v37 }
 0x967   :  { %8280 = vst [vmem:[#allocation9 + $0x50] sm:$0xff] %v8248_v6  ;;  %v8121_v38 = vmul.f32 0.5, %v10567_v24  ;;  %v8186_v59 = vsub.f32 %v7997_v0, %v14236_v61 }
 0x968   :  { %10570 = vtanh.f32 %v8058_v46  ;;  %v7714_v62 = vmul.f32 %v7682_v40, %v7650_v34 }
 0x969   :  { %v8153_v18 = vadd.f32 0.5, %v8121_v38 }
 0x96a   :  { %v14439_v22 = vadd.f32 %v7714_v62, %v14109_v23 }
 0x96b   :  { %v10569_v58 = vpop.eup %10568  ;;  %v8217_v55 = vmul.f32 %v8185_v48, %v8153_v18  ;;  %v7909_v57 = vpop.f32.mrf.mxu0 }
 0x96c   :  { %v7998_v54 = vpop.f32.mrf.mxu1  ;;  %v7619_v15 = vmul.f32 0.5, %v10569_v58  ;;  %v7910_v35 = vadd.f32 %v7909_v57, %v14268_v20 }
 0x96d   :  { %v8249_v9 = vadd.f32 %v8217_v55, %v14222_v3  ;;  %v7999_v10 = vadd.f32 %v7998_v54, %v14284_v52 }
 0x96e   :  { %v10571_v7 = vpop.eup %10570  ;;  %v7651_v43 = vadd.f32 0.5, %v7619_v15  ;;  %v8059_v36 = vmul.f32 0.5, %v7910_v35 }
 0x96f   :  { %8281 = vst [vmem:[#allocation9 + $0x58] sm:$0xff] %v8249_v9  ;;  %v8122_v53 = vmul.f32 0.5, %v10571_v7  ;;  %v8187_v47 = vsub.f32 %v7999_v10, %v14239_v51 }
 0x970   :  { %v7715_v33 = vmul.f32 %v7683_v19, %v7651_v43  ;;  %10572 = vtanh.f32 %v8059_v36 }
 0x971   :  { %v8154_v21 = vadd.f32 0.5, %v8122_v53 }
 0x972   :  { %v14442_v3 = vadd.f32 %v7715_v33, %v14105_v49 }
 0x973   :  { %v8218_v31 = vmul.f32 %v8186_v59, %v8154_v21  ;;  %v7912_v44 = vpop.f32.mrf.mxu0 }
 0x974   :  { %v8001_v25 = vpop.f32.mrf.mxu1  ;;  %v7913_v8 = vadd.f32 %v7912_v44, %v14268_v20  ;;  %v7763_v28 = vpack.c.bf16 %v14442_v3, %v14439_v22 }
 0x975   :  { %v8250_v17 = vadd.f32 %v8218_v31, %v14236_v61  ;;  %v8002_v61 = vadd.f32 %v8001_v25, %v14284_v52 }
 0x976   :  { %v10573_v4 = vpop.eup %10572  ;;  %v8060_v26 = vmul.f32 0.5, %v7913_v8  ;;  %7951 = vmatmul.bf16.gmra.mxu0 %v7763_v28  ;;  %8040 = vmatmul.bf16.vlgmr.msrb.gmra.mxu3 %v7763_v28 }
 0x977   :  { %8282 = vst [vmem:[#allocation9 + $0x60] sm:$0xff] %v8250_v17  ;;  %v8123_v23 = vmul.f32 0.5, %v10573_v4  ;;  %v8188_v48 = vsub.f32 %v8002_v61, %v14253_v60 }
 0x978   :  { %10574 = vtanh.f32 %v8060_v26 }
 0x979   :  { %v8155_v49 = vadd.f32 0.5, %v8123_v23 }
 0x97b   :  { %v8219_v6 = vmul.f32 %v8187_v47, %v8155_v49  ;;  %v7914_v2 = vpop.f32.mrf.mxu0 }
 0x97c   :  { %v8003_v24 = vpop.f32.mrf.mxu1  ;;  %v7915_v37 = vadd.f32 %v7914_v2, %v14268_v20 }
 0x97d   :  { %v8251_v46 = vadd.f32 %v8219_v6, %v14239_v51  ;;  %v8004_v54 = vadd.f32 %v8003_v24, %v14284_v52 }
 0x97e   :  { %v10575_v27 = vpop.eup %10574  ;;  %v8061_v38 = vmul.f32 0.5, %v7915_v37 }
 0x97f   :  { %8283 = vst [vmem:[#allocation9 + $0x68] sm:$0xff] %v8251_v46  ;;  %v8124_v41 = vmul.f32 0.5, %v10575_v27  ;;  %v8189_v9 = vsub.f32 %v8004_v54, %v14256_v45 }
 0x980   :  { %10576 = vtanh.f32 %v8061_v38 }
 0x981   :  { %v8156_v18 = vadd.f32 0.5, %v8124_v41 }
 0x983   :  { %v8220_v39 = vmul.f32 %v8188_v48, %v8156_v18  ;;  %v7917_v34 = vpop.f32.mrf.mxu0 }
 0x984   :  { %v8006_v58 = vpop.f32.mrf.mxu1  ;;  %v7918_v55 = vadd.f32 %v7917_v34, %v14268_v20 }
 0x985   :  { %v8252_v57 = vadd.f32 %v8220_v39, %v14253_v60  ;;  %v8007_v36 = vadd.f32 %v8006_v58, %v14284_v52 }
 0x986   :  { %v10577_v51 = vpop.eup %10576  ;;  %v8062_v40 = vmul.f32 0.5, %v7918_v55 }
 0x987   :  { %8284 = vst [vmem:[#allocation9 + $0x70] sm:$0xff] %v8252_v57  ;;  %v8125_v15 = vmul.f32 0.5, %v10577_v51  ;;  %v8190_v59 = vsub.f32 %v8007_v36, %v14274_v32 }
 0x988   :  { %10578 = vtanh.f32 %v8062_v40 }
 0x989   :  { %v8157_v35 = vadd.f32 0.5, %v8125_v15 }
 0x98b   :  { %v8221_v0 = vmul.f32 %v8189_v9, %v8157_v35  ;;  %v7919_v7 = vpop.f32.mrf.mxu0 }
 0x98c   :  { %v8008_v19 = vpop.f32.mrf.mxu1  ;;  %v7920_v62 = vadd.f32 %v7919_v7, %v14268_v20 }
 0x98d   :  { %v8253_v43 = vadd.f32 %v8221_v0, %v14256_v45  ;;  %v8009_v17 = vadd.f32 %v8008_v19, %v14284_v52 }
 0x98e   :  { %v10579_v60 = vpop.eup %10578  ;;  %v8063_v53 = vmul.f32 0.5, %v7920_v62 }
 0x98f   :  { %8285 = vst [vmem:[#allocation9 + $0x78] sm:$0xff] %v8253_v43  ;;  %v8126_v33 = vmul.f32 0.5, %v10579_v60  ;;  %v8191_v23 = vsub.f32 %v8009_v17, %v14277_v5 }
 0x990   :  { %10580 = vtanh.f32 %v8063_v53 }
 0x991   :  { %v8158_v21 = vadd.f32 0.5, %v8126_v33 }
 0x993   :  { %v8222_v31 = vmul.f32 %v8190_v59, %v8158_v21  ;;  %v7922_v44 = vpop.f32.mrf.mxu0 }
 0x994   :  { %v8011_v25 = vpop.f32.mrf.mxu1  ;;  %v7923_v8 = vadd.f32 %v7922_v44, %v14268_v20 }
 0x995   :  { %v8254_v28 = vadd.f32 %v8222_v31, %v14274_v32  ;;  %v8012_v37 = vadd.f32 %v8011_v25, %v14284_v52 }
 0x996   :  { %v10581_v45 = vpop.eup %10580  ;;  %v8064_v10 = vmul.f32 0.5, %v7923_v8 }
 0x997   :  { %8286 = vst [vmem:[#allocation9 + $0x80] sm:$0xff] %v8254_v28  ;;  %v8127_v4 = vmul.f32 0.5, %v10581_v45  ;;  %v8192_v38 = vsub.f32 %v8012_v37, %v14297_v11 }
 0x998   :  { %10582 = vtanh.f32 %v8064_v10 }
 0x999   :  { %v8159_v26 = vadd.f32 0.5, %v8127_v4 }
 0x99b   :  { %v8223_v49 = vmul.f32 %v8191_v23, %v8159_v26  ;;  %v7924_v47 = vpop.f32.mrf.mxu0 }
 0x99c   :  { %v8013_v6 = vpop.f32.mrf.mxu1  ;;  %v7925_v2 = vadd.f32 %v7924_v47, %v14268_v20 }
 0x99d   :  { %v8255_v24 = vadd.f32 %v8223_v49, %v14277_v5  ;;  %v8014_v58 = vadd.f32 %v8013_v6, %v14284_v52 }
 0x99e   :  { %v10583_v32 = vpop.eup %10582  ;;  %v8065_v46 = vmul.f32 0.5, %v7925_v2 }
 0x99f   :  { %8287 = vst [vmem:[#allocation9 + $0x88] sm:$0xff] %v8255_v24  ;;  %v8128_v61 = vmul.f32 0.5, %v10583_v32  ;;  %v8193_v51 = vsub.f32 %v8014_v58, %v14300_v50 }
 0x9a0   :  { %10584 = vtanh.f32 %v8065_v46 }
 0x9a1   :  { %v8160_v27 = vadd.f32 0.5, %v8128_v61 }
 0x9a3   :  { %v8224_v41 = vmul.f32 %v8192_v38, %v8160_v27  ;;  %v7927_v18 = vpop.f32.mrf.mxu0 }
 0x9a4   :  { %v8016_v48 = vpop.f32.mrf.mxu1  ;;  %v7928_v39 = vadd.f32 %v7927_v18, %v14268_v20 }
 0x9a5   :  { %v8256_v34 = vadd.f32 %v8224_v41, %v14297_v11  ;;  %v8017_v7 = vadd.f32 %v8016_v48, %v14284_v52 }
 0x9a6   :  { %v10585_v5 = vpop.eup %10584  ;;  %v8066_v55 = vmul.f32 0.5, %v7928_v39 }
 0x9a7   :  { %8288 = vst [vmem:[#allocation9 + $0x90] sm:$0xff] %v8256_v34  ;;  %v8129_v57 = vmul.f32 0.5, %v10585_v5  ;;  %v8194_v36 = vsub.f32 %v8017_v7, %v14325_v14 }
 0x9a8   :  { %10586 = vtanh.f32 %v8066_v55 }
 0x9a9   :  { %v8161_v54 = vadd.f32 0.5, %v8129_v57 }
 0x9ab   :  { %v8225_v40 = vmul.f32 %v8193_v51, %v8161_v54  ;;  %v7929_v15 = vpop.f32.mrf.mxu0 }
 0x9ac   :  { %v8018_v35 = vpop.f32.mrf.mxu1  ;;  %v7930_v9 = vadd.f32 %v7929_v15, %v14268_v20 }
 0x9ad   :  { %v8257_v0 = vadd.f32 %v8225_v40, %v14300_v50  ;;  %v8019_v31 = vadd.f32 %v8018_v35, %v14284_v52 }
 0x9ae   :  { %v10587_v11 = vpop.eup %10586  ;;  %v8067_v19 = vmul.f32 0.5, %v7930_v9 }
 0x9af   :  { %8289 = vst [vmem:[#allocation9 + $0x98] sm:$0xff] %v8257_v0  ;;  %v8130_v62 = vmul.f32 0.5, %v10587_v11  ;;  %v8195_v28 = vsub.f32 %v8019_v31, %v14328_v42 }
 0x9b0   :  { %10588 = vtanh.f32 %v8067_v19 }
 0x9b1   :  { %v8162_v43 = vadd.f32 0.5, %v8130_v62 }
 0x9b3   :  { %v8226_v60 = vmul.f32 %v8194_v36, %v8162_v43  ;;  %v7932_v53 = vpop.f32.mrf.mxu0 }
 0x9b4   :  { %v8021_v33 = vpop.f32.mrf.mxu1  ;;  %v7933_v21 = vadd.f32 %v7932_v53, %v14268_v20 }
 0x9b5   :  { %v8258_v59 = vadd.f32 %v8226_v60, %v14325_v14  ;;  %v8022_v23 = vadd.f32 %v8021_v33, %v14284_v52 }
 0x9b6   :  { %v10589_v50 = vpop.eup %10588  ;;  %v8068_v44 = vmul.f32 0.5, %v7933_v21 }
 0x9b7   :  { %8290 = vst [vmem:[#allocation9 + $0xa0] sm:$0xff] %v8258_v59  ;;  %v8131_v25 = vmul.f32 0.5, %v10589_v50  ;;  %v8196_v2 = vsub.f32 %v8022_v23, %v14349_v56 }
 0x9b8   :  { %10590 = vtanh.f32 %v8068_v44 }
 0x9b9   :  { %v8163_v8 = vadd.f32 0.5, %v8131_v25 }
 0x9bb   :  { %v8227_v17 = vmul.f32 %v8195_v28, %v8163_v8  ;;  %v7934_v45 = vpop.f32.mrf.mxu0 }
 0x9bc   :  { %v8023_v10 = vpop.f32.mrf.mxu1  ;;  %v7935_v4 = vadd.f32 %v7934_v45, %v14268_v20 }
 0x9bd   :  { %v8259_v26 = vadd.f32 %v8227_v17, %v14328_v42  ;;  %v8024_v27 = vadd.f32 %v8023_v10, %v14284_v52 }
 0x9be   :  { %v10591_v14 = vpop.eup %10590  ;;  %v8069_v49 = vmul.f32 0.5, %v7935_v4 }
 0x9bf   :  { %8291 = vst [vmem:[#allocation9 + $0xa8] sm:$0xff] %v8259_v26  ;;  %v8132_v47 = vmul.f32 0.5, %v10591_v14  ;;  %v8197_v48 = vsub.f32 %v8024_v27, %v14352_v13 }
 0x9c0   :  { %10592 = vtanh.f32 %v8069_v49 }
 0x9c1   :  { %v8164_v6 = vadd.f32 0.5, %v8132_v47 }
 0x9c3   :  { %v8228_v24 = vmul.f32 %v8196_v2, %v8164_v6  ;;  %v7937_v37 = vpop.f32.mrf.mxu0 }
 0x9c4   :  { %v8026_v32 = vpop.f32.mrf.mxu1  ;;  %v7938_v46 = vadd.f32 %v7937_v37, %v14268_v20 }
 0x9c5   :  { %v8260_v61 = vadd.f32 %v8228_v24, %v14349_v56  ;;  %v8027_v57 = vadd.f32 %v8026_v32, %v14284_v52 }
 0x9c6   :  { %v10593_v42 = vpop.eup %10592  ;;  %v8070_v38 = vmul.f32 0.5, %v7938_v46 }
 0x9c7   :  { %8292 = vst [vmem:[#allocation9 + $0xb0] sm:$0xff] %v8260_v61  ;;  %v8133_v41 = vmul.f32 0.5, %v10593_v42  ;;  %v8198_v15 = vsub.f32 %v8027_v57, %v14374_v29 }
 0x9c8   :  { %10594 = vtanh.f32 %v8070_v38 }
 0x9c9   :  { %v8165_v18 = vadd.f32 0.5, %v8133_v41 }
 0x9cb   :  { %v8229_v39 = vmul.f32 %v8197_v48, %v8165_v18  ;;  %v7939_v34 = vpop.f32.mrf.mxu0 }
 0x9cc   :  { %v8028_v58 = vpop.f32.mrf.mxu1  ;;  %v7940_v5 = vadd.f32 %v7939_v34, %v14268_v20 }
 0x9cd   :  { %v8261_v55 = vadd.f32 %v8229_v39, %v14352_v13  ;;  %v8029_v19 = vadd.f32 %v8028_v58, %v14284_v52 }
 0x9ce   :  { %v10595_v56 = vpop.eup %10594  ;;  %v8071_v54 = vmul.f32 0.5, %v7940_v5 }
 0x9cf   :  { %8293 = vst [vmem:[#allocation9 + $0xb8] sm:$0xff] %v8261_v55  ;;  %v8134_v51 = vmul.f32 0.5, %v10595_v56  ;;  %v8199_v60 = vsub.f32 %v8029_v19, %v14377_v30 }
 0x9d0   :  { %10596 = vtanh.f32 %v8071_v54 }
 0x9d1   :  { %v8166_v40 = vadd.f32 0.5, %v8134_v51 }
 0x9d3   :  { %v8230_v35 = vmul.f32 %v8198_v15, %v8166_v40  ;;  %v7942_v9 = vpop.f32.mrf.mxu0 }
 0x9d4   :  { %v7943_v0 = vadd.f32 %v7942_v9, %v14268_v20  ;;  %v8031_v7 = vpop.f32.mrf.mxu1 }
 0x9d5   :  { %v8262_v11 = vadd.f32 %v8230_v35, %v14374_v29  ;;  %v8032_v31 = vadd.f32 %v8031_v7, %v14284_v52 }
 0x9d6   :  { %v10597_v13 = vpop.eup %10596  ;;  %v8072_v62 = vmul.f32 0.5, %v7943_v0 }
 0x9d7   :  { %8294 = vst [vmem:[#allocation9 + $0xc0] sm:$0xff] %v8262_v11  ;;  %v8135_v43 = vmul.f32 0.5, %v10597_v13  ;;  %v8200_v28 = vsub.f32 %v8032_v31, %v14397_v63 }
 0x9d8   :  { %10598 = vtanh.f32 %v8072_v62 }
 0x9d9   :  { %v8167_v36 = vadd.f32 0.5, %v8135_v43 }
 0x9db   :  { %v8231_v53 = vmul.f32 %v8199_v60, %v8167_v36  ;;  %v7944_v33 = vpop.f32.mrf.mxu0 }
 0x9dc   :  { %v7945_v21 = vadd.f32 %v7944_v33, %v14268_v20  ;;  %v8033_v44 = vpop.f32.mrf.mxu1 }
 0x9dd   :  { %v8263_v59 = vadd.f32 %v8231_v53, %v14377_v30  ;;  %v8034_v26 = vadd.f32 %v8033_v44, %v14284_v52 }
 0x9de   :  { %v10599_v50 = vpop.eup %10598  ;;  %v8073_v29 = vmul.f32 0.5, %v7945_v21 }
 0x9df   :  { %8295 = vst [vmem:[#allocation9 + $0xc8] sm:$0xff] %v8263_v59  ;;  %v8136_v25 = vmul.f32 0.5, %v10599_v50  ;;  %v8201_v6 = vsub.f32 %v8034_v26, %v14400_v12 }
 0x9e0   :  { %10600 = vtanh.f32 %v8073_v29 }
 0x9e1   :  { %v8168_v8 = vadd.f32 0.5, %v8136_v25 }
 0x9e3   :  { %v8232_v17 = vmul.f32 %v8200_v28, %v8168_v8  ;;  %v7947_v45 = vpop.f32.mrf.mxu0 }
 0x9e4   :  { %v7948_v10 = vadd.f32 %v7947_v45, %v14268_v20  ;;  %v8036_v49 = vpop.f32.mrf.mxu1 }
 0x9e5   :  { %v8264_v4 = vadd.f32 %v8232_v17, %v14397_v63  ;;  %v8037_v46 = vadd.f32 %v8036_v49, %v14284_v52 }
 0x9e6   :  { %v10601_v30 = vpop.eup %10600  ;;  %v8074_v23 = vmul.f32 0.5, %v7948_v10 }
 0x9e7   :  { %8296 = vst [vmem:[#allocation9 + $0xd0] sm:$0xff] %v8264_v4  ;;  %v8137_v14 = vmul.f32 0.5, %v10601_v30  ;;  %v8202_v38 = vsub.f32 %v8037_v46, %v14419_v1 }
 0x9e8   :  { %10602 = vtanh.f32 %v8074_v23 }
 0x9e9   :  { %v8169_v47 = vadd.f32 0.5, %v8137_v14 }
 0x9eb   :  { %v8233_v2 = vmul.f32 %v8201_v6, %v8169_v47  ;;  %v7949_v24 = vpop.f32.mrf.mxu0 }
 0x9ec   :  { %v7950_v37 = vadd.f32 %v7949_v24, %v14268_v20  ;;  %v8038_v41 = vpop.f32.mrf.mxu1 }
 0x9ed   :  { %v8265_v32 = vadd.f32 %v8233_v2, %v14400_v12  ;;  %v8039_v58 = vadd.f32 %v8038_v41, %v14284_v52 }
 0x9ee   :  { %v10603_v63 = vpop.eup %10602  ;;  %v8075_v61 = vmul.f32 0.5, %v7950_v37 }
 0x9ef   :  { %8297 = vst [vmem:[#allocation9 + $0xd8] sm:$0xff] %v8265_v32  ;;  %v8138_v27 = vmul.f32 0.5, %v10603_v63  ;;  %v8203_v56 = vsub.f32 %v8039_v58, %v14422_v16 }
 0x9f0   :  { %10604 = vtanh.f32 %v8075_v61 }
 0x9f1   :  { %v8170_v42 = vadd.f32 0.5, %v8138_v27 }
 0x9f3   :  { %v8234_v18 = vmul.f32 %v8202_v38, %v8170_v42  ;;  %v7952_v48 = vpop.f32.mrf.mxu0 }
 0x9f4   :  { %v7953_v39 = vadd.f32 %v7952_v48, %v14268_v20 }
 0x9f5   :  { %v8266_v34 = vadd.f32 %v8234_v18, %v14419_v1 }
 0x9f6   :  { %v10605_v12 = vpop.eup %10604  ;;  %v8076_v5 = vmul.f32 0.5, %v7953_v39 }
 0x9f7   :  { %8298 = vst [vmem:[#allocation9 + $0xe0] sm:$0xff] %v8266_v34  ;;  %v8139_v55 = vmul.f32 0.5, %v10605_v12 }
 0x9f8   :  { %10606 = vtanh.f32 %v8076_v5 }
 0x9f9   :  { %v8171_v57 = vadd.f32 0.5, %v8139_v55  ;;  %v8041_v54 = vpop.f32.mrf.mxu3 }
 0x9fa   :  { %v8042_v9 = vadd.f32 %v8041_v54, %v14284_v52 }
 0x9fb   :  { %v8235_v51 = vmul.f32 %v8203_v56, %v8171_v57  ;;  %v7954_v40 = vpop.f32.mrf.mxu0 }
 0x9fc   :  { %v7955_v15 = vadd.f32 %v7954_v40, %v14268_v20  ;;  %v8204_v19 = vsub.f32 %v8042_v9, %v14439_v22 }
 0x9fd   :  { %v8267_v35 = vadd.f32 %v8235_v51, %v14422_v16 }
 0x9fe   :  { %v10607_v1 = vpop.eup %10606  ;;  %v8077_v0 = vmul.f32 0.5, %v7955_v15 }
 0x9ff   :  { %8299 = vst [vmem:[#allocation9 + $0xe8] sm:$0xff] %v8267_v35  ;;  %v8140_v7 = vmul.f32 0.5, %v10607_v1 }
 0xa00   :  { %10608 = vtanh.f32 %v8077_v0 }
 0xa01   :  { %v8172_v11 = vadd.f32 0.5, %v8140_v7  ;;  %v8043_v13 = vpop.f32.mrf.mxu3 }
 0xa02   :  { %v8044_v36 = vadd.f32 %v8043_v13, %v14284_v52 }
 0xa03   :  { %v8236_v62 = vmul.f32 %v8204_v19, %v8172_v11 }
 0xa04   :  { %v8205_v53 = vsub.f32 %v8044_v36, %v14442_v3 }
 0xa05   :  { %v8268_v43 = vadd.f32 %v8236_v62, %v14439_v22 }
 0xa06   :  { %v10609_v60 = vpop.eup %10608 }
 0xa07   :  { %8300 = vst [vmem:[#allocation9 + $0xf0] sm:$0xff] %v8268_v43  ;;  %v8141_v20 = vmul.f32 0.5, %v10609_v60 }
 0xa09   :  { %v8173_v16 = vadd.f32 0.5, %v8141_v20 }
 0xa0b   :  { %v8237_v33 = vmul.f32 %v8205_v53, %v8173_v16 }
 0xa0d   :  { %v8269_v21 = vadd.f32 %v8237_v33, %v14442_v3 }
 0xa0f   :  { %8301 = vst [vmem:[#allocation9 + $0xf8] sm:$0xff] %v8269_v21 }
 0xa10   :  { %8314 = dma.vmem_to_hbm [thread:$0]  %s8307_s17, 4096, %s8309_s19, [#allocation5], %s10713_s13, %s10713_s13, %s10714_s14  }
 0xa11   :  { %10710 = dma.done.wait [#allocation5], 4096  }
 0xa12   :  { %10711 = vsyncadd [#allocation5], 4294963200 }
 0xa13   :  { %8319 = vsyncpa [#allocation4], 1 }
 0xa14   :  { %8320 = vsyncpa [#allocation7], 1 }
 0xa15   :  { %8321 = vsyncpa [#allocation5], 1 }

</bundles_post_ra>
